<compile_context>
chip_gen: v6e
topology: v6e:2x2x1
jax: 0.10.0
libtpu: 0.0.40
codegen_flags: <defaults>
</compile_context>

<pallas_src>
import numpy as np
import jax
import jax.numpy as jnp
from jax import lax
from jax.experimental import pallas as pl
from jax.experimental.pallas import tpu as pltpu


def _to_i32(u):
    """Python int (32-bit pattern) -> np.int32 with two's-complement wrap."""
    u &= 0xFFFFFFFF
    return np.int32(u - (1 << 32)) if u >= (1 << 31) else np.int32(u)


_I32_SIGN = _to_i32(0x80000000)   # -2147483648
_I32_ONES = _to_i32(0xFFFFFFFF)   # -1


def _make_moments_kernel(R, C, n_valid, ranks, fracs, decay, max_):
    """ranks = (kl_lo, kl_hi, kh_lo, kh_hi) into the n_valid real elements."""
    n_pad = R * C - n_valid
    # Padded elements are forced to the minimum key, so they occupy the lowest
    # n_pad ranks; shift the requested ranks accordingly.
    eff_ranks = [k + n_pad for k in ranks]
    fl = np.float32(fracs[0])
    fh = np.float32(fracs[1])
    d = np.float32(decay)
    omd = np.float32(1.0 - decay)
    inv_max = np.float32(1.0 / max_)

    def kernel(x_ref, low_ref, high_ref, out_ref):
        x = x_ref[...]                                    # (R, C) f32
        b = pltpu.bitcast(x, jnp.int32)                   # raw IEEE-754 bits
        # Order-preserving key (monotone in unsigned bit order):
        #   sign bit 0 (>= +0.0): flip the sign bit
        #   sign bit 1 (<= -0.0): flip all bits
        ukey = jnp.where(b < 0, b ^ _I32_ONES, b ^ _I32_SIGN)
        if n_pad:
            ridx = lax.broadcasted_iota(jnp.int32, (R, C), 0)
            cidx = lax.broadcasted_iota(jnp.int32, (R, C), 1)
            flat = ridx * C + cidx
            ukey = jnp.where(flat < n_valid, ukey, jnp.int32(0))

        # Four concurrent MSB-first radix selects -> exact order statistics.
        prefixes = [jnp.int32(0)] * 4
        remain = [jnp.float32(k) for k in eff_ranks]      # exact: k << 2^24
        for bit in range(31, -1, -1):
            bit_mask = _to_i32(1 << bit)
            cur_mask = _to_i32((0xFFFFFFFF << bit) & 0xFFFFFFFF)  # bits 31..bit
            masked = ukey & cur_mask
            for r in range(4):
                # candidates matching the prefix whose current bit is 0
                cnt0 = jnp.sum(jnp.where(masked == prefixes[r], 1.0, 0.0))
                go_hi = remain[r] >= cnt0
                prefixes[r] = jnp.where(go_hi, prefixes[r] | bit_mask,
                                        prefixes[r])
                remain[r] = jnp.where(go_hi, remain[r] - cnt0, remain[r])

        # Recover the float value of each selected key (all elements sharing a
        # key have identical bit patterns, so max() returns it exactly).
        neg_inf = jnp.float32(-jnp.inf)

        def value_of(key):
            return jnp.max(jnp.where(ukey == key, x, neg_inf))

        v_kl_lo = value_of(prefixes[0])
        v_kl_hi = value_of(prefixes[1])
        v_kh_lo = value_of(prefixes[2])
        v_kh_hi = value_of(prefixes[3])

        # torch.quantile default 'linear' interpolation
        low_q = v_kl_lo + fl * (v_kl_hi - v_kl_lo)
        high_q = v_kh_lo + fh * (v_kh_hi - v_kh_lo)

        new_low = d * low_ref[0] + omd * low_q
        new_high = d * high_ref[0] + omd * high_q
        invscale = jnp.maximum(inv_max, new_high - new_low)

        # Single lane-dense output row: lanes [0,1,2] = [low, high, invscale].
        lane = lax.broadcasted_iota(jnp.int32, (1, C), 1)
        out_ref[...] = jnp.where(lane == 0, new_low,
                                 jnp.where(lane == 1, new_high, invscale))

    return kernel


def moments_forward(x, low, high, *, decay=0.99, max_=1e8,
                    percentile_low=0.05, percentile_high=0.95):
    """Returns ((low, invscale), (new_low_buf, new_high_buf))."""
    # TODO(synk): fabric.all_gather is a cross-process collective; single-device
    # semantics (identity gather) are assumed here.
    x = jnp.asarray(x, jnp.float32)
    N = int(np.prod(x.shape))
    C = 128
    tile = 8 * C
    n_padded = ((N + tile - 1) // tile) * tile
    R = n_padded // C

    x_flat = x.reshape(-1)
    if n_padded > N:
        x_flat = jnp.concatenate(
            [x_flat, jnp.zeros((n_padded - N,), jnp.float32)])
    x2d = x_flat.reshape(R, C)
    low = jnp.asarray(low, jnp.float32).reshape(1)
    high = jnp.asarray(high, jnp.float32).reshape(1)

    # torch.quantile ('linear') rank / interpolation parameters (static).
    def interp(q):
        pos = q * (N - 1)
        k_lo = int(np.floor(pos))
        k_hi = min(k_lo + 1, N - 1)
        return k_lo, k_hi, float(pos - k_lo)

    kl_lo, kl_hi, fl = interp(percentile_low)
    kh_lo, kh_hi, fh = interp(percentile_high)

    kernel = _make_moments_kernel(R, C, N, (kl_lo, kl_hi, kh_lo, kh_hi),
                                  (fl, fh), decay, max_)

    x_bytes = R * C * 4
    vmem_limit = int(min(64 * 2**20, max(8 * 2**20, 6 * x_bytes)))

    out = pl.pallas_call(
        kernel,
        out_shape=jax.ShapeDtypeStruct((1, C), jnp.float32),
        in_specs=[
            pl.BlockSpec(memory_space=pltpu.MemorySpace.VMEM),   # x2d
            pl.BlockSpec(memory_space=pltpu.MemorySpace.SMEM),   # low buffer
            pl.BlockSpec(memory_space=pltpu.MemorySpace.SMEM),   # high buffer
        ],
        out_specs=pl.BlockSpec(memory_space=pltpu.MemorySpace.VMEM),
        compiler_params=pltpu.CompilerParams(vmem_limit_bytes=vmem_limit),
    )(x2d, low, high)

    new_low = out[0, 0]
    new_high = out[0, 1]
    invscale = out[0, 2]
    return (new_low, invscale), (new_low, new_high)


def _reference(x, low, high, decay=0.99, max_=1e8, ql=0.05, qh=0.95):
    x = jnp.asarray(x, jnp.float32)
    low_q = jnp.quantile(x, ql)
    high_q = jnp.quantile(x, qh)
    new_low = decay * low + (1 - decay) * low_q
    new_high = decay * high + (1 - decay) * high_q
    invscale = jnp.maximum(1.0 / max_, new_high - new_low)
    return new_low, new_high, invscale


if __name__ == "__main__":
    key = jax.random.PRNGKey(0)
    k1, k2 = jax.random.split(key)

    # DreamerV3-style lambda-returns-shaped input; flattened size 2048.
    x = jax.random.normal(k1, (2, 4, 16, 16), dtype=jnp.float32) * 3.0 + 0.5
    low0 = jnp.zeros((), jnp.float32)
    high0 = jnp.zeros((), jnp.float32)

    (low_out, inv_out), (new_low, new_high) = moments_forward(x, low0, high0)
    jax.block_until_ready((low_out, inv_out, new_low, new_high))

    ref_low, ref_high, ref_inv = _reference(x, low0, high0)
    assert np.allclose(np.asarray(low_out), np.asarray(ref_low), rtol=1e-5, atol=1e-6)
    assert np.allclose(np.asarray(new_high), np.asarray(ref_high), rtol=1e-5, atol=1e-6)
    assert np.allclose(np.asarray(inv_out), np.asarray(ref_inv), rtol=1e-5, atol=1e-6)

    # Non-multiple-of-128 size exercises the padding / rank-shift path.
    x_odd = jax.random.normal(k2, (3, 5, 7), dtype=jnp.float32)
    low1 = jnp.float32(-0.3)
    high1 = jnp.float32(0.7)
    (low_out2, inv_out2), (new_low2, new_high2) = moments_forward(x_odd, low1, high1)
    jax.block_until_ready((low_out2, inv_out2, new_low2, new_high2))

    ref_low2, ref_high2, ref_inv2 = _reference(x_odd, low1, high1)
    assert np.allclose(np.asarray(low_out2), np.asarray(ref_low2), rtol=1e-5, atol=1e-6)
    assert np.allclose(np.asarray(new_high2), np.asarray(ref_high2), rtol=1e-5, atol=1e-6)
    assert np.allclose(np.asarray(inv_out2), np.asarray(ref_inv2), rtol=1e-5, atol=1e-6)

    print("KERNEL_OK")
</pallas_src>

<mosaic_0001>
module attributes {stable_mosaic.version = 11 : i64} {
  func.func @kernel(%arg0: memref<16x128xf32, #tpu.memory_space<vmem>>, %arg1: memref<1xf32, #tpu.memory_space<smem>>, %arg2: memref<1xf32, #tpu.memory_space<smem>>, %arg3: memref<1x128xf32, #tpu.memory_space<vmem>>) attributes {dimension_semantics = [], scalar_prefetch = 0 : i64, scratch_operands = 0 : i64, tpu.core_type = #tpu.core_type<tc>} {
    %c0 = arith.constant 0 : index
    %c0_0 = arith.constant 0 : index
    %0 = vector.load %arg0[%c0, %c0_0] : memref<16x128xf32, #tpu.memory_space<vmem>>, vector<16x128xf32>
    %1 = tpu.bitcast %0 : vector<16x128xf32> -> vector<16x128xi32>
    %c0_i32 = arith.constant 0 : i32
    %2 = vector.broadcast %c0_i32 : i32 to vector<16x128xi32>
    %3 = arith.cmpi slt, %1, %2 : vector<16x128xi32>
    %c-1_i32 = arith.constant -1 : i32
    %4 = vector.broadcast %c-1_i32 : i32 to vector<16x128xi32>
    %5 = arith.xori %1, %4 : vector<16x128xi32>
    %c-2147483648_i32 = arith.constant -2147483648 : i32
    %6 = vector.broadcast %c-2147483648_i32 : i32 to vector<16x128xi32>
    %7 = arith.xori %1, %6 : vector<16x128xi32>
    %8 = arith.select %3, %5, %7 : vector<16x128xi1>, vector<16x128xi32>
    %c-2147483648_i32_1 = arith.constant -2147483648 : i32
    %9 = vector.broadcast %c-2147483648_i32_1 : i32 to vector<16x128xi32>
    %10 = arith.andi %8, %9 : vector<16x128xi32>
    %c0_i32_2 = arith.constant 0 : i32
    %11 = vector.broadcast %c0_i32_2 : i32 to vector<16x128xi32>
    %12 = arith.cmpi eq, %10, %11 : vector<16x128xi32>
    %cst = arith.constant 1.000000e+00 : f32
    %cst_3 = arith.constant 0.000000e+00 : f32
    %13 = vector.broadcast %cst : f32 to vector<16x128xf32>
    %14 = vector.broadcast %cst_3 : f32 to vector<16x128xf32>
    %15 = arith.select %12, %13, %14 : vector<16x128xi1>, vector<16x128xf32>
    %16 = vector.shape_cast %15 : vector<16x128xf32> to vector<1x16x128xf32>
    %cst_4 = arith.constant dense<0.000000e+00> : vector<1xf32>
    %17 = vector.multi_reduction <add>, %16, %cst_4 [1, 2] : vector<1x16x128xf32> to vector<1xf32>
    %18 = vector.shape_cast %17 : vector<1xf32> to vector<1x1x1xf32>
    %19 = vector.extract %18[0, 0, 0] : f32 from vector<1x1x1xf32>
    %cst_5 = arith.constant 1.020000e+02 : f32
    %20 = arith.cmpf oge, %cst_5, %19 : f32
    %c0_i32_6 = arith.constant 0 : i32
    %c-2147483648_i32_7 = arith.constant -2147483648 : i32
    %21 = arith.ori %c0_i32_6, %c-2147483648_i32_7 : i32
    %c0_i32_8 = arith.constant 0 : i32
    %22 = arith.select %20, %21, %c0_i32_8 : i32
    %cst_9 = arith.constant 1.020000e+02 : f32
    %23 = arith.subf %cst_9, %19 : f32
    %cst_10 = arith.constant 1.020000e+02 : f32
    %24 = arith.select %20, %23, %cst_10 : f32
    %c0_i32_11 = arith.constant 0 : i32
    %25 = vector.broadcast %c0_i32_11 : i32 to vector<16x128xi32>
    %26 = arith.cmpi eq, %10, %25 : vector<16x128xi32>
    %cst_12 = arith.constant 1.000000e+00 : f32
    %cst_13 = arith.constant 0.000000e+00 : f32
    %27 = vector.broadcast %cst_12 : f32 to vector<16x128xf32>
    %28 = vector.broadcast %cst_13 : f32 to vector<16x128xf32>
    %29 = arith.select %26, %27, %28 : vector<16x128xi1>, vector<16x128xf32>
    %30 = vector.shape_cast %29 : vector<16x128xf32> to vector<1x16x128xf32>
    %cst_14 = arith.constant dense<0.000000e+00> : vector<1xf32>
    %31 = vector.multi_reduction <add>, %30, %cst_14 [1, 2] : vector<1x16x128xf32> to vector<1xf32>
    %32 = vector.shape_cast %31 : vector<1xf32> to vector<1x1x1xf32>
    %33 = vector.extract %32[0, 0, 0] : f32 from vector<1x1x1xf32>
    %cst_15 = arith.constant 1.030000e+02 : f32
    %34 = arith.cmpf oge, %cst_15, %33 : f32
    %c0_i32_16 = arith.constant 0 : i32
    %c-2147483648_i32_17 = arith.constant -2147483648 : i32
    %35 = arith.ori %c0_i32_16, %c-2147483648_i32_17 : i32
    %c0_i32_18 = arith.constant 0 : i32
    %36 = arith.select %34, %35, %c0_i32_18 : i32
    %cst_19 = arith.constant 1.030000e+02 : f32
    %37 = arith.subf %cst_19, %33 : f32
    %cst_20 = arith.constant 1.030000e+02 : f32
    %38 = arith.select %34, %37, %cst_20 : f32
    %c0_i32_21 = arith.constant 0 : i32
    %39 = vector.broadcast %c0_i32_21 : i32 to vector<16x128xi32>
    %40 = arith.cmpi eq, %10, %39 : vector<16x128xi32>
    %cst_22 = arith.constant 1.000000e+00 : f32
    %cst_23 = arith.constant 0.000000e+00 : f32
    %41 = vector.broadcast %cst_22 : f32 to vector<16x128xf32>
    %42 = vector.broadcast %cst_23 : f32 to vector<16x128xf32>
    %43 = arith.select %40, %41, %42 : vector<16x128xi1>, vector<16x128xf32>
    %44 = vector.shape_cast %43 : vector<16x128xf32> to vector<1x16x128xf32>
    %cst_24 = arith.constant dense<0.000000e+00> : vector<1xf32>
    %45 = vector.multi_reduction <add>, %44, %cst_24 [1, 2] : vector<1x16x128xf32> to vector<1xf32>
    %46 = vector.shape_cast %45 : vector<1xf32> to vector<1x1x1xf32>
    %47 = vector.extract %46[0, 0, 0] : f32 from vector<1x1x1xf32>
    %cst_25 = arith.constant 1.944000e+03 : f32
    %48 = arith.cmpf oge, %cst_25, %47 : f32
    %c0_i32_26 = arith.constant 0 : i32
    %c-2147483648_i32_27 = arith.constant -2147483648 : i32
    %49 = arith.ori %c0_i32_26, %c-2147483648_i32_27 : i32
    %c0_i32_28 = arith.constant 0 : i32
    %50 = arith.select %48, %49, %c0_i32_28 : i32
    %cst_29 = arith.constant 1.944000e+03 : f32
    %51 = arith.subf %cst_29, %47 : f32
    %cst_30 = arith.constant 1.944000e+03 : f32
    %52 = arith.select %48, %51, %cst_30 : f32
    %c0_i32_31 = arith.constant 0 : i32
    %53 = vector.broadcast %c0_i32_31 : i32 to vector<16x128xi32>
    %54 = arith.cmpi eq, %10, %53 : vector<16x128xi32>
    %cst_32 = arith.constant 1.000000e+00 : f32
    %cst_33 = arith.constant 0.000000e+00 : f32
    %55 = vector.broadcast %cst_32 : f32 to vector<16x128xf32>
    %56 = vector.broadcast %cst_33 : f32 to vector<16x128xf32>
    %57 = arith.select %54, %55, %56 : vector<16x128xi1>, vector<16x128xf32>
    %58 = vector.shape_cast %57 : vector<16x128xf32> to vector<1x16x128xf32>
    %cst_34 = arith.constant dense<0.000000e+00> : vector<1xf32>
    %59 = vector.multi_reduction <add>, %58, %cst_34 [1, 2] : vector<1x16x128xf32> to vector<1xf32>
    %60 = vector.shape_cast %59 : vector<1xf32> to vector<1x1x1xf32>
    %61 = vector.extract %60[0, 0, 0] : f32 from vector<1x1x1xf32>
    %cst_35 = arith.constant 1.945000e+03 : f32
    %62 = arith.cmpf oge, %cst_35, %61 : f32
    %c0_i32_36 = arith.constant 0 : i32
    %c-2147483648_i32_37 = arith.constant -2147483648 : i32
    %63 = arith.ori %c0_i32_36, %c-2147483648_i32_37 : i32
    %c0_i32_38 = arith.constant 0 : i32
    %64 = arith.select %62, %63, %c0_i32_38 : i32
    %cst_39 = arith.constant 1.945000e+03 : f32
    %65 = arith.subf %cst_39, %61 : f32
    %cst_40 = arith.constant 1.945000e+03 : f32
    %66 = arith.select %62, %65, %cst_40 : f32
    %c-1073741824_i32 = arith.constant -1073741824 : i32
    %67 = vector.broadcast %c-1073741824_i32 : i32 to vector<16x128xi32>
    %68 = arith.andi %8, %67 : vector<16x128xi32>
    %69 = vector.broadcast %22 : i32 to vector<16x128xi32>
    %70 = arith.cmpi eq, %68, %69 : vector<16x128xi32>
    %cst_41 = arith.constant 1.000000e+00 : f32
    %cst_42 = arith.constant 0.000000e+00 : f32
    %71 = vector.broadcast %cst_41 : f32 to vector<16x128xf32>
    %72 = vector.broadcast %cst_42 : f32 to vector<16x128xf32>
    %73 = arith.select %70, %71, %72 : vector<16x128xi1>, vector<16x128xf32>
    %74 = vector.shape_cast %73 : vector<16x128xf32> to vector<1x16x128xf32>
    %cst_43 = arith.constant dense<0.000000e+00> : vector<1xf32>
    %75 = vector.multi_reduction <add>, %74, %cst_43 [1, 2] : vector<1x16x128xf32> to vector<1xf32>
    %76 = vector.shape_cast %75 : vector<1xf32> to vector<1x1x1xf32>
    %77 = vector.extract %76[0, 0, 0] : f32 from vector<1x1x1xf32>
    %78 = arith.cmpf oge, %24, %77 : f32
    %c1073741824_i32 = arith.constant 1073741824 : i32
    %79 = arith.ori %22, %c1073741824_i32 : i32
    %80 = arith.select %78, %79, %22 : i32
    %81 = arith.subf %24, %77 : f32
    %82 = arith.select %78, %81, %24 : f32
    %83 = vector.broadcast %36 : i32 to vector<16x128xi32>
    %84 = arith.cmpi eq, %68, %83 : vector<16x128xi32>
    %cst_44 = arith.constant 1.000000e+00 : f32
    %cst_45 = arith.constant 0.000000e+00 : f32
    %85 = vector.broadcast %cst_44 : f32 to vector<16x128xf32>
    %86 = vector.broadcast %cst_45 : f32 to vector<16x128xf32>
    %87 = arith.select %84, %85, %86 : vector<16x128xi1>, vector<16x128xf32>
    %88 = vector.shape_cast %87 : vector<16x128xf32> to vector<1x16x128xf32>
    %cst_46 = arith.constant dense<0.000000e+00> : vector<1xf32>
    %89 = vector.multi_reduction <add>, %88, %cst_46 [1, 2] : vector<1x16x128xf32> to vector<1xf32>
    %90 = vector.shape_cast %89 : vector<1xf32> to vector<1x1x1xf32>
    %91 = vector.extract %90[0, 0, 0] : f32 from vector<1x1x1xf32>
    %92 = arith.cmpf oge, %38, %91 : f32
    %c1073741824_i32_47 = arith.constant 1073741824 : i32
    %93 = arith.ori %36, %c1073741824_i32_47 : i32
    %94 = arith.select %92, %93, %36 : i32
    %95 = arith.subf %38, %91 : f32
    %96 = arith.select %92, %95, %38 : f32
    %97 = vector.broadcast %50 : i32 to vector<16x128xi32>
    %98 = arith.cmpi eq, %68, %97 : vector<16x128xi32>
    %cst_48 = arith.constant 1.000000e+00 : f32
    %cst_49 = arith.constant 0.000000e+00 : f32
    %99 = vector.broadcast %cst_48 : f32 to vector<16x128xf32>
    %100 = vector.broadcast %cst_49 : f32 to vector<16x128xf32>
    %101 = arith.select %98, %99, %100 : vector<16x128xi1>, vector<16x128xf32>
    %102 = vector.shape_cast %101 : vector<16x128xf32> to vector<1x16x128xf32>
    %cst_50 = arith.constant dense<0.000000e+00> : vector<1xf32>
    %103 = vector.multi_reduction <add>, %102, %cst_50 [1, 2] : vector<1x16x128xf32> to vector<1xf32>
    %104 = vector.shape_cast %103 : vector<1xf32> to vector<1x1x1xf32>
    %105 = vector.extract %104[0, 0, 0] : f32 from vector<1x1x1xf32>
    %106 = arith.cmpf oge, %52, %105 : f32
    %c1073741824_i32_51 = arith.constant 1073741824 : i32
    %107 = arith.ori %50, %c1073741824_i32_51 : i32
    %108 = arith.select %106, %107, %50 : i32
    %109 = arith.subf %52, %105 : f32
    %110 = arith.select %106, %109, %52 : f32
    %111 = vector.broadcast %64 : i32 to vector<16x128xi32>
    %112 = arith.cmpi eq, %68, %111 : vector<16x128xi32>
    %cst_52 = arith.constant 1.000000e+00 : f32
    %cst_53 = arith.constant 0.000000e+00 : f32
    %113 = vector.broadcast %cst_52 : f32 to vector<16x128xf32>
    %114 = vector.broadcast %cst_53 : f32 to vector<16x128xf32>
    %115 = arith.select %112, %113, %114 : vector<16x128xi1>, vector<16x128xf32>
    %116 = vector.shape_cast %115 : vector<16x128xf32> to vector<1x16x128xf32>
    %cst_54 = arith.constant dense<0.000000e+00> : vector<1xf32>
    %117 = vector.multi_reduction <add>, %116, %cst_54 [1, 2] : vector<1x16x128xf32> to vector<1xf32>
    %118 = vector.shape_cast %117 : vector<1xf32> to vector<1x1x1xf32>
    %119 = vector.extract %118[0, 0, 0] : f32 from vector<1x1x1xf32>
    %120 = arith.cmpf oge, %66, %119 : f32
    %c1073741824_i32_55 = arith.constant 1073741824 : i32
    %121 = arith.ori %64, %c1073741824_i32_55 : i32
    %122 = arith.select %120, %121, %64 : i32
    %123 = arith.subf %66, %119 : f32
    %124 = arith.select %120, %123, %66 : f32
    %c-536870912_i32 = arith.constant -536870912 : i32
    %125 = vector.broadcast %c-536870912_i32 : i32 to vector<16x128xi32>
    %126 = arith.andi %8, %125 : vector<16x128xi32>
    %127 = vector.broadcast %80 : i32 to vector<16x128xi32>
    %128 = arith.cmpi eq, %126, %127 : vector<16x128xi32>
    %cst_56 = arith.constant 1.000000e+00 : f32
    %cst_57 = arith.constant 0.000000e+00 : f32
    %129 = vector.broadcast %cst_56 : f32 to vector<16x128xf32>
    %130 = vector.broadcast %cst_57 : f32 to vector<16x128xf32>
    %131 = arith.select %128, %129, %130 : vector<16x128xi1>, vector<16x128xf32>
    %132 = vector.shape_cast %131 : vector<16x128xf32> to vector<1x16x128xf32>
    %cst_58 = arith.constant dense<0.000000e+00> : vector<1xf32>
    %133 = vector.multi_reduction <add>, %132, %cst_58 [1, 2] : vector<1x16x128xf32> to vector<1xf32>
    %134 = vector.shape_cast %133 : vector<1xf32> to vector<1x1x1xf32>
    %135 = vector.extract %134[0, 0, 0] : f32 from vector<1x1x1xf32>
    %136 = arith.cmpf oge, %82, %135 : f32
    %c536870912_i32 = arith.constant 536870912 : i32
    %137 = arith.ori %80, %c536870912_i32 : i32
    %138 = arith.select %136, %137, %80 : i32
    %139 = arith.subf %82, %135 : f32
    %140 = arith.select %136, %139, %82 : f32
    %141 = vector.broadcast %94 : i32 to vector<16x128xi32>
    %142 = arith.cmpi eq, %126, %141 : vector<16x128xi32>
    %cst_59 = arith.constant 1.000000e+00 : f32
    %cst_60 = arith.constant 0.000000e+00 : f32
    %143 = vector.broadcast %cst_59 : f32 to vector<16x128xf32>
    %144 = vector.broadcast %cst_60 : f32 to vector<16x128xf32>
    %145 = arith.select %142, %143, %144 : vector<16x128xi1>, vector<16x128xf32>
    %146 = vector.shape_cast %145 : vector<16x128xf32> to vector<1x16x128xf32>
    %cst_61 = arith.constant dense<0.000000e+00> : vector<1xf32>
    %147 = vector.multi_reduction <add>, %146, %cst_61 [1, 2] : vector<1x16x128xf32> to vector<1xf32>
    %148 = vector.shape_cast %147 : vector<1xf32> to vector<1x1x1xf32>
    %149 = vector.extract %148[0, 0, 0] : f32 from vector<1x1x1xf32>
    %150 = arith.cmpf oge, %96, %149 : f32
    %c536870912_i32_62 = arith.constant 536870912 : i32
    %151 = arith.ori %94, %c536870912_i32_62 : i32
    %152 = arith.select %150, %151, %94 : i32
    %153 = arith.subf %96, %149 : f32
    %154 = arith.select %150, %153, %96 : f32
    %155 = vector.broadcast %108 : i32 to vector<16x128xi32>
    %156 = arith.cmpi eq, %126, %155 : vector<16x128xi32>
    %cst_63 = arith.constant 1.000000e+00 : f32
    %cst_64 = arith.constant 0.000000e+00 : f32
    %157 = vector.broadcast %cst_63 : f32 to vector<16x128xf32>
    %158 = vector.broadcast %cst_64 : f32 to vector<16x128xf32>
    %159 = arith.select %156, %157, %158 : vector<16x128xi1>, vector<16x128xf32>
    %160 = vector.shape_cast %159 : vector<16x128xf32> to vector<1x16x128xf32>
    %cst_65 = arith.constant dense<0.000000e+00> : vector<1xf32>
    %161 = vector.multi_reduction <add>, %160, %cst_65 [1, 2] : vector<1x16x128xf32> to vector<1xf32>
    %162 = vector.shape_cast %161 : vector<1xf32> to vector<1x1x1xf32>
    %163 = vector.extract %162[0, 0, 0] : f32 from vector<1x1x1xf32>
    %164 = arith.cmpf oge, %110, %163 : f32
    %c536870912_i32_66 = arith.constant 536870912 : i32
    %165 = arith.ori %108, %c536870912_i32_66 : i32
    %166 = arith.select %164, %165, %108 : i32
    %167 = arith.subf %110, %163 : f32
    %168 = arith.select %164, %167, %110 : f32
    %169 = vector.broadcast %122 : i32 to vector<16x128xi32>
    %170 = arith.cmpi eq, %126, %169 : vector<16x128xi32>
    %cst_67 = arith.constant 1.000000e+00 : f32
    %cst_68 = arith.constant 0.000000e+00 : f32
    %171 = vector.broadcast %cst_67 : f32 to vector<16x128xf32>
    %172 = vector.broadcast %cst_68 : f32 to vector<16x128xf32>
    %173 = arith.select %170, %171, %172 : vector<16x128xi1>, vector<16x128xf32>
    %174 = vector.shape_cast %173 : vector<16x128xf32> to vector<1x16x128xf32>
    %cst_69 = arith.constant dense<0.000000e+00> : vector<1xf32>
    %175 = vector.multi_reduction <add>, %174, %cst_69 [1, 2] : vector<1x16x128xf32> to vector<1xf32>
    %176 = vector.shape_cast %175 : vector<1xf32> to vector<1x1x1xf32>
    %177 = vector.extract %176[0, 0, 0] : f32 from vector<1x1x1xf32>
    %178 = arith.cmpf oge, %124, %177 : f32
    %c536870912_i32_70 = arith.constant 536870912 : i32
    %179 = arith.ori %122, %c536870912_i32_70 : i32
    %180 = arith.select %178, %179, %122 : i32
    %181 = arith.subf %124, %177 : f32
    %182 = arith.select %178, %181, %124 : f32
    %c-268435456_i32 = arith.constant -268435456 : i32
    %183 = vector.broadcast %c-268435456_i32 : i32 to vector<16x128xi32>
    %184 = arith.andi %8, %183 : vector<16x128xi32>
    %185 = vector.broadcast %138 : i32 to vector<16x128xi32>
    %186 = arith.cmpi eq, %184, %185 : vector<16x128xi32>
    %cst_71 = arith.constant 1.000000e+00 : f32
    %cst_72 = arith.constant 0.000000e+00 : f32
    %187 = vector.broadcast %cst_71 : f32 to vector<16x128xf32>
    %188 = vector.broadcast %cst_72 : f32 to vector<16x128xf32>
    %189 = arith.select %186, %187, %188 : vector<16x128xi1>, vector<16x128xf32>
    %190 = vector.shape_cast %189 : vector<16x128xf32> to vector<1x16x128xf32>
    %cst_73 = arith.constant dense<0.000000e+00> : vector<1xf32>
    %191 = vector.multi_reduction <add>, %190, %cst_73 [1, 2] : vector<1x16x128xf32> to vector<1xf32>
    %192 = vector.shape_cast %191 : vector<1xf32> to vector<1x1x1xf32>
    %193 = vector.extract %192[0, 0, 0] : f32 from vector<1x1x1xf32>
    %194 = arith.cmpf oge, %140, %193 : f32
    %c268435456_i32 = arith.constant 268435456 : i32
    %195 = arith.ori %138, %c268435456_i32 : i32
    %196 = arith.select %194, %195, %138 : i32
    %197 = arith.subf %140, %193 : f32
    %198 = arith.select %194, %197, %140 : f32
    %199 = vector.broadcast %152 : i32 to vector<16x128xi32>
    %200 = arith.cmpi eq, %184, %199 : vector<16x128xi32>
    %cst_74 = arith.constant 1.000000e+00 : f32
    %cst_75 = arith.constant 0.000000e+00 : f32
    %201 = vector.broadcast %cst_74 : f32 to vector<16x128xf32>
    %202 = vector.broadcast %cst_75 : f32 to vector<16x128xf32>
    %203 = arith.select %200, %201, %202 : vector<16x128xi1>, vector<16x128xf32>
    %204 = vector.shape_cast %203 : vector<16x128xf32> to vector<1x16x128xf32>
    %cst_76 = arith.constant dense<0.000000e+00> : vector<1xf32>
    %205 = vector.multi_reduction <add>, %204, %cst_76 [1, 2] : vector<1x16x128xf32> to vector<1xf32>
    %206 = vector.shape_cast %205 : vector<1xf32> to vector<1x1x1xf32>
    %207 = vector.extract %206[0, 0, 0] : f32 from vector<1x1x1xf32>
    %208 = arith.cmpf oge, %154, %207 : f32
    %c268435456_i32_77 = arith.constant 268435456 : i32
    %209 = arith.ori %152, %c268435456_i32_77 : i32
    %210 = arith.select %208, %209, %152 : i32
    %211 = arith.subf %154, %207 : f32
    %212 = arith.select %208, %211, %154 : f32
    %213 = vector.broadcast %166 : i32 to vector<16x128xi32>
    %214 = arith.cmpi eq, %184, %213 : vector<16x128xi32>
    %cst_78 = arith.constant 1.000000e+00 : f32
    %cst_79 = arith.constant 0.000000e+00 : f32
    %215 = vector.broadcast %cst_78 : f32 to vector<16x128xf32>
    %216 = vector.broadcast %cst_79 : f32 to vector<16x128xf32>
    %217 = arith.select %214, %215, %216 : vector<16x128xi1>, vector<16x128xf32>
    %218 = vector.shape_cast %217 : vector<16x128xf32> to vector<1x16x128xf32>
    %cst_80 = arith.constant dense<0.000000e+00> : vector<1xf32>
    %219 = vector.multi_reduction <add>, %218, %cst_80 [1, 2] : vector<1x16x128xf32> to vector<1xf32>
    %220 = vector.shape_cast %219 : vector<1xf32> to vector<1x1x1xf32>
    %221 = vector.extract %220[0, 0, 0] : f32 from vector<1x1x1xf32>
    %222 = arith.cmpf oge, %168, %221 : f32
    %c268435456_i32_81 = arith.constant 268435456 : i32
    %223 = arith.ori %166, %c268435456_i32_81 : i32
    %224 = arith.select %222, %223, %166 : i32
    %225 = arith.subf %168, %221 : f32
    %226 = arith.select %222, %225, %168 : f32
    %227 = vector.broadcast %180 : i32 to vector<16x128xi32>
    %228 = arith.cmpi eq, %184, %227 : vector<16x128xi32>
    %cst_82 = arith.constant 1.000000e+00 : f32
    %cst_83 = arith.constant 0.000000e+00 : f32
    %229 = vector.broadcast %cst_82 : f32 to vector<16x128xf32>
    %230 = vector.broadcast %cst_83 : f32 to vector<16x128xf32>
    %231 = arith.select %228, %229, %230 : vector<16x128xi1>, vector<16x128xf32>
    %232 = vector.shape_cast %231 : vector<16x128xf32> to vector<1x16x128xf32>
    %cst_84 = arith.constant dense<0.000000e+00> : vector<1xf32>
    %233 = vector.multi_reduction <add>, %232, %cst_84 [1, 2] : vector<1x16x128xf32> to vector<1xf32>
    %234 = vector.shape_cast %233 : vector<1xf32> to vector<1x1x1xf32>
    %235 = vector.extract %234[0, 0, 0] : f32 from vector<1x1x1xf32>
    %236 = arith.cmpf oge, %182, %235 : f32
    %c268435456_i32_85 = arith.constant 268435456 : i32
    %237 = arith.ori %180, %c268435456_i32_85 : i32
    %238 = arith.select %236, %237, %180 : i32
    %239 = arith.subf %182, %235 : f32
    %240 = arith.select %236, %239, %182 : f32
    %c-134217728_i32 = arith.constant -134217728 : i32
    %241 = vector.broadcast %c-134217728_i32 : i32 to vector<16x128xi32>
    %242 = arith.andi %8, %241 : vector<16x128xi32>
    %243 = vector.broadcast %196 : i32 to vector<16x128xi32>
    %244 = arith.cmpi eq, %242, %243 : vector<16x128xi32>
    %cst_86 = arith.constant 1.000000e+00 : f32
    %cst_87 = arith.constant 0.000000e+00 : f32
    %245 = vector.broadcast %cst_86 : f32 to vector<16x128xf32>
    %246 = vector.broadcast %cst_87 : f32 to vector<16x128xf32>
    %247 = arith.select %244, %245, %246 : vector<16x128xi1>, vector<16x128xf32>
    %248 = vector.shape_cast %247 : vector<16x128xf32> to vector<1x16x128xf32>
    %cst_88 = arith.constant dense<0.000000e+00> : vector<1xf32>
    %249 = vector.multi_reduction <add>, %248, %cst_88 [1, 2] : vector<1x16x128xf32> to vector<1xf32>
    %250 = vector.shape_cast %249 : vector<1xf32> to vector<1x1x1xf32>
    %251 = vector.extract %250[0, 0, 0] : f32 from vector<1x1x1xf32>
    %252 = arith.cmpf oge, %198, %251 : f32
    %c134217728_i32 = arith.constant 134217728 : i32
    %253 = arith.ori %196, %c134217728_i32 : i32
    %254 = arith.select %252, %253, %196 : i32
    %255 = arith.subf %198, %251 : f32
    %256 = arith.select %252, %255, %198 : f32
    %257 = vector.broadcast %210 : i32 to vector<16x128xi32>
    %258 = arith.cmpi eq, %242, %257 : vector<16x128xi32>
    %cst_89 = arith.constant 1.000000e+00 : f32
    %cst_90 = arith.constant 0.000000e+00 : f32
    %259 = vector.broadcast %cst_89 : f32 to vector<16x128xf32>
    %260 = vector.broadcast %cst_90 : f32 to vector<16x128xf32>
    %261 = arith.select %258, %259, %260 : vector<16x128xi1>, vector<16x128xf32>
    %262 = vector.shape_cast %261 : vector<16x128xf32> to vector<1x16x128xf32>
    %cst_91 = arith.constant dense<0.000000e+00> : vector<1xf32>
    %263 = vector.multi_reduction <add>, %262, %cst_91 [1, 2] : vector<1x16x128xf32> to vector<1xf32>
    %264 = vector.shape_cast %263 : vector<1xf32> to vector<1x1x1xf32>
    %265 = vector.extract %264[0, 0, 0] : f32 from vector<1x1x1xf32>
    %266 = arith.cmpf oge, %212, %265 : f32
    %c134217728_i32_92 = arith.constant 134217728 : i32
    %267 = arith.ori %210, %c134217728_i32_92 : i32
    %268 = arith.select %266, %267, %210 : i32
    %269 = arith.subf %212, %265 : f32
    %270 = arith.select %266, %269, %212 : f32
    %271 = vector.broadcast %224 : i32 to vector<16x128xi32>
    %272 = arith.cmpi eq, %242, %271 : vector<16x128xi32>
    %cst_93 = arith.constant 1.000000e+00 : f32
    %cst_94 = arith.constant 0.000000e+00 : f32
    %273 = vector.broadcast %cst_93 : f32 to vector<16x128xf32>
    %274 = vector.broadcast %cst_94 : f32 to vector<16x128xf32>
    %275 = arith.select %272, %273, %274 : vector<16x128xi1>, vector<16x128xf32>
    %276 = vector.shape_cast %275 : vector<16x128xf32> to vector<1x16x128xf32>
    %cst_95 = arith.constant dense<0.000000e+00> : vector<1xf32>
    %277 = vector.multi_reduction <add>, %276, %cst_95 [1, 2] : vector<1x16x128xf32> to vector<1xf32>
    %278 = vector.shape_cast %277 : vector<1xf32> to vector<1x1x1xf32>
    %279 = vector.extract %278[0, 0, 0] : f32 from vector<1x1x1xf32>
    %280 = arith.cmpf oge, %226, %279 : f32
    %c134217728_i32_96 = arith.constant 134217728 : i32
    %281 = arith.ori %224, %c134217728_i32_96 : i32
    %282 = arith.select %280, %281, %224 : i32
    %283 = arith.subf %226, %279 : f32
    %284 = arith.select %280, %283, %226 : f32
    %285 = vector.broadcast %238 : i32 to vector<16x128xi32>
    %286 = arith.cmpi eq, %242, %285 : vector<16x128xi32>
    %cst_97 = arith.constant 1.000000e+00 : f32
    %cst_98 = arith.constant 0.000000e+00 : f32
    %287 = vector.broadcast %cst_97 : f32 to vector<16x128xf32>
    %288 = vector.broadcast %cst_98 : f32 to vector<16x128xf32>
    %289 = arith.select %286, %287, %288 : vector<16x128xi1>, vector<16x128xf32>
    %290 = vector.shape_cast %289 : vector<16x128xf32> to vector<1x16x128xf32>
    %cst_99 = arith.constant dense<0.000000e+00> : vector<1xf32>
    %291 = vector.multi_reduction <add>, %290, %cst_99 [1, 2] : vector<1x16x128xf32> to vector<1xf32>
    %292 = vector.shape_cast %291 : vector<1xf32> to vector<1x1x1xf32>
    %293 = vector.extract %292[0, 0, 0] : f32 from vector<1x1x1xf32>
    %294 = arith.cmpf oge, %240, %293 : f32
    %c134217728_i32_100 = arith.constant 134217728 : i32
    %295 = arith.ori %238, %c134217728_i32_100 : i32
    %296 = arith.select %294, %295, %238 : i32
    %297 = arith.subf %240, %293 : f32
    %298 = arith.select %294, %297, %240 : f32
    %c-67108864_i32 = arith.constant -67108864 : i32
    %299 = vector.broadcast %c-67108864_i32 : i32 to vector<16x128xi32>
    %300 = arith.andi %8, %299 : vector<16x128xi32>
    %301 = vector.broadcast %254 : i32 to vector<16x128xi32>
    %302 = arith.cmpi eq, %300, %301 : vector<16x128xi32>
    %cst_101 = arith.constant 1.000000e+00 : f32
    %cst_102 = arith.constant 0.000000e+00 : f32
    %303 = vector.broadcast %cst_101 : f32 to vector<16x128xf32>
    %304 = vector.broadcast %cst_102 : f32 to vector<16x128xf32>
    %305 = arith.select %302, %303, %304 : vector<16x128xi1>, vector<16x128xf32>
    %306 = vector.shape_cast %305 : vector<16x128xf32> to vector<1x16x128xf32>
    %cst_103 = arith.constant dense<0.000000e+00> : vector<1xf32>
    %307 = vector.multi_reduction <add>, %306, %cst_103 [1, 2] : vector<1x16x128xf32> to vector<1xf32>
    %308 = vector.shape_cast %307 : vector<1xf32> to vector<1x1x1xf32>
    %309 = vector.extract %308[0, 0, 0] : f32 from vector<1x1x1xf32>
    %310 = arith.cmpf oge, %256, %309 : f32
    %c67108864_i32 = arith.constant 67108864 : i32
    %311 = arith.ori %254, %c67108864_i32 : i32
    %312 = arith.select %310, %311, %254 : i32
    %313 = arith.subf %256, %309 : f32
    %314 = arith.select %310, %313, %256 : f32
    %315 = vector.broadcast %268 : i32 to vector<16x128xi32>
    %316 = arith.cmpi eq, %300, %315 : vector<16x128xi32>
    %cst_104 = arith.constant 1.000000e+00 : f32
    %cst_105 = arith.constant 0.000000e+00 : f32
    %317 = vector.broadcast %cst_104 : f32 to vector<16x128xf32>
    %318 = vector.broadcast %cst_105 : f32 to vector<16x128xf32>
    %319 = arith.select %316, %317, %318 : vector<16x128xi1>, vector<16x128xf32>
    %320 = vector.shape_cast %319 : vector<16x128xf32> to vector<1x16x128xf32>
    %cst_106 = arith.constant dense<0.000000e+00> : vector<1xf32>
    %321 = vector.multi_reduction <add>, %320, %cst_106 [1, 2] : vector<1x16x128xf32> to vector<1xf32>
    %322 = vector.shape_cast %321 : vector<1xf32> to vector<1x1x1xf32>
    %323 = vector.extract %322[0, 0, 0] : f32 from vector<1x1x1xf32>
    %324 = arith.cmpf oge, %270, %323 : f32
    %c67108864_i32_107 = arith.constant 67108864 : i32
    %325 = arith.ori %268, %c67108864_i32_107 : i32
    %326 = arith.select %324, %325, %268 : i32
    %327 = arith.subf %270, %323 : f32
    %328 = arith.select %324, %327, %270 : f32
    %329 = vector.broadcast %282 : i32 to vector<16x128xi32>
    %330 = arith.cmpi eq, %300, %329 : vector<16x128xi32>
    %cst_108 = arith.constant 1.000000e+00 : f32
    %cst_109 = arith.constant 0.000000e+00 : f32
    %331 = vector.broadcast %cst_108 : f32 to vector<16x128xf32>
    %332 = vector.broadcast %cst_109 : f32 to vector<16x128xf32>
    %333 = arith.select %330, %331, %332 : vector<16x128xi1>, vector<16x128xf32>
    %334 = vector.shape_cast %333 : vector<16x128xf32> to vector<1x16x128xf32>
    %cst_110 = arith.constant dense<0.000000e+00> : vector<1xf32>
    %335 = vector.multi_reduction <add>, %334, %cst_110 [1, 2] : vector<1x16x128xf32> to vector<1xf32>
    %336 = vector.shape_cast %335 : vector<1xf32> to vector<1x1x1xf32>
    %337 = vector.extract %336[0, 0, 0] : f32 from vector<1x1x1xf32>
    %338 = arith.cmpf oge, %284, %337 : f32
    %c67108864_i32_111 = arith.constant 67108864 : i32
    %339 = arith.ori %282, %c67108864_i32_111 : i32
    %340 = arith.select %338, %339, %282 : i32
    %341 = arith.subf %284, %337 : f32
    %342 = arith.select %338, %341, %284 : f32
    %343 = vector.broadcast %296 : i32 to vector<16x128xi32>
    %344 = arith.cmpi eq, %300, %343 : vector<16x128xi32>
    %cst_112 = arith.constant 1.000000e+00 : f32
    %cst_113 = arith.constant 0.000000e+00 : f32
    %345 = vector.broadcast %cst_112 : f32 to vector<16x128xf32>
    %346 = vector.broadcast %cst_113 : f32 to vector<16x128xf32>
    %347 = arith.select %344, %345, %346 : vector<16x128xi1>, vector<16x128xf32>
    %348 = vector.shape_cast %347 : vector<16x128xf32> to vector<1x16x128xf32>
    %cst_114 = arith.constant dense<0.000000e+00> : vector<1xf32>
    %349 = vector.multi_reduction <add>, %348, %cst_114 [1, 2] : vector<1x16x128xf32> to vector<1xf32>
    %350 = vector.shape_cast %349 : vector<1xf32> to vector<1x1x1xf32>
    %351 = vector.extract %350[0, 0, 0] : f32 from vector<1x1x1xf32>
    %352 = arith.cmpf oge, %298, %351 : f32
    %c67108864_i32_115 = arith.constant 67108864 : i32
    %353 = arith.ori %296, %c67108864_i32_115 : i32
    %354 = arith.select %352, %353, %296 : i32
    %355 = arith.subf %298, %351 : f32
    %356 = arith.select %352, %355, %298 : f32
    %c-33554432_i32 = arith.constant -33554432 : i32
    %357 = vector.broadcast %c-33554432_i32 : i32 to vector<16x128xi32>
    %358 = arith.andi %8, %357 : vector<16x128xi32>
    %359 = vector.broadcast %312 : i32 to vector<16x128xi32>
    %360 = arith.cmpi eq, %358, %359 : vector<16x128xi32>
    %cst_116 = arith.constant 1.000000e+00 : f32
    %cst_117 = arith.constant 0.000000e+00 : f32
    %361 = vector.broadcast %cst_116 : f32 to vector<16x128xf32>
    %362 = vector.broadcast %cst_117 : f32 to vector<16x128xf32>
    %363 = arith.select %360, %361, %362 : vector<16x128xi1>, vector<16x128xf32>
    %364 = vector.shape_cast %363 : vector<16x128xf32> to vector<1x16x128xf32>
    %cst_118 = arith.constant dense<0.000000e+00> : vector<1xf32>
    %365 = vector.multi_reduction <add>, %364, %cst_118 [1, 2] : vector<1x16x128xf32> to vector<1xf32>
    %366 = vector.shape_cast %365 : vector<1xf32> to vector<1x1x1xf32>
    %367 = vector.extract %366[0, 0, 0] : f32 from vector<1x1x1xf32>
    %368 = arith.cmpf oge, %314, %367 : f32
    %c33554432_i32 = arith.constant 33554432 : i32
    %369 = arith.ori %312, %c33554432_i32 : i32
    %370 = arith.select %368, %369, %312 : i32
    %371 = arith.subf %314, %367 : f32
    %372 = arith.select %368, %371, %314 : f32
    %373 = vector.broadcast %326 : i32 to vector<16x128xi32>
    %374 = arith.cmpi eq, %358, %373 : vector<16x128xi32>
    %cst_119 = arith.constant 1.000000e+00 : f32
    %cst_120 = arith.constant 0.000000e+00 : f32
    %375 = vector.broadcast %cst_119 : f32 to vector<16x128xf32>
    %376 = vector.broadcast %cst_120 : f32 to vector<16x128xf32>
    %377 = arith.select %374, %375, %376 : vector<16x128xi1>, vector<16x128xf32>
    %378 = vector.shape_cast %377 : vector<16x128xf32> to vector<1x16x128xf32>
    %cst_121 = arith.constant dense<0.000000e+00> : vector<1xf32>
    %379 = vector.multi_reduction <add>, %378, %cst_121 [1, 2] : vector<1x16x128xf32> to vector<1xf32>
    %380 = vector.shape_cast %379 : vector<1xf32> to vector<1x1x1xf32>
    %381 = vector.extract %380[0, 0, 0] : f32 from vector<1x1x1xf32>
    %382 = arith.cmpf oge, %328, %381 : f32
    %c33554432_i32_122 = arith.constant 33554432 : i32
    %383 = arith.ori %326, %c33554432_i32_122 : i32
    %384 = arith.select %382, %383, %326 : i32
    %385 = arith.subf %328, %381 : f32
    %386 = arith.select %382, %385, %328 : f32
    %387 = vector.broadcast %340 : i32 to vector<16x128xi32>
    %388 = arith.cmpi eq, %358, %387 : vector<16x128xi32>
    %cst_123 = arith.constant 1.000000e+00 : f32
    %cst_124 = arith.constant 0.000000e+00 : f32
    %389 = vector.broadcast %cst_123 : f32 to vector<16x128xf32>
    %390 = vector.broadcast %cst_124 : f32 to vector<16x128xf32>
    %391 = arith.select %388, %389, %390 : vector<16x128xi1>, vector<16x128xf32>
    %392 = vector.shape_cast %391 : vector<16x128xf32> to vector<1x16x128xf32>
    %cst_125 = arith.constant dense<0.000000e+00> : vector<1xf32>
    %393 = vector.multi_reduction <add>, %392, %cst_125 [1, 2] : vector<1x16x128xf32> to vector<1xf32>
    %394 = vector.shape_cast %393 : vector<1xf32> to vector<1x1x1xf32>
    %395 = vector.extract %394[0, 0, 0] : f32 from vector<1x1x1xf32>
    %396 = arith.cmpf oge, %342, %395 : f32
    %c33554432_i32_126 = arith.constant 33554432 : i32
    %397 = arith.ori %340, %c33554432_i32_126 : i32
    %398 = arith.select %396, %397, %340 : i32
    %399 = arith.subf %342, %395 : f32
    %400 = arith.select %396, %399, %342 : f32
    %401 = vector.broadcast %354 : i32 to vector<16x128xi32>
    %402 = arith.cmpi eq, %358, %401 : vector<16x128xi32>
    %cst_127 = arith.constant 1.000000e+00 : f32
    %cst_128 = arith.constant 0.000000e+00 : f32
    %403 = vector.broadcast %cst_127 : f32 to vector<16x128xf32>
    %404 = vector.broadcast %cst_128 : f32 to vector<16x128xf32>
    %405 = arith.select %402, %403, %404 : vector<16x128xi1>, vector<16x128xf32>
    %406 = vector.shape_cast %405 : vector<16x128xf32> to vector<1x16x128xf32>
    %cst_129 = arith.constant dense<0.000000e+00> : vector<1xf32>
    %407 = vector.multi_reduction <add>, %406, %cst_129 [1, 2] : vector<1x16x128xf32> to vector<1xf32>
    %408 = vector.shape_cast %407 : vector<1xf32> to vector<1x1x1xf32>
    %409 = vector.extract %408[0, 0, 0] : f32 from vector<1x1x1xf32>
    %410 = arith.cmpf oge, %356, %409 : f32
    %c33554432_i32_130 = arith.constant 33554432 : i32
    %411 = arith.ori %354, %c33554432_i32_130 : i32
    %412 = arith.select %410, %411, %354 : i32
    %413 = arith.subf %356, %409 : f32
    %414 = arith.select %410, %413, %356 : f32
    %c-16777216_i32 = arith.constant -16777216 : i32
    %415 = vector.broadcast %c-16777216_i32 : i32 to vector<16x128xi32>
    %416 = arith.andi %8, %415 : vector<16x128xi32>
    %417 = vector.broadcast %370 : i32 to vector<16x128xi32>
    %418 = arith.cmpi eq, %416, %417 : vector<16x128xi32>
    %cst_131 = arith.constant 1.000000e+00 : f32
    %cst_132 = arith.constant 0.000000e+00 : f32
    %419 = vector.broadcast %cst_131 : f32 to vector<16x128xf32>
    %420 = vector.broadcast %cst_132 : f32 to vector<16x128xf32>
    %421 = arith.select %418, %419, %420 : vector<16x128xi1>, vector<16x128xf32>
    %422 = vector.shape_cast %421 : vector<16x128xf32> to vector<1x16x128xf32>
    %cst_133 = arith.constant dense<0.000000e+00> : vector<1xf32>
    %423 = vector.multi_reduction <add>, %422, %cst_133 [1, 2] : vector<1x16x128xf32> to vector<1xf32>
    %424 = vector.shape_cast %423 : vector<1xf32> to vector<1x1x1xf32>
    %425 = vector.extract %424[0, 0, 0] : f32 from vector<1x1x1xf32>
    %426 = arith.cmpf oge, %372, %425 : f32
    %c16777216_i32 = arith.constant 16777216 : i32
    %427 = arith.ori %370, %c16777216_i32 : i32
    %428 = arith.select %426, %427, %370 : i32
    %429 = arith.subf %372, %425 : f32
    %430 = arith.select %426, %429, %372 : f32
    %431 = vector.broadcast %384 : i32 to vector<16x128xi32>
    %432 = arith.cmpi eq, %416, %431 : vector<16x128xi32>
    %cst_134 = arith.constant 1.000000e+00 : f32
    %cst_135 = arith.constant 0.000000e+00 : f32
    %433 = vector.broadcast %cst_134 : f32 to vector<16x128xf32>
    %434 = vector.broadcast %cst_135 : f32 to vector<16x128xf32>
    %435 = arith.select %432, %433, %434 : vector<16x128xi1>, vector<16x128xf32>
    %436 = vector.shape_cast %435 : vector<16x128xf32> to vector<1x16x128xf32>
    %cst_136 = arith.constant dense<0.000000e+00> : vector<1xf32>
    %437 = vector.multi_reduction <add>, %436, %cst_136 [1, 2] : vector<1x16x128xf32> to vector<1xf32>
    %438 = vector.shape_cast %437 : vector<1xf32> to vector<1x1x1xf32>
    %439 = vector.extract %438[0, 0, 0] : f32 from vector<1x1x1xf32>
    %440 = arith.cmpf oge, %386, %439 : f32
    %c16777216_i32_137 = arith.constant 16777216 : i32
    %441 = arith.ori %384, %c16777216_i32_137 : i32
    %442 = arith.select %440, %441, %384 : i32
    %443 = arith.subf %386, %439 : f32
    %444 = arith.select %440, %443, %386 : f32
    %445 = vector.broadcast %398 : i32 to vector<16x128xi32>
    %446 = arith.cmpi eq, %416, %445 : vector<16x128xi32>
    %cst_138 = arith.constant 1.000000e+00 : f32
    %cst_139 = arith.constant 0.000000e+00 : f32
    %447 = vector.broadcast %cst_138 : f32 to vector<16x128xf32>
    %448 = vector.broadcast %cst_139 : f32 to vector<16x128xf32>
    %449 = arith.select %446, %447, %448 : vector<16x128xi1>, vector<16x128xf32>
    %450 = vector.shape_cast %449 : vector<16x128xf32> to vector<1x16x128xf32>
    %cst_140 = arith.constant dense<0.000000e+00> : vector<1xf32>
    %451 = vector.multi_reduction <add>, %450, %cst_140 [1, 2] : vector<1x16x128xf32> to vector<1xf32>
    %452 = vector.shape_cast %451 : vector<1xf32> to vector<1x1x1xf32>
    %453 = vector.extract %452[0, 0, 0] : f32 from vector<1x1x1xf32>
    %454 = arith.cmpf oge, %400, %453 : f32
    %c16777216_i32_141 = arith.constant 16777216 : i32
    %455 = arith.ori %398, %c16777216_i32_141 : i32
    %456 = arith.select %454, %455, %398 : i32
    %457 = arith.subf %400, %453 : f32
    %458 = arith.select %454, %457, %400 : f32
    %459 = vector.broadcast %412 : i32 to vector<16x128xi32>
    %460 = arith.cmpi eq, %416, %459 : vector<16x128xi32>
    %cst_142 = arith.constant 1.000000e+00 : f32
    %cst_143 = arith.constant 0.000000e+00 : f32
    %461 = vector.broadcast %cst_142 : f32 to vector<16x128xf32>
    %462 = vector.broadcast %cst_143 : f32 to vector<16x128xf32>
    %463 = arith.select %460, %461, %462 : vector<16x128xi1>, vector<16x128xf32>
    %464 = vector.shape_cast %463 : vector<16x128xf32> to vector<1x16x128xf32>
    %cst_144 = arith.constant dense<0.000000e+00> : vector<1xf32>
    %465 = vector.multi_reduction <add>, %464, %cst_144 [1, 2] : vector<1x16x128xf32> to vector<1xf32>
    %466 = vector.shape_cast %465 : vector<1xf32> to vector<1x1x1xf32>
    %467 = vector.extract %466[0, 0, 0] : f32 from vector<1x1x1xf32>
    %468 = arith.cmpf oge, %414, %467 : f32
    %c16777216_i32_145 = arith.constant 16777216 : i32
    %469 = arith.ori %412, %c16777216_i32_145 : i32
    %470 = arith.select %468, %469, %412 : i32
    %471 = arith.subf %414, %467 : f32
    %472 = arith.select %468, %471, %414 : f32
    %c-8388608_i32 = arith.constant -8388608 : i32
    %473 = vector.broadcast %c-8388608_i32 : i32 to vector<16x128xi32>
    %474 = arith.andi %8, %473 : vector<16x128xi32>
    %475 = vector.broadcast %428 : i32 to vector<16x128xi32>
    %476 = arith.cmpi eq, %474, %475 : vector<16x128xi32>
    %cst_146 = arith.constant 1.000000e+00 : f32
    %cst_147 = arith.constant 0.000000e+00 : f32
    %477 = vector.broadcast %cst_146 : f32 to vector<16x128xf32>
    %478 = vector.broadcast %cst_147 : f32 to vector<16x128xf32>
    %479 = arith.select %476, %477, %478 : vector<16x128xi1>, vector<16x128xf32>
    %480 = vector.shape_cast %479 : vector<16x128xf32> to vector<1x16x128xf32>
    %cst_148 = arith.constant dense<0.000000e+00> : vector<1xf32>
    %481 = vector.multi_reduction <add>, %480, %cst_148 [1, 2] : vector<1x16x128xf32> to vector<1xf32>
    %482 = vector.shape_cast %481 : vector<1xf32> to vector<1x1x1xf32>
    %483 = vector.extract %482[0, 0, 0] : f32 from vector<1x1x1xf32>
    %484 = arith.cmpf oge, %430, %483 : f32
    %c8388608_i32 = arith.constant 8388608 : i32
    %485 = arith.ori %428, %c8388608_i32 : i32
    %486 = arith.select %484, %485, %428 : i32
    %487 = arith.subf %430, %483 : f32
    %488 = arith.select %484, %487, %430 : f32
    %489 = vector.broadcast %442 : i32 to vector<16x128xi32>
    %490 = arith.cmpi eq, %474, %489 : vector<16x128xi32>
    %cst_149 = arith.constant 1.000000e+00 : f32
    %cst_150 = arith.constant 0.000000e+00 : f32
    %491 = vector.broadcast %cst_149 : f32 to vector<16x128xf32>
    %492 = vector.broadcast %cst_150 : f32 to vector<16x128xf32>
    %493 = arith.select %490, %491, %492 : vector<16x128xi1>, vector<16x128xf32>
    %494 = vector.shape_cast %493 : vector<16x128xf32> to vector<1x16x128xf32>
    %cst_151 = arith.constant dense<0.000000e+00> : vector<1xf32>
    %495 = vector.multi_reduction <add>, %494, %cst_151 [1, 2] : vector<1x16x128xf32> to vector<1xf32>
    %496 = vector.shape_cast %495 : vector<1xf32> to vector<1x1x1xf32>
    %497 = vector.extract %496[0, 0, 0] : f32 from vector<1x1x1xf32>
    %498 = arith.cmpf oge, %444, %497 : f32
    %c8388608_i32_152 = arith.constant 8388608 : i32
    %499 = arith.ori %442, %c8388608_i32_152 : i32
    %500 = arith.select %498, %499, %442 : i32
    %501 = arith.subf %444, %497 : f32
    %502 = arith.select %498, %501, %444 : f32
    %503 = vector.broadcast %456 : i32 to vector<16x128xi32>
    %504 = arith.cmpi eq, %474, %503 : vector<16x128xi32>
    %cst_153 = arith.constant 1.000000e+00 : f32
    %cst_154 = arith.constant 0.000000e+00 : f32
    %505 = vector.broadcast %cst_153 : f32 to vector<16x128xf32>
    %506 = vector.broadcast %cst_154 : f32 to vector<16x128xf32>
    %507 = arith.select %504, %505, %506 : vector<16x128xi1>, vector<16x128xf32>
    %508 = vector.shape_cast %507 : vector<16x128xf32> to vector<1x16x128xf32>
    %cst_155 = arith.constant dense<0.000000e+00> : vector<1xf32>
    %509 = vector.multi_reduction <add>, %508, %cst_155 [1, 2] : vector<1x16x128xf32> to vector<1xf32>
    %510 = vector.shape_cast %509 : vector<1xf32> to vector<1x1x1xf32>
    %511 = vector.extract %510[0, 0, 0] : f32 from vector<1x1x1xf32>
    %512 = arith.cmpf oge, %458, %511 : f32
    %c8388608_i32_156 = arith.constant 8388608 : i32
    %513 = arith.ori %456, %c8388608_i32_156 : i32
    %514 = arith.select %512, %513, %456 : i32
    %515 = arith.subf %458, %511 : f32
    %516 = arith.select %512, %515, %458 : f32
    %517 = vector.broadcast %470 : i32 to vector<16x128xi32>
    %518 = arith.cmpi eq, %474, %517 : vector<16x128xi32>
    %cst_157 = arith.constant 1.000000e+00 : f32
    %cst_158 = arith.constant 0.000000e+00 : f32
    %519 = vector.broadcast %cst_157 : f32 to vector<16x128xf32>
    %520 = vector.broadcast %cst_158 : f32 to vector<16x128xf32>
    %521 = arith.select %518, %519, %520 : vector<16x128xi1>, vector<16x128xf32>
    %522 = vector.shape_cast %521 : vector<16x128xf32> to vector<1x16x128xf32>
    %cst_159 = arith.constant dense<0.000000e+00> : vector<1xf32>
    %523 = vector.multi_reduction <add>, %522, %cst_159 [1, 2] : vector<1x16x128xf32> to vector<1xf32>
    %524 = vector.shape_cast %523 : vector<1xf32> to vector<1x1x1xf32>
    %525 = vector.extract %524[0, 0, 0] : f32 from vector<1x1x1xf32>
    %526 = arith.cmpf oge, %472, %525 : f32
    %c8388608_i32_160 = arith.constant 8388608 : i32
    %527 = arith.ori %470, %c8388608_i32_160 : i32
    %528 = arith.select %526, %527, %470 : i32
    %529 = arith.subf %472, %525 : f32
    %530 = arith.select %526, %529, %472 : f32
    %c-4194304_i32 = arith.constant -4194304 : i32
    %531 = vector.broadcast %c-4194304_i32 : i32 to vector<16x128xi32>
    %532 = arith.andi %8, %531 : vector<16x128xi32>
    %533 = vector.broadcast %486 : i32 to vector<16x128xi32>
    %534 = arith.cmpi eq, %532, %533 : vector<16x128xi32>
    %cst_161 = arith.constant 1.000000e+00 : f32
    %cst_162 = arith.constant 0.000000e+00 : f32
    %535 = vector.broadcast %cst_161 : f32 to vector<16x128xf32>
    %536 = vector.broadcast %cst_162 : f32 to vector<16x128xf32>
    %537 = arith.select %534, %535, %536 : vector<16x128xi1>, vector<16x128xf32>
    %538 = vector.shape_cast %537 : vector<16x128xf32> to vector<1x16x128xf32>
    %cst_163 = arith.constant dense<0.000000e+00> : vector<1xf32>
    %539 = vector.multi_reduction <add>, %538, %cst_163 [1, 2] : vector<1x16x128xf32> to vector<1xf32>
    %540 = vector.shape_cast %539 : vector<1xf32> to vector<1x1x1xf32>
    %541 = vector.extract %540[0, 0, 0] : f32 from vector<1x1x1xf32>
    %542 = arith.cmpf oge, %488, %541 : f32
    %c4194304_i32 = arith.constant 4194304 : i32
    %543 = arith.ori %486, %c4194304_i32 : i32
    %544 = arith.select %542, %543, %486 : i32
    %545 = arith.subf %488, %541 : f32
    %546 = arith.select %542, %545, %488 : f32
    %547 = vector.broadcast %500 : i32 to vector<16x128xi32>
    %548 = arith.cmpi eq, %532, %547 : vector<16x128xi32>
    %cst_164 = arith.constant 1.000000e+00 : f32
    %cst_165 = arith.constant 0.000000e+00 : f32
    %549 = vector.broadcast %cst_164 : f32 to vector<16x128xf32>
    %550 = vector.broadcast %cst_165 : f32 to vector<16x128xf32>
    %551 = arith.select %548, %549, %550 : vector<16x128xi1>, vector<16x128xf32>
    %552 = vector.shape_cast %551 : vector<16x128xf32> to vector<1x16x128xf32>
    %cst_166 = arith.constant dense<0.000000e+00> : vector<1xf32>
    %553 = vector.multi_reduction <add>, %552, %cst_166 [1, 2] : vector<1x16x128xf32> to vector<1xf32>
    %554 = vector.shape_cast %553 : vector<1xf32> to vector<1x1x1xf32>
    %555 = vector.extract %554[0, 0, 0] : f32 from vector<1x1x1xf32>
    %556 = arith.cmpf oge, %502, %555 : f32
    %c4194304_i32_167 = arith.constant 4194304 : i32
    %557 = arith.ori %500, %c4194304_i32_167 : i32
    %558 = arith.select %556, %557, %500 : i32
    %559 = arith.subf %502, %555 : f32
    %560 = arith.select %556, %559, %502 : f32
    %561 = vector.broadcast %514 : i32 to vector<16x128xi32>
    %562 = arith.cmpi eq, %532, %561 : vector<16x128xi32>
    %cst_168 = arith.constant 1.000000e+00 : f32
    %cst_169 = arith.constant 0.000000e+00 : f32
    %563 = vector.broadcast %cst_168 : f32 to vector<16x128xf32>
    %564 = vector.broadcast %cst_169 : f32 to vector<16x128xf32>
    %565 = arith.select %562, %563, %564 : vector<16x128xi1>, vector<16x128xf32>
    %566 = vector.shape_cast %565 : vector<16x128xf32> to vector<1x16x128xf32>
    %cst_170 = arith.constant dense<0.000000e+00> : vector<1xf32>
    %567 = vector.multi_reduction <add>, %566, %cst_170 [1, 2] : vector<1x16x128xf32> to vector<1xf32>
    %568 = vector.shape_cast %567 : vector<1xf32> to vector<1x1x1xf32>
    %569 = vector.extract %568[0, 0, 0] : f32 from vector<1x1x1xf32>
    %570 = arith.cmpf oge, %516, %569 : f32
    %c4194304_i32_171 = arith.constant 4194304 : i32
    %571 = arith.ori %514, %c4194304_i32_171 : i32
    %572 = arith.select %570, %571, %514 : i32
    %573 = arith.subf %516, %569 : f32
    %574 = arith.select %570, %573, %516 : f32
    %575 = vector.broadcast %528 : i32 to vector<16x128xi32>
    %576 = arith.cmpi eq, %532, %575 : vector<16x128xi32>
    %cst_172 = arith.constant 1.000000e+00 : f32
    %cst_173 = arith.constant 0.000000e+00 : f32
    %577 = vector.broadcast %cst_172 : f32 to vector<16x128xf32>
    %578 = vector.broadcast %cst_173 : f32 to vector<16x128xf32>
    %579 = arith.select %576, %577, %578 : vector<16x128xi1>, vector<16x128xf32>
    %580 = vector.shape_cast %579 : vector<16x128xf32> to vector<1x16x128xf32>
    %cst_174 = arith.constant dense<0.000000e+00> : vector<1xf32>
    %581 = vector.multi_reduction <add>, %580, %cst_174 [1, 2] : vector<1x16x128xf32> to vector<1xf32>
    %582 = vector.shape_cast %581 : vector<1xf32> to vector<1x1x1xf32>
    %583 = vector.extract %582[0, 0, 0] : f32 from vector<1x1x1xf32>
    %584 = arith.cmpf oge, %530, %583 : f32
    %c4194304_i32_175 = arith.constant 4194304 : i32
    %585 = arith.ori %528, %c4194304_i32_175 : i32
    %586 = arith.select %584, %585, %528 : i32
    %587 = arith.subf %530, %583 : f32
    %588 = arith.select %584, %587, %530 : f32
    %c-2097152_i32 = arith.constant -2097152 : i32
    %589 = vector.broadcast %c-2097152_i32 : i32 to vector<16x128xi32>
    %590 = arith.andi %8, %589 : vector<16x128xi32>
    %591 = vector.broadcast %544 : i32 to vector<16x128xi32>
    %592 = arith.cmpi eq, %590, %591 : vector<16x128xi32>
    %cst_176 = arith.constant 1.000000e+00 : f32
    %cst_177 = arith.constant 0.000000e+00 : f32
    %593 = vector.broadcast %cst_176 : f32 to vector<16x128xf32>
    %594 = vector.broadcast %cst_177 : f32 to vector<16x128xf32>
    %595 = arith.select %592, %593, %594 : vector<16x128xi1>, vector<16x128xf32>
    %596 = vector.shape_cast %595 : vector<16x128xf32> to vector<1x16x128xf32>
    %cst_178 = arith.constant dense<0.000000e+00> : vector<1xf32>
    %597 = vector.multi_reduction <add>, %596, %cst_178 [1, 2] : vector<1x16x128xf32> to vector<1xf32>
    %598 = vector.shape_cast %597 : vector<1xf32> to vector<1x1x1xf32>
    %599 = vector.extract %598[0, 0, 0] : f32 from vector<1x1x1xf32>
    %600 = arith.cmpf oge, %546, %599 : f32
    %c2097152_i32 = arith.constant 2097152 : i32
    %601 = arith.ori %544, %c2097152_i32 : i32
    %602 = arith.select %600, %601, %544 : i32
    %603 = arith.subf %546, %599 : f32
    %604 = arith.select %600, %603, %546 : f32
    %605 = vector.broadcast %558 : i32 to vector<16x128xi32>
    %606 = arith.cmpi eq, %590, %605 : vector<16x128xi32>
    %cst_179 = arith.constant 1.000000e+00 : f32
    %cst_180 = arith.constant 0.000000e+00 : f32
    %607 = vector.broadcast %cst_179 : f32 to vector<16x128xf32>
    %608 = vector.broadcast %cst_180 : f32 to vector<16x128xf32>
    %609 = arith.select %606, %607, %608 : vector<16x128xi1>, vector<16x128xf32>
    %610 = vector.shape_cast %609 : vector<16x128xf32> to vector<1x16x128xf32>
    %cst_181 = arith.constant dense<0.000000e+00> : vector<1xf32>
    %611 = vector.multi_reduction <add>, %610, %cst_181 [1, 2] : vector<1x16x128xf32> to vector<1xf32>
    %612 = vector.shape_cast %611 : vector<1xf32> to vector<1x1x1xf32>
    %613 = vector.extract %612[0, 0, 0] : f32 from vector<1x1x1xf32>
    %614 = arith.cmpf oge, %560, %613 : f32
    %c2097152_i32_182 = arith.constant 2097152 : i32
    %615 = arith.ori %558, %c2097152_i32_182 : i32
    %616 = arith.select %614, %615, %558 : i32
    %617 = arith.subf %560, %613 : f32
    %618 = arith.select %614, %617, %560 : f32
    %619 = vector.broadcast %572 : i32 to vector<16x128xi32>
    %620 = arith.cmpi eq, %590, %619 : vector<16x128xi32>
    %cst_183 = arith.constant 1.000000e+00 : f32
    %cst_184 = arith.constant 0.000000e+00 : f32
    %621 = vector.broadcast %cst_183 : f32 to vector<16x128xf32>
    %622 = vector.broadcast %cst_184 : f32 to vector<16x128xf32>
    %623 = arith.select %620, %621, %622 : vector<16x128xi1>, vector<16x128xf32>
    %624 = vector.shape_cast %623 : vector<16x128xf32> to vector<1x16x128xf32>
    %cst_185 = arith.constant dense<0.000000e+00> : vector<1xf32>
    %625 = vector.multi_reduction <add>, %624, %cst_185 [1, 2] : vector<1x16x128xf32> to vector<1xf32>
    %626 = vector.shape_cast %625 : vector<1xf32> to vector<1x1x1xf32>
    %627 = vector.extract %626[0, 0, 0] : f32 from vector<1x1x1xf32>
    %628 = arith.cmpf oge, %574, %627 : f32
    %c2097152_i32_186 = arith.constant 2097152 : i32
    %629 = arith.ori %572, %c2097152_i32_186 : i32
    %630 = arith.select %628, %629, %572 : i32
    %631 = arith.subf %574, %627 : f32
    %632 = arith.select %628, %631, %574 : f32
    %633 = vector.broadcast %586 : i32 to vector<16x128xi32>
    %634 = arith.cmpi eq, %590, %633 : vector<16x128xi32>
    %cst_187 = arith.constant 1.000000e+00 : f32
    %cst_188 = arith.constant 0.000000e+00 : f32
    %635 = vector.broadcast %cst_187 : f32 to vector<16x128xf32>
    %636 = vector.broadcast %cst_188 : f32 to vector<16x128xf32>
    %637 = arith.select %634, %635, %636 : vector<16x128xi1>, vector<16x128xf32>
    %638 = vector.shape_cast %637 : vector<16x128xf32> to vector<1x16x128xf32>
    %cst_189 = arith.constant dense<0.000000e+00> : vector<1xf32>
    %639 = vector.multi_reduction <add>, %638, %cst_189 [1, 2] : vector<1x16x128xf32> to vector<1xf32>
    %640 = vector.shape_cast %639 : vector<1xf32> to vector<1x1x1xf32>
    %641 = vector.extract %640[0, 0, 0] : f32 from vector<1x1x1xf32>
    %642 = arith.cmpf oge, %588, %641 : f32
    %c2097152_i32_190 = arith.constant 2097152 : i32
    %643 = arith.ori %586, %c2097152_i32_190 : i32
    %644 = arith.select %642, %643, %586 : i32
    %645 = arith.subf %588, %641 : f32
    %646 = arith.select %642, %645, %588 : f32
    %c-1048576_i32 = arith.constant -1048576 : i32
    %647 = vector.broadcast %c-1048576_i32 : i32 to vector<16x128xi32>
    %648 = arith.andi %8, %647 : vector<16x128xi32>
    %649 = vector.broadcast %602 : i32 to vector<16x128xi32>
    %650 = arith.cmpi eq, %648, %649 : vector<16x128xi32>
    %cst_191 = arith.constant 1.000000e+00 : f32
    %cst_192 = arith.constant 0.000000e+00 : f32
    %651 = vector.broadcast %cst_191 : f32 to vector<16x128xf32>
    %652 = vector.broadcast %cst_192 : f32 to vector<16x128xf32>
    %653 = arith.select %650, %651, %652 : vector<16x128xi1>, vector<16x128xf32>
    %654 = vector.shape_cast %653 : vector<16x128xf32> to vector<1x16x128xf32>
    %cst_193 = arith.constant dense<0.000000e+00> : vector<1xf32>
    %655 = vector.multi_reduction <add>, %654, %cst_193 [1, 2] : vector<1x16x128xf32> to vector<1xf32>
    %656 = vector.shape_cast %655 : vector<1xf32> to vector<1x1x1xf32>
    %657 = vector.extract %656[0, 0, 0] : f32 from vector<1x1x1xf32>
    %658 = arith.cmpf oge, %604, %657 : f32
    %c1048576_i32 = arith.constant 1048576 : i32
    %659 = arith.ori %602, %c1048576_i32 : i32
    %660 = arith.select %658, %659, %602 : i32
    %661 = arith.subf %604, %657 : f32
    %662 = arith.select %658, %661, %604 : f32
    %663 = vector.broadcast %616 : i32 to vector<16x128xi32>
    %664 = arith.cmpi eq, %648, %663 : vector<16x128xi32>
    %cst_194 = arith.constant 1.000000e+00 : f32
    %cst_195 = arith.constant 0.000000e+00 : f32
    %665 = vector.broadcast %cst_194 : f32 to vector<16x128xf32>
    %666 = vector.broadcast %cst_195 : f32 to vector<16x128xf32>
    %667 = arith.select %664, %665, %666 : vector<16x128xi1>, vector<16x128xf32>
    %668 = vector.shape_cast %667 : vector<16x128xf32> to vector<1x16x128xf32>
    %cst_196 = arith.constant dense<0.000000e+00> : vector<1xf32>
    %669 = vector.multi_reduction <add>, %668, %cst_196 [1, 2] : vector<1x16x128xf32> to vector<1xf32>
    %670 = vector.shape_cast %669 : vector<1xf32> to vector<1x1x1xf32>
    %671 = vector.extract %670[0, 0, 0] : f32 from vector<1x1x1xf32>
    %672 = arith.cmpf oge, %618, %671 : f32
    %c1048576_i32_197 = arith.constant 1048576 : i32
    %673 = arith.ori %616, %c1048576_i32_197 : i32
    %674 = arith.select %672, %673, %616 : i32
    %675 = arith.subf %618, %671 : f32
    %676 = arith.select %672, %675, %618 : f32
    %677 = vector.broadcast %630 : i32 to vector<16x128xi32>
    %678 = arith.cmpi eq, %648, %677 : vector<16x128xi32>
    %cst_198 = arith.constant 1.000000e+00 : f32
    %cst_199 = arith.constant 0.000000e+00 : f32
    %679 = vector.broadcast %cst_198 : f32 to vector<16x128xf32>
    %680 = vector.broadcast %cst_199 : f32 to vector<16x128xf32>
    %681 = arith.select %678, %679, %680 : vector<16x128xi1>, vector<16x128xf32>
    %682 = vector.shape_cast %681 : vector<16x128xf32> to vector<1x16x128xf32>
    %cst_200 = arith.constant dense<0.000000e+00> : vector<1xf32>
    %683 = vector.multi_reduction <add>, %682, %cst_200 [1, 2] : vector<1x16x128xf32> to vector<1xf32>
    %684 = vector.shape_cast %683 : vector<1xf32> to vector<1x1x1xf32>
    %685 = vector.extract %684[0, 0, 0] : f32 from vector<1x1x1xf32>
    %686 = arith.cmpf oge, %632, %685 : f32
    %c1048576_i32_201 = arith.constant 1048576 : i32
    %687 = arith.ori %630, %c1048576_i32_201 : i32
    %688 = arith.select %686, %687, %630 : i32
    %689 = arith.subf %632, %685 : f32
    %690 = arith.select %686, %689, %632 : f32
    %691 = vector.broadcast %644 : i32 to vector<16x128xi32>
    %692 = arith.cmpi eq, %648, %691 : vector<16x128xi32>
    %cst_202 = arith.constant 1.000000e+00 : f32
    %cst_203 = arith.constant 0.000000e+00 : f32
    %693 = vector.broadcast %cst_202 : f32 to vector<16x128xf32>
    %694 = vector.broadcast %cst_203 : f32 to vector<16x128xf32>
    %695 = arith.select %692, %693, %694 : vector<16x128xi1>, vector<16x128xf32>
    %696 = vector.shape_cast %695 : vector<16x128xf32> to vector<1x16x128xf32>
    %cst_204 = arith.constant dense<0.000000e+00> : vector<1xf32>
    %697 = vector.multi_reduction <add>, %696, %cst_204 [1, 2] : vector<1x16x128xf32> to vector<1xf32>
    %698 = vector.shape_cast %697 : vector<1xf32> to vector<1x1x1xf32>
    %699 = vector.extract %698[0, 0, 0] : f32 from vector<1x1x1xf32>
    %700 = arith.cmpf oge, %646, %699 : f32
    %c1048576_i32_205 = arith.constant 1048576 : i32
    %701 = arith.ori %644, %c1048576_i32_205 : i32
    %702 = arith.select %700, %701, %644 : i32
    %703 = arith.subf %646, %699 : f32
    %704 = arith.select %700, %703, %646 : f32
    %c-524288_i32 = arith.constant -524288 : i32
    %705 = vector.broadcast %c-524288_i32 : i32 to vector<16x128xi32>
    %706 = arith.andi %8, %705 : vector<16x128xi32>
    %707 = vector.broadcast %660 : i32 to vector<16x128xi32>
    %708 = arith.cmpi eq, %706, %707 : vector<16x128xi32>
    %cst_206 = arith.constant 1.000000e+00 : f32
    %cst_207 = arith.constant 0.000000e+00 : f32
    %709 = vector.broadcast %cst_206 : f32 to vector<16x128xf32>
    %710 = vector.broadcast %cst_207 : f32 to vector<16x128xf32>
    %711 = arith.select %708, %709, %710 : vector<16x128xi1>, vector<16x128xf32>
    %712 = vector.shape_cast %711 : vector<16x128xf32> to vector<1x16x128xf32>
    %cst_208 = arith.constant dense<0.000000e+00> : vector<1xf32>
    %713 = vector.multi_reduction <add>, %712, %cst_208 [1, 2] : vector<1x16x128xf32> to vector<1xf32>
    %714 = vector.shape_cast %713 : vector<1xf32> to vector<1x1x1xf32>
    %715 = vector.extract %714[0, 0, 0] : f32 from vector<1x1x1xf32>
    %716 = arith.cmpf oge, %662, %715 : f32
    %c524288_i32 = arith.constant 524288 : i32
    %717 = arith.ori %660, %c524288_i32 : i32
    %718 = arith.select %716, %717, %660 : i32
    %719 = arith.subf %662, %715 : f32
    %720 = arith.select %716, %719, %662 : f32
    %721 = vector.broadcast %674 : i32 to vector<16x128xi32>
    %722 = arith.cmpi eq, %706, %721 : vector<16x128xi32>
    %cst_209 = arith.constant 1.000000e+00 : f32
    %cst_210 = arith.constant 0.000000e+00 : f32
    %723 = vector.broadcast %cst_209 : f32 to vector<16x128xf32>
    %724 = vector.broadcast %cst_210 : f32 to vector<16x128xf32>
    %725 = arith.select %722, %723, %724 : vector<16x128xi1>, vector<16x128xf32>
    %726 = vector.shape_cast %725 : vector<16x128xf32> to vector<1x16x128xf32>
    %cst_211 = arith.constant dense<0.000000e+00> : vector<1xf32>
    %727 = vector.multi_reduction <add>, %726, %cst_211 [1, 2] : vector<1x16x128xf32> to vector<1xf32>
    %728 = vector.shape_cast %727 : vector<1xf32> to vector<1x1x1xf32>
    %729 = vector.extract %728[0, 0, 0] : f32 from vector<1x1x1xf32>
    %730 = arith.cmpf oge, %676, %729 : f32
    %c524288_i32_212 = arith.constant 524288 : i32
    %731 = arith.ori %674, %c524288_i32_212 : i32
    %732 = arith.select %730, %731, %674 : i32
    %733 = arith.subf %676, %729 : f32
    %734 = arith.select %730, %733, %676 : f32
    %735 = vector.broadcast %688 : i32 to vector<16x128xi32>
    %736 = arith.cmpi eq, %706, %735 : vector<16x128xi32>
    %cst_213 = arith.constant 1.000000e+00 : f32
    %cst_214 = arith.constant 0.000000e+00 : f32
    %737 = vector.broadcast %cst_213 : f32 to vector<16x128xf32>
    %738 = vector.broadcast %cst_214 : f32 to vector<16x128xf32>
    %739 = arith.select %736, %737, %738 : vector<16x128xi1>, vector<16x128xf32>
    %740 = vector.shape_cast %739 : vector<16x128xf32> to vector<1x16x128xf32>
    %cst_215 = arith.constant dense<0.000000e+00> : vector<1xf32>
    %741 = vector.multi_reduction <add>, %740, %cst_215 [1, 2] : vector<1x16x128xf32> to vector<1xf32>
    %742 = vector.shape_cast %741 : vector<1xf32> to vector<1x1x1xf32>
    %743 = vector.extract %742[0, 0, 0] : f32 from vector<1x1x1xf32>
    %744 = arith.cmpf oge, %690, %743 : f32
    %c524288_i32_216 = arith.constant 524288 : i32
    %745 = arith.ori %688, %c524288_i32_216 : i32
    %746 = arith.select %744, %745, %688 : i32
    %747 = arith.subf %690, %743 : f32
    %748 = arith.select %744, %747, %690 : f32
    %749 = vector.broadcast %702 : i32 to vector<16x128xi32>
    %750 = arith.cmpi eq, %706, %749 : vector<16x128xi32>
    %cst_217 = arith.constant 1.000000e+00 : f32
    %cst_218 = arith.constant 0.000000e+00 : f32
    %751 = vector.broadcast %cst_217 : f32 to vector<16x128xf32>
    %752 = vector.broadcast %cst_218 : f32 to vector<16x128xf32>
    %753 = arith.select %750, %751, %752 : vector<16x128xi1>, vector<16x128xf32>
    %754 = vector.shape_cast %753 : vector<16x128xf32> to vector<1x16x128xf32>
    %cst_219 = arith.constant dense<0.000000e+00> : vector<1xf32>
    %755 = vector.multi_reduction <add>, %754, %cst_219 [1, 2] : vector<1x16x128xf32> to vector<1xf32>
    %756 = vector.shape_cast %755 : vector<1xf32> to vector<1x1x1xf32>
    %757 = vector.extract %756[0, 0, 0] : f32 from vector<1x1x1xf32>
    %758 = arith.cmpf oge, %704, %757 : f32
    %c524288_i32_220 = arith.constant 524288 : i32
    %759 = arith.ori %702, %c524288_i32_220 : i32
    %760 = arith.select %758, %759, %702 : i32
    %761 = arith.subf %704, %757 : f32
    %762 = arith.select %758, %761, %704 : f32
    %c-262144_i32 = arith.constant -262144 : i32
    %763 = vector.broadcast %c-262144_i32 : i32 to vector<16x128xi32>
    %764 = arith.andi %8, %763 : vector<16x128xi32>
    %765 = vector.broadcast %718 : i32 to vector<16x128xi32>
    %766 = arith.cmpi eq, %764, %765 : vector<16x128xi32>
    %cst_221 = arith.constant 1.000000e+00 : f32
    %cst_222 = arith.constant 0.000000e+00 : f32
    %767 = vector.broadcast %cst_221 : f32 to vector<16x128xf32>
    %768 = vector.broadcast %cst_222 : f32 to vector<16x128xf32>
    %769 = arith.select %766, %767, %768 : vector<16x128xi1>, vector<16x128xf32>
    %770 = vector.shape_cast %769 : vector<16x128xf32> to vector<1x16x128xf32>
    %cst_223 = arith.constant dense<0.000000e+00> : vector<1xf32>
    %771 = vector.multi_reduction <add>, %770, %cst_223 [1, 2] : vector<1x16x128xf32> to vector<1xf32>
    %772 = vector.shape_cast %771 : vector<1xf32> to vector<1x1x1xf32>
    %773 = vector.extract %772[0, 0, 0] : f32 from vector<1x1x1xf32>
    %774 = arith.cmpf oge, %720, %773 : f32
    %c262144_i32 = arith.constant 262144 : i32
    %775 = arith.ori %718, %c262144_i32 : i32
    %776 = arith.select %774, %775, %718 : i32
    %777 = arith.subf %720, %773 : f32
    %778 = arith.select %774, %777, %720 : f32
    %779 = vector.broadcast %732 : i32 to vector<16x128xi32>
    %780 = arith.cmpi eq, %764, %779 : vector<16x128xi32>
    %cst_224 = arith.constant 1.000000e+00 : f32
    %cst_225 = arith.constant 0.000000e+00 : f32
    %781 = vector.broadcast %cst_224 : f32 to vector<16x128xf32>
    %782 = vector.broadcast %cst_225 : f32 to vector<16x128xf32>
    %783 = arith.select %780, %781, %782 : vector<16x128xi1>, vector<16x128xf32>
    %784 = vector.shape_cast %783 : vector<16x128xf32> to vector<1x16x128xf32>
    %cst_226 = arith.constant dense<0.000000e+00> : vector<1xf32>
    %785 = vector.multi_reduction <add>, %784, %cst_226 [1, 2] : vector<1x16x128xf32> to vector<1xf32>
    %786 = vector.shape_cast %785 : vector<1xf32> to vector<1x1x1xf32>
    %787 = vector.extract %786[0, 0, 0] : f32 from vector<1x1x1xf32>
    %788 = arith.cmpf oge, %734, %787 : f32
    %c262144_i32_227 = arith.constant 262144 : i32
    %789 = arith.ori %732, %c262144_i32_227 : i32
    %790 = arith.select %788, %789, %732 : i32
    %791 = arith.subf %734, %787 : f32
    %792 = arith.select %788, %791, %734 : f32
    %793 = vector.broadcast %746 : i32 to vector<16x128xi32>
    %794 = arith.cmpi eq, %764, %793 : vector<16x128xi32>
    %cst_228 = arith.constant 1.000000e+00 : f32
    %cst_229 = arith.constant 0.000000e+00 : f32
    %795 = vector.broadcast %cst_228 : f32 to vector<16x128xf32>
    %796 = vector.broadcast %cst_229 : f32 to vector<16x128xf32>
    %797 = arith.select %794, %795, %796 : vector<16x128xi1>, vector<16x128xf32>
    %798 = vector.shape_cast %797 : vector<16x128xf32> to vector<1x16x128xf32>
    %cst_230 = arith.constant dense<0.000000e+00> : vector<1xf32>
    %799 = vector.multi_reduction <add>, %798, %cst_230 [1, 2] : vector<1x16x128xf32> to vector<1xf32>
    %800 = vector.shape_cast %799 : vector<1xf32> to vector<1x1x1xf32>
    %801 = vector.extract %800[0, 0, 0] : f32 from vector<1x1x1xf32>
    %802 = arith.cmpf oge, %748, %801 : f32
    %c262144_i32_231 = arith.constant 262144 : i32
    %803 = arith.ori %746, %c262144_i32_231 : i32
    %804 = arith.select %802, %803, %746 : i32
    %805 = arith.subf %748, %801 : f32
    %806 = arith.select %802, %805, %748 : f32
    %807 = vector.broadcast %760 : i32 to vector<16x128xi32>
    %808 = arith.cmpi eq, %764, %807 : vector<16x128xi32>
    %cst_232 = arith.constant 1.000000e+00 : f32
    %cst_233 = arith.constant 0.000000e+00 : f32
    %809 = vector.broadcast %cst_232 : f32 to vector<16x128xf32>
    %810 = vector.broadcast %cst_233 : f32 to vector<16x128xf32>
    %811 = arith.select %808, %809, %810 : vector<16x128xi1>, vector<16x128xf32>
    %812 = vector.shape_cast %811 : vector<16x128xf32> to vector<1x16x128xf32>
    %cst_234 = arith.constant dense<0.000000e+00> : vector<1xf32>
    %813 = vector.multi_reduction <add>, %812, %cst_234 [1, 2] : vector<1x16x128xf32> to vector<1xf32>
    %814 = vector.shape_cast %813 : vector<1xf32> to vector<1x1x1xf32>
    %815 = vector.extract %814[0, 0, 0] : f32 from vector<1x1x1xf32>
    %816 = arith.cmpf oge, %762, %815 : f32
    %c262144_i32_235 = arith.constant 262144 : i32
    %817 = arith.ori %760, %c262144_i32_235 : i32
    %818 = arith.select %816, %817, %760 : i32
    %819 = arith.subf %762, %815 : f32
    %820 = arith.select %816, %819, %762 : f32
    %c-131072_i32 = arith.constant -131072 : i32
    %821 = vector.broadcast %c-131072_i32 : i32 to vector<16x128xi32>
    %822 = arith.andi %8, %821 : vector<16x128xi32>
    %823 = vector.broadcast %776 : i32 to vector<16x128xi32>
    %824 = arith.cmpi eq, %822, %823 : vector<16x128xi32>
    %cst_236 = arith.constant 1.000000e+00 : f32
    %cst_237 = arith.constant 0.000000e+00 : f32
    %825 = vector.broadcast %cst_236 : f32 to vector<16x128xf32>
    %826 = vector.broadcast %cst_237 : f32 to vector<16x128xf32>
    %827 = arith.select %824, %825, %826 : vector<16x128xi1>, vector<16x128xf32>
    %828 = vector.shape_cast %827 : vector<16x128xf32> to vector<1x16x128xf32>
    %cst_238 = arith.constant dense<0.000000e+00> : vector<1xf32>
    %829 = vector.multi_reduction <add>, %828, %cst_238 [1, 2] : vector<1x16x128xf32> to vector<1xf32>
    %830 = vector.shape_cast %829 : vector<1xf32> to vector<1x1x1xf32>
    %831 = vector.extract %830[0, 0, 0] : f32 from vector<1x1x1xf32>
    %832 = arith.cmpf oge, %778, %831 : f32
    %c131072_i32 = arith.constant 131072 : i32
    %833 = arith.ori %776, %c131072_i32 : i32
    %834 = arith.select %832, %833, %776 : i32
    %835 = arith.subf %778, %831 : f32
    %836 = arith.select %832, %835, %778 : f32
    %837 = vector.broadcast %790 : i32 to vector<16x128xi32>
    %838 = arith.cmpi eq, %822, %837 : vector<16x128xi32>
    %cst_239 = arith.constant 1.000000e+00 : f32
    %cst_240 = arith.constant 0.000000e+00 : f32
    %839 = vector.broadcast %cst_239 : f32 to vector<16x128xf32>
    %840 = vector.broadcast %cst_240 : f32 to vector<16x128xf32>
    %841 = arith.select %838, %839, %840 : vector<16x128xi1>, vector<16x128xf32>
    %842 = vector.shape_cast %841 : vector<16x128xf32> to vector<1x16x128xf32>
    %cst_241 = arith.constant dense<0.000000e+00> : vector<1xf32>
    %843 = vector.multi_reduction <add>, %842, %cst_241 [1, 2] : vector<1x16x128xf32> to vector<1xf32>
    %844 = vector.shape_cast %843 : vector<1xf32> to vector<1x1x1xf32>
    %845 = vector.extract %844[0, 0, 0] : f32 from vector<1x1x1xf32>
    %846 = arith.cmpf oge, %792, %845 : f32
    %c131072_i32_242 = arith.constant 131072 : i32
    %847 = arith.ori %790, %c131072_i32_242 : i32
    %848 = arith.select %846, %847, %790 : i32
    %849 = arith.subf %792, %845 : f32
    %850 = arith.select %846, %849, %792 : f32
    %851 = vector.broadcast %804 : i32 to vector<16x128xi32>
    %852 = arith.cmpi eq, %822, %851 : vector<16x128xi32>
    %cst_243 = arith.constant 1.000000e+00 : f32
    %cst_244 = arith.constant 0.000000e+00 : f32
    %853 = vector.broadcast %cst_243 : f32 to vector<16x128xf32>
    %854 = vector.broadcast %cst_244 : f32 to vector<16x128xf32>
    %855 = arith.select %852, %853, %854 : vector<16x128xi1>, vector<16x128xf32>
    %856 = vector.shape_cast %855 : vector<16x128xf32> to vector<1x16x128xf32>
    %cst_245 = arith.constant dense<0.000000e+00> : vector<1xf32>
    %857 = vector.multi_reduction <add>, %856, %cst_245 [1, 2] : vector<1x16x128xf32> to vector<1xf32>
    %858 = vector.shape_cast %857 : vector<1xf32> to vector<1x1x1xf32>
    %859 = vector.extract %858[0, 0, 0] : f32 from vector<1x1x1xf32>
    %860 = arith.cmpf oge, %806, %859 : f32
    %c131072_i32_246 = arith.constant 131072 : i32
    %861 = arith.ori %804, %c131072_i32_246 : i32
    %862 = arith.select %860, %861, %804 : i32
    %863 = arith.subf %806, %859 : f32
    %864 = arith.select %860, %863, %806 : f32
    %865 = vector.broadcast %818 : i32 to vector<16x128xi32>
    %866 = arith.cmpi eq, %822, %865 : vector<16x128xi32>
    %cst_247 = arith.constant 1.000000e+00 : f32
    %cst_248 = arith.constant 0.000000e+00 : f32
    %867 = vector.broadcast %cst_247 : f32 to vector<16x128xf32>
    %868 = vector.broadcast %cst_248 : f32 to vector<16x128xf32>
    %869 = arith.select %866, %867, %868 : vector<16x128xi1>, vector<16x128xf32>
    %870 = vector.shape_cast %869 : vector<16x128xf32> to vector<1x16x128xf32>
    %cst_249 = arith.constant dense<0.000000e+00> : vector<1xf32>
    %871 = vector.multi_reduction <add>, %870, %cst_249 [1, 2] : vector<1x16x128xf32> to vector<1xf32>
    %872 = vector.shape_cast %871 : vector<1xf32> to vector<1x1x1xf32>
    %873 = vector.extract %872[0, 0, 0] : f32 from vector<1x1x1xf32>
    %874 = arith.cmpf oge, %820, %873 : f32
    %c131072_i32_250 = arith.constant 131072 : i32
    %875 = arith.ori %818, %c131072_i32_250 : i32
    %876 = arith.select %874, %875, %818 : i32
    %877 = arith.subf %820, %873 : f32
    %878 = arith.select %874, %877, %820 : f32
    %c-65536_i32 = arith.constant -65536 : i32
    %879 = vector.broadcast %c-65536_i32 : i32 to vector<16x128xi32>
    %880 = arith.andi %8, %879 : vector<16x128xi32>
    %881 = vector.broadcast %834 : i32 to vector<16x128xi32>
    %882 = arith.cmpi eq, %880, %881 : vector<16x128xi32>
    %cst_251 = arith.constant 1.000000e+00 : f32
    %cst_252 = arith.constant 0.000000e+00 : f32
    %883 = vector.broadcast %cst_251 : f32 to vector<16x128xf32>
    %884 = vector.broadcast %cst_252 : f32 to vector<16x128xf32>
    %885 = arith.select %882, %883, %884 : vector<16x128xi1>, vector<16x128xf32>
    %886 = vector.shape_cast %885 : vector<16x128xf32> to vector<1x16x128xf32>
    %cst_253 = arith.constant dense<0.000000e+00> : vector<1xf32>
    %887 = vector.multi_reduction <add>, %886, %cst_253 [1, 2] : vector<1x16x128xf32> to vector<1xf32>
    %888 = vector.shape_cast %887 : vector<1xf32> to vector<1x1x1xf32>
    %889 = vector.extract %888[0, 0, 0] : f32 from vector<1x1x1xf32>
    %890 = arith.cmpf oge, %836, %889 : f32
    %c65536_i32 = arith.constant 65536 : i32
    %891 = arith.ori %834, %c65536_i32 : i32
    %892 = arith.select %890, %891, %834 : i32
    %893 = arith.subf %836, %889 : f32
    %894 = arith.select %890, %893, %836 : f32
    %895 = vector.broadcast %848 : i32 to vector<16x128xi32>
    %896 = arith.cmpi eq, %880, %895 : vector<16x128xi32>
    %cst_254 = arith.constant 1.000000e+00 : f32
    %cst_255 = arith.constant 0.000000e+00 : f32
    %897 = vector.broadcast %cst_254 : f32 to vector<16x128xf32>
    %898 = vector.broadcast %cst_255 : f32 to vector<16x128xf32>
    %899 = arith.select %896, %897, %898 : vector<16x128xi1>, vector<16x128xf32>
    %900 = vector.shape_cast %899 : vector<16x128xf32> to vector<1x16x128xf32>
    %cst_256 = arith.constant dense<0.000000e+00> : vector<1xf32>
    %901 = vector.multi_reduction <add>, %900, %cst_256 [1, 2] : vector<1x16x128xf32> to vector<1xf32>
    %902 = vector.shape_cast %901 : vector<1xf32> to vector<1x1x1xf32>
    %903 = vector.extract %902[0, 0, 0] : f32 from vector<1x1x1xf32>
    %904 = arith.cmpf oge, %850, %903 : f32
    %c65536_i32_257 = arith.constant 65536 : i32
    %905 = arith.ori %848, %c65536_i32_257 : i32
    %906 = arith.select %904, %905, %848 : i32
    %907 = arith.subf %850, %903 : f32
    %908 = arith.select %904, %907, %850 : f32
    %909 = vector.broadcast %862 : i32 to vector<16x128xi32>
    %910 = arith.cmpi eq, %880, %909 : vector<16x128xi32>
    %cst_258 = arith.constant 1.000000e+00 : f32
    %cst_259 = arith.constant 0.000000e+00 : f32
    %911 = vector.broadcast %cst_258 : f32 to vector<16x128xf32>
    %912 = vector.broadcast %cst_259 : f32 to vector<16x128xf32>
    %913 = arith.select %910, %911, %912 : vector<16x128xi1>, vector<16x128xf32>
    %914 = vector.shape_cast %913 : vector<16x128xf32> to vector<1x16x128xf32>
    %cst_260 = arith.constant dense<0.000000e+00> : vector<1xf32>
    %915 = vector.multi_reduction <add>, %914, %cst_260 [1, 2] : vector<1x16x128xf32> to vector<1xf32>
    %916 = vector.shape_cast %915 : vector<1xf32> to vector<1x1x1xf32>
    %917 = vector.extract %916[0, 0, 0] : f32 from vector<1x1x1xf32>
    %918 = arith.cmpf oge, %864, %917 : f32
    %c65536_i32_261 = arith.constant 65536 : i32
    %919 = arith.ori %862, %c65536_i32_261 : i32
    %920 = arith.select %918, %919, %862 : i32
    %921 = arith.subf %864, %917 : f32
    %922 = arith.select %918, %921, %864 : f32
    %923 = vector.broadcast %876 : i32 to vector<16x128xi32>
    %924 = arith.cmpi eq, %880, %923 : vector<16x128xi32>
    %cst_262 = arith.constant 1.000000e+00 : f32
    %cst_263 = arith.constant 0.000000e+00 : f32
    %925 = vector.broadcast %cst_262 : f32 to vector<16x128xf32>
    %926 = vector.broadcast %cst_263 : f32 to vector<16x128xf32>
    %927 = arith.select %924, %925, %926 : vector<16x128xi1>, vector<16x128xf32>
    %928 = vector.shape_cast %927 : vector<16x128xf32> to vector<1x16x128xf32>
    %cst_264 = arith.constant dense<0.000000e+00> : vector<1xf32>
    %929 = vector.multi_reduction <add>, %928, %cst_264 [1, 2] : vector<1x16x128xf32> to vector<1xf32>
    %930 = vector.shape_cast %929 : vector<1xf32> to vector<1x1x1xf32>
    %931 = vector.extract %930[0, 0, 0] : f32 from vector<1x1x1xf32>
    %932 = arith.cmpf oge, %878, %931 : f32
    %c65536_i32_265 = arith.constant 65536 : i32
    %933 = arith.ori %876, %c65536_i32_265 : i32
    %934 = arith.select %932, %933, %876 : i32
    %935 = arith.subf %878, %931 : f32
    %936 = arith.select %932, %935, %878 : f32
    %c-32768_i32 = arith.constant -32768 : i32
    %937 = vector.broadcast %c-32768_i32 : i32 to vector<16x128xi32>
    %938 = arith.andi %8, %937 : vector<16x128xi32>
    %939 = vector.broadcast %892 : i32 to vector<16x128xi32>
    %940 = arith.cmpi eq, %938, %939 : vector<16x128xi32>
    %cst_266 = arith.constant 1.000000e+00 : f32
    %cst_267 = arith.constant 0.000000e+00 : f32
    %941 = vector.broadcast %cst_266 : f32 to vector<16x128xf32>
    %942 = vector.broadcast %cst_267 : f32 to vector<16x128xf32>
    %943 = arith.select %940, %941, %942 : vector<16x128xi1>, vector<16x128xf32>
    %944 = vector.shape_cast %943 : vector<16x128xf32> to vector<1x16x128xf32>
    %cst_268 = arith.constant dense<0.000000e+00> : vector<1xf32>
    %945 = vector.multi_reduction <add>, %944, %cst_268 [1, 2] : vector<1x16x128xf32> to vector<1xf32>
    %946 = vector.shape_cast %945 : vector<1xf32> to vector<1x1x1xf32>
    %947 = vector.extract %946[0, 0, 0] : f32 from vector<1x1x1xf32>
    %948 = arith.cmpf oge, %894, %947 : f32
    %c32768_i32 = arith.constant 32768 : i32
    %949 = arith.ori %892, %c32768_i32 : i32
    %950 = arith.select %948, %949, %892 : i32
    %951 = arith.subf %894, %947 : f32
    %952 = arith.select %948, %951, %894 : f32
    %953 = vector.broadcast %906 : i32 to vector<16x128xi32>
    %954 = arith.cmpi eq, %938, %953 : vector<16x128xi32>
    %cst_269 = arith.constant 1.000000e+00 : f32
    %cst_270 = arith.constant 0.000000e+00 : f32
    %955 = vector.broadcast %cst_269 : f32 to vector<16x128xf32>
    %956 = vector.broadcast %cst_270 : f32 to vector<16x128xf32>
    %957 = arith.select %954, %955, %956 : vector<16x128xi1>, vector<16x128xf32>
    %958 = vector.shape_cast %957 : vector<16x128xf32> to vector<1x16x128xf32>
    %cst_271 = arith.constant dense<0.000000e+00> : vector<1xf32>
    %959 = vector.multi_reduction <add>, %958, %cst_271 [1, 2] : vector<1x16x128xf32> to vector<1xf32>
    %960 = vector.shape_cast %959 : vector<1xf32> to vector<1x1x1xf32>
    %961 = vector.extract %960[0, 0, 0] : f32 from vector<1x1x1xf32>
    %962 = arith.cmpf oge, %908, %961 : f32
    %c32768_i32_272 = arith.constant 32768 : i32
    %963 = arith.ori %906, %c32768_i32_272 : i32
    %964 = arith.select %962, %963, %906 : i32
    %965 = arith.subf %908, %961 : f32
    %966 = arith.select %962, %965, %908 : f32
    %967 = vector.broadcast %920 : i32 to vector<16x128xi32>
    %968 = arith.cmpi eq, %938, %967 : vector<16x128xi32>
    %cst_273 = arith.constant 1.000000e+00 : f32
    %cst_274 = arith.constant 0.000000e+00 : f32
    %969 = vector.broadcast %cst_273 : f32 to vector<16x128xf32>
    %970 = vector.broadcast %cst_274 : f32 to vector<16x128xf32>
    %971 = arith.select %968, %969, %970 : vector<16x128xi1>, vector<16x128xf32>
    %972 = vector.shape_cast %971 : vector<16x128xf32> to vector<1x16x128xf32>
    %cst_275 = arith.constant dense<0.000000e+00> : vector<1xf32>
    %973 = vector.multi_reduction <add>, %972, %cst_275 [1, 2] : vector<1x16x128xf32> to vector<1xf32>
    %974 = vector.shape_cast %973 : vector<1xf32> to vector<1x1x1xf32>
    %975 = vector.extract %974[0, 0, 0] : f32 from vector<1x1x1xf32>
    %976 = arith.cmpf oge, %922, %975 : f32
    %c32768_i32_276 = arith.constant 32768 : i32
    %977 = arith.ori %920, %c32768_i32_276 : i32
    %978 = arith.select %976, %977, %920 : i32
    %979 = arith.subf %922, %975 : f32
    %980 = arith.select %976, %979, %922 : f32
    %981 = vector.broadcast %934 : i32 to vector<16x128xi32>
    %982 = arith.cmpi eq, %938, %981 : vector<16x128xi32>
    %cst_277 = arith.constant 1.000000e+00 : f32
    %cst_278 = arith.constant 0.000000e+00 : f32
    %983 = vector.broadcast %cst_277 : f32 to vector<16x128xf32>
    %984 = vector.broadcast %cst_278 : f32 to vector<16x128xf32>
    %985 = arith.select %982, %983, %984 : vector<16x128xi1>, vector<16x128xf32>
    %986 = vector.shape_cast %985 : vector<16x128xf32> to vector<1x16x128xf32>
    %cst_279 = arith.constant dense<0.000000e+00> : vector<1xf32>
    %987 = vector.multi_reduction <add>, %986, %cst_279 [1, 2] : vector<1x16x128xf32> to vector<1xf32>
    %988 = vector.shape_cast %987 : vector<1xf32> to vector<1x1x1xf32>
    %989 = vector.extract %988[0, 0, 0] : f32 from vector<1x1x1xf32>
    %990 = arith.cmpf oge, %936, %989 : f32
    %c32768_i32_280 = arith.constant 32768 : i32
    %991 = arith.ori %934, %c32768_i32_280 : i32
    %992 = arith.select %990, %991, %934 : i32
    %993 = arith.subf %936, %989 : f32
    %994 = arith.select %990, %993, %936 : f32
    %c-16384_i32 = arith.constant -16384 : i32
    %995 = vector.broadcast %c-16384_i32 : i32 to vector<16x128xi32>
    %996 = arith.andi %8, %995 : vector<16x128xi32>
    %997 = vector.broadcast %950 : i32 to vector<16x128xi32>
    %998 = arith.cmpi eq, %996, %997 : vector<16x128xi32>
    %cst_281 = arith.constant 1.000000e+00 : f32
    %cst_282 = arith.constant 0.000000e+00 : f32
    %999 = vector.broadcast %cst_281 : f32 to vector<16x128xf32>
    %1000 = vector.broadcast %cst_282 : f32 to vector<16x128xf32>
    %1001 = arith.select %998, %999, %1000 : vector<16x128xi1>, vector<16x128xf32>
    %1002 = vector.shape_cast %1001 : vector<16x128xf32> to vector<1x16x128xf32>
    %cst_283 = arith.constant dense<0.000000e+00> : vector<1xf32>
    %1003 = vector.multi_reduction <add>, %1002, %cst_283 [1, 2] : vector<1x16x128xf32> to vector<1xf32>
    %1004 = vector.shape_cast %1003 : vector<1xf32> to vector<1x1x1xf32>
    %1005 = vector.extract %1004[0, 0, 0] : f32 from vector<1x1x1xf32>
    %1006 = arith.cmpf oge, %952, %1005 : f32
    %c16384_i32 = arith.constant 16384 : i32
    %1007 = arith.ori %950, %c16384_i32 : i32
    %1008 = arith.select %1006, %1007, %950 : i32
    %1009 = arith.subf %952, %1005 : f32
    %1010 = arith.select %1006, %1009, %952 : f32
    %1011 = vector.broadcast %964 : i32 to vector<16x128xi32>
    %1012 = arith.cmpi eq, %996, %1011 : vector<16x128xi32>
    %cst_284 = arith.constant 1.000000e+00 : f32
    %cst_285 = arith.constant 0.000000e+00 : f32
    %1013 = vector.broadcast %cst_284 : f32 to vector<16x128xf32>
    %1014 = vector.broadcast %cst_285 : f32 to vector<16x128xf32>
    %1015 = arith.select %1012, %1013, %1014 : vector<16x128xi1>, vector<16x128xf32>
    %1016 = vector.shape_cast %1015 : vector<16x128xf32> to vector<1x16x128xf32>
    %cst_286 = arith.constant dense<0.000000e+00> : vector<1xf32>
    %1017 = vector.multi_reduction <add>, %1016, %cst_286 [1, 2] : vector<1x16x128xf32> to vector<1xf32>
    %1018 = vector.shape_cast %1017 : vector<1xf32> to vector<1x1x1xf32>
    %1019 = vector.extract %1018[0, 0, 0] : f32 from vector<1x1x1xf32>
    %1020 = arith.cmpf oge, %966, %1019 : f32
    %c16384_i32_287 = arith.constant 16384 : i32
    %1021 = arith.ori %964, %c16384_i32_287 : i32
    %1022 = arith.select %1020, %1021, %964 : i32
    %1023 = arith.subf %966, %1019 : f32
    %1024 = arith.select %1020, %1023, %966 : f32
    %1025 = vector.broadcast %978 : i32 to vector<16x128xi32>
    %1026 = arith.cmpi eq, %996, %1025 : vector<16x128xi32>
    %cst_288 = arith.constant 1.000000e+00 : f32
    %cst_289 = arith.constant 0.000000e+00 : f32
    %1027 = vector.broadcast %cst_288 : f32 to vector<16x128xf32>
    %1028 = vector.broadcast %cst_289 : f32 to vector<16x128xf32>
    %1029 = arith.select %1026, %1027, %1028 : vector<16x128xi1>, vector<16x128xf32>
    %1030 = vector.shape_cast %1029 : vector<16x128xf32> to vector<1x16x128xf32>
    %cst_290 = arith.constant dense<0.000000e+00> : vector<1xf32>
    %1031 = vector.multi_reduction <add>, %1030, %cst_290 [1, 2] : vector<1x16x128xf32> to vector<1xf32>
    %1032 = vector.shape_cast %1031 : vector<1xf32> to vector<1x1x1xf32>
    %1033 = vector.extract %1032[0, 0, 0] : f32 from vector<1x1x1xf32>
    %1034 = arith.cmpf oge, %980, %1033 : f32
    %c16384_i32_291 = arith.constant 16384 : i32
    %1035 = arith.ori %978, %c16384_i32_291 : i32
    %1036 = arith.select %1034, %1035, %978 : i32
    %1037 = arith.subf %980, %1033 : f32
    %1038 = arith.select %1034, %1037, %980 : f32
    %1039 = vector.broadcast %992 : i32 to vector<16x128xi32>
    %1040 = arith.cmpi eq, %996, %1039 : vector<16x128xi32>
    %cst_292 = arith.constant 1.000000e+00 : f32
    %cst_293 = arith.constant 0.000000e+00 : f32
    %1041 = vector.broadcast %cst_292 : f32 to vector<16x128xf32>
    %1042 = vector.broadcast %cst_293 : f32 to vector<16x128xf32>
    %1043 = arith.select %1040, %1041, %1042 : vector<16x128xi1>, vector<16x128xf32>
    %1044 = vector.shape_cast %1043 : vector<16x128xf32> to vector<1x16x128xf32>
    %cst_294 = arith.constant dense<0.000000e+00> : vector<1xf32>
    %1045 = vector.multi_reduction <add>, %1044, %cst_294 [1, 2] : vector<1x16x128xf32> to vector<1xf32>
    %1046 = vector.shape_cast %1045 : vector<1xf32> to vector<1x1x1xf32>
    %1047 = vector.extract %1046[0, 0, 0] : f32 from vector<1x1x1xf32>
    %1048 = arith.cmpf oge, %994, %1047 : f32
    %c16384_i32_295 = arith.constant 16384 : i32
    %1049 = arith.ori %992, %c16384_i32_295 : i32
    %1050 = arith.select %1048, %1049, %992 : i32
    %1051 = arith.subf %994, %1047 : f32
    %1052 = arith.select %1048, %1051, %994 : f32
    %c-8192_i32 = arith.constant -8192 : i32
    %1053 = vector.broadcast %c-8192_i32 : i32 to vector<16x128xi32>
    %1054 = arith.andi %8, %1053 : vector<16x128xi32>
    %1055 = vector.broadcast %1008 : i32 to vector<16x128xi32>
    %1056 = arith.cmpi eq, %1054, %1055 : vector<16x128xi32>
    %cst_296 = arith.constant 1.000000e+00 : f32
    %cst_297 = arith.constant 0.000000e+00 : f32
    %1057 = vector.broadcast %cst_296 : f32 to vector<16x128xf32>
    %1058 = vector.broadcast %cst_297 : f32 to vector<16x128xf32>
    %1059 = arith.select %1056, %1057, %1058 : vector<16x128xi1>, vector<16x128xf32>
    %1060 = vector.shape_cast %1059 : vector<16x128xf32> to vector<1x16x128xf32>
    %cst_298 = arith.constant dense<0.000000e+00> : vector<1xf32>
    %1061 = vector.multi_reduction <add>, %1060, %cst_298 [1, 2] : vector<1x16x128xf32> to vector<1xf32>
    %1062 = vector.shape_cast %1061 : vector<1xf32> to vector<1x1x1xf32>
    %1063 = vector.extract %1062[0, 0, 0] : f32 from vector<1x1x1xf32>
    %1064 = arith.cmpf oge, %1010, %1063 : f32
    %c8192_i32 = arith.constant 8192 : i32
    %1065 = arith.ori %1008, %c8192_i32 : i32
    %1066 = arith.select %1064, %1065, %1008 : i32
    %1067 = arith.subf %1010, %1063 : f32
    %1068 = arith.select %1064, %1067, %1010 : f32
    %1069 = vector.broadcast %1022 : i32 to vector<16x128xi32>
    %1070 = arith.cmpi eq, %1054, %1069 : vector<16x128xi32>
    %cst_299 = arith.constant 1.000000e+00 : f32
    %cst_300 = arith.constant 0.000000e+00 : f32
    %1071 = vector.broadcast %cst_299 : f32 to vector<16x128xf32>
    %1072 = vector.broadcast %cst_300 : f32 to vector<16x128xf32>
    %1073 = arith.select %1070, %1071, %1072 : vector<16x128xi1>, vector<16x128xf32>
    %1074 = vector.shape_cast %1073 : vector<16x128xf32> to vector<1x16x128xf32>
    %cst_301 = arith.constant dense<0.000000e+00> : vector<1xf32>
    %1075 = vector.multi_reduction <add>, %1074, %cst_301 [1, 2] : vector<1x16x128xf32> to vector<1xf32>
    %1076 = vector.shape_cast %1075 : vector<1xf32> to vector<1x1x1xf32>
    %1077 = vector.extract %1076[0, 0, 0] : f32 from vector<1x1x1xf32>
    %1078 = arith.cmpf oge, %1024, %1077 : f32
    %c8192_i32_302 = arith.constant 8192 : i32
    %1079 = arith.ori %1022, %c8192_i32_302 : i32
    %1080 = arith.select %1078, %1079, %1022 : i32
    %1081 = arith.subf %1024, %1077 : f32
    %1082 = arith.select %1078, %1081, %1024 : f32
    %1083 = vector.broadcast %1036 : i32 to vector<16x128xi32>
    %1084 = arith.cmpi eq, %1054, %1083 : vector<16x128xi32>
    %cst_303 = arith.constant 1.000000e+00 : f32
    %cst_304 = arith.constant 0.000000e+00 : f32
    %1085 = vector.broadcast %cst_303 : f32 to vector<16x128xf32>
    %1086 = vector.broadcast %cst_304 : f32 to vector<16x128xf32>
    %1087 = arith.select %1084, %1085, %1086 : vector<16x128xi1>, vector<16x128xf32>
    %1088 = vector.shape_cast %1087 : vector<16x128xf32> to vector<1x16x128xf32>
    %cst_305 = arith.constant dense<0.000000e+00> : vector<1xf32>
    %1089 = vector.multi_reduction <add>, %1088, %cst_305 [1, 2] : vector<1x16x128xf32> to vector<1xf32>
    %1090 = vector.shape_cast %1089 : vector<1xf32> to vector<1x1x1xf32>
    %1091 = vector.extract %1090[0, 0, 0] : f32 from vector<1x1x1xf32>
    %1092 = arith.cmpf oge, %1038, %1091 : f32
    %c8192_i32_306 = arith.constant 8192 : i32
    %1093 = arith.ori %1036, %c8192_i32_306 : i32
    %1094 = arith.select %1092, %1093, %1036 : i32
    %1095 = arith.subf %1038, %1091 : f32
    %1096 = arith.select %1092, %1095, %1038 : f32
    %1097 = vector.broadcast %1050 : i32 to vector<16x128xi32>
    %1098 = arith.cmpi eq, %1054, %1097 : vector<16x128xi32>
    %cst_307 = arith.constant 1.000000e+00 : f32
    %cst_308 = arith.constant 0.000000e+00 : f32
    %1099 = vector.broadcast %cst_307 : f32 to vector<16x128xf32>
    %1100 = vector.broadcast %cst_308 : f32 to vector<16x128xf32>
    %1101 = arith.select %1098, %1099, %1100 : vector<16x128xi1>, vector<16x128xf32>
    %1102 = vector.shape_cast %1101 : vector<16x128xf32> to vector<1x16x128xf32>
    %cst_309 = arith.constant dense<0.000000e+00> : vector<1xf32>
    %1103 = vector.multi_reduction <add>, %1102, %cst_309 [1, 2] : vector<1x16x128xf32> to vector<1xf32>
    %1104 = vector.shape_cast %1103 : vector<1xf32> to vector<1x1x1xf32>
    %1105 = vector.extract %1104[0, 0, 0] : f32 from vector<1x1x1xf32>
    %1106 = arith.cmpf oge, %1052, %1105 : f32
    %c8192_i32_310 = arith.constant 8192 : i32
    %1107 = arith.ori %1050, %c8192_i32_310 : i32
    %1108 = arith.select %1106, %1107, %1050 : i32
    %1109 = arith.subf %1052, %1105 : f32
    %1110 = arith.select %1106, %1109, %1052 : f32
    %c-4096_i32 = arith.constant -4096 : i32
    %1111 = vector.broadcast %c-4096_i32 : i32 to vector<16x128xi32>
    %1112 = arith.andi %8, %1111 : vector<16x128xi32>
    %1113 = vector.broadcast %1066 : i32 to vector<16x128xi32>
    %1114 = arith.cmpi eq, %1112, %1113 : vector<16x128xi32>
    %cst_311 = arith.constant 1.000000e+00 : f32
    %cst_312 = arith.constant 0.000000e+00 : f32
    %1115 = vector.broadcast %cst_311 : f32 to vector<16x128xf32>
    %1116 = vector.broadcast %cst_312 : f32 to vector<16x128xf32>
    %1117 = arith.select %1114, %1115, %1116 : vector<16x128xi1>, vector<16x128xf32>
    %1118 = vector.shape_cast %1117 : vector<16x128xf32> to vector<1x16x128xf32>
    %cst_313 = arith.constant dense<0.000000e+00> : vector<1xf32>
    %1119 = vector.multi_reduction <add>, %1118, %cst_313 [1, 2] : vector<1x16x128xf32> to vector<1xf32>
    %1120 = vector.shape_cast %1119 : vector<1xf32> to vector<1x1x1xf32>
    %1121 = vector.extract %1120[0, 0, 0] : f32 from vector<1x1x1xf32>
    %1122 = arith.cmpf oge, %1068, %1121 : f32
    %c4096_i32 = arith.constant 4096 : i32
    %1123 = arith.ori %1066, %c4096_i32 : i32
    %1124 = arith.select %1122, %1123, %1066 : i32
    %1125 = arith.subf %1068, %1121 : f32
    %1126 = arith.select %1122, %1125, %1068 : f32
    %1127 = vector.broadcast %1080 : i32 to vector<16x128xi32>
    %1128 = arith.cmpi eq, %1112, %1127 : vector<16x128xi32>
    %cst_314 = arith.constant 1.000000e+00 : f32
    %cst_315 = arith.constant 0.000000e+00 : f32
    %1129 = vector.broadcast %cst_314 : f32 to vector<16x128xf32>
    %1130 = vector.broadcast %cst_315 : f32 to vector<16x128xf32>
    %1131 = arith.select %1128, %1129, %1130 : vector<16x128xi1>, vector<16x128xf32>
    %1132 = vector.shape_cast %1131 : vector<16x128xf32> to vector<1x16x128xf32>
    %cst_316 = arith.constant dense<0.000000e+00> : vector<1xf32>
    %1133 = vector.multi_reduction <add>, %1132, %cst_316 [1, 2] : vector<1x16x128xf32> to vector<1xf32>
    %1134 = vector.shape_cast %1133 : vector<1xf32> to vector<1x1x1xf32>
    %1135 = vector.extract %1134[0, 0, 0] : f32 from vector<1x1x1xf32>
    %1136 = arith.cmpf oge, %1082, %1135 : f32
    %c4096_i32_317 = arith.constant 4096 : i32
    %1137 = arith.ori %1080, %c4096_i32_317 : i32
    %1138 = arith.select %1136, %1137, %1080 : i32
    %1139 = arith.subf %1082, %1135 : f32
    %1140 = arith.select %1136, %1139, %1082 : f32
    %1141 = vector.broadcast %1094 : i32 to vector<16x128xi32>
    %1142 = arith.cmpi eq, %1112, %1141 : vector<16x128xi32>
    %cst_318 = arith.constant 1.000000e+00 : f32
    %cst_319 = arith.constant 0.000000e+00 : f32
    %1143 = vector.broadcast %cst_318 : f32 to vector<16x128xf32>
    %1144 = vector.broadcast %cst_319 : f32 to vector<16x128xf32>
    %1145 = arith.select %1142, %1143, %1144 : vector<16x128xi1>, vector<16x128xf32>
    %1146 = vector.shape_cast %1145 : vector<16x128xf32> to vector<1x16x128xf32>
    %cst_320 = arith.constant dense<0.000000e+00> : vector<1xf32>
    %1147 = vector.multi_reduction <add>, %1146, %cst_320 [1, 2] : vector<1x16x128xf32> to vector<1xf32>
    %1148 = vector.shape_cast %1147 : vector<1xf32> to vector<1x1x1xf32>
    %1149 = vector.extract %1148[0, 0, 0] : f32 from vector<1x1x1xf32>
    %1150 = arith.cmpf oge, %1096, %1149 : f32
    %c4096_i32_321 = arith.constant 4096 : i32
    %1151 = arith.ori %1094, %c4096_i32_321 : i32
    %1152 = arith.select %1150, %1151, %1094 : i32
    %1153 = arith.subf %1096, %1149 : f32
    %1154 = arith.select %1150, %1153, %1096 : f32
    %1155 = vector.broadcast %1108 : i32 to vector<16x128xi32>
    %1156 = arith.cmpi eq, %1112, %1155 : vector<16x128xi32>
    %cst_322 = arith.constant 1.000000e+00 : f32
    %cst_323 = arith.constant 0.000000e+00 : f32
    %1157 = vector.broadcast %cst_322 : f32 to vector<16x128xf32>
    %1158 = vector.broadcast %cst_323 : f32 to vector<16x128xf32>
    %1159 = arith.select %1156, %1157, %1158 : vector<16x128xi1>, vector<16x128xf32>
    %1160 = vector.shape_cast %1159 : vector<16x128xf32> to vector<1x16x128xf32>
    %cst_324 = arith.constant dense<0.000000e+00> : vector<1xf32>
    %1161 = vector.multi_reduction <add>, %1160, %cst_324 [1, 2] : vector<1x16x128xf32> to vector<1xf32>
    %1162 = vector.shape_cast %1161 : vector<1xf32> to vector<1x1x1xf32>
    %1163 = vector.extract %1162[0, 0, 0] : f32 from vector<1x1x1xf32>
    %1164 = arith.cmpf oge, %1110, %1163 : f32
    %c4096_i32_325 = arith.constant 4096 : i32
    %1165 = arith.ori %1108, %c4096_i32_325 : i32
    %1166 = arith.select %1164, %1165, %1108 : i32
    %1167 = arith.subf %1110, %1163 : f32
    %1168 = arith.select %1164, %1167, %1110 : f32
    %c-2048_i32 = arith.constant -2048 : i32
    %1169 = vector.broadcast %c-2048_i32 : i32 to vector<16x128xi32>
    %1170 = arith.andi %8, %1169 : vector<16x128xi32>
    %1171 = vector.broadcast %1124 : i32 to vector<16x128xi32>
    %1172 = arith.cmpi eq, %1170, %1171 : vector<16x128xi32>
    %cst_326 = arith.constant 1.000000e+00 : f32
    %cst_327 = arith.constant 0.000000e+00 : f32
    %1173 = vector.broadcast %cst_326 : f32 to vector<16x128xf32>
    %1174 = vector.broadcast %cst_327 : f32 to vector<16x128xf32>
    %1175 = arith.select %1172, %1173, %1174 : vector<16x128xi1>, vector<16x128xf32>
    %1176 = vector.shape_cast %1175 : vector<16x128xf32> to vector<1x16x128xf32>
    %cst_328 = arith.constant dense<0.000000e+00> : vector<1xf32>
    %1177 = vector.multi_reduction <add>, %1176, %cst_328 [1, 2] : vector<1x16x128xf32> to vector<1xf32>
    %1178 = vector.shape_cast %1177 : vector<1xf32> to vector<1x1x1xf32>
    %1179 = vector.extract %1178[0, 0, 0] : f32 from vector<1x1x1xf32>
    %1180 = arith.cmpf oge, %1126, %1179 : f32
    %c2048_i32 = arith.constant 2048 : i32
    %1181 = arith.ori %1124, %c2048_i32 : i32
    %1182 = arith.select %1180, %1181, %1124 : i32
    %1183 = arith.subf %1126, %1179 : f32
    %1184 = arith.select %1180, %1183, %1126 : f32
    %1185 = vector.broadcast %1138 : i32 to vector<16x128xi32>
    %1186 = arith.cmpi eq, %1170, %1185 : vector<16x128xi32>
    %cst_329 = arith.constant 1.000000e+00 : f32
    %cst_330 = arith.constant 0.000000e+00 : f32
    %1187 = vector.broadcast %cst_329 : f32 to vector<16x128xf32>
    %1188 = vector.broadcast %cst_330 : f32 to vector<16x128xf32>
    %1189 = arith.select %1186, %1187, %1188 : vector<16x128xi1>, vector<16x128xf32>
    %1190 = vector.shape_cast %1189 : vector<16x128xf32> to vector<1x16x128xf32>
    %cst_331 = arith.constant dense<0.000000e+00> : vector<1xf32>
    %1191 = vector.multi_reduction <add>, %1190, %cst_331 [1, 2] : vector<1x16x128xf32> to vector<1xf32>
    %1192 = vector.shape_cast %1191 : vector<1xf32> to vector<1x1x1xf32>
    %1193 = vector.extract %1192[0, 0, 0] : f32 from vector<1x1x1xf32>
    %1194 = arith.cmpf oge, %1140, %1193 : f32
    %c2048_i32_332 = arith.constant 2048 : i32
    %1195 = arith.ori %1138, %c2048_i32_332 : i32
    %1196 = arith.select %1194, %1195, %1138 : i32
    %1197 = arith.subf %1140, %1193 : f32
    %1198 = arith.select %1194, %1197, %1140 : f32
    %1199 = vector.broadcast %1152 : i32 to vector<16x128xi32>
    %1200 = arith.cmpi eq, %1170, %1199 : vector<16x128xi32>
    %cst_333 = arith.constant 1.000000e+00 : f32
    %cst_334 = arith.constant 0.000000e+00 : f32
    %1201 = vector.broadcast %cst_333 : f32 to vector<16x128xf32>
    %1202 = vector.broadcast %cst_334 : f32 to vector<16x128xf32>
    %1203 = arith.select %1200, %1201, %1202 : vector<16x128xi1>, vector<16x128xf32>
    %1204 = vector.shape_cast %1203 : vector<16x128xf32> to vector<1x16x128xf32>
    %cst_335 = arith.constant dense<0.000000e+00> : vector<1xf32>
    %1205 = vector.multi_reduction <add>, %1204, %cst_335 [1, 2] : vector<1x16x128xf32> to vector<1xf32>
    %1206 = vector.shape_cast %1205 : vector<1xf32> to vector<1x1x1xf32>
    %1207 = vector.extract %1206[0, 0, 0] : f32 from vector<1x1x1xf32>
    %1208 = arith.cmpf oge, %1154, %1207 : f32
    %c2048_i32_336 = arith.constant 2048 : i32
    %1209 = arith.ori %1152, %c2048_i32_336 : i32
    %1210 = arith.select %1208, %1209, %1152 : i32
    %1211 = arith.subf %1154, %1207 : f32
    %1212 = arith.select %1208, %1211, %1154 : f32
    %1213 = vector.broadcast %1166 : i32 to vector<16x128xi32>
    %1214 = arith.cmpi eq, %1170, %1213 : vector<16x128xi32>
    %cst_337 = arith.constant 1.000000e+00 : f32
    %cst_338 = arith.constant 0.000000e+00 : f32
    %1215 = vector.broadcast %cst_337 : f32 to vector<16x128xf32>
    %1216 = vector.broadcast %cst_338 : f32 to vector<16x128xf32>
    %1217 = arith.select %1214, %1215, %1216 : vector<16x128xi1>, vector<16x128xf32>
    %1218 = vector.shape_cast %1217 : vector<16x128xf32> to vector<1x16x128xf32>
    %cst_339 = arith.constant dense<0.000000e+00> : vector<1xf32>
    %1219 = vector.multi_reduction <add>, %1218, %cst_339 [1, 2] : vector<1x16x128xf32> to vector<1xf32>
    %1220 = vector.shape_cast %1219 : vector<1xf32> to vector<1x1x1xf32>
    %1221 = vector.extract %1220[0, 0, 0] : f32 from vector<1x1x1xf32>
    %1222 = arith.cmpf oge, %1168, %1221 : f32
    %c2048_i32_340 = arith.constant 2048 : i32
    %1223 = arith.ori %1166, %c2048_i32_340 : i32
    %1224 = arith.select %1222, %1223, %1166 : i32
    %1225 = arith.subf %1168, %1221 : f32
    %1226 = arith.select %1222, %1225, %1168 : f32
    %c-1024_i32 = arith.constant -1024 : i32
    %1227 = vector.broadcast %c-1024_i32 : i32 to vector<16x128xi32>
    %1228 = arith.andi %8, %1227 : vector<16x128xi32>
    %1229 = vector.broadcast %1182 : i32 to vector<16x128xi32>
    %1230 = arith.cmpi eq, %1228, %1229 : vector<16x128xi32>
    %cst_341 = arith.constant 1.000000e+00 : f32
    %cst_342 = arith.constant 0.000000e+00 : f32
    %1231 = vector.broadcast %cst_341 : f32 to vector<16x128xf32>
    %1232 = vector.broadcast %cst_342 : f32 to vector<16x128xf32>
    %1233 = arith.select %1230, %1231, %1232 : vector<16x128xi1>, vector<16x128xf32>
    %1234 = vector.shape_cast %1233 : vector<16x128xf32> to vector<1x16x128xf32>
    %cst_343 = arith.constant dense<0.000000e+00> : vector<1xf32>
    %1235 = vector.multi_reduction <add>, %1234, %cst_343 [1, 2] : vector<1x16x128xf32> to vector<1xf32>
    %1236 = vector.shape_cast %1235 : vector<1xf32> to vector<1x1x1xf32>
    %1237 = vector.extract %1236[0, 0, 0] : f32 from vector<1x1x1xf32>
    %1238 = arith.cmpf oge, %1184, %1237 : f32
    %c1024_i32 = arith.constant 1024 : i32
    %1239 = arith.ori %1182, %c1024_i32 : i32
    %1240 = arith.select %1238, %1239, %1182 : i32
    %1241 = arith.subf %1184, %1237 : f32
    %1242 = arith.select %1238, %1241, %1184 : f32
    %1243 = vector.broadcast %1196 : i32 to vector<16x128xi32>
    %1244 = arith.cmpi eq, %1228, %1243 : vector<16x128xi32>
    %cst_344 = arith.constant 1.000000e+00 : f32
    %cst_345 = arith.constant 0.000000e+00 : f32
    %1245 = vector.broadcast %cst_344 : f32 to vector<16x128xf32>
    %1246 = vector.broadcast %cst_345 : f32 to vector<16x128xf32>
    %1247 = arith.select %1244, %1245, %1246 : vector<16x128xi1>, vector<16x128xf32>
    %1248 = vector.shape_cast %1247 : vector<16x128xf32> to vector<1x16x128xf32>
    %cst_346 = arith.constant dense<0.000000e+00> : vector<1xf32>
    %1249 = vector.multi_reduction <add>, %1248, %cst_346 [1, 2] : vector<1x16x128xf32> to vector<1xf32>
    %1250 = vector.shape_cast %1249 : vector<1xf32> to vector<1x1x1xf32>
    %1251 = vector.extract %1250[0, 0, 0] : f32 from vector<1x1x1xf32>
    %1252 = arith.cmpf oge, %1198, %1251 : f32
    %c1024_i32_347 = arith.constant 1024 : i32
    %1253 = arith.ori %1196, %c1024_i32_347 : i32
    %1254 = arith.select %1252, %1253, %1196 : i32
    %1255 = arith.subf %1198, %1251 : f32
    %1256 = arith.select %1252, %1255, %1198 : f32
    %1257 = vector.broadcast %1210 : i32 to vector<16x128xi32>
    %1258 = arith.cmpi eq, %1228, %1257 : vector<16x128xi32>
    %cst_348 = arith.constant 1.000000e+00 : f32
    %cst_349 = arith.constant 0.000000e+00 : f32
    %1259 = vector.broadcast %cst_348 : f32 to vector<16x128xf32>
    %1260 = vector.broadcast %cst_349 : f32 to vector<16x128xf32>
    %1261 = arith.select %1258, %1259, %1260 : vector<16x128xi1>, vector<16x128xf32>
    %1262 = vector.shape_cast %1261 : vector<16x128xf32> to vector<1x16x128xf32>
    %cst_350 = arith.constant dense<0.000000e+00> : vector<1xf32>
    %1263 = vector.multi_reduction <add>, %1262, %cst_350 [1, 2] : vector<1x16x128xf32> to vector<1xf32>
    %1264 = vector.shape_cast %1263 : vector<1xf32> to vector<1x1x1xf32>
    %1265 = vector.extract %1264[0, 0, 0] : f32 from vector<1x1x1xf32>
    %1266 = arith.cmpf oge, %1212, %1265 : f32
    %c1024_i32_351 = arith.constant 1024 : i32
    %1267 = arith.ori %1210, %c1024_i32_351 : i32
    %1268 = arith.select %1266, %1267, %1210 : i32
    %1269 = arith.subf %1212, %1265 : f32
    %1270 = arith.select %1266, %1269, %1212 : f32
    %1271 = vector.broadcast %1224 : i32 to vector<16x128xi32>
    %1272 = arith.cmpi eq, %1228, %1271 : vector<16x128xi32>
    %cst_352 = arith.constant 1.000000e+00 : f32
    %cst_353 = arith.constant 0.000000e+00 : f32
    %1273 = vector.broadcast %cst_352 : f32 to vector<16x128xf32>
    %1274 = vector.broadcast %cst_353 : f32 to vector<16x128xf32>
    %1275 = arith.select %1272, %1273, %1274 : vector<16x128xi1>, vector<16x128xf32>
    %1276 = vector.shape_cast %1275 : vector<16x128xf32> to vector<1x16x128xf32>
    %cst_354 = arith.constant dense<0.000000e+00> : vector<1xf32>
    %1277 = vector.multi_reduction <add>, %1276, %cst_354 [1, 2] : vector<1x16x128xf32> to vector<1xf32>
    %1278 = vector.shape_cast %1277 : vector<1xf32> to vector<1x1x1xf32>
    %1279 = vector.extract %1278[0, 0, 0] : f32 from vector<1x1x1xf32>
    %1280 = arith.cmpf oge, %1226, %1279 : f32
    %c1024_i32_355 = arith.constant 1024 : i32
    %1281 = arith.ori %1224, %c1024_i32_355 : i32
    %1282 = arith.select %1280, %1281, %1224 : i32
    %1283 = arith.subf %1226, %1279 : f32
    %1284 = arith.select %1280, %1283, %1226 : f32
    %c-512_i32 = arith.constant -512 : i32
    %1285 = vector.broadcast %c-512_i32 : i32 to vector<16x128xi32>
    %1286 = arith.andi %8, %1285 : vector<16x128xi32>
    %1287 = vector.broadcast %1240 : i32 to vector<16x128xi32>
    %1288 = arith.cmpi eq, %1286, %1287 : vector<16x128xi32>
    %cst_356 = arith.constant 1.000000e+00 : f32
    %cst_357 = arith.constant 0.000000e+00 : f32
    %1289 = vector.broadcast %cst_356 : f32 to vector<16x128xf32>
    %1290 = vector.broadcast %cst_357 : f32 to vector<16x128xf32>
    %1291 = arith.select %1288, %1289, %1290 : vector<16x128xi1>, vector<16x128xf32>
    %1292 = vector.shape_cast %1291 : vector<16x128xf32> to vector<1x16x128xf32>
    %cst_358 = arith.constant dense<0.000000e+00> : vector<1xf32>
    %1293 = vector.multi_reduction <add>, %1292, %cst_358 [1, 2] : vector<1x16x128xf32> to vector<1xf32>
    %1294 = vector.shape_cast %1293 : vector<1xf32> to vector<1x1x1xf32>
    %1295 = vector.extract %1294[0, 0, 0] : f32 from vector<1x1x1xf32>
    %1296 = arith.cmpf oge, %1242, %1295 : f32
    %c512_i32 = arith.constant 512 : i32
    %1297 = arith.ori %1240, %c512_i32 : i32
    %1298 = arith.select %1296, %1297, %1240 : i32
    %1299 = arith.subf %1242, %1295 : f32
    %1300 = arith.select %1296, %1299, %1242 : f32
    %1301 = vector.broadcast %1254 : i32 to vector<16x128xi32>
    %1302 = arith.cmpi eq, %1286, %1301 : vector<16x128xi32>
    %cst_359 = arith.constant 1.000000e+00 : f32
    %cst_360 = arith.constant 0.000000e+00 : f32
    %1303 = vector.broadcast %cst_359 : f32 to vector<16x128xf32>
    %1304 = vector.broadcast %cst_360 : f32 to vector<16x128xf32>
    %1305 = arith.select %1302, %1303, %1304 : vector<16x128xi1>, vector<16x128xf32>
    %1306 = vector.shape_cast %1305 : vector<16x128xf32> to vector<1x16x128xf32>
    %cst_361 = arith.constant dense<0.000000e+00> : vector<1xf32>
    %1307 = vector.multi_reduction <add>, %1306, %cst_361 [1, 2] : vector<1x16x128xf32> to vector<1xf32>
    %1308 = vector.shape_cast %1307 : vector<1xf32> to vector<1x1x1xf32>
    %1309 = vector.extract %1308[0, 0, 0] : f32 from vector<1x1x1xf32>
    %1310 = arith.cmpf oge, %1256, %1309 : f32
    %c512_i32_362 = arith.constant 512 : i32
    %1311 = arith.ori %1254, %c512_i32_362 : i32
    %1312 = arith.select %1310, %1311, %1254 : i32
    %1313 = arith.subf %1256, %1309 : f32
    %1314 = arith.select %1310, %1313, %1256 : f32
    %1315 = vector.broadcast %1268 : i32 to vector<16x128xi32>
    %1316 = arith.cmpi eq, %1286, %1315 : vector<16x128xi32>
    %cst_363 = arith.constant 1.000000e+00 : f32
    %cst_364 = arith.constant 0.000000e+00 : f32
    %1317 = vector.broadcast %cst_363 : f32 to vector<16x128xf32>
    %1318 = vector.broadcast %cst_364 : f32 to vector<16x128xf32>
    %1319 = arith.select %1316, %1317, %1318 : vector<16x128xi1>, vector<16x128xf32>
    %1320 = vector.shape_cast %1319 : vector<16x128xf32> to vector<1x16x128xf32>
    %cst_365 = arith.constant dense<0.000000e+00> : vector<1xf32>
    %1321 = vector.multi_reduction <add>, %1320, %cst_365 [1, 2] : vector<1x16x128xf32> to vector<1xf32>
    %1322 = vector.shape_cast %1321 : vector<1xf32> to vector<1x1x1xf32>
    %1323 = vector.extract %1322[0, 0, 0] : f32 from vector<1x1x1xf32>
    %1324 = arith.cmpf oge, %1270, %1323 : f32
    %c512_i32_366 = arith.constant 512 : i32
    %1325 = arith.ori %1268, %c512_i32_366 : i32
    %1326 = arith.select %1324, %1325, %1268 : i32
    %1327 = arith.subf %1270, %1323 : f32
    %1328 = arith.select %1324, %1327, %1270 : f32
    %1329 = vector.broadcast %1282 : i32 to vector<16x128xi32>
    %1330 = arith.cmpi eq, %1286, %1329 : vector<16x128xi32>
    %cst_367 = arith.constant 1.000000e+00 : f32
    %cst_368 = arith.constant 0.000000e+00 : f32
    %1331 = vector.broadcast %cst_367 : f32 to vector<16x128xf32>
    %1332 = vector.broadcast %cst_368 : f32 to vector<16x128xf32>
    %1333 = arith.select %1330, %1331, %1332 : vector<16x128xi1>, vector<16x128xf32>
    %1334 = vector.shape_cast %1333 : vector<16x128xf32> to vector<1x16x128xf32>
    %cst_369 = arith.constant dense<0.000000e+00> : vector<1xf32>
    %1335 = vector.multi_reduction <add>, %1334, %cst_369 [1, 2] : vector<1x16x128xf32> to vector<1xf32>
    %1336 = vector.shape_cast %1335 : vector<1xf32> to vector<1x1x1xf32>
    %1337 = vector.extract %1336[0, 0, 0] : f32 from vector<1x1x1xf32>
    %1338 = arith.cmpf oge, %1284, %1337 : f32
    %c512_i32_370 = arith.constant 512 : i32
    %1339 = arith.ori %1282, %c512_i32_370 : i32
    %1340 = arith.select %1338, %1339, %1282 : i32
    %1341 = arith.subf %1284, %1337 : f32
    %1342 = arith.select %1338, %1341, %1284 : f32
    %c-256_i32 = arith.constant -256 : i32
    %1343 = vector.broadcast %c-256_i32 : i32 to vector<16x128xi32>
    %1344 = arith.andi %8, %1343 : vector<16x128xi32>
    %1345 = vector.broadcast %1298 : i32 to vector<16x128xi32>
    %1346 = arith.cmpi eq, %1344, %1345 : vector<16x128xi32>
    %cst_371 = arith.constant 1.000000e+00 : f32
    %cst_372 = arith.constant 0.000000e+00 : f32
    %1347 = vector.broadcast %cst_371 : f32 to vector<16x128xf32>
    %1348 = vector.broadcast %cst_372 : f32 to vector<16x128xf32>
    %1349 = arith.select %1346, %1347, %1348 : vector<16x128xi1>, vector<16x128xf32>
    %1350 = vector.shape_cast %1349 : vector<16x128xf32> to vector<1x16x128xf32>
    %cst_373 = arith.constant dense<0.000000e+00> : vector<1xf32>
    %1351 = vector.multi_reduction <add>, %1350, %cst_373 [1, 2] : vector<1x16x128xf32> to vector<1xf32>
    %1352 = vector.shape_cast %1351 : vector<1xf32> to vector<1x1x1xf32>
    %1353 = vector.extract %1352[0, 0, 0] : f32 from vector<1x1x1xf32>
    %1354 = arith.cmpf oge, %1300, %1353 : f32
    %c256_i32 = arith.constant 256 : i32
    %1355 = arith.ori %1298, %c256_i32 : i32
    %1356 = arith.select %1354, %1355, %1298 : i32
    %1357 = arith.subf %1300, %1353 : f32
    %1358 = arith.select %1354, %1357, %1300 : f32
    %1359 = vector.broadcast %1312 : i32 to vector<16x128xi32>
    %1360 = arith.cmpi eq, %1344, %1359 : vector<16x128xi32>
    %cst_374 = arith.constant 1.000000e+00 : f32
    %cst_375 = arith.constant 0.000000e+00 : f32
    %1361 = vector.broadcast %cst_374 : f32 to vector<16x128xf32>
    %1362 = vector.broadcast %cst_375 : f32 to vector<16x128xf32>
    %1363 = arith.select %1360, %1361, %1362 : vector<16x128xi1>, vector<16x128xf32>
    %1364 = vector.shape_cast %1363 : vector<16x128xf32> to vector<1x16x128xf32>
    %cst_376 = arith.constant dense<0.000000e+00> : vector<1xf32>
    %1365 = vector.multi_reduction <add>, %1364, %cst_376 [1, 2] : vector<1x16x128xf32> to vector<1xf32>
    %1366 = vector.shape_cast %1365 : vector<1xf32> to vector<1x1x1xf32>
    %1367 = vector.extract %1366[0, 0, 0] : f32 from vector<1x1x1xf32>
    %1368 = arith.cmpf oge, %1314, %1367 : f32
    %c256_i32_377 = arith.constant 256 : i32
    %1369 = arith.ori %1312, %c256_i32_377 : i32
    %1370 = arith.select %1368, %1369, %1312 : i32
    %1371 = arith.subf %1314, %1367 : f32
    %1372 = arith.select %1368, %1371, %1314 : f32
    %1373 = vector.broadcast %1326 : i32 to vector<16x128xi32>
    %1374 = arith.cmpi eq, %1344, %1373 : vector<16x128xi32>
    %cst_378 = arith.constant 1.000000e+00 : f32
    %cst_379 = arith.constant 0.000000e+00 : f32
    %1375 = vector.broadcast %cst_378 : f32 to vector<16x128xf32>
    %1376 = vector.broadcast %cst_379 : f32 to vector<16x128xf32>
    %1377 = arith.select %1374, %1375, %1376 : vector<16x128xi1>, vector<16x128xf32>
    %1378 = vector.shape_cast %1377 : vector<16x128xf32> to vector<1x16x128xf32>
    %cst_380 = arith.constant dense<0.000000e+00> : vector<1xf32>
    %1379 = vector.multi_reduction <add>, %1378, %cst_380 [1, 2] : vector<1x16x128xf32> to vector<1xf32>
    %1380 = vector.shape_cast %1379 : vector<1xf32> to vector<1x1x1xf32>
    %1381 = vector.extract %1380[0, 0, 0] : f32 from vector<1x1x1xf32>
    %1382 = arith.cmpf oge, %1328, %1381 : f32
    %c256_i32_381 = arith.constant 256 : i32
    %1383 = arith.ori %1326, %c256_i32_381 : i32
    %1384 = arith.select %1382, %1383, %1326 : i32
    %1385 = arith.subf %1328, %1381 : f32
    %1386 = arith.select %1382, %1385, %1328 : f32
    %1387 = vector.broadcast %1340 : i32 to vector<16x128xi32>
    %1388 = arith.cmpi eq, %1344, %1387 : vector<16x128xi32>
    %cst_382 = arith.constant 1.000000e+00 : f32
    %cst_383 = arith.constant 0.000000e+00 : f32
    %1389 = vector.broadcast %cst_382 : f32 to vector<16x128xf32>
    %1390 = vector.broadcast %cst_383 : f32 to vector<16x128xf32>
    %1391 = arith.select %1388, %1389, %1390 : vector<16x128xi1>, vector<16x128xf32>
    %1392 = vector.shape_cast %1391 : vector<16x128xf32> to vector<1x16x128xf32>
    %cst_384 = arith.constant dense<0.000000e+00> : vector<1xf32>
    %1393 = vector.multi_reduction <add>, %1392, %cst_384 [1, 2] : vector<1x16x128xf32> to vector<1xf32>
    %1394 = vector.shape_cast %1393 : vector<1xf32> to vector<1x1x1xf32>
    %1395 = vector.extract %1394[0, 0, 0] : f32 from vector<1x1x1xf32>
    %1396 = arith.cmpf oge, %1342, %1395 : f32
    %c256_i32_385 = arith.constant 256 : i32
    %1397 = arith.ori %1340, %c256_i32_385 : i32
    %1398 = arith.select %1396, %1397, %1340 : i32
    %1399 = arith.subf %1342, %1395 : f32
    %1400 = arith.select %1396, %1399, %1342 : f32
    %c-128_i32 = arith.constant -128 : i32
    %1401 = vector.broadcast %c-128_i32 : i32 to vector<16x128xi32>
    %1402 = arith.andi %8, %1401 : vector<16x128xi32>
    %1403 = vector.broadcast %1356 : i32 to vector<16x128xi32>
    %1404 = arith.cmpi eq, %1402, %1403 : vector<16x128xi32>
    %cst_386 = arith.constant 1.000000e+00 : f32
    %cst_387 = arith.constant 0.000000e+00 : f32
    %1405 = vector.broadcast %cst_386 : f32 to vector<16x128xf32>
    %1406 = vector.broadcast %cst_387 : f32 to vector<16x128xf32>
    %1407 = arith.select %1404, %1405, %1406 : vector<16x128xi1>, vector<16x128xf32>
    %1408 = vector.shape_cast %1407 : vector<16x128xf32> to vector<1x16x128xf32>
    %cst_388 = arith.constant dense<0.000000e+00> : vector<1xf32>
    %1409 = vector.multi_reduction <add>, %1408, %cst_388 [1, 2] : vector<1x16x128xf32> to vector<1xf32>
    %1410 = vector.shape_cast %1409 : vector<1xf32> to vector<1x1x1xf32>
    %1411 = vector.extract %1410[0, 0, 0] : f32 from vector<1x1x1xf32>
    %1412 = arith.cmpf oge, %1358, %1411 : f32
    %c128_i32 = arith.constant 128 : i32
    %1413 = arith.ori %1356, %c128_i32 : i32
    %1414 = arith.select %1412, %1413, %1356 : i32
    %1415 = arith.subf %1358, %1411 : f32
    %1416 = arith.select %1412, %1415, %1358 : f32
    %1417 = vector.broadcast %1370 : i32 to vector<16x128xi32>
    %1418 = arith.cmpi eq, %1402, %1417 : vector<16x128xi32>
    %cst_389 = arith.constant 1.000000e+00 : f32
    %cst_390 = arith.constant 0.000000e+00 : f32
    %1419 = vector.broadcast %cst_389 : f32 to vector<16x128xf32>
    %1420 = vector.broadcast %cst_390 : f32 to vector<16x128xf32>
    %1421 = arith.select %1418, %1419, %1420 : vector<16x128xi1>, vector<16x128xf32>
    %1422 = vector.shape_cast %1421 : vector<16x128xf32> to vector<1x16x128xf32>
    %cst_391 = arith.constant dense<0.000000e+00> : vector<1xf32>
    %1423 = vector.multi_reduction <add>, %1422, %cst_391 [1, 2] : vector<1x16x128xf32> to vector<1xf32>
    %1424 = vector.shape_cast %1423 : vector<1xf32> to vector<1x1x1xf32>
    %1425 = vector.extract %1424[0, 0, 0] : f32 from vector<1x1x1xf32>
    %1426 = arith.cmpf oge, %1372, %1425 : f32
    %c128_i32_392 = arith.constant 128 : i32
    %1427 = arith.ori %1370, %c128_i32_392 : i32
    %1428 = arith.select %1426, %1427, %1370 : i32
    %1429 = arith.subf %1372, %1425 : f32
    %1430 = arith.select %1426, %1429, %1372 : f32
    %1431 = vector.broadcast %1384 : i32 to vector<16x128xi32>
    %1432 = arith.cmpi eq, %1402, %1431 : vector<16x128xi32>
    %cst_393 = arith.constant 1.000000e+00 : f32
    %cst_394 = arith.constant 0.000000e+00 : f32
    %1433 = vector.broadcast %cst_393 : f32 to vector<16x128xf32>
    %1434 = vector.broadcast %cst_394 : f32 to vector<16x128xf32>
    %1435 = arith.select %1432, %1433, %1434 : vector<16x128xi1>, vector<16x128xf32>
    %1436 = vector.shape_cast %1435 : vector<16x128xf32> to vector<1x16x128xf32>
    %cst_395 = arith.constant dense<0.000000e+00> : vector<1xf32>
    %1437 = vector.multi_reduction <add>, %1436, %cst_395 [1, 2] : vector<1x16x128xf32> to vector<1xf32>
    %1438 = vector.shape_cast %1437 : vector<1xf32> to vector<1x1x1xf32>
    %1439 = vector.extract %1438[0, 0, 0] : f32 from vector<1x1x1xf32>
    %1440 = arith.cmpf oge, %1386, %1439 : f32
    %c128_i32_396 = arith.constant 128 : i32
    %1441 = arith.ori %1384, %c128_i32_396 : i32
    %1442 = arith.select %1440, %1441, %1384 : i32
    %1443 = arith.subf %1386, %1439 : f32
    %1444 = arith.select %1440, %1443, %1386 : f32
    %1445 = vector.broadcast %1398 : i32 to vector<16x128xi32>
    %1446 = arith.cmpi eq, %1402, %1445 : vector<16x128xi32>
    %cst_397 = arith.constant 1.000000e+00 : f32
    %cst_398 = arith.constant 0.000000e+00 : f32
    %1447 = vector.broadcast %cst_397 : f32 to vector<16x128xf32>
    %1448 = vector.broadcast %cst_398 : f32 to vector<16x128xf32>
    %1449 = arith.select %1446, %1447, %1448 : vector<16x128xi1>, vector<16x128xf32>
    %1450 = vector.shape_cast %1449 : vector<16x128xf32> to vector<1x16x128xf32>
    %cst_399 = arith.constant dense<0.000000e+00> : vector<1xf32>
    %1451 = vector.multi_reduction <add>, %1450, %cst_399 [1, 2] : vector<1x16x128xf32> to vector<1xf32>
    %1452 = vector.shape_cast %1451 : vector<1xf32> to vector<1x1x1xf32>
    %1453 = vector.extract %1452[0, 0, 0] : f32 from vector<1x1x1xf32>
    %1454 = arith.cmpf oge, %1400, %1453 : f32
    %c128_i32_400 = arith.constant 128 : i32
    %1455 = arith.ori %1398, %c128_i32_400 : i32
    %1456 = arith.select %1454, %1455, %1398 : i32
    %1457 = arith.subf %1400, %1453 : f32
    %1458 = arith.select %1454, %1457, %1400 : f32
    %c-64_i32 = arith.constant -64 : i32
    %1459 = vector.broadcast %c-64_i32 : i32 to vector<16x128xi32>
    %1460 = arith.andi %8, %1459 : vector<16x128xi32>
    %1461 = vector.broadcast %1414 : i32 to vector<16x128xi32>
    %1462 = arith.cmpi eq, %1460, %1461 : vector<16x128xi32>
    %cst_401 = arith.constant 1.000000e+00 : f32
    %cst_402 = arith.constant 0.000000e+00 : f32
    %1463 = vector.broadcast %cst_401 : f32 to vector<16x128xf32>
    %1464 = vector.broadcast %cst_402 : f32 to vector<16x128xf32>
    %1465 = arith.select %1462, %1463, %1464 : vector<16x128xi1>, vector<16x128xf32>
    %1466 = vector.shape_cast %1465 : vector<16x128xf32> to vector<1x16x128xf32>
    %cst_403 = arith.constant dense<0.000000e+00> : vector<1xf32>
    %1467 = vector.multi_reduction <add>, %1466, %cst_403 [1, 2] : vector<1x16x128xf32> to vector<1xf32>
    %1468 = vector.shape_cast %1467 : vector<1xf32> to vector<1x1x1xf32>
    %1469 = vector.extract %1468[0, 0, 0] : f32 from vector<1x1x1xf32>
    %1470 = arith.cmpf oge, %1416, %1469 : f32
    %c64_i32 = arith.constant 64 : i32
    %1471 = arith.ori %1414, %c64_i32 : i32
    %1472 = arith.select %1470, %1471, %1414 : i32
    %1473 = arith.subf %1416, %1469 : f32
    %1474 = arith.select %1470, %1473, %1416 : f32
    %1475 = vector.broadcast %1428 : i32 to vector<16x128xi32>
    %1476 = arith.cmpi eq, %1460, %1475 : vector<16x128xi32>
    %cst_404 = arith.constant 1.000000e+00 : f32
    %cst_405 = arith.constant 0.000000e+00 : f32
    %1477 = vector.broadcast %cst_404 : f32 to vector<16x128xf32>
    %1478 = vector.broadcast %cst_405 : f32 to vector<16x128xf32>
    %1479 = arith.select %1476, %1477, %1478 : vector<16x128xi1>, vector<16x128xf32>
    %1480 = vector.shape_cast %1479 : vector<16x128xf32> to vector<1x16x128xf32>
    %cst_406 = arith.constant dense<0.000000e+00> : vector<1xf32>
    %1481 = vector.multi_reduction <add>, %1480, %cst_406 [1, 2] : vector<1x16x128xf32> to vector<1xf32>
    %1482 = vector.shape_cast %1481 : vector<1xf32> to vector<1x1x1xf32>
    %1483 = vector.extract %1482[0, 0, 0] : f32 from vector<1x1x1xf32>
    %1484 = arith.cmpf oge, %1430, %1483 : f32
    %c64_i32_407 = arith.constant 64 : i32
    %1485 = arith.ori %1428, %c64_i32_407 : i32
    %1486 = arith.select %1484, %1485, %1428 : i32
    %1487 = arith.subf %1430, %1483 : f32
    %1488 = arith.select %1484, %1487, %1430 : f32
    %1489 = vector.broadcast %1442 : i32 to vector<16x128xi32>
    %1490 = arith.cmpi eq, %1460, %1489 : vector<16x128xi32>
    %cst_408 = arith.constant 1.000000e+00 : f32
    %cst_409 = arith.constant 0.000000e+00 : f32
    %1491 = vector.broadcast %cst_408 : f32 to vector<16x128xf32>
    %1492 = vector.broadcast %cst_409 : f32 to vector<16x128xf32>
    %1493 = arith.select %1490, %1491, %1492 : vector<16x128xi1>, vector<16x128xf32>
    %1494 = vector.shape_cast %1493 : vector<16x128xf32> to vector<1x16x128xf32>
    %cst_410 = arith.constant dense<0.000000e+00> : vector<1xf32>
    %1495 = vector.multi_reduction <add>, %1494, %cst_410 [1, 2] : vector<1x16x128xf32> to vector<1xf32>
    %1496 = vector.shape_cast %1495 : vector<1xf32> to vector<1x1x1xf32>
    %1497 = vector.extract %1496[0, 0, 0] : f32 from vector<1x1x1xf32>
    %1498 = arith.cmpf oge, %1444, %1497 : f32
    %c64_i32_411 = arith.constant 64 : i32
    %1499 = arith.ori %1442, %c64_i32_411 : i32
    %1500 = arith.select %1498, %1499, %1442 : i32
    %1501 = arith.subf %1444, %1497 : f32
    %1502 = arith.select %1498, %1501, %1444 : f32
    %1503 = vector.broadcast %1456 : i32 to vector<16x128xi32>
    %1504 = arith.cmpi eq, %1460, %1503 : vector<16x128xi32>
    %cst_412 = arith.constant 1.000000e+00 : f32
    %cst_413 = arith.constant 0.000000e+00 : f32
    %1505 = vector.broadcast %cst_412 : f32 to vector<16x128xf32>
    %1506 = vector.broadcast %cst_413 : f32 to vector<16x128xf32>
    %1507 = arith.select %1504, %1505, %1506 : vector<16x128xi1>, vector<16x128xf32>
    %1508 = vector.shape_cast %1507 : vector<16x128xf32> to vector<1x16x128xf32>
    %cst_414 = arith.constant dense<0.000000e+00> : vector<1xf32>
    %1509 = vector.multi_reduction <add>, %1508, %cst_414 [1, 2] : vector<1x16x128xf32> to vector<1xf32>
    %1510 = vector.shape_cast %1509 : vector<1xf32> to vector<1x1x1xf32>
    %1511 = vector.extract %1510[0, 0, 0] : f32 from vector<1x1x1xf32>
    %1512 = arith.cmpf oge, %1458, %1511 : f32
    %c64_i32_415 = arith.constant 64 : i32
    %1513 = arith.ori %1456, %c64_i32_415 : i32
    %1514 = arith.select %1512, %1513, %1456 : i32
    %1515 = arith.subf %1458, %1511 : f32
    %1516 = arith.select %1512, %1515, %1458 : f32
    %c-32_i32 = arith.constant -32 : i32
    %1517 = vector.broadcast %c-32_i32 : i32 to vector<16x128xi32>
    %1518 = arith.andi %8, %1517 : vector<16x128xi32>
    %1519 = vector.broadcast %1472 : i32 to vector<16x128xi32>
    %1520 = arith.cmpi eq, %1518, %1519 : vector<16x128xi32>
    %cst_416 = arith.constant 1.000000e+00 : f32
    %cst_417 = arith.constant 0.000000e+00 : f32
    %1521 = vector.broadcast %cst_416 : f32 to vector<16x128xf32>
    %1522 = vector.broadcast %cst_417 : f32 to vector<16x128xf32>
    %1523 = arith.select %1520, %1521, %1522 : vector<16x128xi1>, vector<16x128xf32>
    %1524 = vector.shape_cast %1523 : vector<16x128xf32> to vector<1x16x128xf32>
    %cst_418 = arith.constant dense<0.000000e+00> : vector<1xf32>
    %1525 = vector.multi_reduction <add>, %1524, %cst_418 [1, 2] : vector<1x16x128xf32> to vector<1xf32>
    %1526 = vector.shape_cast %1525 : vector<1xf32> to vector<1x1x1xf32>
    %1527 = vector.extract %1526[0, 0, 0] : f32 from vector<1x1x1xf32>
    %1528 = arith.cmpf oge, %1474, %1527 : f32
    %c32_i32 = arith.constant 32 : i32
    %1529 = arith.ori %1472, %c32_i32 : i32
    %1530 = arith.select %1528, %1529, %1472 : i32
    %1531 = arith.subf %1474, %1527 : f32
    %1532 = arith.select %1528, %1531, %1474 : f32
    %1533 = vector.broadcast %1486 : i32 to vector<16x128xi32>
    %1534 = arith.cmpi eq, %1518, %1533 : vector<16x128xi32>
    %cst_419 = arith.constant 1.000000e+00 : f32
    %cst_420 = arith.constant 0.000000e+00 : f32
    %1535 = vector.broadcast %cst_419 : f32 to vector<16x128xf32>
    %1536 = vector.broadcast %cst_420 : f32 to vector<16x128xf32>
    %1537 = arith.select %1534, %1535, %1536 : vector<16x128xi1>, vector<16x128xf32>
    %1538 = vector.shape_cast %1537 : vector<16x128xf32> to vector<1x16x128xf32>
    %cst_421 = arith.constant dense<0.000000e+00> : vector<1xf32>
    %1539 = vector.multi_reduction <add>, %1538, %cst_421 [1, 2] : vector<1x16x128xf32> to vector<1xf32>
    %1540 = vector.shape_cast %1539 : vector<1xf32> to vector<1x1x1xf32>
    %1541 = vector.extract %1540[0, 0, 0] : f32 from vector<1x1x1xf32>
    %1542 = arith.cmpf oge, %1488, %1541 : f32
    %c32_i32_422 = arith.constant 32 : i32
    %1543 = arith.ori %1486, %c32_i32_422 : i32
    %1544 = arith.select %1542, %1543, %1486 : i32
    %1545 = arith.subf %1488, %1541 : f32
    %1546 = arith.select %1542, %1545, %1488 : f32
    %1547 = vector.broadcast %1500 : i32 to vector<16x128xi32>
    %1548 = arith.cmpi eq, %1518, %1547 : vector<16x128xi32>
    %cst_423 = arith.constant 1.000000e+00 : f32
    %cst_424 = arith.constant 0.000000e+00 : f32
    %1549 = vector.broadcast %cst_423 : f32 to vector<16x128xf32>
    %1550 = vector.broadcast %cst_424 : f32 to vector<16x128xf32>
    %1551 = arith.select %1548, %1549, %1550 : vector<16x128xi1>, vector<16x128xf32>
    %1552 = vector.shape_cast %1551 : vector<16x128xf32> to vector<1x16x128xf32>
    %cst_425 = arith.constant dense<0.000000e+00> : vector<1xf32>
    %1553 = vector.multi_reduction <add>, %1552, %cst_425 [1, 2] : vector<1x16x128xf32> to vector<1xf32>
    %1554 = vector.shape_cast %1553 : vector<1xf32> to vector<1x1x1xf32>
    %1555 = vector.extract %1554[0, 0, 0] : f32 from vector<1x1x1xf32>
    %1556 = arith.cmpf oge, %1502, %1555 : f32
    %c32_i32_426 = arith.constant 32 : i32
    %1557 = arith.ori %1500, %c32_i32_426 : i32
    %1558 = arith.select %1556, %1557, %1500 : i32
    %1559 = arith.subf %1502, %1555 : f32
    %1560 = arith.select %1556, %1559, %1502 : f32
    %1561 = vector.broadcast %1514 : i32 to vector<16x128xi32>
    %1562 = arith.cmpi eq, %1518, %1561 : vector<16x128xi32>
    %cst_427 = arith.constant 1.000000e+00 : f32
    %cst_428 = arith.constant 0.000000e+00 : f32
    %1563 = vector.broadcast %cst_427 : f32 to vector<16x128xf32>
    %1564 = vector.broadcast %cst_428 : f32 to vector<16x128xf32>
    %1565 = arith.select %1562, %1563, %1564 : vector<16x128xi1>, vector<16x128xf32>
    %1566 = vector.shape_cast %1565 : vector<16x128xf32> to vector<1x16x128xf32>
    %cst_429 = arith.constant dense<0.000000e+00> : vector<1xf32>
    %1567 = vector.multi_reduction <add>, %1566, %cst_429 [1, 2] : vector<1x16x128xf32> to vector<1xf32>
    %1568 = vector.shape_cast %1567 : vector<1xf32> to vector<1x1x1xf32>
    %1569 = vector.extract %1568[0, 0, 0] : f32 from vector<1x1x1xf32>
    %1570 = arith.cmpf oge, %1516, %1569 : f32
    %c32_i32_430 = arith.constant 32 : i32
    %1571 = arith.ori %1514, %c32_i32_430 : i32
    %1572 = arith.select %1570, %1571, %1514 : i32
    %1573 = arith.subf %1516, %1569 : f32
    %1574 = arith.select %1570, %1573, %1516 : f32
    %c-16_i32 = arith.constant -16 : i32
    %1575 = vector.broadcast %c-16_i32 : i32 to vector<16x128xi32>
    %1576 = arith.andi %8, %1575 : vector<16x128xi32>
    %1577 = vector.broadcast %1530 : i32 to vector<16x128xi32>
    %1578 = arith.cmpi eq, %1576, %1577 : vector<16x128xi32>
    %cst_431 = arith.constant 1.000000e+00 : f32
    %cst_432 = arith.constant 0.000000e+00 : f32
    %1579 = vector.broadcast %cst_431 : f32 to vector<16x128xf32>
    %1580 = vector.broadcast %cst_432 : f32 to vector<16x128xf32>
    %1581 = arith.select %1578, %1579, %1580 : vector<16x128xi1>, vector<16x128xf32>
    %1582 = vector.shape_cast %1581 : vector<16x128xf32> to vector<1x16x128xf32>
    %cst_433 = arith.constant dense<0.000000e+00> : vector<1xf32>
    %1583 = vector.multi_reduction <add>, %1582, %cst_433 [1, 2] : vector<1x16x128xf32> to vector<1xf32>
    %1584 = vector.shape_cast %1583 : vector<1xf32> to vector<1x1x1xf32>
    %1585 = vector.extract %1584[0, 0, 0] : f32 from vector<1x1x1xf32>
    %1586 = arith.cmpf oge, %1532, %1585 : f32
    %c16_i32 = arith.constant 16 : i32
    %1587 = arith.ori %1530, %c16_i32 : i32
    %1588 = arith.select %1586, %1587, %1530 : i32
    %1589 = arith.subf %1532, %1585 : f32
    %1590 = arith.select %1586, %1589, %1532 : f32
    %1591 = vector.broadcast %1544 : i32 to vector<16x128xi32>
    %1592 = arith.cmpi eq, %1576, %1591 : vector<16x128xi32>
    %cst_434 = arith.constant 1.000000e+00 : f32
    %cst_435 = arith.constant 0.000000e+00 : f32
    %1593 = vector.broadcast %cst_434 : f32 to vector<16x128xf32>
    %1594 = vector.broadcast %cst_435 : f32 to vector<16x128xf32>
    %1595 = arith.select %1592, %1593, %1594 : vector<16x128xi1>, vector<16x128xf32>
    %1596 = vector.shape_cast %1595 : vector<16x128xf32> to vector<1x16x128xf32>
    %cst_436 = arith.constant dense<0.000000e+00> : vector<1xf32>
    %1597 = vector.multi_reduction <add>, %1596, %cst_436 [1, 2] : vector<1x16x128xf32> to vector<1xf32>
    %1598 = vector.shape_cast %1597 : vector<1xf32> to vector<1x1x1xf32>
    %1599 = vector.extract %1598[0, 0, 0] : f32 from vector<1x1x1xf32>
    %1600 = arith.cmpf oge, %1546, %1599 : f32
    %c16_i32_437 = arith.constant 16 : i32
    %1601 = arith.ori %1544, %c16_i32_437 : i32
    %1602 = arith.select %1600, %1601, %1544 : i32
    %1603 = arith.subf %1546, %1599 : f32
    %1604 = arith.select %1600, %1603, %1546 : f32
    %1605 = vector.broadcast %1558 : i32 to vector<16x128xi32>
    %1606 = arith.cmpi eq, %1576, %1605 : vector<16x128xi32>
    %cst_438 = arith.constant 1.000000e+00 : f32
    %cst_439 = arith.constant 0.000000e+00 : f32
    %1607 = vector.broadcast %cst_438 : f32 to vector<16x128xf32>
    %1608 = vector.broadcast %cst_439 : f32 to vector<16x128xf32>
    %1609 = arith.select %1606, %1607, %1608 : vector<16x128xi1>, vector<16x128xf32>
    %1610 = vector.shape_cast %1609 : vector<16x128xf32> to vector<1x16x128xf32>
    %cst_440 = arith.constant dense<0.000000e+00> : vector<1xf32>
    %1611 = vector.multi_reduction <add>, %1610, %cst_440 [1, 2] : vector<1x16x128xf32> to vector<1xf32>
    %1612 = vector.shape_cast %1611 : vector<1xf32> to vector<1x1x1xf32>
    %1613 = vector.extract %1612[0, 0, 0] : f32 from vector<1x1x1xf32>
    %1614 = arith.cmpf oge, %1560, %1613 : f32
    %c16_i32_441 = arith.constant 16 : i32
    %1615 = arith.ori %1558, %c16_i32_441 : i32
    %1616 = arith.select %1614, %1615, %1558 : i32
    %1617 = arith.subf %1560, %1613 : f32
    %1618 = arith.select %1614, %1617, %1560 : f32
    %1619 = vector.broadcast %1572 : i32 to vector<16x128xi32>
    %1620 = arith.cmpi eq, %1576, %1619 : vector<16x128xi32>
    %cst_442 = arith.constant 1.000000e+00 : f32
    %cst_443 = arith.constant 0.000000e+00 : f32
    %1621 = vector.broadcast %cst_442 : f32 to vector<16x128xf32>
    %1622 = vector.broadcast %cst_443 : f32 to vector<16x128xf32>
    %1623 = arith.select %1620, %1621, %1622 : vector<16x128xi1>, vector<16x128xf32>
    %1624 = vector.shape_cast %1623 : vector<16x128xf32> to vector<1x16x128xf32>
    %cst_444 = arith.constant dense<0.000000e+00> : vector<1xf32>
    %1625 = vector.multi_reduction <add>, %1624, %cst_444 [1, 2] : vector<1x16x128xf32> to vector<1xf32>
    %1626 = vector.shape_cast %1625 : vector<1xf32> to vector<1x1x1xf32>
    %1627 = vector.extract %1626[0, 0, 0] : f32 from vector<1x1x1xf32>
    %1628 = arith.cmpf oge, %1574, %1627 : f32
    %c16_i32_445 = arith.constant 16 : i32
    %1629 = arith.ori %1572, %c16_i32_445 : i32
    %1630 = arith.select %1628, %1629, %1572 : i32
    %1631 = arith.subf %1574, %1627 : f32
    %1632 = arith.select %1628, %1631, %1574 : f32
    %c-8_i32 = arith.constant -8 : i32
    %1633 = vector.broadcast %c-8_i32 : i32 to vector<16x128xi32>
    %1634 = arith.andi %8, %1633 : vector<16x128xi32>
    %1635 = vector.broadcast %1588 : i32 to vector<16x128xi32>
    %1636 = arith.cmpi eq, %1634, %1635 : vector<16x128xi32>
    %cst_446 = arith.constant 1.000000e+00 : f32
    %cst_447 = arith.constant 0.000000e+00 : f32
    %1637 = vector.broadcast %cst_446 : f32 to vector<16x128xf32>
    %1638 = vector.broadcast %cst_447 : f32 to vector<16x128xf32>
    %1639 = arith.select %1636, %1637, %1638 : vector<16x128xi1>, vector<16x128xf32>
    %1640 = vector.shape_cast %1639 : vector<16x128xf32> to vector<1x16x128xf32>
    %cst_448 = arith.constant dense<0.000000e+00> : vector<1xf32>
    %1641 = vector.multi_reduction <add>, %1640, %cst_448 [1, 2] : vector<1x16x128xf32> to vector<1xf32>
    %1642 = vector.shape_cast %1641 : vector<1xf32> to vector<1x1x1xf32>
    %1643 = vector.extract %1642[0, 0, 0] : f32 from vector<1x1x1xf32>
    %1644 = arith.cmpf oge, %1590, %1643 : f32
    %c8_i32 = arith.constant 8 : i32
    %1645 = arith.ori %1588, %c8_i32 : i32
    %1646 = arith.select %1644, %1645, %1588 : i32
    %1647 = arith.subf %1590, %1643 : f32
    %1648 = arith.select %1644, %1647, %1590 : f32
    %1649 = vector.broadcast %1602 : i32 to vector<16x128xi32>
    %1650 = arith.cmpi eq, %1634, %1649 : vector<16x128xi32>
    %cst_449 = arith.constant 1.000000e+00 : f32
    %cst_450 = arith.constant 0.000000e+00 : f32
    %1651 = vector.broadcast %cst_449 : f32 to vector<16x128xf32>
    %1652 = vector.broadcast %cst_450 : f32 to vector<16x128xf32>
    %1653 = arith.select %1650, %1651, %1652 : vector<16x128xi1>, vector<16x128xf32>
    %1654 = vector.shape_cast %1653 : vector<16x128xf32> to vector<1x16x128xf32>
    %cst_451 = arith.constant dense<0.000000e+00> : vector<1xf32>
    %1655 = vector.multi_reduction <add>, %1654, %cst_451 [1, 2] : vector<1x16x128xf32> to vector<1xf32>
    %1656 = vector.shape_cast %1655 : vector<1xf32> to vector<1x1x1xf32>
    %1657 = vector.extract %1656[0, 0, 0] : f32 from vector<1x1x1xf32>
    %1658 = arith.cmpf oge, %1604, %1657 : f32
    %c8_i32_452 = arith.constant 8 : i32
    %1659 = arith.ori %1602, %c8_i32_452 : i32
    %1660 = arith.select %1658, %1659, %1602 : i32
    %1661 = arith.subf %1604, %1657 : f32
    %1662 = arith.select %1658, %1661, %1604 : f32
    %1663 = vector.broadcast %1616 : i32 to vector<16x128xi32>
    %1664 = arith.cmpi eq, %1634, %1663 : vector<16x128xi32>
    %cst_453 = arith.constant 1.000000e+00 : f32
    %cst_454 = arith.constant 0.000000e+00 : f32
    %1665 = vector.broadcast %cst_453 : f32 to vector<16x128xf32>
    %1666 = vector.broadcast %cst_454 : f32 to vector<16x128xf32>
    %1667 = arith.select %1664, %1665, %1666 : vector<16x128xi1>, vector<16x128xf32>
    %1668 = vector.shape_cast %1667 : vector<16x128xf32> to vector<1x16x128xf32>
    %cst_455 = arith.constant dense<0.000000e+00> : vector<1xf32>
    %1669 = vector.multi_reduction <add>, %1668, %cst_455 [1, 2] : vector<1x16x128xf32> to vector<1xf32>
    %1670 = vector.shape_cast %1669 : vector<1xf32> to vector<1x1x1xf32>
    %1671 = vector.extract %1670[0, 0, 0] : f32 from vector<1x1x1xf32>
    %1672 = arith.cmpf oge, %1618, %1671 : f32
    %c8_i32_456 = arith.constant 8 : i32
    %1673 = arith.ori %1616, %c8_i32_456 : i32
    %1674 = arith.select %1672, %1673, %1616 : i32
    %1675 = arith.subf %1618, %1671 : f32
    %1676 = arith.select %1672, %1675, %1618 : f32
    %1677 = vector.broadcast %1630 : i32 to vector<16x128xi32>
    %1678 = arith.cmpi eq, %1634, %1677 : vector<16x128xi32>
    %cst_457 = arith.constant 1.000000e+00 : f32
    %cst_458 = arith.constant 0.000000e+00 : f32
    %1679 = vector.broadcast %cst_457 : f32 to vector<16x128xf32>
    %1680 = vector.broadcast %cst_458 : f32 to vector<16x128xf32>
    %1681 = arith.select %1678, %1679, %1680 : vector<16x128xi1>, vector<16x128xf32>
    %1682 = vector.shape_cast %1681 : vector<16x128xf32> to vector<1x16x128xf32>
    %cst_459 = arith.constant dense<0.000000e+00> : vector<1xf32>
    %1683 = vector.multi_reduction <add>, %1682, %cst_459 [1, 2] : vector<1x16x128xf32> to vector<1xf32>
    %1684 = vector.shape_cast %1683 : vector<1xf32> to vector<1x1x1xf32>
    %1685 = vector.extract %1684[0, 0, 0] : f32 from vector<1x1x1xf32>
    %1686 = arith.cmpf oge, %1632, %1685 : f32
    %c8_i32_460 = arith.constant 8 : i32
    %1687 = arith.ori %1630, %c8_i32_460 : i32
    %1688 = arith.select %1686, %1687, %1630 : i32
    %1689 = arith.subf %1632, %1685 : f32
    %1690 = arith.select %1686, %1689, %1632 : f32
    %c-4_i32 = arith.constant -4 : i32
    %1691 = vector.broadcast %c-4_i32 : i32 to vector<16x128xi32>
    %1692 = arith.andi %8, %1691 : vector<16x128xi32>
    %1693 = vector.broadcast %1646 : i32 to vector<16x128xi32>
    %1694 = arith.cmpi eq, %1692, %1693 : vector<16x128xi32>
    %cst_461 = arith.constant 1.000000e+00 : f32
    %cst_462 = arith.constant 0.000000e+00 : f32
    %1695 = vector.broadcast %cst_461 : f32 to vector<16x128xf32>
    %1696 = vector.broadcast %cst_462 : f32 to vector<16x128xf32>
    %1697 = arith.select %1694, %1695, %1696 : vector<16x128xi1>, vector<16x128xf32>
    %1698 = vector.shape_cast %1697 : vector<16x128xf32> to vector<1x16x128xf32>
    %cst_463 = arith.constant dense<0.000000e+00> : vector<1xf32>
    %1699 = vector.multi_reduction <add>, %1698, %cst_463 [1, 2] : vector<1x16x128xf32> to vector<1xf32>
    %1700 = vector.shape_cast %1699 : vector<1xf32> to vector<1x1x1xf32>
    %1701 = vector.extract %1700[0, 0, 0] : f32 from vector<1x1x1xf32>
    %1702 = arith.cmpf oge, %1648, %1701 : f32
    %c4_i32 = arith.constant 4 : i32
    %1703 = arith.ori %1646, %c4_i32 : i32
    %1704 = arith.select %1702, %1703, %1646 : i32
    %1705 = arith.subf %1648, %1701 : f32
    %1706 = arith.select %1702, %1705, %1648 : f32
    %1707 = vector.broadcast %1660 : i32 to vector<16x128xi32>
    %1708 = arith.cmpi eq, %1692, %1707 : vector<16x128xi32>
    %cst_464 = arith.constant 1.000000e+00 : f32
    %cst_465 = arith.constant 0.000000e+00 : f32
    %1709 = vector.broadcast %cst_464 : f32 to vector<16x128xf32>
    %1710 = vector.broadcast %cst_465 : f32 to vector<16x128xf32>
    %1711 = arith.select %1708, %1709, %1710 : vector<16x128xi1>, vector<16x128xf32>
    %1712 = vector.shape_cast %1711 : vector<16x128xf32> to vector<1x16x128xf32>
    %cst_466 = arith.constant dense<0.000000e+00> : vector<1xf32>
    %1713 = vector.multi_reduction <add>, %1712, %cst_466 [1, 2] : vector<1x16x128xf32> to vector<1xf32>
    %1714 = vector.shape_cast %1713 : vector<1xf32> to vector<1x1x1xf32>
    %1715 = vector.extract %1714[0, 0, 0] : f32 from vector<1x1x1xf32>
    %1716 = arith.cmpf oge, %1662, %1715 : f32
    %c4_i32_467 = arith.constant 4 : i32
    %1717 = arith.ori %1660, %c4_i32_467 : i32
    %1718 = arith.select %1716, %1717, %1660 : i32
    %1719 = arith.subf %1662, %1715 : f32
    %1720 = arith.select %1716, %1719, %1662 : f32
    %1721 = vector.broadcast %1674 : i32 to vector<16x128xi32>
    %1722 = arith.cmpi eq, %1692, %1721 : vector<16x128xi32>
    %cst_468 = arith.constant 1.000000e+00 : f32
    %cst_469 = arith.constant 0.000000e+00 : f32
    %1723 = vector.broadcast %cst_468 : f32 to vector<16x128xf32>
    %1724 = vector.broadcast %cst_469 : f32 to vector<16x128xf32>
    %1725 = arith.select %1722, %1723, %1724 : vector<16x128xi1>, vector<16x128xf32>
    %1726 = vector.shape_cast %1725 : vector<16x128xf32> to vector<1x16x128xf32>
    %cst_470 = arith.constant dense<0.000000e+00> : vector<1xf32>
    %1727 = vector.multi_reduction <add>, %1726, %cst_470 [1, 2] : vector<1x16x128xf32> to vector<1xf32>
    %1728 = vector.shape_cast %1727 : vector<1xf32> to vector<1x1x1xf32>
    %1729 = vector.extract %1728[0, 0, 0] : f32 from vector<1x1x1xf32>
    %1730 = arith.cmpf oge, %1676, %1729 : f32
    %c4_i32_471 = arith.constant 4 : i32
    %1731 = arith.ori %1674, %c4_i32_471 : i32
    %1732 = arith.select %1730, %1731, %1674 : i32
    %1733 = arith.subf %1676, %1729 : f32
    %1734 = arith.select %1730, %1733, %1676 : f32
    %1735 = vector.broadcast %1688 : i32 to vector<16x128xi32>
    %1736 = arith.cmpi eq, %1692, %1735 : vector<16x128xi32>
    %cst_472 = arith.constant 1.000000e+00 : f32
    %cst_473 = arith.constant 0.000000e+00 : f32
    %1737 = vector.broadcast %cst_472 : f32 to vector<16x128xf32>
    %1738 = vector.broadcast %cst_473 : f32 to vector<16x128xf32>
    %1739 = arith.select %1736, %1737, %1738 : vector<16x128xi1>, vector<16x128xf32>
    %1740 = vector.shape_cast %1739 : vector<16x128xf32> to vector<1x16x128xf32>
    %cst_474 = arith.constant dense<0.000000e+00> : vector<1xf32>
    %1741 = vector.multi_reduction <add>, %1740, %cst_474 [1, 2] : vector<1x16x128xf32> to vector<1xf32>
    %1742 = vector.shape_cast %1741 : vector<1xf32> to vector<1x1x1xf32>
    %1743 = vector.extract %1742[0, 0, 0] : f32 from vector<1x1x1xf32>
    %1744 = arith.cmpf oge, %1690, %1743 : f32
    %c4_i32_475 = arith.constant 4 : i32
    %1745 = arith.ori %1688, %c4_i32_475 : i32
    %1746 = arith.select %1744, %1745, %1688 : i32
    %1747 = arith.subf %1690, %1743 : f32
    %1748 = arith.select %1744, %1747, %1690 : f32
    %c-2_i32 = arith.constant -2 : i32
    %1749 = vector.broadcast %c-2_i32 : i32 to vector<16x128xi32>
    %1750 = arith.andi %8, %1749 : vector<16x128xi32>
    %1751 = vector.broadcast %1704 : i32 to vector<16x128xi32>
    %1752 = arith.cmpi eq, %1750, %1751 : vector<16x128xi32>
    %cst_476 = arith.constant 1.000000e+00 : f32
    %cst_477 = arith.constant 0.000000e+00 : f32
    %1753 = vector.broadcast %cst_476 : f32 to vector<16x128xf32>
    %1754 = vector.broadcast %cst_477 : f32 to vector<16x128xf32>
    %1755 = arith.select %1752, %1753, %1754 : vector<16x128xi1>, vector<16x128xf32>
    %1756 = vector.shape_cast %1755 : vector<16x128xf32> to vector<1x16x128xf32>
    %cst_478 = arith.constant dense<0.000000e+00> : vector<1xf32>
    %1757 = vector.multi_reduction <add>, %1756, %cst_478 [1, 2] : vector<1x16x128xf32> to vector<1xf32>
    %1758 = vector.shape_cast %1757 : vector<1xf32> to vector<1x1x1xf32>
    %1759 = vector.extract %1758[0, 0, 0] : f32 from vector<1x1x1xf32>
    %1760 = arith.cmpf oge, %1706, %1759 : f32
    %c2_i32 = arith.constant 2 : i32
    %1761 = arith.ori %1704, %c2_i32 : i32
    %1762 = arith.select %1760, %1761, %1704 : i32
    %1763 = arith.subf %1706, %1759 : f32
    %1764 = arith.select %1760, %1763, %1706 : f32
    %1765 = vector.broadcast %1718 : i32 to vector<16x128xi32>
    %1766 = arith.cmpi eq, %1750, %1765 : vector<16x128xi32>
    %cst_479 = arith.constant 1.000000e+00 : f32
    %cst_480 = arith.constant 0.000000e+00 : f32
    %1767 = vector.broadcast %cst_479 : f32 to vector<16x128xf32>
    %1768 = vector.broadcast %cst_480 : f32 to vector<16x128xf32>
    %1769 = arith.select %1766, %1767, %1768 : vector<16x128xi1>, vector<16x128xf32>
    %1770 = vector.shape_cast %1769 : vector<16x128xf32> to vector<1x16x128xf32>
    %cst_481 = arith.constant dense<0.000000e+00> : vector<1xf32>
    %1771 = vector.multi_reduction <add>, %1770, %cst_481 [1, 2] : vector<1x16x128xf32> to vector<1xf32>
    %1772 = vector.shape_cast %1771 : vector<1xf32> to vector<1x1x1xf32>
    %1773 = vector.extract %1772[0, 0, 0] : f32 from vector<1x1x1xf32>
    %1774 = arith.cmpf oge, %1720, %1773 : f32
    %c2_i32_482 = arith.constant 2 : i32
    %1775 = arith.ori %1718, %c2_i32_482 : i32
    %1776 = arith.select %1774, %1775, %1718 : i32
    %1777 = arith.subf %1720, %1773 : f32
    %1778 = arith.select %1774, %1777, %1720 : f32
    %1779 = vector.broadcast %1732 : i32 to vector<16x128xi32>
    %1780 = arith.cmpi eq, %1750, %1779 : vector<16x128xi32>
    %cst_483 = arith.constant 1.000000e+00 : f32
    %cst_484 = arith.constant 0.000000e+00 : f32
    %1781 = vector.broadcast %cst_483 : f32 to vector<16x128xf32>
    %1782 = vector.broadcast %cst_484 : f32 to vector<16x128xf32>
    %1783 = arith.select %1780, %1781, %1782 : vector<16x128xi1>, vector<16x128xf32>
    %1784 = vector.shape_cast %1783 : vector<16x128xf32> to vector<1x16x128xf32>
    %cst_485 = arith.constant dense<0.000000e+00> : vector<1xf32>
    %1785 = vector.multi_reduction <add>, %1784, %cst_485 [1, 2] : vector<1x16x128xf32> to vector<1xf32>
    %1786 = vector.shape_cast %1785 : vector<1xf32> to vector<1x1x1xf32>
    %1787 = vector.extract %1786[0, 0, 0] : f32 from vector<1x1x1xf32>
    %1788 = arith.cmpf oge, %1734, %1787 : f32
    %c2_i32_486 = arith.constant 2 : i32
    %1789 = arith.ori %1732, %c2_i32_486 : i32
    %1790 = arith.select %1788, %1789, %1732 : i32
    %1791 = arith.subf %1734, %1787 : f32
    %1792 = arith.select %1788, %1791, %1734 : f32
    %1793 = vector.broadcast %1746 : i32 to vector<16x128xi32>
    %1794 = arith.cmpi eq, %1750, %1793 : vector<16x128xi32>
    %cst_487 = arith.constant 1.000000e+00 : f32
    %cst_488 = arith.constant 0.000000e+00 : f32
    %1795 = vector.broadcast %cst_487 : f32 to vector<16x128xf32>
    %1796 = vector.broadcast %cst_488 : f32 to vector<16x128xf32>
    %1797 = arith.select %1794, %1795, %1796 : vector<16x128xi1>, vector<16x128xf32>
    %1798 = vector.shape_cast %1797 : vector<16x128xf32> to vector<1x16x128xf32>
    %cst_489 = arith.constant dense<0.000000e+00> : vector<1xf32>
    %1799 = vector.multi_reduction <add>, %1798, %cst_489 [1, 2] : vector<1x16x128xf32> to vector<1xf32>
    %1800 = vector.shape_cast %1799 : vector<1xf32> to vector<1x1x1xf32>
    %1801 = vector.extract %1800[0, 0, 0] : f32 from vector<1x1x1xf32>
    %1802 = arith.cmpf oge, %1748, %1801 : f32
    %c2_i32_490 = arith.constant 2 : i32
    %1803 = arith.ori %1746, %c2_i32_490 : i32
    %1804 = arith.select %1802, %1803, %1746 : i32
    %1805 = arith.subf %1748, %1801 : f32
    %1806 = arith.select %1802, %1805, %1748 : f32
    %c-1_i32_491 = arith.constant -1 : i32
    %1807 = vector.broadcast %c-1_i32_491 : i32 to vector<16x128xi32>
    %1808 = arith.andi %8, %1807 : vector<16x128xi32>
    %1809 = vector.broadcast %1762 : i32 to vector<16x128xi32>
    %1810 = arith.cmpi eq, %1808, %1809 : vector<16x128xi32>
    %cst_492 = arith.constant 1.000000e+00 : f32
    %cst_493 = arith.constant 0.000000e+00 : f32
    %1811 = vector.broadcast %cst_492 : f32 to vector<16x128xf32>
    %1812 = vector.broadcast %cst_493 : f32 to vector<16x128xf32>
    %1813 = arith.select %1810, %1811, %1812 : vector<16x128xi1>, vector<16x128xf32>
    %1814 = vector.shape_cast %1813 : vector<16x128xf32> to vector<1x16x128xf32>
    %cst_494 = arith.constant dense<0.000000e+00> : vector<1xf32>
    %1815 = vector.multi_reduction <add>, %1814, %cst_494 [1, 2] : vector<1x16x128xf32> to vector<1xf32>
    %1816 = vector.shape_cast %1815 : vector<1xf32> to vector<1x1x1xf32>
    %1817 = vector.extract %1816[0, 0, 0] : f32 from vector<1x1x1xf32>
    %1818 = arith.cmpf oge, %1764, %1817 : f32
    %c1_i32 = arith.constant 1 : i32
    %1819 = arith.ori %1762, %c1_i32 : i32
    %1820 = arith.select %1818, %1819, %1762 : i32
    %1821 = vector.broadcast %1776 : i32 to vector<16x128xi32>
    %1822 = arith.cmpi eq, %1808, %1821 : vector<16x128xi32>
    %cst_495 = arith.constant 1.000000e+00 : f32
    %cst_496 = arith.constant 0.000000e+00 : f32
    %1823 = vector.broadcast %cst_495 : f32 to vector<16x128xf32>
    %1824 = vector.broadcast %cst_496 : f32 to vector<16x128xf32>
    %1825 = arith.select %1822, %1823, %1824 : vector<16x128xi1>, vector<16x128xf32>
    %1826 = vector.shape_cast %1825 : vector<16x128xf32> to vector<1x16x128xf32>
    %cst_497 = arith.constant dense<0.000000e+00> : vector<1xf32>
    %1827 = vector.multi_reduction <add>, %1826, %cst_497 [1, 2] : vector<1x16x128xf32> to vector<1xf32>
    %1828 = vector.shape_cast %1827 : vector<1xf32> to vector<1x1x1xf32>
    %1829 = vector.extract %1828[0, 0, 0] : f32 from vector<1x1x1xf32>
    %1830 = arith.cmpf oge, %1778, %1829 : f32
    %c1_i32_498 = arith.constant 1 : i32
    %1831 = arith.ori %1776, %c1_i32_498 : i32
    %1832 = arith.select %1830, %1831, %1776 : i32
    %1833 = vector.broadcast %1790 : i32 to vector<16x128xi32>
    %1834 = arith.cmpi eq, %1808, %1833 : vector<16x128xi32>
    %cst_499 = arith.constant 1.000000e+00 : f32
    %cst_500 = arith.constant 0.000000e+00 : f32
    %1835 = vector.broadcast %cst_499 : f32 to vector<16x128xf32>
    %1836 = vector.broadcast %cst_500 : f32 to vector<16x128xf32>
    %1837 = arith.select %1834, %1835, %1836 : vector<16x128xi1>, vector<16x128xf32>
    %1838 = vector.shape_cast %1837 : vector<16x128xf32> to vector<1x16x128xf32>
    %cst_501 = arith.constant dense<0.000000e+00> : vector<1xf32>
    %1839 = vector.multi_reduction <add>, %1838, %cst_501 [1, 2] : vector<1x16x128xf32> to vector<1xf32>
    %1840 = vector.shape_cast %1839 : vector<1xf32> to vector<1x1x1xf32>
    %1841 = vector.extract %1840[0, 0, 0] : f32 from vector<1x1x1xf32>
    %1842 = arith.cmpf oge, %1792, %1841 : f32
    %c1_i32_502 = arith.constant 1 : i32
    %1843 = arith.ori %1790, %c1_i32_502 : i32
    %1844 = arith.select %1842, %1843, %1790 : i32
    %1845 = vector.broadcast %1804 : i32 to vector<16x128xi32>
    %1846 = arith.cmpi eq, %1808, %1845 : vector<16x128xi32>
    %cst_503 = arith.constant 1.000000e+00 : f32
    %cst_504 = arith.constant 0.000000e+00 : f32
    %1847 = vector.broadcast %cst_503 : f32 to vector<16x128xf32>
    %1848 = vector.broadcast %cst_504 : f32 to vector<16x128xf32>
    %1849 = arith.select %1846, %1847, %1848 : vector<16x128xi1>, vector<16x128xf32>
    %1850 = vector.shape_cast %1849 : vector<16x128xf32> to vector<1x16x128xf32>
    %cst_505 = arith.constant dense<0.000000e+00> : vector<1xf32>
    %1851 = vector.multi_reduction <add>, %1850, %cst_505 [1, 2] : vector<1x16x128xf32> to vector<1xf32>
    %1852 = vector.shape_cast %1851 : vector<1xf32> to vector<1x1x1xf32>
    %1853 = vector.extract %1852[0, 0, 0] : f32 from vector<1x1x1xf32>
    %1854 = arith.cmpf oge, %1806, %1853 : f32
    %c1_i32_506 = arith.constant 1 : i32
    %1855 = arith.ori %1804, %c1_i32_506 : i32
    %1856 = arith.select %1854, %1855, %1804 : i32
    %1857 = vector.broadcast %1820 : i32 to vector<16x128xi32>
    %1858 = arith.cmpi eq, %8, %1857 : vector<16x128xi32>
    %cst_507 = arith.constant 0xFF800000 : f32
    %1859 = vector.broadcast %cst_507 : f32 to vector<16x128xf32>
    %1860 = arith.select %1858, %0, %1859 : vector<16x128xi1>, vector<16x128xf32>
    %1861 = vector.shape_cast %1860 : vector<16x128xf32> to vector<1x16x128xf32>
    %cst_508 = arith.constant dense<0xFF800000> : vector<1xf32>
    %1862 = vector.multi_reduction <maximumf>, %1861, %cst_508 [1, 2] : vector<1x16x128xf32> to vector<1xf32>
    %1863 = vector.shape_cast %1862 : vector<1xf32> to vector<1x1x1xf32>
    %1864 = vector.extract %1863[0, 0, 0] : f32 from vector<1x1x1xf32>
    %1865 = vector.broadcast %1832 : i32 to vector<16x128xi32>
    %1866 = arith.cmpi eq, %8, %1865 : vector<16x128xi32>
    %cst_509 = arith.constant 0xFF800000 : f32
    %1867 = vector.broadcast %cst_509 : f32 to vector<16x128xf32>
    %1868 = arith.select %1866, %0, %1867 : vector<16x128xi1>, vector<16x128xf32>
    %1869 = vector.shape_cast %1868 : vector<16x128xf32> to vector<1x16x128xf32>
    %cst_510 = arith.constant dense<0xFF800000> : vector<1xf32>
    %1870 = vector.multi_reduction <maximumf>, %1869, %cst_510 [1, 2] : vector<1x16x128xf32> to vector<1xf32>
    %1871 = vector.shape_cast %1870 : vector<1xf32> to vector<1x1x1xf32>
    %1872 = vector.extract %1871[0, 0, 0] : f32 from vector<1x1x1xf32>
    %1873 = vector.broadcast %1844 : i32 to vector<16x128xi32>
    %1874 = arith.cmpi eq, %8, %1873 : vector<16x128xi32>
    %cst_511 = arith.constant 0xFF800000 : f32
    %1875 = vector.broadcast %cst_511 : f32 to vector<16x128xf32>
    %1876 = arith.select %1874, %0, %1875 : vector<16x128xi1>, vector<16x128xf32>
    %1877 = vector.shape_cast %1876 : vector<16x128xf32> to vector<1x16x128xf32>
    %cst_512 = arith.constant dense<0xFF800000> : vector<1xf32>
    %1878 = vector.multi_reduction <maximumf>, %1877, %cst_512 [1, 2] : vector<1x16x128xf32> to vector<1xf32>
    %1879 = vector.shape_cast %1878 : vector<1xf32> to vector<1x1x1xf32>
    %1880 = vector.extract %1879[0, 0, 0] : f32 from vector<1x1x1xf32>
    %1881 = vector.broadcast %1856 : i32 to vector<16x128xi32>
    %1882 = arith.cmpi eq, %8, %1881 : vector<16x128xi32>
    %cst_513 = arith.constant 0xFF800000 : f32
    %1883 = vector.broadcast %cst_513 : f32 to vector<16x128xf32>
    %1884 = arith.select %1882, %0, %1883 : vector<16x128xi1>, vector<16x128xf32>
    %1885 = vector.shape_cast %1884 : vector<16x128xf32> to vector<1x16x128xf32>
    %cst_514 = arith.constant dense<0xFF800000> : vector<1xf32>
    %1886 = vector.multi_reduction <maximumf>, %1885, %cst_514 [1, 2] : vector<1x16x128xf32> to vector<1xf32>
    %1887 = vector.shape_cast %1886 : vector<1xf32> to vector<1x1x1xf32>
    %1888 = vector.extract %1887[0, 0, 0] : f32 from vector<1x1x1xf32>
    %1889 = arith.subf %1872, %1864 : f32
    %cst_515 = arith.constant 3.500000e-01 : f32
    %1890 = arith.mulf %cst_515, %1889 : f32
    %1891 = arith.addf %1864, %1890 : f32
    %1892 = arith.subf %1888, %1880 : f32
    %cst_516 = arith.constant 6.500000e-01 : f32
    %1893 = arith.mulf %cst_516, %1892 : f32
    %1894 = arith.addf %1880, %1893 : f32
    %c0_517 = arith.constant 0 : index
    %1895 = memref.load %arg1[%c0_517] : memref<1xf32, #tpu.memory_space<smem>>
    %cst_518 = arith.constant 9.900000e-01 : f32
    %1896 = arith.mulf %cst_518, %1895 : f32
    %cst_519 = arith.constant 0.00999999977 : f32
    %1897 = arith.mulf %cst_519, %1891 : f32
    %1898 = arith.addf %1896, %1897 : f32
    %c0_520 = arith.constant 0 : index
    %1899 = memref.load %arg2[%c0_520] : memref<1xf32, #tpu.memory_space<smem>>
    %cst_521 = arith.constant 9.900000e-01 : f32
    %1900 = arith.mulf %cst_521, %1899 : f32
    %cst_522 = arith.constant 0.00999999977 : f32
    %1901 = arith.mulf %cst_522, %1894 : f32
    %1902 = arith.addf %1900, %1901 : f32
    %1903 = arith.subf %1902, %1898 : f32
    %cst_523 = arith.constant 9.99999993E-9 : f32
    %1904 = arith.maximumf %cst_523, %1903 : f32
    %1905 = tpu.iota {dimensions = array<i32: 1>} : vector<1x128xi32>
    %c0_i32_524 = arith.constant 0 : i32
    %1906 = vector.broadcast %c0_i32_524 : i32 to vector<1x128xi32>
    %1907 = arith.cmpi eq, %1905, %1906 : vector<1x128xi32>
    %c1_i32_525 = arith.constant 1 : i32
    %1908 = vector.broadcast %c1_i32_525 : i32 to vector<1x128xi32>
    %1909 = arith.cmpi eq, %1905, %1908 : vector<1x128xi32>
    %1910 = vector.broadcast %1902 : f32 to vector<1x128xf32>
    %1911 = vector.broadcast %1904 : f32 to vector<1x128xf32>
    %1912 = arith.select %1909, %1910, %1911 : vector<1x128xi1>, vector<1x128xf32>
    %1913 = vector.broadcast %1898 : f32 to vector<1x128xf32>
    %1914 = arith.select %1907, %1913, %1912 : vector<1x128xi1>, vector<1x128xf32>
    %c0_526 = arith.constant 0 : index
    %c0_527 = arith.constant 0 : index
    %1915 = vector.load %arg3[%c0_526, %c0_527] : memref<1x128xf32, #tpu.memory_space<vmem>>, vector<1x128xf32>
    tpu.vector_store %arg3[%c0_526, %c0_527], %1914 {strides = array<i32>} : memref<1x128xf32, #tpu.memory_space<vmem>>, vector<1x128xf32>,
    return
  }
}

</mosaic_0001>

<bundles_post_ra>
// kernel: tpu_custom_call.1
= control target key start
LH: loop header
LB: loop body
LE: loop exit
PB: predicated region body
PF: predicated region fallthrough
CT: control target
= control target key end

     0   :  { %10 = vsyncpa [#allocation5], 0  ;;  %s4976_s0 = inlined_call_operand.hbm [shape: f32[16,128], index: 0, kind: input, shape index: {}]   ;;  %s4977_s1 = inlined_call_operand.<no memory space> [shape: f32[1], index: 1, kind: input, shape index: {}]   ;;  %s4978_s2 = inlined_call_operand.<no memory space> [shape: f32[1], index: 2, kind: input, shape index: {}]   ;;  %s4979_s3 = inlined_call_operand.hbm [shape: f32[1,128], index: 3, kind: output, shape index: {}]  }
   0x1   :  { %11 = vsyncpa [#allocation6], 0  ;;  %s3022_s12 = smov [#allocation4]  }
   0x2   :  { %s17_s13 = sshll.u32 %s3022_s12, 4  ;;  %s18_s13 = int_to_ptr.vmem [resolvable:$true] %s17_s13 }
   0x3   :  { %s2986_s14 = scalar_lea.vmem %s18_s13, 256  ;;  %p2991_p1 = scmp.lt.s32.totalorder %s18_s13, %s18_s13 }
   0x4   :  { %p2987_p0 = scmp.ne.s32.totalorder %s18_s13, %s2986_s14  ;;  %p2992_p2 = scmp.lt.s32.totalorder %s2986_s14, %s2986_s14 }
   0x6   :  { %p2993_p3 = por %p2992_p2, %p2991_p1 }
   0x8   :  { %p2994_p4 = pnand %p2993_p3, %p2987_p0 }
   0xa   :  { %2997 = shalt.err (!%p2994_p4)
}
   0xb   :  { %s3023_s15 = smov 128   ;;  %s3024_s16 = smov 8  }
   0xc   :  { %23 = dma.hbm_to_vmem [thread:$0]  %s4976_s0, 256, %s18_s13, [#allocation5], %s3023_s15, %s3023_s15, %s3024_s16  }
   0xd   :  { %3018 = dma.done.wait [#allocation5], 256  }
   0xe   :  { %3019 = vsyncadd [#allocation5], 4294967040  ;;  %v31_v0 = vld [vmem:[#allocation4] sm:$0xff]  ;;  %v32_v1 = vld [vmem:[#allocation4 + $0x8] sm:$0xff]  ;;  %v3025_v10 = vmov 0.0  }
   0xf   :  { %vm35_vm0 = vcmp.lt.s32.totalorder %v31_v0, 0  ;;  %vm36_vm1 = vcmp.lt.s32.totalorder %v32_v1, 0  ;;  %v37_v2 = vxor.u32 4294967295, %v31_v0  ;;  %v38_v3 = vxor.u32 4294967295, %v32_v1 }
  0x10   :  { %v39_v4 = vxor.u32 2147483648, %v31_v0  ;;  %v40_v5 = vxor.u32 2147483648, %v32_v1 }
  0x12   :  { %v3051_v6 = vsel %vm35_vm0, %v37_v2, %v39_v4  ;;  %v3053_v7 = vsel %vm36_vm1, %v38_v3, %v40_v5 }
  0x13   :  { %v43_v8 = vand.u32 2147483648, %v3051_v6  ;;  %v44_v9 = vand.u32 2147483648, %v3053_v7  ;;  %v75_v21 = vand.u32 3221225472, %v3051_v6  ;;  %v76_v22 = vand.u32 3221225472, %v3053_v7 }
  0x14   :  { %v157_v3 = vand.u32 3758096384, %v3051_v6  ;;  %v158_v4 = vand.u32 3758096384, %v3053_v7 }
  0x15   :  { %vm45_vm2 = vcmp.eq.s32.totalorder %v43_v8, 0  ;;  %vm46_vm3 = vcmp.eq.s32.totalorder %v44_v9, 0 }
  0x16   :  { %v47_v11 = vsel %vm45_vm2, 1.0, %v3025_v10  ;;  %v48_v12 = vsel %vm46_vm3, 1.0, %v3025_v10 }
  0x17   :  { %v49_v13 = vadd.f32 %v48_v12, %v47_v11 }
  0x19   :  { %50 = vadd.xlane.f32.xlu0 %v49_v13 }
  0xa2   :  { %v51_v14 = vpop.xlane.xlu0 %50 }
  0xa3   :  { %v52_v15 = vrot.slane %v51_v14, 4 }
  0xa5   :  { %v53_v16 = vadd.f32 %v52_v15, %v51_v14 }
  0xa7   :  { %v54_v17 = vrot.slane %v53_v16, 2 }
  0xa9   :  { %v55_v18 = vadd.f32 %v54_v17, %v53_v16 }
  0xab   :  { %v56_v19 = vrot.slane %v55_v18, 1 }
  0xad   :  { %v57_v20 = vadd.f32 %v56_v19, %v55_v18 }
  0xaf   :  { %2712 = vpush %v57_v20 }
  0xe0   :  { %s3059_s0 = spop %2712 }
  0xe1   :  { %p2709_p5 = scmp.le.f32.partialorder %s3059_s0, 103.0  ;;  %p2708_p6 = scmp.le.f32.partialorder %s3059_s0, 102.0 }
  0xe2   :  { %p2710_p7 = scmp.le.f32.partialorder %s3059_s0, 1944.0  ;;  %p2711_p8 = scmp.le.f32.partialorder %s3059_s0, 1945.0 }
  0xe3   :  { %s3069_s19 = scalar_select %p2709_p5, 2147483648, 0 }
  0xe4   :  { %s3073_s20 = scalar_select %p2708_p6, 2147483648, 0 }
  0xe5   :  { %v97_v23 = vstv %s3069_s19  ;;  %s3078_s21 = scalar_select %p2710_p7, 2147483648, 0 }
  0xe6   :  { %vm98_vm4 = vcmp.eq.s32.totalorder %v75_v21, %v97_v23  ;;  %vm99_vm5 = vcmp.eq.s32.totalorder %v76_v22, %v97_v23  ;;  %v77_v24 = vstv %s3073_s20  ;;  %s3083_s22 = scalar_select %p2711_p8, 2147483648, 0 }
  0xe7   :  { %v100_v25 = vsel %vm98_vm4, 1.0, %v3025_v10  ;;  %v101_v26 = vsel %vm99_vm5, 1.0, %v3025_v10  ;;  %vm78_vm6 = vcmp.eq.s32.totalorder %v75_v21, %v77_v24  ;;  %vm79_vm7 = vcmp.eq.s32.totalorder %v76_v22, %v77_v24  ;;  %s61_s23 = ssub.f32 102.0, %s3059_s0  ;;  %s93_s28 = sor.u32 1073741824, %s3073_s20 }
  0xe8   :  { %v102_v27 = vadd.f32 %v101_v26, %v100_v25  ;;  %v80_v28 = vsel %vm78_vm6, 1.0, %v3025_v10  ;;  %v81_v29 = vsel %vm79_vm7, 1.0, %v3025_v10  ;;  %v117_v30 = vstv %s3078_s21  ;;  %s65_s24 = ssub.f32 103.0, %s3059_s0  ;;  %s113_s4 = sor.u32 1073741824, %s3069_s19 }
  0xe9   :  { %v82_v31 = vadd.f32 %v81_v29, %v80_v28  ;;  %vm118_vm8 = vcmp.eq.s32.totalorder %v75_v21, %v117_v30  ;;  %vm119_vm9 = vcmp.eq.s32.totalorder %v76_v22, %v117_v30  ;;  %v137_v32 = vstv %s3083_s22  ;;  %s69_s25 = ssub.f32 1944.0, %s3059_s0  ;;  %s4981_s23 = smov (!%p2708_p6, %s61_s23), 102.0 }
  0xea   :  { %103 = vadd.xlane.f32.xlu1 %v102_v27  ;;  %v120_v33 = vsel %vm118_vm8, 1.0, %v3025_v10  ;;  %v121_v34 = vsel %vm119_vm9, 1.0, %v3025_v10  ;;  %vm138_vm10 = vcmp.eq.s32.totalorder %v75_v21, %v137_v32  ;;  %vm139_vm11 = vcmp.eq.s32.totalorder %v76_v22, %v137_v32  ;;  %s73_s26 = ssub.f32 1945.0, %s3059_s0  ;;  %s4983_s24 = smov (!%p2709_p5, %s65_s24), 103.0 }
  0xeb   :  { %83 = vadd.xlane.f32.xlu0 %v82_v31  ;;  %v140_v35 = vsel %vm138_vm10, 1.0, %v3025_v10  ;;  %v141_v36 = vsel %vm139_vm11, 1.0, %v3025_v10  ;;  %v122_v37 = vadd.f32 %v121_v34, %v120_v33  ;;  %s4985_s25 = smov (!%p2710_p7, %s69_s25), 1944.0  ;;  %s133_s7 = sor.u32 1073741824, %s3078_s21 }
  0xec   :  { %v142_v38 = vadd.f32 %v141_v36, %v140_v35  ;;  %s4987_s26 = smov (!%p2711_p8, %s73_s26), 1945.0  ;;  %s153_s10 = sor.u32 1073741824, %s3083_s22 }
  0xee   :  { %123 = vadd.xlane.f32.xlu1 %v122_v37 }
  0xef   :  { %143 = vadd.xlane.f32.xlu0 %v142_v38 }
 0x173   :  { %v104_v39 = vpop.xlane.xlu1 %103 }
 0x174   :  { %v105_v40 = vrot.slane %v104_v39, 4  ;;  %v84_v41 = vpop.xlane.xlu0 %83 }
 0x175   :  { %v85_v42 = vrot.slane %v84_v41, 4 }
 0x176   :  { %v106_v43 = vadd.f32 %v105_v40, %v104_v39 }
 0x177   :  { %v86_v44 = vadd.f32 %v85_v42, %v84_v41  ;;  %v124_v45 = vpop.xlane.xlu1 %123 }
 0x178   :  { %v125_v46 = vrot.slane %v124_v45, 4  ;;  %v144_v47 = vpop.xlane.xlu0 %143  ;;  %v107_v48 = vrot.slane %v106_v43, 2 }
 0x179   :  { %v145_v49 = vrot.slane %v144_v47, 4  ;;  %v87_v50 = vrot.slane %v86_v44, 2 }
 0x17a   :  { %v126_v51 = vadd.f32 %v125_v46, %v124_v45  ;;  %v108_v52 = vadd.f32 %v107_v48, %v106_v43 }
 0x17b   :  { %v146_v53 = vadd.f32 %v145_v49, %v144_v47  ;;  %v88_v54 = vadd.f32 %v87_v50, %v86_v44 }
 0x17c   :  { %v109_v55 = vrot.slane %v108_v52, 1  ;;  %v127_v56 = vrot.slane %v126_v51, 2 }
 0x17d   :  { %v89_v57 = vrot.slane %v88_v54, 1  ;;  %v147_v58 = vrot.slane %v146_v53, 2 }
 0x17e   :  { %v110_v59 = vadd.f32 %v109_v55, %v108_v52  ;;  %v128_v60 = vadd.f32 %v127_v56, %v126_v51  ;;  %v239_v52 = vand.u32 4026531840, %v3051_v6 }
 0x17f   :  { %v90_v61 = vadd.f32 %v89_v57, %v88_v54  ;;  %v148_v62 = vadd.f32 %v147_v58, %v146_v53  ;;  %v240_v53 = vand.u32 4026531840, %v3053_v7 }
 0x180   :  { %v129_v63 = vrot.slane %v128_v60, 1 }
 0x181   :  { %2714 = vpush %v90_v61  ;;  %v149_v0 = vrot.slane %v148_v62, 1 }
 0x182   :  { %2716 = vpush %v110_v59  ;;  %v130_v1 = vadd.f32 %v129_v63, %v128_v60 }
 0x183   :  { %v150_v2 = vadd.f32 %v149_v0, %v148_v62 }
 0x184   :  { %2718 = vpush %v130_v1 }
 0x185   :  { %2720 = vpush %v150_v2 }
 0x1b2   :  { %s3115_s27 = spop %2714 }
 0x1b3   :  { %p92_p9 = scmp.ge.f32.partialorder %s4981_s23, %s3115_s27  ;;  %s95_s29 = ssub.f32 %s4981_s23, %s3115_s27 }
 0x1b4   :  { %s3122_s30 = spop %2716 }
 0x1b5   :  { %s4989_s28 = smov (!%p92_p9, %s93_s28), %s3073_s20  ;;  %p112_p10 = scmp.ge.f32.partialorder %s4983_s24, %s3122_s30 }
 0x1b6   :  { %s115_s5 = ssub.f32 %s4983_s24, %s3122_s30  ;;  %s3137_s6 = spop %2718  ;;  %v159_v5 = vstv %s4989_s28 }
 0x1b7   :  { %s4991_s4 = smov (!%p112_p10, %s113_s4), %s3069_s19  ;;  %vm160_vm12 = vcmp.eq.s32.totalorder %v157_v3, %v159_v5  ;;  %vm161_vm13 = vcmp.eq.s32.totalorder %v158_v4, %v159_v5  ;;  %p132_p11 = scmp.ge.f32.partialorder %s4985_s25, %s3137_s6 }
 0x1b8   :  { %s135_s8 = ssub.f32 %s4985_s25, %s3137_s6  ;;  %v162_v8 = vsel %vm160_vm12, 1.0, %v3025_v10  ;;  %v163_v9 = vsel %vm161_vm13, 1.0, %v3025_v10  ;;  %s3153_s9 = spop %2720  ;;  %v179_v11 = vstv %s4991_s4 }
 0x1b9   :  { %v164_v12 = vadd.f32 %v163_v9, %v162_v8  ;;  %s4993_s7 = smov (!%p132_p11, %s133_s7), %s3078_s21  ;;  %vm180_vm14 = vcmp.eq.s32.totalorder %v157_v3, %v179_v11  ;;  %vm181_vm15 = vcmp.eq.s32.totalorder %v158_v4, %v179_v11  ;;  %p152_p12 = scmp.ge.f32.partialorder %s4987_s26, %s3153_s9 }
 0x1ba   :  { %s155_s11 = ssub.f32 %s4987_s26, %s3153_s9  ;;  %v182_v13 = vsel %vm180_vm14, 1.0, %v3025_v10  ;;  %v183_v14 = vsel %vm181_vm15, 1.0, %v3025_v10  ;;  %v199_v16 = vstv %s4993_s7  ;;  %s4995_s29 = smov (!%p92_p9, %s95_s29), %s4981_s23 }
 0x1bb   :  { %165 = vadd.xlane.f32.xlu1 %v164_v12  ;;  %v184_v15 = vadd.f32 %v183_v14, %v182_v13  ;;  %s4997_s10 = smov (!%p152_p12, %s153_s10), %s3083_s22  ;;  %vm200_vm0 = vcmp.eq.s32.totalorder %v157_v3, %v199_v16  ;;  %vm201_vm1 = vcmp.eq.s32.totalorder %v158_v4, %v199_v16  ;;  %s4999_s5 = smov (!%p112_p10, %s115_s5), %s4983_s24 }
 0x1bc   :  { %v202_v17 = vsel %vm200_vm0, 1.0, %v3025_v10  ;;  %v203_v18 = vsel %vm201_vm1, 1.0, %v3025_v10  ;;  %v219_v20 = vstv %s4997_s10  ;;  %s5001_s8 = smov (!%p132_p11, %s135_s8), %s4985_s25  ;;  %s5003_s11 = smov (!%p152_p12, %s155_s11), %s4987_s26 }
 0x1bd   :  { %185 = vadd.xlane.f32.xlu0 %v184_v15  ;;  %v204_v19 = vadd.f32 %v203_v18, %v202_v17  ;;  %vm220_vm2 = vcmp.eq.s32.totalorder %v157_v3, %v219_v20  ;;  %vm221_vm3 = vcmp.eq.s32.totalorder %v158_v4, %v219_v20  ;;  %s175_s14 = sor.u32 536870912, %s4989_s28  ;;  %s195_s16 = sor.u32 536870912, %s4991_s4 }
 0x1be   :  { %v222_v21 = vsel %vm220_vm2, 1.0, %v3025_v10  ;;  %v223_v22 = vsel %vm221_vm3, 1.0, %v3025_v10  ;;  %s215_s0 = sor.u32 536870912, %s4993_s7  ;;  %s235_s21 = sor.u32 536870912, %s4997_s10 }
 0x1bf   :  { %205 = vadd.xlane.f32.xlu1 %v204_v19  ;;  %v224_v23 = vadd.f32 %v223_v22, %v222_v21 }
 0x1c1   :  { %225 = vadd.xlane.f32.xlu0 %v224_v23 }
 0x244   :  { %v166_v24 = vpop.xlane.xlu1 %165 }
 0x245   :  { %v167_v25 = vrot.slane %v166_v24, 4 }
 0x246   :  { %v186_v27 = vpop.xlane.xlu0 %185 }
 0x247   :  { %v168_v26 = vadd.f32 %v167_v25, %v166_v24  ;;  %v187_v28 = vrot.slane %v186_v27, 4 }
 0x248   :  { %v206_v31 = vpop.xlane.xlu1 %205 }
 0x249   :  { %v169_v29 = vrot.slane %v168_v26, 2  ;;  %v188_v30 = vadd.f32 %v187_v28, %v186_v27  ;;  %v207_v32 = vrot.slane %v206_v31, 4 }
 0x24a   :  { %v226_v36 = vpop.xlane.xlu0 %225 }
 0x24b   :  { %v170_v33 = vadd.f32 %v169_v29, %v168_v26  ;;  %v189_v34 = vrot.slane %v188_v30, 2  ;;  %v208_v35 = vadd.f32 %v207_v32, %v206_v31  ;;  %v227_v38 = vrot.slane %v226_v36, 4 }
 0x24d   :  { %v171_v37 = vrot.slane %v170_v33, 1  ;;  %v190_v39 = vadd.f32 %v189_v34, %v188_v30  ;;  %v209_v41 = vrot.slane %v208_v35, 2  ;;  %v228_v42 = vadd.f32 %v227_v38, %v226_v36 }
 0x24e   :  { %v322_v38 = vand.u32 4160749568, %v3053_v7 }
 0x24f   :  { %v172_v40 = vadd.f32 %v171_v37, %v170_v33  ;;  %v191_v43 = vrot.slane %v190_v39, 1  ;;  %v210_v44 = vadd.f32 %v209_v41, %v208_v35  ;;  %v229_v46 = vrot.slane %v228_v42, 2 }
 0x250   :  { %v321_v37 = vand.u32 4160749568, %v3051_v6 }
 0x251   :  { %2722 = vpush %v172_v40  ;;  %v192_v45 = vadd.f32 %v191_v43, %v190_v39  ;;  %v211_v47 = vrot.slane %v210_v44, 1  ;;  %v230_v48 = vadd.f32 %v229_v46, %v228_v42 }
 0x253   :  { %2724 = vpush %v192_v45  ;;  %v212_v49 = vadd.f32 %v211_v47, %v210_v44  ;;  %v231_v50 = vrot.slane %v230_v48, 1 }
 0x255   :  { %2726 = vpush %v212_v49  ;;  %v232_v51 = vadd.f32 %v231_v50, %v230_v48 }
 0x257   :  { %2728 = vpush %v232_v51 }
 0x282   :  { %s3211_s12 = spop %2722 }
 0x283   :  { %p174_p13 = scmp.ge.f32.partialorder %s4995_s29, %s3211_s12  ;;  %s177_s13 = ssub.f32 %s4995_s29, %s3211_s12 }
 0x284   :  { %s3226_s15 = spop %2724 }
 0x285   :  { %s5005_s14 = smov (!%p174_p13, %s175_s14), %s4989_s28  ;;  %p194_p0 = scmp.ge.f32.partialorder %s4999_s5, %s3226_s15 }
 0x286   :  { %s197_s17 = ssub.f32 %s4999_s5, %s3226_s15  ;;  %v241_v54 = vstv %s5005_s14  ;;  %s3234_s18 = spop %2726 }
 0x287   :  { %vm242_vm4 = vcmp.eq.s32.totalorder %v239_v52, %v241_v54  ;;  %vm243_vm5 = vcmp.eq.s32.totalorder %v240_v53, %v241_v54  ;;  %s5007_s16 = smov (!%p194_p0, %s195_s16), %s4991_s4  ;;  %p214_p1 = scmp.ge.f32.partialorder %s5001_s8, %s3234_s18 }
 0x288   :  { %v244_v55 = vsel %vm242_vm4, 1.0, %v3025_v10  ;;  %v245_v56 = vsel %vm243_vm5, 1.0, %v3025_v10  ;;  %s217_s19 = ssub.f32 %s5001_s8, %s3234_s18  ;;  %s3249_s20 = spop %2728  ;;  %v261_v58 = vstv %s5007_s16 }
 0x289   :  { %v246_v57 = vadd.f32 %v245_v56, %v244_v55  ;;  %s5009_s0 = smov (!%p214_p1, %s215_s0), %s4993_s7  ;;  %vm262_vm6 = vcmp.eq.s32.totalorder %v239_v52, %v261_v58  ;;  %vm263_vm7 = vcmp.eq.s32.totalorder %v240_v53, %v261_v58  ;;  %p234_p2 = scmp.ge.f32.partialorder %s5003_s11, %s3249_s20 }
 0x28a   :  { %s237_s22 = ssub.f32 %s5003_s11, %s3249_s20  ;;  %v264_v59 = vsel %vm262_vm6, 1.0, %v3025_v10  ;;  %v265_v60 = vsel %vm263_vm7, 1.0, %v3025_v10  ;;  %v281_v62 = vstv %s5009_s0  ;;  %s5011_s13 = smov (!%p174_p13, %s177_s13), %s4995_s29 }
 0x28b   :  { %247 = vadd.xlane.f32.xlu1 %v246_v57  ;;  %v266_v61 = vadd.f32 %v265_v60, %v264_v59  ;;  %s5013_s21 = smov (!%p234_p2, %s235_s21), %s4997_s10  ;;  %vm282_vm8 = vcmp.eq.s32.totalorder %v239_v52, %v281_v62  ;;  %vm283_vm9 = vcmp.eq.s32.totalorder %v240_v53, %v281_v62  ;;  %s5015_s17 = smov (!%p194_p0, %s197_s17), %s4999_s5 }
 0x28c   :  { %v284_v63 = vsel %vm282_vm8, 1.0, %v3025_v10  ;;  %v285_v0 = vsel %vm283_vm9, 1.0, %v3025_v10  ;;  %v301_v2 = vstv %s5013_s21  ;;  %s5017_s19 = smov (!%p214_p1, %s217_s19), %s5001_s8  ;;  %s5019_s22 = smov (!%p234_p2, %s237_s22), %s5003_s11 }
 0x28d   :  { %267 = vadd.xlane.f32.xlu0 %v266_v61  ;;  %v286_v1 = vadd.f32 %v285_v0, %v284_v63  ;;  %vm302_vm10 = vcmp.eq.s32.totalorder %v239_v52, %v301_v2  ;;  %vm303_vm11 = vcmp.eq.s32.totalorder %v240_v53, %v301_v2  ;;  %s257_s25 = sor.u32 268435456, %s5005_s14  ;;  %s277_s27 = sor.u32 268435456, %s5007_s16 }
 0x28e   :  { %v304_v3 = vsel %vm302_vm10, 1.0, %v3025_v10  ;;  %v305_v4 = vsel %vm303_vm11, 1.0, %v3025_v10  ;;  %s297_s30 = sor.u32 268435456, %s5009_s0  ;;  %s317_s6 = sor.u32 268435456, %s5013_s21 }
 0x28f   :  { %287 = vadd.xlane.f32.xlu1 %v286_v1  ;;  %v306_v5 = vadd.f32 %v305_v4, %v304_v3 }
 0x291   :  { %307 = vadd.xlane.f32.xlu0 %v306_v5 }
 0x314   :  { %v248_v8 = vpop.xlane.xlu1 %247 }
 0x315   :  { %v249_v9 = vrot.slane %v248_v8, 4 }
 0x316   :  { %v268_v12 = vpop.xlane.xlu0 %267 }
 0x317   :  { %v250_v11 = vadd.f32 %v249_v9, %v248_v8  ;;  %v269_v13 = vrot.slane %v268_v12, 4 }
 0x318   :  { %v288_v16 = vpop.xlane.xlu1 %287 }
 0x319   :  { %v251_v14 = vrot.slane %v250_v11, 2  ;;  %v270_v15 = vadd.f32 %v269_v13, %v268_v12  ;;  %v289_v18 = vrot.slane %v288_v16, 4 }
 0x31a   :  { %v308_v22 = vpop.xlane.xlu0 %307 }
 0x31b   :  { %v252_v17 = vadd.f32 %v251_v14, %v250_v11  ;;  %v271_v20 = vrot.slane %v270_v15, 2  ;;  %v290_v21 = vadd.f32 %v289_v18, %v288_v16  ;;  %v309_v23 = vrot.slane %v308_v22, 4 }
 0x31d   :  { %v253_v19 = vrot.slane %v252_v17, 1  ;;  %v272_v25 = vadd.f32 %v271_v20, %v270_v15  ;;  %v291_v26 = vrot.slane %v290_v21, 2  ;;  %v310_v27 = vadd.f32 %v309_v23, %v308_v22 }
 0x31e   :  { %v403_v22 = vand.u32 4227858432, %v3051_v6  ;;  %v404_v23 = vand.u32 4227858432, %v3053_v7 }
 0x31f   :  { %v254_v24 = vadd.f32 %v253_v19, %v252_v17  ;;  %v273_v28 = vrot.slane %v272_v25, 1  ;;  %v292_v29 = vadd.f32 %v291_v26, %v290_v21  ;;  %v311_v31 = vrot.slane %v310_v27, 2 }
 0x321   :  { %2730 = vpush %v254_v24  ;;  %v274_v30 = vadd.f32 %v273_v28, %v272_v25  ;;  %v293_v32 = vrot.slane %v292_v29, 1  ;;  %v312_v33 = vadd.f32 %v311_v31, %v310_v27 }
 0x323   :  { %2732 = vpush %v274_v30  ;;  %v294_v34 = vadd.f32 %v293_v32, %v292_v29  ;;  %v313_v35 = vrot.slane %v312_v33, 1 }
 0x325   :  { %2734 = vpush %v294_v34  ;;  %v314_v36 = vadd.f32 %v313_v35, %v312_v33 }
 0x327   :  { %2736 = vpush %v314_v36 }
 0x352   :  { %s2731_s23 = spop %2730 }
 0x353   :  { %p256_p3 = scmp.ge.f32.partialorder %s5011_s13, %s2731_s23  ;;  %s259_s24 = ssub.f32 %s5011_s13, %s2731_s23 }
 0x354   :  { %s3315_s26 = spop %2732 }
 0x355   :  { %s5021_s25 = smov (!%p256_p3, %s257_s25), %s5005_s14  ;;  %p276_p4 = scmp.ge.f32.partialorder %s5015_s17, %s3315_s26 }
 0x356   :  { %s279_s28 = ssub.f32 %s5015_s17, %s3315_s26  ;;  %v323_v39 = vstv %s5021_s25  ;;  %s5023_s24 = smov (!%p256_p3, %s259_s24), %s5011_s13 }
 0x357   :  { %vm324_vm12 = vcmp.eq.s32.totalorder %v321_v37, %v323_v39  ;;  %vm325_vm13 = vcmp.eq.s32.totalorder %v322_v38, %v323_v39  ;;  %s5025_s27 = smov (!%p276_p4, %s277_s27), %s5007_s16  ;;  %s2735_s29 = spop %2734 }
 0x358   :  { %v326_v40 = vsel %vm324_vm12, 1.0, %v3025_v10  ;;  %v327_v41 = vsel %vm325_vm13, 1.0, %v3025_v10  ;;  %p296_p5 = scmp.ge.f32.partialorder %s5017_s19, %s2735_s29  ;;  %s299_s4 = ssub.f32 %s5017_s19, %s2735_s29  ;;  %v343_v43 = vstv %s5025_s27 }
 0x359   :  { %v328_v42 = vadd.f32 %v327_v41, %v326_v40  ;;  %s2737_s5 = spop %2736  ;;  %vm344_vm14 = vcmp.eq.s32.totalorder %v321_v37, %v343_v43  ;;  %vm345_vm15 = vcmp.eq.s32.totalorder %v322_v38, %v343_v43  ;;  %s5029_s28 = smov (!%p276_p4, %s279_s28), %s5015_s17 }
 0x35a   :  { %s5027_s30 = smov (!%p296_p5, %s297_s30), %s5009_s0  ;;  %v346_v44 = vsel %vm344_vm14, 1.0, %v3025_v10  ;;  %v347_v45 = vsel %vm345_vm15, 1.0, %v3025_v10  ;;  %p316_p6 = scmp.ge.f32.partialorder %s5019_s22, %s2737_s5 }
 0x35b   :  { %329 = vadd.xlane.f32.xlu1 %v328_v42  ;;  %s319_s7 = ssub.f32 %s5019_s22, %s2737_s5  ;;  %v348_v46 = vadd.f32 %v347_v45, %v346_v44  ;;  %v363_v47 = vstv %s5027_s30  ;;  %s5033_s4 = smov (!%p296_p5, %s299_s4), %s5017_s19 }
 0x35c   :  { %s5031_s6 = smov (!%p316_p6, %s317_s6), %s5013_s21  ;;  %vm364_vm0 = vcmp.eq.s32.totalorder %v321_v37, %v363_v47  ;;  %vm365_vm1 = vcmp.eq.s32.totalorder %v322_v38, %v363_v47  ;;  %s339_s10 = sor.u32 134217728, %s5021_s25 }
 0x35d   :  { %349 = vadd.xlane.f32.xlu0 %v348_v46  ;;  %v366_v48 = vsel %vm364_vm0, 1.0, %v3025_v10  ;;  %v367_v49 = vsel %vm365_vm1, 1.0, %v3025_v10  ;;  %v383_v51 = vstv %s5031_s6  ;;  %s5035_s7 = smov (!%p316_p6, %s319_s7), %s5019_s22  ;;  %s359_s12 = sor.u32 134217728, %s5025_s27 }
 0x35e   :  { %v368_v50 = vadd.f32 %v367_v49, %v366_v48  ;;  %vm384_vm2 = vcmp.eq.s32.totalorder %v321_v37, %v383_v51  ;;  %vm385_vm3 = vcmp.eq.s32.totalorder %v322_v38, %v383_v51  ;;  %s379_s15 = sor.u32 134217728, %s5027_s30  ;;  %s399_s18 = sor.u32 134217728, %s5031_s6 }
 0x35f   :  { %v386_v52 = vsel %vm384_vm2, 1.0, %v3025_v10  ;;  %v387_v53 = vsel %vm385_vm3, 1.0, %v3025_v10 }
 0x360   :  { %369 = vadd.xlane.f32.xlu1 %v368_v50  ;;  %v388_v54 = vadd.f32 %v387_v53, %v386_v52 }
 0x362   :  { %389 = vadd.xlane.f32.xlu0 %v388_v54 }
 0x3e4   :  { %v330_v55 = vpop.xlane.xlu1 %329 }
 0x3e5   :  { %v331_v56 = vrot.slane %v330_v55, 4 }
 0x3e6   :  { %v350_v58 = vpop.xlane.xlu0 %349 }
 0x3e7   :  { %v332_v57 = vadd.f32 %v331_v56, %v330_v55  ;;  %v351_v59 = vrot.slane %v350_v58, 4 }
 0x3e9   :  { %v333_v60 = vrot.slane %v332_v57, 2  ;;  %v352_v61 = vadd.f32 %v351_v59, %v350_v58  ;;  %v370_v63 = vpop.xlane.xlu1 %369 }
 0x3ea   :  { %v371_v0 = vrot.slane %v370_v63, 4 }
 0x3eb   :  { %v334_v62 = vadd.f32 %v333_v60, %v332_v57  ;;  %v353_v2 = vrot.slane %v352_v61, 2  ;;  %v390_v4 = vpop.xlane.xlu0 %389 }
 0x3ec   :  { %v372_v3 = vadd.f32 %v371_v0, %v370_v63  ;;  %v391_v9 = vrot.slane %v390_v4, 4 }
 0x3ed   :  { %v335_v1 = vrot.slane %v334_v62, 1  ;;  %v354_v8 = vadd.f32 %v353_v2, %v352_v61 }
 0x3ee   :  { %v373_v12 = vrot.slane %v372_v3, 2  ;;  %v392_v13 = vadd.f32 %v391_v9, %v390_v4  ;;  %v485_v4 = vand.u32 4261412864, %v3051_v6 }
 0x3ef   :  { %v336_v5 = vadd.f32 %v335_v1, %v334_v62  ;;  %v355_v11 = vrot.slane %v354_v8, 1 }
 0x3f0   :  { %v374_v15 = vadd.f32 %v373_v12, %v372_v3  ;;  %v393_v16 = vrot.slane %v392_v13, 2 }
 0x3f1   :  { %2738 = vpush %v336_v5  ;;  %v356_v14 = vadd.f32 %v355_v11, %v354_v8  ;;  %v486_v5 = vand.u32 4261412864, %v3053_v7 }
 0x3f2   :  { %v375_v17 = vrot.slane %v374_v15, 1  ;;  %v394_v18 = vadd.f32 %v393_v16, %v392_v13 }
 0x3f3   :  { %2740 = vpush %v356_v14 }
 0x3f4   :  { %v376_v19 = vadd.f32 %v375_v17, %v374_v15  ;;  %v395_v20 = vrot.slane %v394_v18, 1 }
 0x3f6   :  { %2742 = vpush %v376_v19  ;;  %v396_v21 = vadd.f32 %v395_v20, %v394_v18 }
 0x3f8   :  { %2744 = vpush %v396_v21 }
 0x422   :  { %s2739_s8 = spop %2738 }
 0x423   :  { %p338_p7 = scmp.ge.f32.partialorder %s5023_s24, %s2739_s8  ;;  %s341_s9 = ssub.f32 %s5023_s24, %s2739_s8 }
 0x424   :  { %s2741_s11 = spop %2740 }
 0x425   :  { %s5037_s10 = smov (!%p338_p7, %s339_s10), %s5021_s25  ;;  %p358_p8 = scmp.ge.f32.partialorder %s5029_s28, %s2741_s11 }
 0x426   :  { %s361_s13 = ssub.f32 %s5029_s28, %s2741_s11  ;;  %v405_v24 = vstv %s5037_s10  ;;  %s5039_s9 = smov (!%p338_p7, %s341_s9), %s5023_s24 }
 0x427   :  { %vm406_vm4 = vcmp.eq.s32.totalorder %v403_v22, %v405_v24  ;;  %vm407_vm5 = vcmp.eq.s32.totalorder %v404_v23, %v405_v24  ;;  %s5041_s12 = smov (!%p358_p8, %s359_s12), %s5025_s27  ;;  %s2743_s14 = spop %2742 }
 0x428   :  { %v408_v25 = vsel %vm406_vm4, 1.0, %v3025_v10  ;;  %v409_v26 = vsel %vm407_vm5, 1.0, %v3025_v10  ;;  %p378_p9 = scmp.ge.f32.partialorder %s5033_s4, %s2743_s14  ;;  %s381_s16 = ssub.f32 %s5033_s4, %s2743_s14  ;;  %v425_v28 = vstv %s5041_s12 }
 0x429   :  { %v410_v27 = vadd.f32 %v409_v26, %v408_v25  ;;  %vm426_vm6 = vcmp.eq.s32.totalorder %v403_v22, %v425_v28  ;;  %vm427_vm7 = vcmp.eq.s32.totalorder %v404_v23, %v425_v28  ;;  %s5043_s13 = smov (!%p358_p8, %s361_s13), %s5029_s28  ;;  %s2745_s17 = spop %2744 }
 0x42a   :  { %s5045_s15 = smov (!%p378_p9, %s379_s15), %s5027_s30  ;;  %v428_v29 = vsel %vm426_vm6, 1.0, %v3025_v10  ;;  %v429_v30 = vsel %vm427_vm7, 1.0, %v3025_v10  ;;  %p398_p10 = scmp.ge.f32.partialorder %s5035_s7, %s2745_s17 }
 0x42b   :  { %411 = vadd.xlane.f32.xlu1 %v410_v27  ;;  %v430_v31 = vadd.f32 %v429_v30, %v428_v29  ;;  %s401_s0 = ssub.f32 %s5035_s7, %s2745_s17  ;;  %v445_v32 = vstv %s5045_s15  ;;  %s5047_s16 = smov (!%p378_p9, %s381_s16), %s5033_s4 }
 0x42c   :  { %vm446_vm8 = vcmp.eq.s32.totalorder %v403_v22, %v445_v32  ;;  %vm447_vm9 = vcmp.eq.s32.totalorder %v404_v23, %v445_v32  ;;  %s5049_s18 = smov (!%p398_p10, %s399_s18), %s5031_s6  ;;  %s421_s21 = sor.u32 67108864, %s5037_s10 }
 0x42d   :  { %431 = vadd.xlane.f32.xlu0 %v430_v31  ;;  %v448_v33 = vsel %vm446_vm8, 1.0, %v3025_v10  ;;  %v449_v34 = vsel %vm447_vm9, 1.0, %v3025_v10  ;;  %v465_v36 = vstv %s5049_s18  ;;  %s5051_s0 = smov (!%p398_p10, %s401_s0), %s5035_s7  ;;  %s441_s23 = sor.u32 67108864, %s5041_s12 }
 0x42e   :  { %v450_v35 = vadd.f32 %v449_v34, %v448_v33  ;;  %vm466_vm10 = vcmp.eq.s32.totalorder %v403_v22, %v465_v36  ;;  %vm467_vm11 = vcmp.eq.s32.totalorder %v404_v23, %v465_v36  ;;  %s461_s26 = sor.u32 67108864, %s5045_s15  ;;  %s481_s29 = sor.u32 67108864, %s5049_s18 }
 0x42f   :  { %v468_v37 = vsel %vm466_vm10, 1.0, %v3025_v10  ;;  %v469_v38 = vsel %vm467_vm11, 1.0, %v3025_v10 }
 0x430   :  { %451 = vadd.xlane.f32.xlu1 %v450_v35  ;;  %v470_v39 = vadd.f32 %v469_v38, %v468_v37 }
 0x432   :  { %471 = vadd.xlane.f32.xlu0 %v470_v39 }
 0x4b4   :  { %v412_v40 = vpop.xlane.xlu1 %411 }
 0x4b5   :  { %v413_v41 = vrot.slane %v412_v40, 4 }
 0x4b6   :  { %v432_v43 = vpop.xlane.xlu0 %431 }
 0x4b7   :  { %v414_v42 = vadd.f32 %v413_v41, %v412_v40  ;;  %v433_v44 = vrot.slane %v432_v43, 4 }
 0x4b9   :  { %v415_v45 = vrot.slane %v414_v42, 2  ;;  %v434_v46 = vadd.f32 %v433_v44, %v432_v43  ;;  %v452_v48 = vpop.xlane.xlu1 %451 }
 0x4ba   :  { %v453_v49 = vrot.slane %v452_v48, 4 }
 0x4bb   :  { %v416_v47 = vadd.f32 %v415_v45, %v414_v42  ;;  %v435_v51 = vrot.slane %v434_v46, 2  ;;  %v472_v55 = vpop.xlane.xlu0 %471 }
 0x4bc   :  { %v454_v52 = vadd.f32 %v453_v49, %v452_v48  ;;  %v473_v56 = vrot.slane %v472_v55, 4 }
 0x4bd   :  { %v417_v50 = vrot.slane %v416_v47, 1  ;;  %v436_v54 = vadd.f32 %v435_v51, %v434_v46 }
 0x4be   :  { %v455_v58 = vrot.slane %v454_v52, 2  ;;  %v474_v59 = vadd.f32 %v473_v56, %v472_v55 }
 0x4bf   :  { %v418_v53 = vadd.f32 %v417_v50, %v416_v47  ;;  %v437_v57 = vrot.slane %v436_v54, 1 }
 0x4c0   :  { %v456_v61 = vadd.f32 %v455_v58, %v454_v52  ;;  %v475_v63 = vrot.slane %v474_v59, 2 }
 0x4c1   :  { %2746 = vpush %v418_v53  ;;  %v438_v60 = vadd.f32 %v437_v57, %v436_v54  ;;  %v567_v53 = vand.u32 4278190080, %v3051_v6  ;;  %v568_v54 = vand.u32 4278190080, %v3053_v7 }
 0x4c2   :  { %v457_v62 = vrot.slane %v456_v61, 1  ;;  %v476_v1 = vadd.f32 %v475_v63, %v474_v59 }
 0x4c3   :  { %2748 = vpush %v438_v60 }
 0x4c4   :  { %v458_v0 = vadd.f32 %v457_v62, %v456_v61  ;;  %v477_v2 = vrot.slane %v476_v1, 1 }
 0x4c6   :  { %2750 = vpush %v458_v0  ;;  %v478_v3 = vadd.f32 %v477_v2, %v476_v1 }
 0x4c8   :  { %2752 = vpush %v478_v3 }
 0x4f2   :  { %s2747_s19 = spop %2746 }
 0x4f3   :  { %p420_p11 = scmp.ge.f32.partialorder %s5039_s9, %s2747_s19  ;;  %s423_s20 = ssub.f32 %s5039_s9, %s2747_s19 }
 0x4f4   :  { %s2749_s22 = spop %2748 }
 0x4f5   :  { %s5053_s21 = smov (!%p420_p11, %s421_s21), %s5037_s10  ;;  %p440_p12 = scmp.ge.f32.partialorder %s5043_s13, %s2749_s22 }
 0x4f6   :  { %s443_s24 = ssub.f32 %s5043_s13, %s2749_s22  ;;  %v487_v8 = vstv %s5053_s21  ;;  %s5055_s20 = smov (!%p420_p11, %s423_s20), %s5039_s9 }
 0x4f7   :  { %vm488_vm12 = vcmp.eq.s32.totalorder %v485_v4, %v487_v8  ;;  %vm489_vm13 = vcmp.eq.s32.totalorder %v486_v5, %v487_v8  ;;  %s5057_s23 = smov (!%p440_p12, %s441_s23), %s5041_s12  ;;  %s2751_s25 = spop %2750 }
 0x4f8   :  { %v490_v9 = vsel %vm488_vm12, 1.0, %v3025_v10  ;;  %v491_v11 = vsel %vm489_vm13, 1.0, %v3025_v10  ;;  %p460_p13 = scmp.ge.f32.partialorder %s5047_s16, %s2751_s25  ;;  %s463_s27 = ssub.f32 %s5047_s16, %s2751_s25  ;;  %v507_v13 = vstv %s5057_s23 }
 0x4f9   :  { %v492_v12 = vadd.f32 %v491_v11, %v490_v9  ;;  %vm508_vm14 = vcmp.eq.s32.totalorder %v485_v4, %v507_v13  ;;  %vm509_vm15 = vcmp.eq.s32.totalorder %v486_v5, %v507_v13  ;;  %s5059_s24 = smov (!%p440_p12, %s443_s24), %s5043_s13  ;;  %s2753_s28 = spop %2752 }
 0x4fa   :  { %s5061_s26 = smov (!%p460_p13, %s461_s26), %s5045_s15  ;;  %v510_v14 = vsel %vm508_vm14, 1.0, %v3025_v10  ;;  %v511_v15 = vsel %vm509_vm15, 1.0, %v3025_v10  ;;  %p480_p0 = scmp.ge.f32.partialorder %s5051_s0, %s2753_s28 }
 0x4fb   :  { %493 = vadd.xlane.f32.xlu1 %v492_v12  ;;  %v512_v16 = vadd.f32 %v511_v15, %v510_v14  ;;  %s483_s30 = ssub.f32 %s5051_s0, %s2753_s28  ;;  %v527_v17 = vstv %s5061_s26  ;;  %s5063_s27 = smov (!%p460_p13, %s463_s27), %s5047_s16 }
 0x4fc   :  { %vm528_vm0 = vcmp.eq.s32.totalorder %v485_v4, %v527_v17  ;;  %vm529_vm1 = vcmp.eq.s32.totalorder %v486_v5, %v527_v17  ;;  %s5065_s29 = smov (!%p480_p0, %s481_s29), %s5049_s18  ;;  %s503_s6 = sor.u32 33554432, %s5053_s21 }
 0x4fd   :  { %513 = vadd.xlane.f32.xlu0 %v512_v16  ;;  %v530_v18 = vsel %vm528_vm0, 1.0, %v3025_v10  ;;  %v531_v19 = vsel %vm529_vm1, 1.0, %v3025_v10  ;;  %v547_v21 = vstv %s5065_s29  ;;  %s5067_s30 = smov (!%p480_p0, %s483_s30), %s5051_s0  ;;  %s523_s8 = sor.u32 33554432, %s5057_s23 }
 0x4fe   :  { %v532_v20 = vadd.f32 %v531_v19, %v530_v18  ;;  %vm548_vm2 = vcmp.eq.s32.totalorder %v485_v4, %v547_v21  ;;  %vm549_vm3 = vcmp.eq.s32.totalorder %v486_v5, %v547_v21  ;;  %s543_s11 = sor.u32 33554432, %s5061_s26  ;;  %s563_s14 = sor.u32 33554432, %s5065_s29 }
 0x4ff   :  { %v550_v22 = vsel %vm548_vm2, 1.0, %v3025_v10  ;;  %v551_v23 = vsel %vm549_vm3, 1.0, %v3025_v10 }
 0x500   :  { %533 = vadd.xlane.f32.xlu1 %v532_v20  ;;  %v552_v24 = vadd.f32 %v551_v23, %v550_v22 }
 0x502   :  { %553 = vadd.xlane.f32.xlu0 %v552_v24 }
 0x584   :  { %v494_v25 = vpop.xlane.xlu1 %493 }
 0x585   :  { %v495_v26 = vrot.slane %v494_v25, 4 }
 0x586   :  { %v514_v28 = vpop.xlane.xlu0 %513 }
 0x587   :  { %v496_v27 = vadd.f32 %v495_v26, %v494_v25  ;;  %v515_v29 = vrot.slane %v514_v28, 4 }
 0x589   :  { %v497_v30 = vrot.slane %v496_v27, 2  ;;  %v516_v31 = vadd.f32 %v515_v29, %v514_v28  ;;  %v534_v33 = vpop.xlane.xlu1 %533 }
 0x58a   :  { %v535_v34 = vrot.slane %v534_v33, 4 }
 0x58b   :  { %v498_v32 = vadd.f32 %v497_v30, %v496_v27  ;;  %v517_v36 = vrot.slane %v516_v31, 2  ;;  %v554_v40 = vpop.xlane.xlu0 %553 }
 0x58c   :  { %v536_v37 = vadd.f32 %v535_v34, %v534_v33  ;;  %v555_v41 = vrot.slane %v554_v40, 4 }
 0x58d   :  { %v499_v35 = vrot.slane %v498_v32, 1  ;;  %v518_v39 = vadd.f32 %v517_v36, %v516_v31 }
 0x58e   :  { %v537_v43 = vrot.slane %v536_v37, 2  ;;  %v556_v44 = vadd.f32 %v555_v41, %v554_v40 }
 0x58f   :  { %v500_v38 = vadd.f32 %v499_v35, %v498_v32  ;;  %v519_v42 = vrot.slane %v518_v39, 1 }
 0x590   :  { %v538_v46 = vadd.f32 %v537_v43, %v536_v37  ;;  %v557_v48 = vrot.slane %v556_v44, 2 }
 0x591   :  { %2754 = vpush %v500_v38  ;;  %v520_v45 = vadd.f32 %v519_v42, %v518_v39  ;;  %v649_v38 = vand.u32 4286578688, %v3051_v6  ;;  %v650_v39 = vand.u32 4286578688, %v3053_v7 }
 0x592   :  { %v539_v47 = vrot.slane %v538_v46, 1  ;;  %v558_v50 = vadd.f32 %v557_v48, %v556_v44 }
 0x593   :  { %2756 = vpush %v520_v45 }
 0x594   :  { %v540_v49 = vadd.f32 %v539_v47, %v538_v46  ;;  %v559_v51 = vrot.slane %v558_v50, 1 }
 0x596   :  { %2758 = vpush %v540_v49  ;;  %v560_v52 = vadd.f32 %v559_v51, %v558_v50 }
 0x598   :  { %2760 = vpush %v560_v52 }
 0x5c2   :  { %s2755_s4 = spop %2754 }
 0x5c3   :  { %p502_p1 = scmp.ge.f32.partialorder %s5055_s20, %s2755_s4  ;;  %s505_s5 = ssub.f32 %s5055_s20, %s2755_s4 }
 0x5c4   :  { %s2757_s7 = spop %2756 }
 0x5c5   :  { %s5069_s6 = smov (!%p502_p1, %s503_s6), %s5053_s21  ;;  %p522_p2 = scmp.ge.f32.partialorder %s5059_s24, %s2757_s7 }
 0x5c6   :  { %s525_s9 = ssub.f32 %s5059_s24, %s2757_s7  ;;  %v569_v55 = vstv %s5069_s6  ;;  %s5071_s5 = smov (!%p502_p1, %s505_s5), %s5055_s20 }
 0x5c7   :  { %vm570_vm4 = vcmp.eq.s32.totalorder %v567_v53, %v569_v55  ;;  %vm571_vm5 = vcmp.eq.s32.totalorder %v568_v54, %v569_v55  ;;  %s5073_s8 = smov (!%p522_p2, %s523_s8), %s5057_s23  ;;  %s2759_s10 = spop %2758 }
 0x5c8   :  { %v572_v56 = vsel %vm570_vm4, 1.0, %v3025_v10  ;;  %v573_v57 = vsel %vm571_vm5, 1.0, %v3025_v10  ;;  %p542_p3 = scmp.ge.f32.partialorder %s5063_s27, %s2759_s10  ;;  %s545_s12 = ssub.f32 %s5063_s27, %s2759_s10  ;;  %v589_v59 = vstv %s5073_s8 }
 0x5c9   :  { %v574_v58 = vadd.f32 %v573_v57, %v572_v56  ;;  %vm590_vm6 = vcmp.eq.s32.totalorder %v567_v53, %v589_v59  ;;  %vm591_vm7 = vcmp.eq.s32.totalorder %v568_v54, %v589_v59  ;;  %s5075_s9 = smov (!%p522_p2, %s525_s9), %s5059_s24  ;;  %s2761_s13 = spop %2760 }
 0x5ca   :  { %s5077_s11 = smov (!%p542_p3, %s543_s11), %s5061_s26  ;;  %v592_v60 = vsel %vm590_vm6, 1.0, %v3025_v10  ;;  %v593_v61 = vsel %vm591_vm7, 1.0, %v3025_v10  ;;  %p562_p4 = scmp.ge.f32.partialorder %s5067_s30, %s2761_s13 }
 0x5cb   :  { %575 = vadd.xlane.f32.xlu1 %v574_v58  ;;  %v594_v62 = vadd.f32 %v593_v61, %v592_v60  ;;  %s565_s15 = ssub.f32 %s5067_s30, %s2761_s13  ;;  %v609_v63 = vstv %s5077_s11  ;;  %s5079_s12 = smov (!%p542_p3, %s545_s12), %s5063_s27 }
 0x5cc   :  { %vm610_vm8 = vcmp.eq.s32.totalorder %v567_v53, %v609_v63  ;;  %vm611_vm9 = vcmp.eq.s32.totalorder %v568_v54, %v609_v63  ;;  %s5081_s14 = smov (!%p562_p4, %s563_s14), %s5065_s29  ;;  %s585_s18 = sor.u32 16777216, %s5069_s6 }
 0x5cd   :  { %595 = vadd.xlane.f32.xlu0 %v594_v62  ;;  %v612_v0 = vsel %vm610_vm8, 1.0, %v3025_v10  ;;  %v613_v1 = vsel %vm611_vm9, 1.0, %v3025_v10  ;;  %v629_v3 = vstv %s5081_s14  ;;  %s5083_s15 = smov (!%p562_p4, %s565_s15), %s5067_s30  ;;  %s605_s19 = sor.u32 16777216, %s5073_s8 }
 0x5ce   :  { %v614_v2 = vadd.f32 %v613_v1, %v612_v0  ;;  %vm630_vm10 = vcmp.eq.s32.totalorder %v567_v53, %v629_v3  ;;  %vm631_vm11 = vcmp.eq.s32.totalorder %v568_v54, %v629_v3  ;;  %s625_s22 = sor.u32 16777216, %s5077_s11  ;;  %s645_s25 = sor.u32 16777216, %s5081_s14 }
 0x5cf   :  { %v632_v4 = vsel %vm630_vm10, 1.0, %v3025_v10  ;;  %v633_v5 = vsel %vm631_vm11, 1.0, %v3025_v10 }
 0x5d0   :  { %615 = vadd.xlane.f32.xlu1 %v614_v2  ;;  %v634_v8 = vadd.f32 %v633_v5, %v632_v4 }
 0x5d2   :  { %635 = vadd.xlane.f32.xlu0 %v634_v8 }
 0x654   :  { %v576_v9 = vpop.xlane.xlu1 %575 }
 0x655   :  { %v577_v11 = vrot.slane %v576_v9, 4 }
 0x656   :  { %v596_v13 = vpop.xlane.xlu0 %595 }
 0x657   :  { %v578_v12 = vadd.f32 %v577_v11, %v576_v9  ;;  %v597_v14 = vrot.slane %v596_v13, 4 }
 0x659   :  { %v579_v15 = vrot.slane %v578_v12, 2  ;;  %v598_v16 = vadd.f32 %v597_v14, %v596_v13  ;;  %v616_v18 = vpop.xlane.xlu1 %615 }
 0x65a   :  { %v617_v19 = vrot.slane %v616_v18, 4 }
 0x65b   :  { %v580_v17 = vadd.f32 %v579_v15, %v578_v12  ;;  %v599_v21 = vrot.slane %v598_v16, 2  ;;  %v636_v25 = vpop.xlane.xlu0 %635 }
 0x65c   :  { %v618_v22 = vadd.f32 %v617_v19, %v616_v18  ;;  %v637_v26 = vrot.slane %v636_v25, 4 }
 0x65d   :  { %v581_v20 = vrot.slane %v580_v17, 1  ;;  %v600_v24 = vadd.f32 %v599_v21, %v598_v16 }
 0x65e   :  { %v619_v28 = vrot.slane %v618_v22, 2  ;;  %v638_v29 = vadd.f32 %v637_v26, %v636_v25 }
 0x65f   :  { %v582_v23 = vadd.f32 %v581_v20, %v580_v17  ;;  %v601_v27 = vrot.slane %v600_v24, 1 }
 0x660   :  { %v620_v31 = vadd.f32 %v619_v28, %v618_v22  ;;  %v639_v33 = vrot.slane %v638_v29, 2 }
 0x661   :  { %2762 = vpush %v582_v23  ;;  %v602_v30 = vadd.f32 %v601_v27, %v600_v24  ;;  %v731_v23 = vand.u32 4290772992, %v3051_v6  ;;  %v732_v24 = vand.u32 4290772992, %v3053_v7 }
 0x662   :  { %v621_v32 = vrot.slane %v620_v31, 1  ;;  %v640_v35 = vadd.f32 %v639_v33, %v638_v29 }
 0x663   :  { %2764 = vpush %v602_v30 }
 0x664   :  { %v622_v34 = vadd.f32 %v621_v32, %v620_v31  ;;  %v641_v36 = vrot.slane %v640_v35, 1 }
 0x666   :  { %2766 = vpush %v622_v34  ;;  %v642_v37 = vadd.f32 %v641_v36, %v640_v35 }
 0x668   :  { %2768 = vpush %v642_v37 }
 0x692   :  { %s2763_s16 = spop %2762 }
 0x693   :  { %p584_p5 = scmp.ge.f32.partialorder %s5071_s5, %s2763_s16  ;;  %s587_s17 = ssub.f32 %s5071_s5, %s2763_s16 }
 0x694   :  { %s2765_s0 = spop %2764 }
 0x695   :  { %s5085_s18 = smov (!%p584_p5, %s585_s18), %s5069_s6  ;;  %p604_p6 = scmp.ge.f32.partialorder %s5075_s9, %s2765_s0 }
 0x696   :  { %s607_s20 = ssub.f32 %s5075_s9, %s2765_s0  ;;  %v651_v40 = vstv %s5085_s18  ;;  %s5087_s17 = smov (!%p584_p5, %s587_s17), %s5071_s5 }
 0x697   :  { %vm652_vm12 = vcmp.eq.s32.totalorder %v649_v38, %v651_v40  ;;  %vm653_vm13 = vcmp.eq.s32.totalorder %v650_v39, %v651_v40  ;;  %s5089_s19 = smov (!%p604_p6, %s605_s19), %s5073_s8  ;;  %s2767_s21 = spop %2766 }
 0x698   :  { %v654_v41 = vsel %vm652_vm12, 1.0, %v3025_v10  ;;  %v655_v42 = vsel %vm653_vm13, 1.0, %v3025_v10  ;;  %p624_p7 = scmp.ge.f32.partialorder %s5079_s12, %s2767_s21  ;;  %s627_s23 = ssub.f32 %s5079_s12, %s2767_s21  ;;  %v671_v44 = vstv %s5089_s19 }
 0x699   :  { %v656_v43 = vadd.f32 %v655_v42, %v654_v41  ;;  %vm672_vm14 = vcmp.eq.s32.totalorder %v649_v38, %v671_v44  ;;  %vm673_vm15 = vcmp.eq.s32.totalorder %v650_v39, %v671_v44  ;;  %s5091_s20 = smov (!%p604_p6, %s607_s20), %s5075_s9  ;;  %s2769_s24 = spop %2768 }
 0x69a   :  { %s5093_s22 = smov (!%p624_p7, %s625_s22), %s5077_s11  ;;  %v674_v45 = vsel %vm672_vm14, 1.0, %v3025_v10  ;;  %v675_v46 = vsel %vm673_vm15, 1.0, %v3025_v10  ;;  %p644_p8 = scmp.ge.f32.partialorder %s5083_s15, %s2769_s24 }
 0x69b   :  { %657 = vadd.xlane.f32.xlu1 %v656_v43  ;;  %v676_v47 = vadd.f32 %v675_v46, %v674_v45  ;;  %s647_s26 = ssub.f32 %s5083_s15, %s2769_s24  ;;  %v691_v48 = vstv %s5093_s22  ;;  %s5095_s23 = smov (!%p624_p7, %s627_s23), %s5079_s12 }
 0x69c   :  { %vm692_vm0 = vcmp.eq.s32.totalorder %v649_v38, %v691_v48  ;;  %vm693_vm1 = vcmp.eq.s32.totalorder %v650_v39, %v691_v48  ;;  %s5097_s25 = smov (!%p644_p8, %s645_s25), %s5081_s14  ;;  %s667_s29 = sor.u32 8388608, %s5085_s18 }
 0x69d   :  { %677 = vadd.xlane.f32.xlu0 %v676_v47  ;;  %v694_v49 = vsel %vm692_vm0, 1.0, %v3025_v10  ;;  %v695_v50 = vsel %vm693_vm1, 1.0, %v3025_v10  ;;  %v711_v52 = vstv %s5097_s25  ;;  %s5099_s26 = smov (!%p644_p8, %s647_s26), %s5083_s15  ;;  %s687_s4 = sor.u32 8388608, %s5089_s19 }
 0x69e   :  { %v696_v51 = vadd.f32 %v695_v50, %v694_v49  ;;  %vm712_vm2 = vcmp.eq.s32.totalorder %v649_v38, %v711_v52  ;;  %vm713_vm3 = vcmp.eq.s32.totalorder %v650_v39, %v711_v52  ;;  %s707_s7 = sor.u32 8388608, %s5093_s22  ;;  %s727_s10 = sor.u32 8388608, %s5097_s25 }
 0x69f   :  { %v714_v53 = vsel %vm712_vm2, 1.0, %v3025_v10  ;;  %v715_v54 = vsel %vm713_vm3, 1.0, %v3025_v10 }
 0x6a0   :  { %697 = vadd.xlane.f32.xlu1 %v696_v51  ;;  %v716_v55 = vadd.f32 %v715_v54, %v714_v53 }
 0x6a2   :  { %717 = vadd.xlane.f32.xlu0 %v716_v55 }
 0x724   :  { %v658_v56 = vpop.xlane.xlu1 %657 }
 0x725   :  { %v659_v57 = vrot.slane %v658_v56, 4 }
 0x726   :  { %v678_v59 = vpop.xlane.xlu0 %677 }
 0x727   :  { %v660_v58 = vadd.f32 %v659_v57, %v658_v56  ;;  %v679_v60 = vrot.slane %v678_v59, 4 }
 0x729   :  { %v661_v61 = vrot.slane %v660_v58, 2  ;;  %v680_v62 = vadd.f32 %v679_v60, %v678_v59  ;;  %v698_v0 = vpop.xlane.xlu1 %697 }
 0x72a   :  { %v699_v1 = vrot.slane %v698_v0, 4 }
 0x72b   :  { %v662_v63 = vadd.f32 %v661_v61, %v660_v58  ;;  %v681_v3 = vrot.slane %v680_v62, 2  ;;  %v718_v9 = vpop.xlane.xlu0 %717 }
 0x72c   :  { %v700_v4 = vadd.f32 %v699_v1, %v698_v0  ;;  %v719_v12 = vrot.slane %v718_v9, 4 }
 0x72d   :  { %v663_v2 = vrot.slane %v662_v63, 1  ;;  %v682_v8 = vadd.f32 %v681_v3, %v680_v62 }
 0x72e   :  { %v701_v11 = vrot.slane %v700_v4, 2  ;;  %v720_v14 = vadd.f32 %v719_v12, %v718_v9 }
 0x72f   :  { %v664_v5 = vadd.f32 %v663_v2, %v662_v63  ;;  %v683_v13 = vrot.slane %v682_v8, 1 }
 0x730   :  { %v702_v16 = vadd.f32 %v701_v11, %v700_v4  ;;  %v721_v17 = vrot.slane %v720_v14, 2 }
 0x731   :  { %2770 = vpush %v664_v5  ;;  %v684_v15 = vadd.f32 %v683_v13, %v682_v8  ;;  %v813_v5 = vand.u32 4292870144, %v3051_v6  ;;  %v814_v8 = vand.u32 4292870144, %v3053_v7 }
 0x732   :  { %v703_v18 = vrot.slane %v702_v16, 1  ;;  %v722_v20 = vadd.f32 %v721_v17, %v720_v14 }
 0x733   :  { %2772 = vpush %v684_v15 }
 0x734   :  { %v704_v19 = vadd.f32 %v703_v18, %v702_v16  ;;  %v723_v21 = vrot.slane %v722_v20, 1 }
 0x736   :  { %2774 = vpush %v704_v19  ;;  %v724_v22 = vadd.f32 %v723_v21, %v722_v20 }
 0x738   :  { %2776 = vpush %v724_v22 }
 0x762   :  { %s2771_s27 = spop %2770 }
 0x763   :  { %p666_p9 = scmp.ge.f32.partialorder %s5087_s17, %s2771_s27  ;;  %s669_s28 = ssub.f32 %s5087_s17, %s2771_s27 }
 0x764   :  { %s2773_s30 = spop %2772 }
 0x765   :  { %s5101_s29 = smov (!%p666_p9, %s667_s29), %s5085_s18  ;;  %p686_p10 = scmp.ge.f32.partialorder %s5091_s20, %s2773_s30 }
 0x766   :  { %s689_s5 = ssub.f32 %s5091_s20, %s2773_s30  ;;  %v733_v25 = vstv %s5101_s29  ;;  %s5103_s28 = smov (!%p666_p9, %s669_s28), %s5087_s17 }
 0x767   :  { %vm734_vm4 = vcmp.eq.s32.totalorder %v731_v23, %v733_v25  ;;  %vm735_vm5 = vcmp.eq.s32.totalorder %v732_v24, %v733_v25  ;;  %s5105_s4 = smov (!%p686_p10, %s687_s4), %s5089_s19  ;;  %s2775_s6 = spop %2774 }
 0x768   :  { %v736_v26 = vsel %vm734_vm4, 1.0, %v3025_v10  ;;  %v737_v27 = vsel %vm735_vm5, 1.0, %v3025_v10  ;;  %p706_p11 = scmp.ge.f32.partialorder %s5095_s23, %s2775_s6  ;;  %s709_s8 = ssub.f32 %s5095_s23, %s2775_s6  ;;  %v753_v29 = vstv %s5105_s4 }
 0x769   :  { %v738_v28 = vadd.f32 %v737_v27, %v736_v26  ;;  %vm754_vm6 = vcmp.eq.s32.totalorder %v731_v23, %v753_v29  ;;  %vm755_vm7 = vcmp.eq.s32.totalorder %v732_v24, %v753_v29  ;;  %s5107_s5 = smov (!%p686_p10, %s689_s5), %s5091_s20  ;;  %s2777_s9 = spop %2776 }
 0x76a   :  { %s5109_s7 = smov (!%p706_p11, %s707_s7), %s5093_s22  ;;  %v756_v30 = vsel %vm754_vm6, 1.0, %v3025_v10  ;;  %v757_v31 = vsel %vm755_vm7, 1.0, %v3025_v10  ;;  %p726_p12 = scmp.ge.f32.partialorder %s5099_s26, %s2777_s9 }
 0x76b   :  { %739 = vadd.xlane.f32.xlu1 %v738_v28  ;;  %v758_v32 = vadd.f32 %v757_v31, %v756_v30  ;;  %s729_s11 = ssub.f32 %s5099_s26, %s2777_s9  ;;  %v773_v33 = vstv %s5109_s7  ;;  %s5111_s8 = smov (!%p706_p11, %s709_s8), %s5095_s23 }
 0x76c   :  { %vm774_vm8 = vcmp.eq.s32.totalorder %v731_v23, %v773_v33  ;;  %vm775_vm9 = vcmp.eq.s32.totalorder %v732_v24, %v773_v33  ;;  %s5113_s10 = smov (!%p726_p12, %s727_s10), %s5097_s25  ;;  %s749_s14 = sor.u32 4194304, %s5101_s29 }
 0x76d   :  { %759 = vadd.xlane.f32.xlu0 %v758_v32  ;;  %v776_v34 = vsel %vm774_vm8, 1.0, %v3025_v10  ;;  %v777_v35 = vsel %vm775_vm9, 1.0, %v3025_v10  ;;  %v793_v37 = vstv %s5113_s10  ;;  %s5115_s11 = smov (!%p726_p12, %s729_s11), %s5099_s26  ;;  %s769_s16 = sor.u32 4194304, %s5105_s4 }
 0x76e   :  { %v778_v36 = vadd.f32 %v777_v35, %v776_v34  ;;  %vm794_vm10 = vcmp.eq.s32.totalorder %v731_v23, %v793_v37  ;;  %vm795_vm11 = vcmp.eq.s32.totalorder %v732_v24, %v793_v37  ;;  %s789_s0 = sor.u32 4194304, %s5109_s7  ;;  %s809_s21 = sor.u32 4194304, %s5113_s10 }
 0x76f   :  { %v796_v38 = vsel %vm794_vm10, 1.0, %v3025_v10  ;;  %v797_v39 = vsel %vm795_vm11, 1.0, %v3025_v10 }
 0x770   :  { %779 = vadd.xlane.f32.xlu1 %v778_v36  ;;  %v798_v40 = vadd.f32 %v797_v39, %v796_v38 }
 0x772   :  { %799 = vadd.xlane.f32.xlu0 %v798_v40 }
 0x7f4   :  { %v740_v41 = vpop.xlane.xlu1 %739 }
 0x7f5   :  { %v741_v42 = vrot.slane %v740_v41, 4 }
 0x7f6   :  { %v760_v44 = vpop.xlane.xlu0 %759 }
 0x7f7   :  { %v742_v43 = vadd.f32 %v741_v42, %v740_v41  ;;  %v761_v46 = vrot.slane %v760_v44, 4 }
 0x7f9   :  { %v743_v45 = vrot.slane %v742_v43, 2  ;;  %v762_v47 = vadd.f32 %v761_v46, %v760_v44  ;;  %v780_v49 = vpop.xlane.xlu1 %779 }
 0x7fa   :  { %v781_v51 = vrot.slane %v780_v49, 4 }
 0x7fb   :  { %v744_v48 = vadd.f32 %v743_v45, %v742_v43  ;;  %v763_v50 = vrot.slane %v762_v47, 2  ;;  %v800_v56 = vpop.xlane.xlu0 %799 }
 0x7fc   :  { %v782_v53 = vadd.f32 %v781_v51, %v780_v49  ;;  %v801_v58 = vrot.slane %v800_v56, 4 }
 0x7fd   :  { %v745_v52 = vrot.slane %v744_v48, 1  ;;  %v764_v55 = vadd.f32 %v763_v50, %v762_v47 }
 0x7fe   :  { %v783_v57 = vrot.slane %v782_v53, 2  ;;  %v802_v60 = vadd.f32 %v801_v58, %v800_v56 }
 0x7ff   :  { %v746_v54 = vadd.f32 %v745_v52, %v744_v48  ;;  %v765_v59 = vrot.slane %v764_v55, 1 }
 0x800   :  { %v784_v62 = vadd.f32 %v783_v57, %v782_v53  ;;  %v803_v63 = vrot.slane %v802_v60, 2 }
 0x801   :  { %2778 = vpush %v746_v54  ;;  %v766_v61 = vadd.f32 %v765_v59, %v764_v55  ;;  %v895_v54 = vand.u32 4293918720, %v3051_v6  ;;  %v896_v55 = vand.u32 4293918720, %v3053_v7 }
 0x802   :  { %v785_v0 = vrot.slane %v784_v62, 1  ;;  %v804_v2 = vadd.f32 %v803_v63, %v802_v60 }
 0x803   :  { %2780 = vpush %v766_v61 }
 0x804   :  { %v786_v1 = vadd.f32 %v785_v0, %v784_v62  ;;  %v805_v3 = vrot.slane %v804_v2, 1 }
 0x806   :  { %2782 = vpush %v786_v1  ;;  %v806_v4 = vadd.f32 %v805_v3, %v804_v2 }
 0x808   :  { %2784 = vpush %v806_v4 }
 0x832   :  { %s2779_s12 = spop %2778 }
 0x833   :  { %p748_p13 = scmp.ge.f32.partialorder %s5103_s28, %s2779_s12  ;;  %s751_s13 = ssub.f32 %s5103_s28, %s2779_s12 }
 0x834   :  { %s2781_s15 = spop %2780 }
 0x835   :  { %s5117_s14 = smov (!%p748_p13, %s749_s14), %s5101_s29  ;;  %p768_p0 = scmp.ge.f32.partialorder %s5107_s5, %s2781_s15 }
 0x836   :  { %s771_s17 = ssub.f32 %s5107_s5, %s2781_s15  ;;  %v815_v9 = vstv %s5117_s14  ;;  %s5119_s13 = smov (!%p748_p13, %s751_s13), %s5103_s28 }
 0x837   :  { %vm816_vm12 = vcmp.eq.s32.totalorder %v813_v5, %v815_v9  ;;  %vm817_vm13 = vcmp.eq.s32.totalorder %v814_v8, %v815_v9  ;;  %s5121_s16 = smov (!%p768_p0, %s769_s16), %s5105_s4  ;;  %s2783_s18 = spop %2782 }
 0x838   :  { %v818_v11 = vsel %vm816_vm12, 1.0, %v3025_v10  ;;  %v819_v12 = vsel %vm817_vm13, 1.0, %v3025_v10  ;;  %p788_p1 = scmp.ge.f32.partialorder %s5111_s8, %s2783_s18  ;;  %s791_s19 = ssub.f32 %s5111_s8, %s2783_s18  ;;  %v835_v14 = vstv %s5121_s16 }
 0x839   :  { %v820_v13 = vadd.f32 %v819_v12, %v818_v11  ;;  %vm836_vm14 = vcmp.eq.s32.totalorder %v813_v5, %v835_v14  ;;  %vm837_vm15 = vcmp.eq.s32.totalorder %v814_v8, %v835_v14  ;;  %s5123_s17 = smov (!%p768_p0, %s771_s17), %s5107_s5  ;;  %s2785_s20 = spop %2784 }
 0x83a   :  { %s5125_s0 = smov (!%p788_p1, %s789_s0), %s5109_s7  ;;  %v838_v15 = vsel %vm836_vm14, 1.0, %v3025_v10  ;;  %v839_v16 = vsel %vm837_vm15, 1.0, %v3025_v10  ;;  %p808_p2 = scmp.ge.f32.partialorder %s5115_s11, %s2785_s20 }
 0x83b   :  { %821 = vadd.xlane.f32.xlu1 %v820_v13  ;;  %v840_v17 = vadd.f32 %v839_v16, %v838_v15  ;;  %s811_s22 = ssub.f32 %s5115_s11, %s2785_s20  ;;  %v855_v18 = vstv %s5125_s0  ;;  %s5127_s19 = smov (!%p788_p1, %s791_s19), %s5111_s8 }
 0x83c   :  { %vm856_vm0 = vcmp.eq.s32.totalorder %v813_v5, %v855_v18  ;;  %vm857_vm1 = vcmp.eq.s32.totalorder %v814_v8, %v855_v18  ;;  %s5129_s21 = smov (!%p808_p2, %s809_s21), %s5113_s10  ;;  %s831_s25 = sor.u32 2097152, %s5117_s14 }
 0x83d   :  { %841 = vadd.xlane.f32.xlu0 %v840_v17  ;;  %v858_v19 = vsel %vm856_vm0, 1.0, %v3025_v10  ;;  %v859_v20 = vsel %vm857_vm1, 1.0, %v3025_v10  ;;  %v875_v22 = vstv %s5129_s21  ;;  %s5131_s22 = smov (!%p808_p2, %s811_s22), %s5115_s11  ;;  %s851_s27 = sor.u32 2097152, %s5121_s16 }
 0x83e   :  { %v860_v21 = vadd.f32 %v859_v20, %v858_v19  ;;  %vm876_vm2 = vcmp.eq.s32.totalorder %v813_v5, %v875_v22  ;;  %vm877_vm3 = vcmp.eq.s32.totalorder %v814_v8, %v875_v22  ;;  %s871_s30 = sor.u32 2097152, %s5125_s0  ;;  %s891_s6 = sor.u32 2097152, %s5129_s21 }
 0x83f   :  { %v878_v23 = vsel %vm876_vm2, 1.0, %v3025_v10  ;;  %v879_v24 = vsel %vm877_vm3, 1.0, %v3025_v10 }
 0x840   :  { %861 = vadd.xlane.f32.xlu1 %v860_v21  ;;  %v880_v25 = vadd.f32 %v879_v24, %v878_v23 }
 0x842   :  { %881 = vadd.xlane.f32.xlu0 %v880_v25 }
 0x8c4   :  { %v822_v26 = vpop.xlane.xlu1 %821 }
 0x8c5   :  { %v823_v27 = vrot.slane %v822_v26, 4 }
 0x8c6   :  { %v842_v29 = vpop.xlane.xlu0 %841 }
 0x8c7   :  { %v824_v28 = vadd.f32 %v823_v27, %v822_v26  ;;  %v843_v31 = vrot.slane %v842_v29, 4 }
 0x8c9   :  { %v825_v30 = vrot.slane %v824_v28, 2  ;;  %v844_v32 = vadd.f32 %v843_v31, %v842_v29  ;;  %v862_v34 = vpop.xlane.xlu1 %861 }
 0x8ca   :  { %v863_v36 = vrot.slane %v862_v34, 4 }
 0x8cb   :  { %v826_v33 = vadd.f32 %v825_v30, %v824_v28  ;;  %v845_v35 = vrot.slane %v844_v32, 2  ;;  %v882_v41 = vpop.xlane.xlu0 %881 }
 0x8cc   :  { %v864_v38 = vadd.f32 %v863_v36, %v862_v34  ;;  %v883_v43 = vrot.slane %v882_v41, 4 }
 0x8cd   :  { %v827_v37 = vrot.slane %v826_v33, 1  ;;  %v846_v40 = vadd.f32 %v845_v35, %v844_v32 }
 0x8ce   :  { %v865_v42 = vrot.slane %v864_v38, 2  ;;  %v884_v45 = vadd.f32 %v883_v43, %v882_v41 }
 0x8cf   :  { %v828_v39 = vadd.f32 %v827_v37, %v826_v33  ;;  %v847_v44 = vrot.slane %v846_v40, 1 }
 0x8d0   :  { %v866_v47 = vadd.f32 %v865_v42, %v864_v38  ;;  %v885_v48 = vrot.slane %v884_v45, 2 }
 0x8d1   :  { %2786 = vpush %v828_v39  ;;  %v848_v46 = vadd.f32 %v847_v44, %v846_v40  ;;  %v977_v39 = vand.u32 4294443008, %v3051_v6  ;;  %v978_v40 = vand.u32 4294443008, %v3053_v7 }
 0x8d2   :  { %v867_v49 = vrot.slane %v866_v47, 1  ;;  %v886_v51 = vadd.f32 %v885_v48, %v884_v45 }
 0x8d3   :  { %2788 = vpush %v848_v46 }
 0x8d4   :  { %v868_v50 = vadd.f32 %v867_v49, %v866_v47  ;;  %v887_v52 = vrot.slane %v886_v51, 1 }
 0x8d6   :  { %2790 = vpush %v868_v50  ;;  %v888_v53 = vadd.f32 %v887_v52, %v886_v51 }
 0x8d8   :  { %2792 = vpush %v888_v53 }
 0x902   :  { %s2787_s23 = spop %2786 }
 0x903   :  { %p830_p3 = scmp.ge.f32.partialorder %s5119_s13, %s2787_s23  ;;  %s833_s24 = ssub.f32 %s5119_s13, %s2787_s23 }
 0x904   :  { %s2789_s26 = spop %2788 }
 0x905   :  { %s5133_s25 = smov (!%p830_p3, %s831_s25), %s5117_s14  ;;  %p850_p4 = scmp.ge.f32.partialorder %s5123_s17, %s2789_s26 }
 0x906   :  { %s853_s28 = ssub.f32 %s5123_s17, %s2789_s26  ;;  %v897_v56 = vstv %s5133_s25  ;;  %s5135_s24 = smov (!%p830_p3, %s833_s24), %s5119_s13 }
 0x907   :  { %vm898_vm4 = vcmp.eq.s32.totalorder %v895_v54, %v897_v56  ;;  %vm899_vm5 = vcmp.eq.s32.totalorder %v896_v55, %v897_v56  ;;  %s5137_s27 = smov (!%p850_p4, %s851_s27), %s5121_s16  ;;  %s2791_s29 = spop %2790 }
 0x908   :  { %v900_v57 = vsel %vm898_vm4, 1.0, %v3025_v10  ;;  %v901_v58 = vsel %vm899_vm5, 1.0, %v3025_v10  ;;  %p870_p5 = scmp.ge.f32.partialorder %s5127_s19, %s2791_s29  ;;  %s873_s4 = ssub.f32 %s5127_s19, %s2791_s29  ;;  %v917_v60 = vstv %s5137_s27 }
 0x909   :  { %v902_v59 = vadd.f32 %v901_v58, %v900_v57  ;;  %vm918_vm6 = vcmp.eq.s32.totalorder %v895_v54, %v917_v60  ;;  %vm919_vm7 = vcmp.eq.s32.totalorder %v896_v55, %v917_v60  ;;  %s5139_s28 = smov (!%p850_p4, %s853_s28), %s5123_s17  ;;  %s2793_s5 = spop %2792 }
 0x90a   :  { %s5141_s30 = smov (!%p870_p5, %s871_s30), %s5125_s0  ;;  %v920_v61 = vsel %vm918_vm6, 1.0, %v3025_v10  ;;  %v921_v62 = vsel %vm919_vm7, 1.0, %v3025_v10  ;;  %p890_p6 = scmp.ge.f32.partialorder %s5131_s22, %s2793_s5 }
 0x90b   :  { %903 = vadd.xlane.f32.xlu1 %v902_v59  ;;  %v922_v63 = vadd.f32 %v921_v62, %v920_v61  ;;  %s893_s7 = ssub.f32 %s5131_s22, %s2793_s5  ;;  %v937_v0 = vstv %s5141_s30  ;;  %s5143_s4 = smov (!%p870_p5, %s873_s4), %s5127_s19 }
 0x90c   :  { %vm938_vm8 = vcmp.eq.s32.totalorder %v895_v54, %v937_v0  ;;  %vm939_vm9 = vcmp.eq.s32.totalorder %v896_v55, %v937_v0  ;;  %s5145_s6 = smov (!%p890_p6, %s891_s6), %s5129_s21  ;;  %s913_s10 = sor.u32 1048576, %s5133_s25 }
 0x90d   :  { %923 = vadd.xlane.f32.xlu0 %v922_v63  ;;  %v940_v1 = vsel %vm938_vm8, 1.0, %v3025_v10  ;;  %v941_v2 = vsel %vm939_vm9, 1.0, %v3025_v10  ;;  %v957_v4 = vstv %s5145_s6  ;;  %s5147_s7 = smov (!%p890_p6, %s893_s7), %s5131_s22  ;;  %s933_s12 = sor.u32 1048576, %s5137_s27 }
 0x90e   :  { %v942_v3 = vadd.f32 %v941_v2, %v940_v1  ;;  %vm958_vm10 = vcmp.eq.s32.totalorder %v895_v54, %v957_v4  ;;  %vm959_vm11 = vcmp.eq.s32.totalorder %v896_v55, %v957_v4  ;;  %s953_s15 = sor.u32 1048576, %s5141_s30  ;;  %s973_s18 = sor.u32 1048576, %s5145_s6 }
 0x90f   :  { %v960_v5 = vsel %vm958_vm10, 1.0, %v3025_v10  ;;  %v961_v8 = vsel %vm959_vm11, 1.0, %v3025_v10 }
 0x910   :  { %943 = vadd.xlane.f32.xlu1 %v942_v3  ;;  %v962_v9 = vadd.f32 %v961_v8, %v960_v5 }
 0x912   :  { %963 = vadd.xlane.f32.xlu0 %v962_v9 }
 0x994   :  { %v904_v11 = vpop.xlane.xlu1 %903 }
 0x995   :  { %v905_v12 = vrot.slane %v904_v11, 4 }
 0x996   :  { %v924_v14 = vpop.xlane.xlu0 %923 }
 0x997   :  { %v906_v13 = vadd.f32 %v905_v12, %v904_v11  ;;  %v925_v16 = vrot.slane %v924_v14, 4 }
 0x999   :  { %v907_v15 = vrot.slane %v906_v13, 2  ;;  %v926_v17 = vadd.f32 %v925_v16, %v924_v14  ;;  %v944_v19 = vpop.xlane.xlu1 %943 }
 0x99a   :  { %v945_v21 = vrot.slane %v944_v19, 4 }
 0x99b   :  { %v908_v18 = vadd.f32 %v907_v15, %v906_v13  ;;  %v927_v20 = vrot.slane %v926_v17, 2  ;;  %v964_v26 = vpop.xlane.xlu0 %963 }
 0x99c   :  { %v946_v23 = vadd.f32 %v945_v21, %v944_v19  ;;  %v965_v28 = vrot.slane %v964_v26, 4 }
 0x99d   :  { %v909_v22 = vrot.slane %v908_v18, 1  ;;  %v928_v25 = vadd.f32 %v927_v20, %v926_v17 }
 0x99e   :  { %v947_v27 = vrot.slane %v946_v23, 2  ;;  %v966_v30 = vadd.f32 %v965_v28, %v964_v26 }
 0x99f   :  { %v910_v24 = vadd.f32 %v909_v22, %v908_v18  ;;  %v929_v29 = vrot.slane %v928_v25, 1 }
 0x9a0   :  { %v948_v32 = vadd.f32 %v947_v27, %v946_v23  ;;  %v967_v33 = vrot.slane %v966_v30, 2 }
 0x9a1   :  { %2794 = vpush %v910_v24  ;;  %v930_v31 = vadd.f32 %v929_v29, %v928_v25  ;;  %v1059_v24 = vand.u32 4294705152, %v3051_v6  ;;  %v1060_v25 = vand.u32 4294705152, %v3053_v7 }
 0x9a2   :  { %v949_v34 = vrot.slane %v948_v32, 1  ;;  %v968_v36 = vadd.f32 %v967_v33, %v966_v30 }
 0x9a3   :  { %2796 = vpush %v930_v31 }
 0x9a4   :  { %v950_v35 = vadd.f32 %v949_v34, %v948_v32  ;;  %v969_v37 = vrot.slane %v968_v36, 1 }
 0x9a6   :  { %2798 = vpush %v950_v35  ;;  %v970_v38 = vadd.f32 %v969_v37, %v968_v36 }
 0x9a8   :  { %2800 = vpush %v970_v38 }
 0x9d2   :  { %s2795_s8 = spop %2794 }
 0x9d3   :  { %p912_p7 = scmp.ge.f32.partialorder %s5135_s24, %s2795_s8  ;;  %s915_s9 = ssub.f32 %s5135_s24, %s2795_s8 }
 0x9d4   :  { %s2797_s11 = spop %2796 }
 0x9d5   :  { %s5149_s10 = smov (!%p912_p7, %s913_s10), %s5133_s25  ;;  %p932_p8 = scmp.ge.f32.partialorder %s5139_s28, %s2797_s11 }
 0x9d6   :  { %s935_s13 = ssub.f32 %s5139_s28, %s2797_s11  ;;  %v979_v41 = vstv %s5149_s10  ;;  %s5151_s9 = smov (!%p912_p7, %s915_s9), %s5135_s24 }
 0x9d7   :  { %vm980_vm12 = vcmp.eq.s32.totalorder %v977_v39, %v979_v41  ;;  %vm981_vm13 = vcmp.eq.s32.totalorder %v978_v40, %v979_v41  ;;  %s5153_s12 = smov (!%p932_p8, %s933_s12), %s5137_s27  ;;  %s2799_s14 = spop %2798 }
 0x9d8   :  { %v982_v42 = vsel %vm980_vm12, 1.0, %v3025_v10  ;;  %v983_v43 = vsel %vm981_vm13, 1.0, %v3025_v10  ;;  %p952_p9 = scmp.ge.f32.partialorder %s5143_s4, %s2799_s14  ;;  %s955_s16 = ssub.f32 %s5143_s4, %s2799_s14  ;;  %v999_v45 = vstv %s5153_s12 }
 0x9d9   :  { %v984_v44 = vadd.f32 %v983_v43, %v982_v42  ;;  %vm1000_vm14 = vcmp.eq.s32.totalorder %v977_v39, %v999_v45  ;;  %vm1001_vm15 = vcmp.eq.s32.totalorder %v978_v40, %v999_v45  ;;  %s5155_s13 = smov (!%p932_p8, %s935_s13), %s5139_s28  ;;  %s2801_s17 = spop %2800 }
 0x9da   :  { %s5157_s15 = smov (!%p952_p9, %s953_s15), %s5141_s30  ;;  %v1002_v46 = vsel %vm1000_vm14, 1.0, %v3025_v10  ;;  %v1003_v47 = vsel %vm1001_vm15, 1.0, %v3025_v10  ;;  %p972_p10 = scmp.ge.f32.partialorder %s5147_s7, %s2801_s17 }
 0x9db   :  { %985 = vadd.xlane.f32.xlu1 %v984_v44  ;;  %v1004_v48 = vadd.f32 %v1003_v47, %v1002_v46  ;;  %s975_s0 = ssub.f32 %s5147_s7, %s2801_s17  ;;  %v1019_v49 = vstv %s5157_s15  ;;  %s5159_s16 = smov (!%p952_p9, %s955_s16), %s5143_s4 }
 0x9dc   :  { %vm1020_vm0 = vcmp.eq.s32.totalorder %v977_v39, %v1019_v49  ;;  %vm1021_vm1 = vcmp.eq.s32.totalorder %v978_v40, %v1019_v49  ;;  %s5161_s18 = smov (!%p972_p10, %s973_s18), %s5145_s6  ;;  %s995_s21 = sor.u32 524288, %s5149_s10 }
 0x9dd   :  { %1005 = vadd.xlane.f32.xlu0 %v1004_v48  ;;  %v1022_v50 = vsel %vm1020_vm0, 1.0, %v3025_v10  ;;  %v1023_v51 = vsel %vm1021_vm1, 1.0, %v3025_v10  ;;  %v1039_v53 = vstv %s5161_s18  ;;  %s5163_s0 = smov (!%p972_p10, %s975_s0), %s5147_s7  ;;  %s1015_s23 = sor.u32 524288, %s5153_s12 }
 0x9de   :  { %v1024_v52 = vadd.f32 %v1023_v51, %v1022_v50  ;;  %vm1040_vm2 = vcmp.eq.s32.totalorder %v977_v39, %v1039_v53  ;;  %vm1041_vm3 = vcmp.eq.s32.totalorder %v978_v40, %v1039_v53  ;;  %s1035_s26 = sor.u32 524288, %s5157_s15  ;;  %s1055_s29 = sor.u32 524288, %s5161_s18 }
 0x9df   :  { %v1042_v54 = vsel %vm1040_vm2, 1.0, %v3025_v10  ;;  %v1043_v55 = vsel %vm1041_vm3, 1.0, %v3025_v10 }
 0x9e0   :  { %1025 = vadd.xlane.f32.xlu1 %v1024_v52  ;;  %v1044_v56 = vadd.f32 %v1043_v55, %v1042_v54 }
 0x9e2   :  { %1045 = vadd.xlane.f32.xlu0 %v1044_v56 }
 0xa64   :  { %v986_v57 = vpop.xlane.xlu1 %985 }
 0xa65   :  { %v987_v58 = vrot.slane %v986_v57, 4 }
 0xa66   :  { %v1006_v60 = vpop.xlane.xlu0 %1005 }
 0xa67   :  { %v988_v59 = vadd.f32 %v987_v58, %v986_v57  ;;  %v1007_v62 = vrot.slane %v1006_v60, 4 }
 0xa69   :  { %v989_v61 = vrot.slane %v988_v59, 2  ;;  %v1008_v63 = vadd.f32 %v1007_v62, %v1006_v60  ;;  %v1026_v1 = vpop.xlane.xlu1 %1025 }
 0xa6a   :  { %v1027_v3 = vrot.slane %v1026_v1, 4 }
 0xa6b   :  { %v990_v0 = vadd.f32 %v989_v61, %v988_v59  ;;  %v1009_v2 = vrot.slane %v1008_v63, 2  ;;  %v1046_v11 = vpop.xlane.xlu0 %1045 }
 0xa6c   :  { %v1028_v5 = vadd.f32 %v1027_v3, %v1026_v1  ;;  %v1047_v13 = vrot.slane %v1046_v11, 4 }
 0xa6d   :  { %v991_v4 = vrot.slane %v990_v0, 1  ;;  %v1010_v9 = vadd.f32 %v1009_v2, %v1008_v63 }
 0xa6e   :  { %v1029_v12 = vrot.slane %v1028_v5, 2  ;;  %v1048_v15 = vadd.f32 %v1047_v13, %v1046_v11 }
 0xa6f   :  { %v992_v8 = vadd.f32 %v991_v4, %v990_v0  ;;  %v1011_v14 = vrot.slane %v1010_v9, 1 }
 0xa70   :  { %v1030_v17 = vadd.f32 %v1029_v12, %v1028_v5  ;;  %v1049_v18 = vrot.slane %v1048_v15, 2 }
 0xa71   :  { %2802 = vpush %v992_v8  ;;  %v1012_v16 = vadd.f32 %v1011_v14, %v1010_v9  ;;  %v1141_v8 = vand.u32 4294836224, %v3051_v6  ;;  %v1142_v9 = vand.u32 4294836224, %v3053_v7 }
 0xa72   :  { %v1031_v19 = vrot.slane %v1030_v17, 1  ;;  %v1050_v21 = vadd.f32 %v1049_v18, %v1048_v15 }
 0xa73   :  { %2804 = vpush %v1012_v16 }
 0xa74   :  { %v1032_v20 = vadd.f32 %v1031_v19, %v1030_v17  ;;  %v1051_v22 = vrot.slane %v1050_v21, 1 }
 0xa76   :  { %2806 = vpush %v1032_v20  ;;  %v1052_v23 = vadd.f32 %v1051_v22, %v1050_v21 }
 0xa78   :  { %2808 = vpush %v1052_v23 }
 0xaa2   :  { %s2803_s19 = spop %2802 }
 0xaa3   :  { %p994_p11 = scmp.ge.f32.partialorder %s5151_s9, %s2803_s19  ;;  %s997_s20 = ssub.f32 %s5151_s9, %s2803_s19 }
 0xaa4   :  { %s2805_s22 = spop %2804 }
 0xaa5   :  { %s5165_s21 = smov (!%p994_p11, %s995_s21), %s5149_s10  ;;  %p1014_p12 = scmp.ge.f32.partialorder %s5155_s13, %s2805_s22 }
 0xaa6   :  { %s1017_s24 = ssub.f32 %s5155_s13, %s2805_s22  ;;  %v1061_v26 = vstv %s5165_s21  ;;  %s5167_s20 = smov (!%p994_p11, %s997_s20), %s5151_s9 }
 0xaa7   :  { %vm1062_vm4 = vcmp.eq.s32.totalorder %v1059_v24, %v1061_v26  ;;  %vm1063_vm5 = vcmp.eq.s32.totalorder %v1060_v25, %v1061_v26  ;;  %s5169_s23 = smov (!%p1014_p12, %s1015_s23), %s5153_s12  ;;  %s2807_s25 = spop %2806 }
 0xaa8   :  { %v1064_v27 = vsel %vm1062_vm4, 1.0, %v3025_v10  ;;  %v1065_v28 = vsel %vm1063_vm5, 1.0, %v3025_v10  ;;  %p1034_p13 = scmp.ge.f32.partialorder %s5159_s16, %s2807_s25  ;;  %s1037_s27 = ssub.f32 %s5159_s16, %s2807_s25  ;;  %v1081_v30 = vstv %s5169_s23 }
 0xaa9   :  { %v1066_v29 = vadd.f32 %v1065_v28, %v1064_v27  ;;  %vm1082_vm6 = vcmp.eq.s32.totalorder %v1059_v24, %v1081_v30  ;;  %vm1083_vm7 = vcmp.eq.s32.totalorder %v1060_v25, %v1081_v30  ;;  %s5171_s24 = smov (!%p1014_p12, %s1017_s24), %s5155_s13  ;;  %s2809_s28 = spop %2808 }
 0xaaa   :  { %s5173_s26 = smov (!%p1034_p13, %s1035_s26), %s5157_s15  ;;  %v1084_v31 = vsel %vm1082_vm6, 1.0, %v3025_v10  ;;  %v1085_v32 = vsel %vm1083_vm7, 1.0, %v3025_v10  ;;  %p1054_p0 = scmp.ge.f32.partialorder %s5163_s0, %s2809_s28 }
 0xaab   :  { %1067 = vadd.xlane.f32.xlu1 %v1066_v29  ;;  %v1086_v33 = vadd.f32 %v1085_v32, %v1084_v31  ;;  %s1057_s30 = ssub.f32 %s5163_s0, %s2809_s28  ;;  %v1101_v34 = vstv %s5173_s26  ;;  %s5175_s27 = smov (!%p1034_p13, %s1037_s27), %s5159_s16 }
 0xaac   :  { %vm1102_vm8 = vcmp.eq.s32.totalorder %v1059_v24, %v1101_v34  ;;  %vm1103_vm9 = vcmp.eq.s32.totalorder %v1060_v25, %v1101_v34  ;;  %s5177_s29 = smov (!%p1054_p0, %s1055_s29), %s5161_s18  ;;  %s1077_s6 = sor.u32 262144, %s5165_s21 }
 0xaad   :  { %1087 = vadd.xlane.f32.xlu0 %v1086_v33  ;;  %v1104_v35 = vsel %vm1102_vm8, 1.0, %v3025_v10  ;;  %v1105_v36 = vsel %vm1103_vm9, 1.0, %v3025_v10  ;;  %v1121_v38 = vstv %s5177_s29  ;;  %s5179_s30 = smov (!%p1054_p0, %s1057_s30), %s5163_s0  ;;  %s1097_s8 = sor.u32 262144, %s5169_s23 }
 0xaae   :  { %v1106_v37 = vadd.f32 %v1105_v36, %v1104_v35  ;;  %vm1122_vm10 = vcmp.eq.s32.totalorder %v1059_v24, %v1121_v38  ;;  %vm1123_vm11 = vcmp.eq.s32.totalorder %v1060_v25, %v1121_v38  ;;  %s1117_s11 = sor.u32 262144, %s5173_s26  ;;  %s1137_s14 = sor.u32 262144, %s5177_s29 }
 0xaaf   :  { %v1124_v39 = vsel %vm1122_vm10, 1.0, %v3025_v10  ;;  %v1125_v40 = vsel %vm1123_vm11, 1.0, %v3025_v10 }
 0xab0   :  { %1107 = vadd.xlane.f32.xlu1 %v1106_v37  ;;  %v1126_v41 = vadd.f32 %v1125_v40, %v1124_v39 }
 0xab2   :  { %1127 = vadd.xlane.f32.xlu0 %v1126_v41 }
 0xb34   :  { %v1068_v42 = vpop.xlane.xlu1 %1067 }
 0xb35   :  { %v1069_v43 = vrot.slane %v1068_v42, 4 }
 0xb36   :  { %v1088_v45 = vpop.xlane.xlu0 %1087 }
 0xb37   :  { %v1070_v44 = vadd.f32 %v1069_v43, %v1068_v42  ;;  %v1089_v47 = vrot.slane %v1088_v45, 4 }
 0xb39   :  { %v1071_v46 = vrot.slane %v1070_v44, 2  ;;  %v1090_v48 = vadd.f32 %v1089_v47, %v1088_v45  ;;  %v1108_v50 = vpop.xlane.xlu1 %1107 }
 0xb3a   :  { %v1109_v52 = vrot.slane %v1108_v50, 4 }
 0xb3b   :  { %v1072_v49 = vadd.f32 %v1071_v46, %v1070_v44  ;;  %v1091_v51 = vrot.slane %v1090_v48, 2  ;;  %v1128_v57 = vpop.xlane.xlu0 %1127 }
 0xb3c   :  { %v1110_v54 = vadd.f32 %v1109_v52, %v1108_v50  ;;  %v1129_v59 = vrot.slane %v1128_v57, 4 }
 0xb3d   :  { %v1073_v53 = vrot.slane %v1072_v49, 1  ;;  %v1092_v56 = vadd.f32 %v1091_v51, %v1090_v48 }
 0xb3e   :  { %v1111_v58 = vrot.slane %v1110_v54, 2  ;;  %v1130_v61 = vadd.f32 %v1129_v59, %v1128_v57 }
 0xb3f   :  { %v1074_v55 = vadd.f32 %v1073_v53, %v1072_v49  ;;  %v1093_v60 = vrot.slane %v1092_v56, 1 }
 0xb40   :  { %v1112_v63 = vadd.f32 %v1111_v58, %v1110_v54  ;;  %v1131_v0 = vrot.slane %v1130_v61, 2 }
 0xb41   :  { %2810 = vpush %v1074_v55  ;;  %v1094_v62 = vadd.f32 %v1093_v60, %v1092_v56  ;;  %v1223_v55 = vand.u32 4294901760, %v3051_v6  ;;  %v1224_v56 = vand.u32 4294901760, %v3053_v7 }
 0xb42   :  { %v1113_v1 = vrot.slane %v1112_v63, 1  ;;  %v1132_v3 = vadd.f32 %v1131_v0, %v1130_v61 }
 0xb43   :  { %2812 = vpush %v1094_v62 }
 0xb44   :  { %v1114_v2 = vadd.f32 %v1113_v1, %v1112_v63  ;;  %v1133_v4 = vrot.slane %v1132_v3, 1 }
 0xb46   :  { %2814 = vpush %v1114_v2  ;;  %v1134_v5 = vadd.f32 %v1133_v4, %v1132_v3 }
 0xb48   :  { %2816 = vpush %v1134_v5 }
 0xb72   :  { %s2811_s4 = spop %2810 }
 0xb73   :  { %p1076_p1 = scmp.ge.f32.partialorder %s5167_s20, %s2811_s4  ;;  %s1079_s5 = ssub.f32 %s5167_s20, %s2811_s4 }
 0xb74   :  { %s2813_s7 = spop %2812 }
 0xb75   :  { %s5181_s6 = smov (!%p1076_p1, %s1077_s6), %s5165_s21  ;;  %p1096_p2 = scmp.ge.f32.partialorder %s5171_s24, %s2813_s7 }
 0xb76   :  { %s1099_s9 = ssub.f32 %s5171_s24, %s2813_s7  ;;  %v1143_v11 = vstv %s5181_s6  ;;  %s5183_s5 = smov (!%p1076_p1, %s1079_s5), %s5167_s20 }
 0xb77   :  { %vm1144_vm12 = vcmp.eq.s32.totalorder %v1141_v8, %v1143_v11  ;;  %vm1145_vm13 = vcmp.eq.s32.totalorder %v1142_v9, %v1143_v11  ;;  %s5185_s8 = smov (!%p1096_p2, %s1097_s8), %s5169_s23  ;;  %s2815_s10 = spop %2814 }
 0xb78   :  { %v1146_v12 = vsel %vm1144_vm12, 1.0, %v3025_v10  ;;  %v1147_v13 = vsel %vm1145_vm13, 1.0, %v3025_v10  ;;  %p1116_p3 = scmp.ge.f32.partialorder %s5175_s27, %s2815_s10  ;;  %s1119_s12 = ssub.f32 %s5175_s27, %s2815_s10  ;;  %v1163_v15 = vstv %s5185_s8 }
 0xb79   :  { %v1148_v14 = vadd.f32 %v1147_v13, %v1146_v12  ;;  %vm1164_vm14 = vcmp.eq.s32.totalorder %v1141_v8, %v1163_v15  ;;  %vm1165_vm15 = vcmp.eq.s32.totalorder %v1142_v9, %v1163_v15  ;;  %s5187_s9 = smov (!%p1096_p2, %s1099_s9), %s5171_s24  ;;  %s2817_s13 = spop %2816 }
 0xb7a   :  { %s5189_s11 = smov (!%p1116_p3, %s1117_s11), %s5173_s26  ;;  %v1166_v16 = vsel %vm1164_vm14, 1.0, %v3025_v10  ;;  %v1167_v17 = vsel %vm1165_vm15, 1.0, %v3025_v10  ;;  %p1136_p4 = scmp.ge.f32.partialorder %s5179_s30, %s2817_s13 }
 0xb7b   :  { %1149 = vadd.xlane.f32.xlu1 %v1148_v14  ;;  %v1168_v18 = vadd.f32 %v1167_v17, %v1166_v16  ;;  %s1139_s15 = ssub.f32 %s5179_s30, %s2817_s13  ;;  %v1183_v19 = vstv %s5189_s11  ;;  %s5191_s12 = smov (!%p1116_p3, %s1119_s12), %s5175_s27 }
 0xb7c   :  { %vm1184_vm0 = vcmp.eq.s32.totalorder %v1141_v8, %v1183_v19  ;;  %vm1185_vm1 = vcmp.eq.s32.totalorder %v1142_v9, %v1183_v19  ;;  %s5193_s14 = smov (!%p1136_p4, %s1137_s14), %s5177_s29  ;;  %s1159_s18 = sor.u32 131072, %s5181_s6 }
 0xb7d   :  { %1169 = vadd.xlane.f32.xlu0 %v1168_v18  ;;  %v1186_v20 = vsel %vm1184_vm0, 1.0, %v3025_v10  ;;  %v1187_v21 = vsel %vm1185_vm1, 1.0, %v3025_v10  ;;  %v1203_v23 = vstv %s5193_s14  ;;  %s5195_s15 = smov (!%p1136_p4, %s1139_s15), %s5179_s30  ;;  %s1179_s19 = sor.u32 131072, %s5185_s8 }
 0xb7e   :  { %v1188_v22 = vadd.f32 %v1187_v21, %v1186_v20  ;;  %vm1204_vm2 = vcmp.eq.s32.totalorder %v1141_v8, %v1203_v23  ;;  %vm1205_vm3 = vcmp.eq.s32.totalorder %v1142_v9, %v1203_v23  ;;  %s1199_s22 = sor.u32 131072, %s5189_s11  ;;  %s1219_s25 = sor.u32 131072, %s5193_s14 }
 0xb7f   :  { %v1206_v24 = vsel %vm1204_vm2, 1.0, %v3025_v10  ;;  %v1207_v25 = vsel %vm1205_vm3, 1.0, %v3025_v10 }
 0xb80   :  { %1189 = vadd.xlane.f32.xlu1 %v1188_v22  ;;  %v1208_v26 = vadd.f32 %v1207_v25, %v1206_v24 }
 0xb82   :  { %1209 = vadd.xlane.f32.xlu0 %v1208_v26 }
 0xc04   :  { %v1150_v27 = vpop.xlane.xlu1 %1149 }
 0xc05   :  { %v1151_v28 = vrot.slane %v1150_v27, 4 }
 0xc06   :  { %v1170_v30 = vpop.xlane.xlu0 %1169 }
 0xc07   :  { %v1152_v29 = vadd.f32 %v1151_v28, %v1150_v27  ;;  %v1171_v32 = vrot.slane %v1170_v30, 4 }
 0xc09   :  { %v1153_v31 = vrot.slane %v1152_v29, 2  ;;  %v1172_v33 = vadd.f32 %v1171_v32, %v1170_v30  ;;  %v1190_v35 = vpop.xlane.xlu1 %1189 }
 0xc0a   :  { %v1191_v37 = vrot.slane %v1190_v35, 4 }
 0xc0b   :  { %v1154_v34 = vadd.f32 %v1153_v31, %v1152_v29  ;;  %v1173_v36 = vrot.slane %v1172_v33, 2  ;;  %v1210_v42 = vpop.xlane.xlu0 %1209 }
 0xc0c   :  { %v1192_v39 = vadd.f32 %v1191_v37, %v1190_v35  ;;  %v1211_v44 = vrot.slane %v1210_v42, 4 }
 0xc0d   :  { %v1155_v38 = vrot.slane %v1154_v34, 1  ;;  %v1174_v41 = vadd.f32 %v1173_v36, %v1172_v33 }
 0xc0e   :  { %v1193_v43 = vrot.slane %v1192_v39, 2  ;;  %v1212_v46 = vadd.f32 %v1211_v44, %v1210_v42 }
 0xc0f   :  { %v1156_v40 = vadd.f32 %v1155_v38, %v1154_v34  ;;  %v1175_v45 = vrot.slane %v1174_v41, 1 }
 0xc10   :  { %v1194_v48 = vadd.f32 %v1193_v43, %v1192_v39  ;;  %v1213_v49 = vrot.slane %v1212_v46, 2 }
 0xc11   :  { %2818 = vpush %v1156_v40  ;;  %v1176_v47 = vadd.f32 %v1175_v45, %v1174_v41  ;;  %v1305_v40 = vand.u32 4294934528, %v3051_v6  ;;  %v1306_v41 = vand.u32 4294934528, %v3053_v7 }
 0xc12   :  { %v1195_v50 = vrot.slane %v1194_v48, 1  ;;  %v1214_v52 = vadd.f32 %v1213_v49, %v1212_v46 }
 0xc13   :  { %2820 = vpush %v1176_v47 }
 0xc14   :  { %v1196_v51 = vadd.f32 %v1195_v50, %v1194_v48  ;;  %v1215_v53 = vrot.slane %v1214_v52, 1 }
 0xc16   :  { %2822 = vpush %v1196_v51  ;;  %v1216_v54 = vadd.f32 %v1215_v53, %v1214_v52 }
 0xc18   :  { %2824 = vpush %v1216_v54 }
 0xc42   :  { %s2819_s16 = spop %2818 }
 0xc43   :  { %p1158_p5 = scmp.ge.f32.partialorder %s5183_s5, %s2819_s16  ;;  %s1161_s17 = ssub.f32 %s5183_s5, %s2819_s16 }
 0xc44   :  { %s2821_s0 = spop %2820 }
 0xc45   :  { %s5197_s18 = smov (!%p1158_p5, %s1159_s18), %s5181_s6  ;;  %p1178_p6 = scmp.ge.f32.partialorder %s5187_s9, %s2821_s0 }
 0xc46   :  { %s1181_s20 = ssub.f32 %s5187_s9, %s2821_s0  ;;  %v1225_v57 = vstv %s5197_s18  ;;  %s5199_s17 = smov (!%p1158_p5, %s1161_s17), %s5183_s5 }
 0xc47   :  { %vm1226_vm4 = vcmp.eq.s32.totalorder %v1223_v55, %v1225_v57  ;;  %vm1227_vm5 = vcmp.eq.s32.totalorder %v1224_v56, %v1225_v57  ;;  %s5201_s19 = smov (!%p1178_p6, %s1179_s19), %s5185_s8  ;;  %s2823_s21 = spop %2822 }
 0xc48   :  { %v1228_v58 = vsel %vm1226_vm4, 1.0, %v3025_v10  ;;  %v1229_v59 = vsel %vm1227_vm5, 1.0, %v3025_v10  ;;  %p1198_p7 = scmp.ge.f32.partialorder %s5191_s12, %s2823_s21  ;;  %s1201_s23 = ssub.f32 %s5191_s12, %s2823_s21  ;;  %v1245_v61 = vstv %s5201_s19 }
 0xc49   :  { %v1230_v60 = vadd.f32 %v1229_v59, %v1228_v58  ;;  %vm1246_vm6 = vcmp.eq.s32.totalorder %v1223_v55, %v1245_v61  ;;  %vm1247_vm7 = vcmp.eq.s32.totalorder %v1224_v56, %v1245_v61  ;;  %s5203_s20 = smov (!%p1178_p6, %s1181_s20), %s5187_s9  ;;  %s2825_s24 = spop %2824 }
 0xc4a   :  { %s5205_s22 = smov (!%p1198_p7, %s1199_s22), %s5189_s11  ;;  %v1248_v62 = vsel %vm1246_vm6, 1.0, %v3025_v10  ;;  %v1249_v63 = vsel %vm1247_vm7, 1.0, %v3025_v10  ;;  %p1218_p8 = scmp.ge.f32.partialorder %s5195_s15, %s2825_s24 }
 0xc4b   :  { %1231 = vadd.xlane.f32.xlu1 %v1230_v60  ;;  %v1250_v0 = vadd.f32 %v1249_v63, %v1248_v62  ;;  %s1221_s26 = ssub.f32 %s5195_s15, %s2825_s24  ;;  %v1265_v1 = vstv %s5205_s22  ;;  %s5207_s23 = smov (!%p1198_p7, %s1201_s23), %s5191_s12 }
 0xc4c   :  { %vm1266_vm8 = vcmp.eq.s32.totalorder %v1223_v55, %v1265_v1  ;;  %vm1267_vm9 = vcmp.eq.s32.totalorder %v1224_v56, %v1265_v1  ;;  %s5209_s25 = smov (!%p1218_p8, %s1219_s25), %s5193_s14  ;;  %s1241_s29 = sor.u32 65536, %s5197_s18 }
 0xc4d   :  { %1251 = vadd.xlane.f32.xlu0 %v1250_v0  ;;  %v1268_v2 = vsel %vm1266_vm8, 1.0, %v3025_v10  ;;  %v1269_v3 = vsel %vm1267_vm9, 1.0, %v3025_v10  ;;  %v1285_v5 = vstv %s5209_s25  ;;  %s5211_s26 = smov (!%p1218_p8, %s1221_s26), %s5195_s15  ;;  %s1261_s4 = sor.u32 65536, %s5201_s19 }
 0xc4e   :  { %v1270_v4 = vadd.f32 %v1269_v3, %v1268_v2  ;;  %vm1286_vm10 = vcmp.eq.s32.totalorder %v1223_v55, %v1285_v5  ;;  %vm1287_vm11 = vcmp.eq.s32.totalorder %v1224_v56, %v1285_v5  ;;  %s1281_s7 = sor.u32 65536, %s5205_s22  ;;  %s1301_s10 = sor.u32 65536, %s5209_s25 }
 0xc4f   :  { %v1288_v8 = vsel %vm1286_vm10, 1.0, %v3025_v10  ;;  %v1289_v9 = vsel %vm1287_vm11, 1.0, %v3025_v10 }
 0xc50   :  { %1271 = vadd.xlane.f32.xlu1 %v1270_v4  ;;  %v1290_v11 = vadd.f32 %v1289_v9, %v1288_v8 }
 0xc52   :  { %1291 = vadd.xlane.f32.xlu0 %v1290_v11 }
 0xcd4   :  { %v1232_v12 = vpop.xlane.xlu1 %1231 }
 0xcd5   :  { %v1233_v13 = vrot.slane %v1232_v12, 4 }
 0xcd6   :  { %v1252_v15 = vpop.xlane.xlu0 %1251 }
 0xcd7   :  { %v1234_v14 = vadd.f32 %v1233_v13, %v1232_v12  ;;  %v1253_v17 = vrot.slane %v1252_v15, 4 }
 0xcd9   :  { %v1235_v16 = vrot.slane %v1234_v14, 2  ;;  %v1254_v18 = vadd.f32 %v1253_v17, %v1252_v15  ;;  %v1272_v20 = vpop.xlane.xlu1 %1271 }
 0xcda   :  { %v1273_v22 = vrot.slane %v1272_v20, 4 }
 0xcdb   :  { %v1236_v19 = vadd.f32 %v1235_v16, %v1234_v14  ;;  %v1255_v21 = vrot.slane %v1254_v18, 2  ;;  %v1292_v27 = vpop.xlane.xlu0 %1291 }
 0xcdc   :  { %v1274_v24 = vadd.f32 %v1273_v22, %v1272_v20  ;;  %v1293_v29 = vrot.slane %v1292_v27, 4 }
 0xcdd   :  { %v1237_v23 = vrot.slane %v1236_v19, 1  ;;  %v1256_v26 = vadd.f32 %v1255_v21, %v1254_v18 }
 0xcde   :  { %v1275_v28 = vrot.slane %v1274_v24, 2  ;;  %v1294_v31 = vadd.f32 %v1293_v29, %v1292_v27 }
 0xcdf   :  { %v1238_v25 = vadd.f32 %v1237_v23, %v1236_v19  ;;  %v1257_v30 = vrot.slane %v1256_v26, 1 }
 0xce0   :  { %v1276_v33 = vadd.f32 %v1275_v28, %v1274_v24  ;;  %v1295_v34 = vrot.slane %v1294_v31, 2 }
 0xce1   :  { %2826 = vpush %v1238_v25  ;;  %v1258_v32 = vadd.f32 %v1257_v30, %v1256_v26  ;;  %v1387_v25 = vand.u32 4294950912, %v3051_v6  ;;  %v1388_v26 = vand.u32 4294950912, %v3053_v7 }
 0xce2   :  { %v1277_v35 = vrot.slane %v1276_v33, 1  ;;  %v1296_v37 = vadd.f32 %v1295_v34, %v1294_v31 }
 0xce3   :  { %2828 = vpush %v1258_v32 }
 0xce4   :  { %v1278_v36 = vadd.f32 %v1277_v35, %v1276_v33  ;;  %v1297_v38 = vrot.slane %v1296_v37, 1 }
 0xce6   :  { %2830 = vpush %v1278_v36  ;;  %v1298_v39 = vadd.f32 %v1297_v38, %v1296_v37 }
 0xce8   :  { %2832 = vpush %v1298_v39 }
 0xd12   :  { %s2827_s27 = spop %2826 }
 0xd13   :  { %p1240_p9 = scmp.ge.f32.partialorder %s5199_s17, %s2827_s27  ;;  %s1243_s28 = ssub.f32 %s5199_s17, %s2827_s27 }
 0xd14   :  { %s2829_s30 = spop %2828 }
 0xd15   :  { %s5213_s29 = smov (!%p1240_p9, %s1241_s29), %s5197_s18  ;;  %p1260_p10 = scmp.ge.f32.partialorder %s5203_s20, %s2829_s30 }
 0xd16   :  { %s1263_s5 = ssub.f32 %s5203_s20, %s2829_s30  ;;  %v1307_v42 = vstv %s5213_s29  ;;  %s5215_s28 = smov (!%p1240_p9, %s1243_s28), %s5199_s17 }
 0xd17   :  { %vm1308_vm12 = vcmp.eq.s32.totalorder %v1305_v40, %v1307_v42  ;;  %vm1309_vm13 = vcmp.eq.s32.totalorder %v1306_v41, %v1307_v42  ;;  %s5217_s4 = smov (!%p1260_p10, %s1261_s4), %s5201_s19  ;;  %s2831_s6 = spop %2830 }
 0xd18   :  { %v1310_v43 = vsel %vm1308_vm12, 1.0, %v3025_v10  ;;  %v1311_v44 = vsel %vm1309_vm13, 1.0, %v3025_v10  ;;  %p1280_p11 = scmp.ge.f32.partialorder %s5207_s23, %s2831_s6  ;;  %s1283_s8 = ssub.f32 %s5207_s23, %s2831_s6  ;;  %v1327_v46 = vstv %s5217_s4 }
 0xd19   :  { %v1312_v45 = vadd.f32 %v1311_v44, %v1310_v43  ;;  %vm1328_vm14 = vcmp.eq.s32.totalorder %v1305_v40, %v1327_v46  ;;  %vm1329_vm15 = vcmp.eq.s32.totalorder %v1306_v41, %v1327_v46  ;;  %s5219_s5 = smov (!%p1260_p10, %s1263_s5), %s5203_s20  ;;  %s2833_s9 = spop %2832 }
 0xd1a   :  { %s5221_s7 = smov (!%p1280_p11, %s1281_s7), %s5205_s22  ;;  %v1330_v47 = vsel %vm1328_vm14, 1.0, %v3025_v10  ;;  %v1331_v48 = vsel %vm1329_vm15, 1.0, %v3025_v10  ;;  %p1300_p12 = scmp.ge.f32.partialorder %s5211_s26, %s2833_s9 }
 0xd1b   :  { %1313 = vadd.xlane.f32.xlu1 %v1312_v45  ;;  %v1332_v49 = vadd.f32 %v1331_v48, %v1330_v47  ;;  %s1303_s11 = ssub.f32 %s5211_s26, %s2833_s9  ;;  %v1347_v50 = vstv %s5221_s7  ;;  %s5223_s8 = smov (!%p1280_p11, %s1283_s8), %s5207_s23 }
 0xd1c   :  { %vm1348_vm0 = vcmp.eq.s32.totalorder %v1305_v40, %v1347_v50  ;;  %vm1349_vm1 = vcmp.eq.s32.totalorder %v1306_v41, %v1347_v50  ;;  %s5225_s10 = smov (!%p1300_p12, %s1301_s10), %s5209_s25  ;;  %s1323_s14 = sor.u32 32768, %s5213_s29 }
 0xd1d   :  { %1333 = vadd.xlane.f32.xlu0 %v1332_v49  ;;  %v1350_v51 = vsel %vm1348_vm0, 1.0, %v3025_v10  ;;  %v1351_v52 = vsel %vm1349_vm1, 1.0, %v3025_v10  ;;  %v1367_v54 = vstv %s5225_s10  ;;  %s5227_s11 = smov (!%p1300_p12, %s1303_s11), %s5211_s26  ;;  %s1343_s16 = sor.u32 32768, %s5217_s4 }
 0xd1e   :  { %v1352_v53 = vadd.f32 %v1351_v52, %v1350_v51  ;;  %vm1368_vm2 = vcmp.eq.s32.totalorder %v1305_v40, %v1367_v54  ;;  %vm1369_vm3 = vcmp.eq.s32.totalorder %v1306_v41, %v1367_v54  ;;  %s1363_s0 = sor.u32 32768, %s5221_s7  ;;  %s1383_s21 = sor.u32 32768, %s5225_s10 }
 0xd1f   :  { %v1370_v55 = vsel %vm1368_vm2, 1.0, %v3025_v10  ;;  %v1371_v56 = vsel %vm1369_vm3, 1.0, %v3025_v10 }
 0xd20   :  { %1353 = vadd.xlane.f32.xlu1 %v1352_v53  ;;  %v1372_v57 = vadd.f32 %v1371_v56, %v1370_v55 }
 0xd22   :  { %1373 = vadd.xlane.f32.xlu0 %v1372_v57 }
 0xda4   :  { %v1314_v58 = vpop.xlane.xlu1 %1313 }
 0xda5   :  { %v1315_v59 = vrot.slane %v1314_v58, 4 }
 0xda6   :  { %v1334_v61 = vpop.xlane.xlu0 %1333 }
 0xda7   :  { %v1316_v60 = vadd.f32 %v1315_v59, %v1314_v58  ;;  %v1335_v63 = vrot.slane %v1334_v61, 4 }
 0xda9   :  { %v1317_v62 = vrot.slane %v1316_v60, 2  ;;  %v1336_v0 = vadd.f32 %v1335_v63, %v1334_v61  ;;  %v1354_v2 = vpop.xlane.xlu1 %1353 }
 0xdaa   :  { %v1355_v4 = vrot.slane %v1354_v2, 4 }
 0xdab   :  { %v1318_v1 = vadd.f32 %v1317_v62, %v1316_v60  ;;  %v1337_v3 = vrot.slane %v1336_v0, 2  ;;  %v1374_v12 = vpop.xlane.xlu0 %1373 }
 0xdac   :  { %v1356_v8 = vadd.f32 %v1355_v4, %v1354_v2  ;;  %v1375_v14 = vrot.slane %v1374_v12, 4 }
 0xdad   :  { %v1319_v5 = vrot.slane %v1318_v1, 1  ;;  %v1338_v11 = vadd.f32 %v1337_v3, %v1336_v0 }
 0xdae   :  { %v1357_v13 = vrot.slane %v1356_v8, 2  ;;  %v1376_v16 = vadd.f32 %v1375_v14, %v1374_v12 }
 0xdaf   :  { %v1320_v9 = vadd.f32 %v1319_v5, %v1318_v1  ;;  %v1339_v15 = vrot.slane %v1338_v11, 1 }
 0xdb0   :  { %v1358_v18 = vadd.f32 %v1357_v13, %v1356_v8  ;;  %v1377_v19 = vrot.slane %v1376_v16, 2 }
 0xdb1   :  { %2834 = vpush %v1320_v9  ;;  %v1340_v17 = vadd.f32 %v1339_v15, %v1338_v11  ;;  %v1469_v9 = vand.u32 4294959104, %v3051_v6  ;;  %v1470_v11 = vand.u32 4294959104, %v3053_v7 }
 0xdb2   :  { %v1359_v20 = vrot.slane %v1358_v18, 1  ;;  %v1378_v22 = vadd.f32 %v1377_v19, %v1376_v16 }
 0xdb3   :  { %2836 = vpush %v1340_v17 }
 0xdb4   :  { %v1360_v21 = vadd.f32 %v1359_v20, %v1358_v18  ;;  %v1379_v23 = vrot.slane %v1378_v22, 1 }
 0xdb6   :  { %2838 = vpush %v1360_v21  ;;  %v1380_v24 = vadd.f32 %v1379_v23, %v1378_v22 }
 0xdb8   :  { %2840 = vpush %v1380_v24 }
 0xde2   :  { %s2835_s12 = spop %2834 }
 0xde3   :  { %p1322_p13 = scmp.ge.f32.partialorder %s5215_s28, %s2835_s12  ;;  %s1325_s13 = ssub.f32 %s5215_s28, %s2835_s12 }
 0xde4   :  { %s2837_s15 = spop %2836 }
 0xde5   :  { %s5229_s14 = smov (!%p1322_p13, %s1323_s14), %s5213_s29  ;;  %p1342_p0 = scmp.ge.f32.partialorder %s5219_s5, %s2837_s15 }
 0xde6   :  { %s1345_s17 = ssub.f32 %s5219_s5, %s2837_s15  ;;  %v1389_v27 = vstv %s5229_s14  ;;  %s5231_s13 = smov (!%p1322_p13, %s1325_s13), %s5215_s28 }
 0xde7   :  { %vm1390_vm4 = vcmp.eq.s32.totalorder %v1387_v25, %v1389_v27  ;;  %vm1391_vm5 = vcmp.eq.s32.totalorder %v1388_v26, %v1389_v27  ;;  %s5233_s16 = smov (!%p1342_p0, %s1343_s16), %s5217_s4  ;;  %s2839_s18 = spop %2838 }
 0xde8   :  { %v1392_v28 = vsel %vm1390_vm4, 1.0, %v3025_v10  ;;  %v1393_v29 = vsel %vm1391_vm5, 1.0, %v3025_v10  ;;  %p1362_p1 = scmp.ge.f32.partialorder %s5223_s8, %s2839_s18  ;;  %s1365_s19 = ssub.f32 %s5223_s8, %s2839_s18  ;;  %v1409_v31 = vstv %s5233_s16 }
 0xde9   :  { %v1394_v30 = vadd.f32 %v1393_v29, %v1392_v28  ;;  %vm1410_vm6 = vcmp.eq.s32.totalorder %v1387_v25, %v1409_v31  ;;  %vm1411_vm7 = vcmp.eq.s32.totalorder %v1388_v26, %v1409_v31  ;;  %s5235_s17 = smov (!%p1342_p0, %s1345_s17), %s5219_s5  ;;  %s2841_s20 = spop %2840 }
 0xdea   :  { %s5237_s0 = smov (!%p1362_p1, %s1363_s0), %s5221_s7  ;;  %v1412_v32 = vsel %vm1410_vm6, 1.0, %v3025_v10  ;;  %v1413_v33 = vsel %vm1411_vm7, 1.0, %v3025_v10  ;;  %p1382_p2 = scmp.ge.f32.partialorder %s5227_s11, %s2841_s20 }
 0xdeb   :  { %1395 = vadd.xlane.f32.xlu1 %v1394_v30  ;;  %v1414_v34 = vadd.f32 %v1413_v33, %v1412_v32  ;;  %s1385_s22 = ssub.f32 %s5227_s11, %s2841_s20  ;;  %v1429_v35 = vstv %s5237_s0  ;;  %s5239_s19 = smov (!%p1362_p1, %s1365_s19), %s5223_s8 }
 0xdec   :  { %vm1430_vm8 = vcmp.eq.s32.totalorder %v1387_v25, %v1429_v35  ;;  %vm1431_vm9 = vcmp.eq.s32.totalorder %v1388_v26, %v1429_v35  ;;  %s5241_s21 = smov (!%p1382_p2, %s1383_s21), %s5225_s10  ;;  %s1405_s25 = sor.u32 16384, %s5229_s14 }
 0xded   :  { %1415 = vadd.xlane.f32.xlu0 %v1414_v34  ;;  %v1432_v36 = vsel %vm1430_vm8, 1.0, %v3025_v10  ;;  %v1433_v37 = vsel %vm1431_vm9, 1.0, %v3025_v10  ;;  %v1449_v39 = vstv %s5241_s21  ;;  %s5243_s22 = smov (!%p1382_p2, %s1385_s22), %s5227_s11  ;;  %s1425_s27 = sor.u32 16384, %s5233_s16 }
 0xdee   :  { %v1434_v38 = vadd.f32 %v1433_v37, %v1432_v36  ;;  %vm1450_vm10 = vcmp.eq.s32.totalorder %v1387_v25, %v1449_v39  ;;  %vm1451_vm11 = vcmp.eq.s32.totalorder %v1388_v26, %v1449_v39  ;;  %s1445_s30 = sor.u32 16384, %s5237_s0  ;;  %s1465_s6 = sor.u32 16384, %s5241_s21 }
 0xdef   :  { %v1452_v40 = vsel %vm1450_vm10, 1.0, %v3025_v10  ;;  %v1453_v41 = vsel %vm1451_vm11, 1.0, %v3025_v10 }
 0xdf0   :  { %1435 = vadd.xlane.f32.xlu1 %v1434_v38  ;;  %v1454_v42 = vadd.f32 %v1453_v41, %v1452_v40 }
 0xdf2   :  { %1455 = vadd.xlane.f32.xlu0 %v1454_v42 }
 0xe74   :  { %v1396_v43 = vpop.xlane.xlu1 %1395 }
 0xe75   :  { %v1397_v44 = vrot.slane %v1396_v43, 4 }
 0xe76   :  { %v1416_v46 = vpop.xlane.xlu0 %1415 }
 0xe77   :  { %v1398_v45 = vadd.f32 %v1397_v44, %v1396_v43  ;;  %v1417_v48 = vrot.slane %v1416_v46, 4 }
 0xe79   :  { %v1399_v47 = vrot.slane %v1398_v45, 2  ;;  %v1418_v49 = vadd.f32 %v1417_v48, %v1416_v46  ;;  %v1436_v51 = vpop.xlane.xlu1 %1435 }
 0xe7a   :  { %v1437_v53 = vrot.slane %v1436_v51, 4 }
 0xe7b   :  { %v1400_v50 = vadd.f32 %v1399_v47, %v1398_v45  ;;  %v1419_v52 = vrot.slane %v1418_v49, 2  ;;  %v1456_v58 = vpop.xlane.xlu0 %1455 }
 0xe7c   :  { %v1438_v55 = vadd.f32 %v1437_v53, %v1436_v51  ;;  %v1457_v60 = vrot.slane %v1456_v58, 4 }
 0xe7d   :  { %v1401_v54 = vrot.slane %v1400_v50, 1  ;;  %v1420_v57 = vadd.f32 %v1419_v52, %v1418_v49 }
 0xe7e   :  { %v1439_v59 = vrot.slane %v1438_v55, 2  ;;  %v1458_v62 = vadd.f32 %v1457_v60, %v1456_v58 }
 0xe7f   :  { %v1402_v56 = vadd.f32 %v1401_v54, %v1400_v50  ;;  %v1421_v61 = vrot.slane %v1420_v57, 1 }
 0xe80   :  { %v1440_v0 = vadd.f32 %v1439_v59, %v1438_v55  ;;  %v1459_v1 = vrot.slane %v1458_v62, 2 }
 0xe81   :  { %2842 = vpush %v1402_v56  ;;  %v1422_v63 = vadd.f32 %v1421_v61, %v1420_v57  ;;  %v1551_v56 = vand.u32 4294963200, %v3051_v6  ;;  %v1552_v57 = vand.u32 4294963200, %v3053_v7 }
 0xe82   :  { %v1441_v2 = vrot.slane %v1440_v0, 1  ;;  %v1460_v4 = vadd.f32 %v1459_v1, %v1458_v62 }
 0xe83   :  { %2844 = vpush %v1422_v63 }
 0xe84   :  { %v1442_v3 = vadd.f32 %v1441_v2, %v1440_v0  ;;  %v1461_v5 = vrot.slane %v1460_v4, 1 }
 0xe86   :  { %2846 = vpush %v1442_v3  ;;  %v1462_v8 = vadd.f32 %v1461_v5, %v1460_v4 }
 0xe88   :  { %2848 = vpush %v1462_v8 }
 0xeb2   :  { %s2843_s23 = spop %2842 }
 0xeb3   :  { %p1404_p3 = scmp.ge.f32.partialorder %s5231_s13, %s2843_s23  ;;  %s1407_s24 = ssub.f32 %s5231_s13, %s2843_s23 }
 0xeb4   :  { %s2845_s26 = spop %2844 }
 0xeb5   :  { %s5245_s25 = smov (!%p1404_p3, %s1405_s25), %s5229_s14  ;;  %p1424_p4 = scmp.ge.f32.partialorder %s5235_s17, %s2845_s26 }
 0xeb6   :  { %s1427_s28 = ssub.f32 %s5235_s17, %s2845_s26  ;;  %v1471_v12 = vstv %s5245_s25  ;;  %s5247_s24 = smov (!%p1404_p3, %s1407_s24), %s5231_s13 }
 0xeb7   :  { %vm1472_vm12 = vcmp.eq.s32.totalorder %v1469_v9, %v1471_v12  ;;  %vm1473_vm13 = vcmp.eq.s32.totalorder %v1470_v11, %v1471_v12  ;;  %s5249_s27 = smov (!%p1424_p4, %s1425_s27), %s5233_s16  ;;  %s2847_s29 = spop %2846 }
 0xeb8   :  { %v1474_v13 = vsel %vm1472_vm12, 1.0, %v3025_v10  ;;  %v1475_v14 = vsel %vm1473_vm13, 1.0, %v3025_v10  ;;  %p1444_p5 = scmp.ge.f32.partialorder %s5239_s19, %s2847_s29  ;;  %s1447_s4 = ssub.f32 %s5239_s19, %s2847_s29  ;;  %v1491_v16 = vstv %s5249_s27 }
 0xeb9   :  { %v1476_v15 = vadd.f32 %v1475_v14, %v1474_v13  ;;  %vm1492_vm14 = vcmp.eq.s32.totalorder %v1469_v9, %v1491_v16  ;;  %vm1493_vm15 = vcmp.eq.s32.totalorder %v1470_v11, %v1491_v16  ;;  %s5251_s28 = smov (!%p1424_p4, %s1427_s28), %s5235_s17  ;;  %s2849_s5 = spop %2848 }
 0xeba   :  { %s5253_s30 = smov (!%p1444_p5, %s1445_s30), %s5237_s0  ;;  %v1494_v17 = vsel %vm1492_vm14, 1.0, %v3025_v10  ;;  %v1495_v18 = vsel %vm1493_vm15, 1.0, %v3025_v10  ;;  %p1464_p6 = scmp.ge.f32.partialorder %s5243_s22, %s2849_s5 }
 0xebb   :  { %1477 = vadd.xlane.f32.xlu1 %v1476_v15  ;;  %v1496_v19 = vadd.f32 %v1495_v18, %v1494_v17  ;;  %s1467_s7 = ssub.f32 %s5243_s22, %s2849_s5  ;;  %v1511_v20 = vstv %s5253_s30  ;;  %s5255_s4 = smov (!%p1444_p5, %s1447_s4), %s5239_s19 }
 0xebc   :  { %vm1512_vm0 = vcmp.eq.s32.totalorder %v1469_v9, %v1511_v20  ;;  %vm1513_vm1 = vcmp.eq.s32.totalorder %v1470_v11, %v1511_v20  ;;  %s5257_s6 = smov (!%p1464_p6, %s1465_s6), %s5241_s21  ;;  %s1487_s10 = sor.u32 8192, %s5245_s25 }
 0xebd   :  { %1497 = vadd.xlane.f32.xlu0 %v1496_v19  ;;  %v1514_v21 = vsel %vm1512_vm0, 1.0, %v3025_v10  ;;  %v1515_v22 = vsel %vm1513_vm1, 1.0, %v3025_v10  ;;  %v1531_v24 = vstv %s5257_s6  ;;  %s5259_s7 = smov (!%p1464_p6, %s1467_s7), %s5243_s22  ;;  %s1507_s12 = sor.u32 8192, %s5249_s27 }
 0xebe   :  { %v1516_v23 = vadd.f32 %v1515_v22, %v1514_v21  ;;  %vm1532_vm2 = vcmp.eq.s32.totalorder %v1469_v9, %v1531_v24  ;;  %vm1533_vm3 = vcmp.eq.s32.totalorder %v1470_v11, %v1531_v24  ;;  %s1527_s15 = sor.u32 8192, %s5253_s30  ;;  %s1547_s18 = sor.u32 8192, %s5257_s6 }
 0xebf   :  { %v1534_v25 = vsel %vm1532_vm2, 1.0, %v3025_v10  ;;  %v1535_v26 = vsel %vm1533_vm3, 1.0, %v3025_v10 }
 0xec0   :  { %1517 = vadd.xlane.f32.xlu1 %v1516_v23  ;;  %v1536_v27 = vadd.f32 %v1535_v26, %v1534_v25 }
 0xec2   :  { %1537 = vadd.xlane.f32.xlu0 %v1536_v27 }
 0xf44   :  { %v1478_v28 = vpop.xlane.xlu1 %1477 }
 0xf45   :  { %v1479_v29 = vrot.slane %v1478_v28, 4 }
 0xf46   :  { %v1498_v31 = vpop.xlane.xlu0 %1497 }
 0xf47   :  { %v1480_v30 = vadd.f32 %v1479_v29, %v1478_v28  ;;  %v1499_v33 = vrot.slane %v1498_v31, 4 }
 0xf49   :  { %v1481_v32 = vrot.slane %v1480_v30, 2  ;;  %v1500_v34 = vadd.f32 %v1499_v33, %v1498_v31  ;;  %v1518_v36 = vpop.xlane.xlu1 %1517 }
 0xf4a   :  { %v1519_v38 = vrot.slane %v1518_v36, 4 }
 0xf4b   :  { %v1482_v35 = vadd.f32 %v1481_v32, %v1480_v30  ;;  %v1501_v37 = vrot.slane %v1500_v34, 2  ;;  %v1538_v43 = vpop.xlane.xlu0 %1537 }
 0xf4c   :  { %v1520_v40 = vadd.f32 %v1519_v38, %v1518_v36  ;;  %v1539_v45 = vrot.slane %v1538_v43, 4 }
 0xf4d   :  { %v1483_v39 = vrot.slane %v1482_v35, 1  ;;  %v1502_v42 = vadd.f32 %v1501_v37, %v1500_v34 }
 0xf4e   :  { %v1521_v44 = vrot.slane %v1520_v40, 2  ;;  %v1540_v47 = vadd.f32 %v1539_v45, %v1538_v43 }
 0xf4f   :  { %v1484_v41 = vadd.f32 %v1483_v39, %v1482_v35  ;;  %v1503_v46 = vrot.slane %v1502_v42, 1 }
 0xf50   :  { %v1522_v49 = vadd.f32 %v1521_v44, %v1520_v40  ;;  %v1541_v50 = vrot.slane %v1540_v47, 2 }
 0xf51   :  { %2850 = vpush %v1484_v41  ;;  %v1504_v48 = vadd.f32 %v1503_v46, %v1502_v42  ;;  %v1633_v41 = vand.u32 4294965248, %v3051_v6  ;;  %v1634_v42 = vand.u32 4294965248, %v3053_v7 }
 0xf52   :  { %v1523_v51 = vrot.slane %v1522_v49, 1  ;;  %v1542_v53 = vadd.f32 %v1541_v50, %v1540_v47 }
 0xf53   :  { %2852 = vpush %v1504_v48 }
 0xf54   :  { %v1524_v52 = vadd.f32 %v1523_v51, %v1522_v49  ;;  %v1543_v54 = vrot.slane %v1542_v53, 1 }
 0xf56   :  { %2854 = vpush %v1524_v52  ;;  %v1544_v55 = vadd.f32 %v1543_v54, %v1542_v53 }
 0xf58   :  { %2856 = vpush %v1544_v55 }
 0xf82   :  { %s2851_s8 = spop %2850 }
 0xf83   :  { %p1486_p7 = scmp.ge.f32.partialorder %s5247_s24, %s2851_s8  ;;  %s1489_s9 = ssub.f32 %s5247_s24, %s2851_s8 }
 0xf84   :  { %s2853_s11 = spop %2852 }
 0xf85   :  { %s5261_s10 = smov (!%p1486_p7, %s1487_s10), %s5245_s25  ;;  %p1506_p8 = scmp.ge.f32.partialorder %s5251_s28, %s2853_s11 }
 0xf86   :  { %s1509_s13 = ssub.f32 %s5251_s28, %s2853_s11  ;;  %v1553_v58 = vstv %s5261_s10  ;;  %s5263_s9 = smov (!%p1486_p7, %s1489_s9), %s5247_s24 }
 0xf87   :  { %vm1554_vm4 = vcmp.eq.s32.totalorder %v1551_v56, %v1553_v58  ;;  %vm1555_vm5 = vcmp.eq.s32.totalorder %v1552_v57, %v1553_v58  ;;  %s5265_s12 = smov (!%p1506_p8, %s1507_s12), %s5249_s27  ;;  %s2855_s14 = spop %2854 }
 0xf88   :  { %v1556_v59 = vsel %vm1554_vm4, 1.0, %v3025_v10  ;;  %v1557_v60 = vsel %vm1555_vm5, 1.0, %v3025_v10  ;;  %p1526_p9 = scmp.ge.f32.partialorder %s5255_s4, %s2855_s14  ;;  %s1529_s16 = ssub.f32 %s5255_s4, %s2855_s14  ;;  %v1573_v62 = vstv %s5265_s12 }
 0xf89   :  { %v1558_v61 = vadd.f32 %v1557_v60, %v1556_v59  ;;  %vm1574_vm6 = vcmp.eq.s32.totalorder %v1551_v56, %v1573_v62  ;;  %vm1575_vm7 = vcmp.eq.s32.totalorder %v1552_v57, %v1573_v62  ;;  %s5267_s13 = smov (!%p1506_p8, %s1509_s13), %s5251_s28  ;;  %s2857_s17 = spop %2856 }
 0xf8a   :  { %s5269_s15 = smov (!%p1526_p9, %s1527_s15), %s5253_s30  ;;  %v1576_v63 = vsel %vm1574_vm6, 1.0, %v3025_v10  ;;  %v1577_v0 = vsel %vm1575_vm7, 1.0, %v3025_v10  ;;  %p1546_p10 = scmp.ge.f32.partialorder %s5259_s7, %s2857_s17 }
 0xf8b   :  { %1559 = vadd.xlane.f32.xlu1 %v1558_v61  ;;  %v1578_v1 = vadd.f32 %v1577_v0, %v1576_v63  ;;  %s1549_s0 = ssub.f32 %s5259_s7, %s2857_s17  ;;  %v1593_v2 = vstv %s5269_s15  ;;  %s5271_s16 = smov (!%p1526_p9, %s1529_s16), %s5255_s4 }
 0xf8c   :  { %vm1594_vm8 = vcmp.eq.s32.totalorder %v1551_v56, %v1593_v2  ;;  %vm1595_vm9 = vcmp.eq.s32.totalorder %v1552_v57, %v1593_v2  ;;  %s5273_s18 = smov (!%p1546_p10, %s1547_s18), %s5257_s6  ;;  %s1569_s21 = sor.u32 4096, %s5261_s10 }
 0xf8d   :  { %1579 = vadd.xlane.f32.xlu0 %v1578_v1  ;;  %v1596_v3 = vsel %vm1594_vm8, 1.0, %v3025_v10  ;;  %v1597_v4 = vsel %vm1595_vm9, 1.0, %v3025_v10  ;;  %v1613_v8 = vstv %s5273_s18  ;;  %s5275_s0 = smov (!%p1546_p10, %s1549_s0), %s5259_s7  ;;  %s1589_s23 = sor.u32 4096, %s5265_s12 }
 0xf8e   :  { %v1598_v5 = vadd.f32 %v1597_v4, %v1596_v3  ;;  %vm1614_vm10 = vcmp.eq.s32.totalorder %v1551_v56, %v1613_v8  ;;  %vm1615_vm11 = vcmp.eq.s32.totalorder %v1552_v57, %v1613_v8  ;;  %s1609_s26 = sor.u32 4096, %s5269_s15  ;;  %s1629_s29 = sor.u32 4096, %s5273_s18 }
 0xf8f   :  { %v1616_v9 = vsel %vm1614_vm10, 1.0, %v3025_v10  ;;  %v1617_v11 = vsel %vm1615_vm11, 1.0, %v3025_v10 }
 0xf90   :  { %1599 = vadd.xlane.f32.xlu1 %v1598_v5  ;;  %v1618_v12 = vadd.f32 %v1617_v11, %v1616_v9 }
 0xf92   :  { %1619 = vadd.xlane.f32.xlu0 %v1618_v12 }
0x1014   :  { %v1560_v13 = vpop.xlane.xlu1 %1559 }
0x1015   :  { %v1561_v14 = vrot.slane %v1560_v13, 4 }
0x1016   :  { %v1580_v16 = vpop.xlane.xlu0 %1579 }
0x1017   :  { %v1562_v15 = vadd.f32 %v1561_v14, %v1560_v13  ;;  %v1581_v18 = vrot.slane %v1580_v16, 4 }
0x1019   :  { %v1563_v17 = vrot.slane %v1562_v15, 2  ;;  %v1582_v19 = vadd.f32 %v1581_v18, %v1580_v16  ;;  %v1600_v21 = vpop.xlane.xlu1 %1599 }
0x101a   :  { %v1601_v23 = vrot.slane %v1600_v21, 4 }
0x101b   :  { %v1564_v20 = vadd.f32 %v1563_v17, %v1562_v15  ;;  %v1583_v22 = vrot.slane %v1582_v19, 2  ;;  %v1620_v28 = vpop.xlane.xlu0 %1619 }
0x101c   :  { %v1602_v25 = vadd.f32 %v1601_v23, %v1600_v21  ;;  %v1621_v30 = vrot.slane %v1620_v28, 4 }
0x101d   :  { %v1565_v24 = vrot.slane %v1564_v20, 1  ;;  %v1584_v27 = vadd.f32 %v1583_v22, %v1582_v19 }
0x101e   :  { %v1603_v29 = vrot.slane %v1602_v25, 2  ;;  %v1622_v32 = vadd.f32 %v1621_v30, %v1620_v28 }
0x101f   :  { %v1566_v26 = vadd.f32 %v1565_v24, %v1564_v20  ;;  %v1585_v31 = vrot.slane %v1584_v27, 1 }
0x1020   :  { %v1604_v34 = vadd.f32 %v1603_v29, %v1602_v25  ;;  %v1623_v35 = vrot.slane %v1622_v32, 2 }
0x1021   :  { %2858 = vpush %v1566_v26  ;;  %v1586_v33 = vadd.f32 %v1585_v31, %v1584_v27  ;;  %v1715_v26 = vand.u32 4294966272, %v3051_v6  ;;  %v1716_v27 = vand.u32 4294966272, %v3053_v7 }
0x1022   :  { %v1605_v36 = vrot.slane %v1604_v34, 1  ;;  %v1624_v38 = vadd.f32 %v1623_v35, %v1622_v32 }
0x1023   :  { %2860 = vpush %v1586_v33 }
0x1024   :  { %v1606_v37 = vadd.f32 %v1605_v36, %v1604_v34  ;;  %v1625_v39 = vrot.slane %v1624_v38, 1 }
0x1026   :  { %2862 = vpush %v1606_v37  ;;  %v1626_v40 = vadd.f32 %v1625_v39, %v1624_v38 }
0x1028   :  { %2864 = vpush %v1626_v40 }
0x1052   :  { %s2859_s19 = spop %2858 }
0x1053   :  { %p1568_p11 = scmp.ge.f32.partialorder %s5263_s9, %s2859_s19  ;;  %s1571_s20 = ssub.f32 %s5263_s9, %s2859_s19 }
0x1054   :  { %s2861_s22 = spop %2860 }
0x1055   :  { %s5277_s21 = smov (!%p1568_p11, %s1569_s21), %s5261_s10  ;;  %p1588_p12 = scmp.ge.f32.partialorder %s5267_s13, %s2861_s22 }
0x1056   :  { %s1591_s24 = ssub.f32 %s5267_s13, %s2861_s22  ;;  %v1635_v43 = vstv %s5277_s21  ;;  %s5279_s20 = smov (!%p1568_p11, %s1571_s20), %s5263_s9 }
0x1057   :  { %vm1636_vm12 = vcmp.eq.s32.totalorder %v1633_v41, %v1635_v43  ;;  %vm1637_vm13 = vcmp.eq.s32.totalorder %v1634_v42, %v1635_v43  ;;  %s5281_s23 = smov (!%p1588_p12, %s1589_s23), %s5265_s12  ;;  %s2863_s25 = spop %2862 }
0x1058   :  { %v1638_v44 = vsel %vm1636_vm12, 1.0, %v3025_v10  ;;  %v1639_v45 = vsel %vm1637_vm13, 1.0, %v3025_v10  ;;  %p1608_p13 = scmp.ge.f32.partialorder %s5271_s16, %s2863_s25  ;;  %s1611_s27 = ssub.f32 %s5271_s16, %s2863_s25  ;;  %v1655_v47 = vstv %s5281_s23 }
0x1059   :  { %v1640_v46 = vadd.f32 %v1639_v45, %v1638_v44  ;;  %vm1656_vm14 = vcmp.eq.s32.totalorder %v1633_v41, %v1655_v47  ;;  %vm1657_vm15 = vcmp.eq.s32.totalorder %v1634_v42, %v1655_v47  ;;  %s5283_s24 = smov (!%p1588_p12, %s1591_s24), %s5267_s13  ;;  %s2865_s28 = spop %2864 }
0x105a   :  { %s5285_s26 = smov (!%p1608_p13, %s1609_s26), %s5269_s15  ;;  %v1658_v48 = vsel %vm1656_vm14, 1.0, %v3025_v10  ;;  %v1659_v49 = vsel %vm1657_vm15, 1.0, %v3025_v10  ;;  %p1628_p0 = scmp.ge.f32.partialorder %s5275_s0, %s2865_s28 }
0x105b   :  { %1641 = vadd.xlane.f32.xlu1 %v1640_v46  ;;  %v1660_v50 = vadd.f32 %v1659_v49, %v1658_v48  ;;  %s1631_s30 = ssub.f32 %s5275_s0, %s2865_s28  ;;  %v1675_v51 = vstv %s5285_s26  ;;  %s5287_s27 = smov (!%p1608_p13, %s1611_s27), %s5271_s16 }
0x105c   :  { %vm1676_vm0 = vcmp.eq.s32.totalorder %v1633_v41, %v1675_v51  ;;  %vm1677_vm1 = vcmp.eq.s32.totalorder %v1634_v42, %v1675_v51  ;;  %s5289_s29 = smov (!%p1628_p0, %s1629_s29), %s5273_s18  ;;  %s1651_s6 = sor.u32 2048, %s5277_s21 }
0x105d   :  { %1661 = vadd.xlane.f32.xlu0 %v1660_v50  ;;  %v1678_v52 = vsel %vm1676_vm0, 1.0, %v3025_v10  ;;  %v1679_v53 = vsel %vm1677_vm1, 1.0, %v3025_v10  ;;  %v1695_v55 = vstv %s5289_s29  ;;  %s5291_s30 = smov (!%p1628_p0, %s1631_s30), %s5275_s0  ;;  %s1671_s8 = sor.u32 2048, %s5281_s23 }
0x105e   :  { %v1680_v54 = vadd.f32 %v1679_v53, %v1678_v52  ;;  %vm1696_vm2 = vcmp.eq.s32.totalorder %v1633_v41, %v1695_v55  ;;  %vm1697_vm3 = vcmp.eq.s32.totalorder %v1634_v42, %v1695_v55  ;;  %s1691_s11 = sor.u32 2048, %s5285_s26  ;;  %s1711_s14 = sor.u32 2048, %s5289_s29 }
0x105f   :  { %v1698_v56 = vsel %vm1696_vm2, 1.0, %v3025_v10  ;;  %v1699_v57 = vsel %vm1697_vm3, 1.0, %v3025_v10 }
0x1060   :  { %1681 = vadd.xlane.f32.xlu1 %v1680_v54  ;;  %v1700_v58 = vadd.f32 %v1699_v57, %v1698_v56 }
0x1062   :  { %1701 = vadd.xlane.f32.xlu0 %v1700_v58 }
0x10e4   :  { %v1642_v59 = vpop.xlane.xlu1 %1641 }
0x10e5   :  { %v1643_v60 = vrot.slane %v1642_v59, 4 }
0x10e6   :  { %v1662_v62 = vpop.xlane.xlu0 %1661 }
0x10e7   :  { %v1644_v61 = vadd.f32 %v1643_v60, %v1642_v59  ;;  %v1663_v0 = vrot.slane %v1662_v62, 4 }
0x10e9   :  { %v1645_v63 = vrot.slane %v1644_v61, 2  ;;  %v1664_v1 = vadd.f32 %v1663_v0, %v1662_v62  ;;  %v1682_v3 = vpop.xlane.xlu1 %1681 }
0x10ea   :  { %v1683_v5 = vrot.slane %v1682_v3, 4 }
0x10eb   :  { %v1646_v2 = vadd.f32 %v1645_v63, %v1644_v61  ;;  %v1665_v4 = vrot.slane %v1664_v1, 2  ;;  %v1702_v13 = vpop.xlane.xlu0 %1701 }
0x10ec   :  { %v1684_v9 = vadd.f32 %v1683_v5, %v1682_v3  ;;  %v1703_v15 = vrot.slane %v1702_v13, 4 }
0x10ed   :  { %v1647_v8 = vrot.slane %v1646_v2, 1  ;;  %v1666_v12 = vadd.f32 %v1665_v4, %v1664_v1 }
0x10ee   :  { %v1685_v14 = vrot.slane %v1684_v9, 2  ;;  %v1704_v17 = vadd.f32 %v1703_v15, %v1702_v13 }
0x10ef   :  { %v1648_v11 = vadd.f32 %v1647_v8, %v1646_v2  ;;  %v1667_v16 = vrot.slane %v1666_v12, 1 }
0x10f0   :  { %v1686_v19 = vadd.f32 %v1685_v14, %v1684_v9  ;;  %v1705_v20 = vrot.slane %v1704_v17, 2 }
0x10f1   :  { %2866 = vpush %v1648_v11  ;;  %v1668_v18 = vadd.f32 %v1667_v16, %v1666_v12  ;;  %v1797_v11 = vand.u32 4294966784, %v3051_v6  ;;  %v1798_v12 = vand.u32 4294966784, %v3053_v7 }
0x10f2   :  { %v1687_v21 = vrot.slane %v1686_v19, 1  ;;  %v1706_v23 = vadd.f32 %v1705_v20, %v1704_v17 }
0x10f3   :  { %2868 = vpush %v1668_v18 }
0x10f4   :  { %v1688_v22 = vadd.f32 %v1687_v21, %v1686_v19  ;;  %v1707_v24 = vrot.slane %v1706_v23, 1 }
0x10f6   :  { %2870 = vpush %v1688_v22  ;;  %v1708_v25 = vadd.f32 %v1707_v24, %v1706_v23 }
0x10f8   :  { %2872 = vpush %v1708_v25 }
0x1122   :  { %s2867_s4 = spop %2866 }
0x1123   :  { %p1650_p1 = scmp.ge.f32.partialorder %s5279_s20, %s2867_s4  ;;  %s1653_s5 = ssub.f32 %s5279_s20, %s2867_s4 }
0x1124   :  { %s2869_s7 = spop %2868 }
0x1125   :  { %s5293_s6 = smov (!%p1650_p1, %s1651_s6), %s5277_s21  ;;  %p1670_p2 = scmp.ge.f32.partialorder %s5283_s24, %s2869_s7 }
0x1126   :  { %s1673_s9 = ssub.f32 %s5283_s24, %s2869_s7  ;;  %v1717_v28 = vstv %s5293_s6  ;;  %s5295_s5 = smov (!%p1650_p1, %s1653_s5), %s5279_s20 }
0x1127   :  { %vm1718_vm4 = vcmp.eq.s32.totalorder %v1715_v26, %v1717_v28  ;;  %vm1719_vm5 = vcmp.eq.s32.totalorder %v1716_v27, %v1717_v28  ;;  %s5297_s8 = smov (!%p1670_p2, %s1671_s8), %s5281_s23  ;;  %s2871_s10 = spop %2870 }
0x1128   :  { %v1720_v29 = vsel %vm1718_vm4, 1.0, %v3025_v10  ;;  %v1721_v30 = vsel %vm1719_vm5, 1.0, %v3025_v10  ;;  %p1690_p3 = scmp.ge.f32.partialorder %s5287_s27, %s2871_s10  ;;  %s1693_s12 = ssub.f32 %s5287_s27, %s2871_s10  ;;  %v1737_v32 = vstv %s5297_s8 }
0x1129   :  { %v1722_v31 = vadd.f32 %v1721_v30, %v1720_v29  ;;  %vm1738_vm6 = vcmp.eq.s32.totalorder %v1715_v26, %v1737_v32  ;;  %vm1739_vm7 = vcmp.eq.s32.totalorder %v1716_v27, %v1737_v32  ;;  %s5299_s9 = smov (!%p1670_p2, %s1673_s9), %s5283_s24  ;;  %s2873_s13 = spop %2872 }
0x112a   :  { %s5301_s11 = smov (!%p1690_p3, %s1691_s11), %s5285_s26  ;;  %v1740_v33 = vsel %vm1738_vm6, 1.0, %v3025_v10  ;;  %v1741_v34 = vsel %vm1739_vm7, 1.0, %v3025_v10  ;;  %p1710_p4 = scmp.ge.f32.partialorder %s5291_s30, %s2873_s13 }
0x112b   :  { %1723 = vadd.xlane.f32.xlu1 %v1722_v31  ;;  %v1742_v35 = vadd.f32 %v1741_v34, %v1740_v33  ;;  %s1713_s15 = ssub.f32 %s5291_s30, %s2873_s13  ;;  %v1757_v36 = vstv %s5301_s11  ;;  %s5303_s12 = smov (!%p1690_p3, %s1693_s12), %s5287_s27 }
0x112c   :  { %vm1758_vm8 = vcmp.eq.s32.totalorder %v1715_v26, %v1757_v36  ;;  %vm1759_vm9 = vcmp.eq.s32.totalorder %v1716_v27, %v1757_v36  ;;  %s5305_s14 = smov (!%p1710_p4, %s1711_s14), %s5289_s29  ;;  %s1733_s18 = sor.u32 1024, %s5293_s6 }
0x112d   :  { %1743 = vadd.xlane.f32.xlu0 %v1742_v35  ;;  %v1760_v37 = vsel %vm1758_vm8, 1.0, %v3025_v10  ;;  %v1761_v38 = vsel %vm1759_vm9, 1.0, %v3025_v10  ;;  %v1777_v40 = vstv %s5305_s14  ;;  %s5307_s15 = smov (!%p1710_p4, %s1713_s15), %s5291_s30  ;;  %s1753_s19 = sor.u32 1024, %s5297_s8 }
0x112e   :  { %v1762_v39 = vadd.f32 %v1761_v38, %v1760_v37  ;;  %vm1778_vm10 = vcmp.eq.s32.totalorder %v1715_v26, %v1777_v40  ;;  %vm1779_vm11 = vcmp.eq.s32.totalorder %v1716_v27, %v1777_v40  ;;  %s1773_s22 = sor.u32 1024, %s5301_s11  ;;  %s1793_s25 = sor.u32 1024, %s5305_s14 }
0x112f   :  { %v1780_v41 = vsel %vm1778_vm10, 1.0, %v3025_v10  ;;  %v1781_v42 = vsel %vm1779_vm11, 1.0, %v3025_v10 }
0x1130   :  { %1763 = vadd.xlane.f32.xlu1 %v1762_v39  ;;  %v1782_v43 = vadd.f32 %v1781_v42, %v1780_v41 }
0x1132   :  { %1783 = vadd.xlane.f32.xlu0 %v1782_v43 }
0x11b4   :  { %v1724_v44 = vpop.xlane.xlu1 %1723 }
0x11b5   :  { %v1725_v45 = vrot.slane %v1724_v44, 4 }
0x11b6   :  { %v1744_v47 = vpop.xlane.xlu0 %1743 }
0x11b7   :  { %v1726_v46 = vadd.f32 %v1725_v45, %v1724_v44  ;;  %v1745_v49 = vrot.slane %v1744_v47, 4 }
0x11b9   :  { %v1727_v48 = vrot.slane %v1726_v46, 2  ;;  %v1746_v50 = vadd.f32 %v1745_v49, %v1744_v47  ;;  %v1764_v52 = vpop.xlane.xlu1 %1763 }
0x11ba   :  { %v1765_v54 = vrot.slane %v1764_v52, 4 }
0x11bb   :  { %v1728_v51 = vadd.f32 %v1727_v48, %v1726_v46  ;;  %v1747_v53 = vrot.slane %v1746_v50, 2  ;;  %v1784_v59 = vpop.xlane.xlu0 %1783 }
0x11bc   :  { %v1766_v56 = vadd.f32 %v1765_v54, %v1764_v52  ;;  %v1785_v61 = vrot.slane %v1784_v59, 4 }
0x11bd   :  { %v1729_v55 = vrot.slane %v1728_v51, 1  ;;  %v1748_v58 = vadd.f32 %v1747_v53, %v1746_v50 }
0x11be   :  { %v1767_v60 = vrot.slane %v1766_v56, 2  ;;  %v1786_v63 = vadd.f32 %v1785_v61, %v1784_v59 }
0x11bf   :  { %v1730_v57 = vadd.f32 %v1729_v55, %v1728_v51  ;;  %v1749_v62 = vrot.slane %v1748_v58, 1 }
0x11c0   :  { %v1768_v1 = vadd.f32 %v1767_v60, %v1766_v56  ;;  %v1787_v2 = vrot.slane %v1786_v63, 2 }
0x11c1   :  { %2874 = vpush %v1730_v57  ;;  %v1750_v0 = vadd.f32 %v1749_v62, %v1748_v58  ;;  %v1879_v57 = vand.u32 4294967040, %v3051_v6  ;;  %v1880_v58 = vand.u32 4294967040, %v3053_v7 }
0x11c2   :  { %v1769_v3 = vrot.slane %v1768_v1, 1  ;;  %v1788_v5 = vadd.f32 %v1787_v2, %v1786_v63 }
0x11c3   :  { %2876 = vpush %v1750_v0 }
0x11c4   :  { %v1770_v4 = vadd.f32 %v1769_v3, %v1768_v1  ;;  %v1789_v8 = vrot.slane %v1788_v5, 1 }
0x11c6   :  { %2878 = vpush %v1770_v4  ;;  %v1790_v9 = vadd.f32 %v1789_v8, %v1788_v5 }
0x11c8   :  { %2880 = vpush %v1790_v9 }
0x11f2   :  { %s2875_s16 = spop %2874 }
0x11f3   :  { %p1732_p5 = scmp.ge.f32.partialorder %s5295_s5, %s2875_s16  ;;  %s1735_s17 = ssub.f32 %s5295_s5, %s2875_s16 }
0x11f4   :  { %s2877_s0 = spop %2876 }
0x11f5   :  { %s5309_s18 = smov (!%p1732_p5, %s1733_s18), %s5293_s6  ;;  %p1752_p6 = scmp.ge.f32.partialorder %s5299_s9, %s2877_s0 }
0x11f6   :  { %s1755_s20 = ssub.f32 %s5299_s9, %s2877_s0  ;;  %v1799_v13 = vstv %s5309_s18  ;;  %s5311_s17 = smov (!%p1732_p5, %s1735_s17), %s5295_s5 }
0x11f7   :  { %vm1800_vm12 = vcmp.eq.s32.totalorder %v1797_v11, %v1799_v13  ;;  %vm1801_vm13 = vcmp.eq.s32.totalorder %v1798_v12, %v1799_v13  ;;  %s5313_s19 = smov (!%p1752_p6, %s1753_s19), %s5297_s8  ;;  %s2879_s21 = spop %2878 }
0x11f8   :  { %v1802_v14 = vsel %vm1800_vm12, 1.0, %v3025_v10  ;;  %v1803_v15 = vsel %vm1801_vm13, 1.0, %v3025_v10  ;;  %p1772_p7 = scmp.ge.f32.partialorder %s5303_s12, %s2879_s21  ;;  %s1775_s23 = ssub.f32 %s5303_s12, %s2879_s21  ;;  %v1819_v17 = vstv %s5313_s19 }
0x11f9   :  { %v1804_v16 = vadd.f32 %v1803_v15, %v1802_v14  ;;  %vm1820_vm14 = vcmp.eq.s32.totalorder %v1797_v11, %v1819_v17  ;;  %vm1821_vm15 = vcmp.eq.s32.totalorder %v1798_v12, %v1819_v17  ;;  %s5315_s20 = smov (!%p1752_p6, %s1755_s20), %s5299_s9  ;;  %s2881_s24 = spop %2880 }
0x11fa   :  { %s5317_s22 = smov (!%p1772_p7, %s1773_s22), %s5301_s11  ;;  %v1822_v18 = vsel %vm1820_vm14, 1.0, %v3025_v10  ;;  %v1823_v19 = vsel %vm1821_vm15, 1.0, %v3025_v10  ;;  %p1792_p8 = scmp.ge.f32.partialorder %s5307_s15, %s2881_s24 }
0x11fb   :  { %1805 = vadd.xlane.f32.xlu1 %v1804_v16  ;;  %v1824_v20 = vadd.f32 %v1823_v19, %v1822_v18  ;;  %s1795_s26 = ssub.f32 %s5307_s15, %s2881_s24  ;;  %v1839_v21 = vstv %s5317_s22  ;;  %s5319_s23 = smov (!%p1772_p7, %s1775_s23), %s5303_s12 }
0x11fc   :  { %vm1840_vm0 = vcmp.eq.s32.totalorder %v1797_v11, %v1839_v21  ;;  %vm1841_vm1 = vcmp.eq.s32.totalorder %v1798_v12, %v1839_v21  ;;  %s5321_s25 = smov (!%p1792_p8, %s1793_s25), %s5305_s14  ;;  %s1815_s29 = sor.u32 512, %s5309_s18 }
0x11fd   :  { %1825 = vadd.xlane.f32.xlu0 %v1824_v20  ;;  %v1842_v22 = vsel %vm1840_vm0, 1.0, %v3025_v10  ;;  %v1843_v23 = vsel %vm1841_vm1, 1.0, %v3025_v10  ;;  %v1859_v25 = vstv %s5321_s25  ;;  %s5323_s26 = smov (!%p1792_p8, %s1795_s26), %s5307_s15  ;;  %s1835_s4 = sor.u32 512, %s5313_s19 }
0x11fe   :  { %v1844_v24 = vadd.f32 %v1843_v23, %v1842_v22  ;;  %vm1860_vm2 = vcmp.eq.s32.totalorder %v1797_v11, %v1859_v25  ;;  %vm1861_vm3 = vcmp.eq.s32.totalorder %v1798_v12, %v1859_v25  ;;  %s1855_s7 = sor.u32 512, %s5317_s22  ;;  %s1875_s10 = sor.u32 512, %s5321_s25 }
0x11ff   :  { %v1862_v26 = vsel %vm1860_vm2, 1.0, %v3025_v10  ;;  %v1863_v27 = vsel %vm1861_vm3, 1.0, %v3025_v10 }
0x1200   :  { %1845 = vadd.xlane.f32.xlu1 %v1844_v24  ;;  %v1864_v28 = vadd.f32 %v1863_v27, %v1862_v26 }
0x1202   :  { %1865 = vadd.xlane.f32.xlu0 %v1864_v28 }
0x1284   :  { %v1806_v29 = vpop.xlane.xlu1 %1805 }
0x1285   :  { %v1807_v30 = vrot.slane %v1806_v29, 4 }
0x1286   :  { %v1826_v32 = vpop.xlane.xlu0 %1825 }
0x1287   :  { %v1808_v31 = vadd.f32 %v1807_v30, %v1806_v29  ;;  %v1827_v34 = vrot.slane %v1826_v32, 4 }
0x1289   :  { %v1809_v33 = vrot.slane %v1808_v31, 2  ;;  %v1828_v35 = vadd.f32 %v1827_v34, %v1826_v32  ;;  %v1846_v37 = vpop.xlane.xlu1 %1845 }
0x128a   :  { %v1847_v39 = vrot.slane %v1846_v37, 4 }
0x128b   :  { %v1810_v36 = vadd.f32 %v1809_v33, %v1808_v31  ;;  %v1829_v38 = vrot.slane %v1828_v35, 2  ;;  %v1866_v44 = vpop.xlane.xlu0 %1865 }
0x128c   :  { %v1848_v41 = vadd.f32 %v1847_v39, %v1846_v37  ;;  %v1867_v46 = vrot.slane %v1866_v44, 4 }
0x128d   :  { %v1811_v40 = vrot.slane %v1810_v36, 1  ;;  %v1830_v43 = vadd.f32 %v1829_v38, %v1828_v35 }
0x128e   :  { %v1849_v45 = vrot.slane %v1848_v41, 2  ;;  %v1868_v48 = vadd.f32 %v1867_v46, %v1866_v44 }
0x128f   :  { %v1812_v42 = vadd.f32 %v1811_v40, %v1810_v36  ;;  %v1831_v47 = vrot.slane %v1830_v43, 1 }
0x1290   :  { %v1850_v50 = vadd.f32 %v1849_v45, %v1848_v41  ;;  %v1869_v51 = vrot.slane %v1868_v48, 2 }
0x1291   :  { %2882 = vpush %v1812_v42  ;;  %v1832_v49 = vadd.f32 %v1831_v47, %v1830_v43  ;;  %v1961_v42 = vand.u32 4294967168, %v3051_v6  ;;  %v1962_v43 = vand.u32 4294967168, %v3053_v7 }
0x1292   :  { %v1851_v52 = vrot.slane %v1850_v50, 1  ;;  %v1870_v54 = vadd.f32 %v1869_v51, %v1868_v48 }
0x1293   :  { %2884 = vpush %v1832_v49 }
0x1294   :  { %v1852_v53 = vadd.f32 %v1851_v52, %v1850_v50  ;;  %v1871_v55 = vrot.slane %v1870_v54, 1 }
0x1296   :  { %2886 = vpush %v1852_v53  ;;  %v1872_v56 = vadd.f32 %v1871_v55, %v1870_v54 }
0x1298   :  { %2888 = vpush %v1872_v56 }
0x12c2   :  { %s2883_s27 = spop %2882 }
0x12c3   :  { %p1814_p9 = scmp.ge.f32.partialorder %s5311_s17, %s2883_s27  ;;  %s1817_s28 = ssub.f32 %s5311_s17, %s2883_s27 }
0x12c4   :  { %s2885_s30 = spop %2884 }
0x12c5   :  { %s5325_s29 = smov (!%p1814_p9, %s1815_s29), %s5309_s18  ;;  %p1834_p10 = scmp.ge.f32.partialorder %s5315_s20, %s2885_s30 }
0x12c6   :  { %s1837_s5 = ssub.f32 %s5315_s20, %s2885_s30  ;;  %v1881_v59 = vstv %s5325_s29  ;;  %s5327_s28 = smov (!%p1814_p9, %s1817_s28), %s5311_s17 }
0x12c7   :  { %vm1882_vm4 = vcmp.eq.s32.totalorder %v1879_v57, %v1881_v59  ;;  %vm1883_vm5 = vcmp.eq.s32.totalorder %v1880_v58, %v1881_v59  ;;  %s5329_s4 = smov (!%p1834_p10, %s1835_s4), %s5313_s19  ;;  %s2887_s6 = spop %2886 }
0x12c8   :  { %v1884_v60 = vsel %vm1882_vm4, 1.0, %v3025_v10  ;;  %v1885_v61 = vsel %vm1883_vm5, 1.0, %v3025_v10  ;;  %p1854_p11 = scmp.ge.f32.partialorder %s5319_s23, %s2887_s6  ;;  %s1857_s8 = ssub.f32 %s5319_s23, %s2887_s6  ;;  %v1901_v63 = vstv %s5329_s4 }
0x12c9   :  { %v1886_v62 = vadd.f32 %v1885_v61, %v1884_v60  ;;  %vm1902_vm6 = vcmp.eq.s32.totalorder %v1879_v57, %v1901_v63  ;;  %vm1903_vm7 = vcmp.eq.s32.totalorder %v1880_v58, %v1901_v63  ;;  %s5331_s5 = smov (!%p1834_p10, %s1837_s5), %s5315_s20  ;;  %s2889_s9 = spop %2888 }
0x12ca   :  { %s5333_s7 = smov (!%p1854_p11, %s1855_s7), %s5317_s22  ;;  %v1904_v0 = vsel %vm1902_vm6, 1.0, %v3025_v10  ;;  %v1905_v1 = vsel %vm1903_vm7, 1.0, %v3025_v10  ;;  %p1874_p12 = scmp.ge.f32.partialorder %s5323_s26, %s2889_s9 }
0x12cb   :  { %1887 = vadd.xlane.f32.xlu1 %v1886_v62  ;;  %v1906_v2 = vadd.f32 %v1905_v1, %v1904_v0  ;;  %s1877_s11 = ssub.f32 %s5323_s26, %s2889_s9  ;;  %v1921_v3 = vstv %s5333_s7  ;;  %s5335_s8 = smov (!%p1854_p11, %s1857_s8), %s5319_s23 }
0x12cc   :  { %vm1922_vm8 = vcmp.eq.s32.totalorder %v1879_v57, %v1921_v3  ;;  %vm1923_vm9 = vcmp.eq.s32.totalorder %v1880_v58, %v1921_v3  ;;  %s5337_s10 = smov (!%p1874_p12, %s1875_s10), %s5321_s25  ;;  %s1897_s14 = sor.u32 256, %s5325_s29 }
0x12cd   :  { %1907 = vadd.xlane.f32.xlu0 %v1906_v2  ;;  %v1924_v4 = vsel %vm1922_vm8, 1.0, %v3025_v10  ;;  %v1925_v5 = vsel %vm1923_vm9, 1.0, %v3025_v10  ;;  %v1941_v9 = vstv %s5337_s10  ;;  %s5339_s11 = smov (!%p1874_p12, %s1877_s11), %s5323_s26  ;;  %s1917_s16 = sor.u32 256, %s5329_s4 }
0x12ce   :  { %v1926_v8 = vadd.f32 %v1925_v5, %v1924_v4  ;;  %vm1942_vm10 = vcmp.eq.s32.totalorder %v1879_v57, %v1941_v9  ;;  %vm1943_vm11 = vcmp.eq.s32.totalorder %v1880_v58, %v1941_v9  ;;  %s1937_s0 = sor.u32 256, %s5333_s7  ;;  %s1957_s21 = sor.u32 256, %s5337_s10 }
0x12cf   :  { %v1944_v11 = vsel %vm1942_vm10, 1.0, %v3025_v10  ;;  %v1945_v12 = vsel %vm1943_vm11, 1.0, %v3025_v10 }
0x12d0   :  { %1927 = vadd.xlane.f32.xlu1 %v1926_v8  ;;  %v1946_v13 = vadd.f32 %v1945_v12, %v1944_v11 }
0x12d2   :  { %1947 = vadd.xlane.f32.xlu0 %v1946_v13 }
0x1354   :  { %v1888_v14 = vpop.xlane.xlu1 %1887 }
0x1355   :  { %v1889_v15 = vrot.slane %v1888_v14, 4 }
0x1356   :  { %v1908_v17 = vpop.xlane.xlu0 %1907 }
0x1357   :  { %v1890_v16 = vadd.f32 %v1889_v15, %v1888_v14  ;;  %v1909_v19 = vrot.slane %v1908_v17, 4 }
0x1359   :  { %v1891_v18 = vrot.slane %v1890_v16, 2  ;;  %v1910_v20 = vadd.f32 %v1909_v19, %v1908_v17  ;;  %v1928_v22 = vpop.xlane.xlu1 %1927 }
0x135a   :  { %v1929_v24 = vrot.slane %v1928_v22, 4 }
0x135b   :  { %v1892_v21 = vadd.f32 %v1891_v18, %v1890_v16  ;;  %v1911_v23 = vrot.slane %v1910_v20, 2  ;;  %v1948_v29 = vpop.xlane.xlu0 %1947 }
0x135c   :  { %v1930_v26 = vadd.f32 %v1929_v24, %v1928_v22  ;;  %v1949_v31 = vrot.slane %v1948_v29, 4 }
0x135d   :  { %v1893_v25 = vrot.slane %v1892_v21, 1  ;;  %v1912_v28 = vadd.f32 %v1911_v23, %v1910_v20 }
0x135e   :  { %v1931_v30 = vrot.slane %v1930_v26, 2  ;;  %v1950_v33 = vadd.f32 %v1949_v31, %v1948_v29 }
0x135f   :  { %v1894_v27 = vadd.f32 %v1893_v25, %v1892_v21  ;;  %v1913_v32 = vrot.slane %v1912_v28, 1 }
0x1360   :  { %v1932_v35 = vadd.f32 %v1931_v30, %v1930_v26  ;;  %v1951_v36 = vrot.slane %v1950_v33, 2 }
0x1361   :  { %2890 = vpush %v1894_v27  ;;  %v1914_v34 = vadd.f32 %v1913_v32, %v1912_v28  ;;  %v2043_v27 = vand.u32 4294967232, %v3051_v6  ;;  %v2044_v28 = vand.u32 4294967232, %v3053_v7 }
0x1362   :  { %v1933_v37 = vrot.slane %v1932_v35, 1  ;;  %v1952_v39 = vadd.f32 %v1951_v36, %v1950_v33 }
0x1363   :  { %2892 = vpush %v1914_v34 }
0x1364   :  { %v1934_v38 = vadd.f32 %v1933_v37, %v1932_v35  ;;  %v1953_v40 = vrot.slane %v1952_v39, 1 }
0x1366   :  { %2894 = vpush %v1934_v38  ;;  %v1954_v41 = vadd.f32 %v1953_v40, %v1952_v39 }
0x1368   :  { %2896 = vpush %v1954_v41 }
0x1392   :  { %s2891_s12 = spop %2890 }
0x1393   :  { %p1896_p13 = scmp.ge.f32.partialorder %s5327_s28, %s2891_s12  ;;  %s1899_s13 = ssub.f32 %s5327_s28, %s2891_s12 }
0x1394   :  { %s2893_s15 = spop %2892 }
0x1395   :  { %s5341_s14 = smov (!%p1896_p13, %s1897_s14), %s5325_s29  ;;  %p1916_p0 = scmp.ge.f32.partialorder %s5331_s5, %s2893_s15 }
0x1396   :  { %s1919_s17 = ssub.f32 %s5331_s5, %s2893_s15  ;;  %v1963_v44 = vstv %s5341_s14  ;;  %s5343_s13 = smov (!%p1896_p13, %s1899_s13), %s5327_s28 }
0x1397   :  { %vm1964_vm12 = vcmp.eq.s32.totalorder %v1961_v42, %v1963_v44  ;;  %vm1965_vm13 = vcmp.eq.s32.totalorder %v1962_v43, %v1963_v44  ;;  %s5345_s16 = smov (!%p1916_p0, %s1917_s16), %s5329_s4  ;;  %s2895_s18 = spop %2894 }
0x1398   :  { %v1966_v45 = vsel %vm1964_vm12, 1.0, %v3025_v10  ;;  %v1967_v46 = vsel %vm1965_vm13, 1.0, %v3025_v10  ;;  %p1936_p1 = scmp.ge.f32.partialorder %s5335_s8, %s2895_s18  ;;  %s1939_s19 = ssub.f32 %s5335_s8, %s2895_s18  ;;  %v1983_v48 = vstv %s5345_s16 }
0x1399   :  { %v1968_v47 = vadd.f32 %v1967_v46, %v1966_v45  ;;  %vm1984_vm14 = vcmp.eq.s32.totalorder %v1961_v42, %v1983_v48  ;;  %vm1985_vm15 = vcmp.eq.s32.totalorder %v1962_v43, %v1983_v48  ;;  %s5347_s17 = smov (!%p1916_p0, %s1919_s17), %s5331_s5  ;;  %s2897_s20 = spop %2896 }
0x139a   :  { %s5349_s0 = smov (!%p1936_p1, %s1937_s0), %s5333_s7  ;;  %v1986_v49 = vsel %vm1984_vm14, 1.0, %v3025_v10  ;;  %v1987_v50 = vsel %vm1985_vm15, 1.0, %v3025_v10  ;;  %p1956_p2 = scmp.ge.f32.partialorder %s5339_s11, %s2897_s20 }
0x139b   :  { %1969 = vadd.xlane.f32.xlu1 %v1968_v47  ;;  %v1988_v51 = vadd.f32 %v1987_v50, %v1986_v49  ;;  %s1959_s22 = ssub.f32 %s5339_s11, %s2897_s20  ;;  %v2003_v52 = vstv %s5349_s0  ;;  %s5351_s19 = smov (!%p1936_p1, %s1939_s19), %s5335_s8 }
0x139c   :  { %vm2004_vm0 = vcmp.eq.s32.totalorder %v1961_v42, %v2003_v52  ;;  %vm2005_vm1 = vcmp.eq.s32.totalorder %v1962_v43, %v2003_v52  ;;  %s5353_s21 = smov (!%p1956_p2, %s1957_s21), %s5337_s10  ;;  %s1979_s25 = sor.u32 128, %s5341_s14 }
0x139d   :  { %1989 = vadd.xlane.f32.xlu0 %v1988_v51  ;;  %v2006_v53 = vsel %vm2004_vm0, 1.0, %v3025_v10  ;;  %v2007_v54 = vsel %vm2005_vm1, 1.0, %v3025_v10  ;;  %v2023_v56 = vstv %s5353_s21  ;;  %s5355_s22 = smov (!%p1956_p2, %s1959_s22), %s5339_s11  ;;  %s1999_s27 = sor.u32 128, %s5345_s16 }
0x139e   :  { %v2008_v55 = vadd.f32 %v2007_v54, %v2006_v53  ;;  %vm2024_vm2 = vcmp.eq.s32.totalorder %v1961_v42, %v2023_v56  ;;  %vm2025_vm3 = vcmp.eq.s32.totalorder %v1962_v43, %v2023_v56  ;;  %s2019_s30 = sor.u32 128, %s5349_s0  ;;  %s2039_s6 = sor.u32 128, %s5353_s21 }
0x139f   :  { %v2026_v57 = vsel %vm2024_vm2, 1.0, %v3025_v10  ;;  %v2027_v58 = vsel %vm2025_vm3, 1.0, %v3025_v10 }
0x13a0   :  { %2009 = vadd.xlane.f32.xlu1 %v2008_v55  ;;  %v2028_v59 = vadd.f32 %v2027_v58, %v2026_v57 }
0x13a2   :  { %2029 = vadd.xlane.f32.xlu0 %v2028_v59 }
0x1424   :  { %v1970_v60 = vpop.xlane.xlu1 %1969 }
0x1425   :  { %v1971_v61 = vrot.slane %v1970_v60, 4 }
0x1426   :  { %v1990_v63 = vpop.xlane.xlu0 %1989 }
0x1427   :  { %v1972_v62 = vadd.f32 %v1971_v61, %v1970_v60  ;;  %v1991_v1 = vrot.slane %v1990_v63, 4 }
0x1429   :  { %v1973_v0 = vrot.slane %v1972_v62, 2  ;;  %v1992_v2 = vadd.f32 %v1991_v1, %v1990_v63  ;;  %v2010_v4 = vpop.xlane.xlu1 %2009 }
0x142a   :  { %v2011_v8 = vrot.slane %v2010_v4, 4 }
0x142b   :  { %v1974_v3 = vadd.f32 %v1973_v0, %v1972_v62  ;;  %v1993_v5 = vrot.slane %v1992_v2, 2  ;;  %v2030_v14 = vpop.xlane.xlu0 %2029 }
0x142c   :  { %v2012_v11 = vadd.f32 %v2011_v8, %v2010_v4  ;;  %v2031_v16 = vrot.slane %v2030_v14, 4 }
0x142d   :  { %v1975_v9 = vrot.slane %v1974_v3, 1  ;;  %v1994_v13 = vadd.f32 %v1993_v5, %v1992_v2 }
0x142e   :  { %v2013_v15 = vrot.slane %v2012_v11, 2  ;;  %v2032_v18 = vadd.f32 %v2031_v16, %v2030_v14 }
0x142f   :  { %v1976_v12 = vadd.f32 %v1975_v9, %v1974_v3  ;;  %v1995_v17 = vrot.slane %v1994_v13, 1 }
0x1430   :  { %v2014_v20 = vadd.f32 %v2013_v15, %v2012_v11  ;;  %v2033_v21 = vrot.slane %v2032_v18, 2 }
0x1431   :  { %2898 = vpush %v1976_v12  ;;  %v1996_v19 = vadd.f32 %v1995_v17, %v1994_v13  ;;  %v2125_v12 = vand.u32 4294967264, %v3051_v6  ;;  %v2126_v13 = vand.u32 4294967264, %v3053_v7 }
0x1432   :  { %v2015_v22 = vrot.slane %v2014_v20, 1  ;;  %v2034_v24 = vadd.f32 %v2033_v21, %v2032_v18 }
0x1433   :  { %2900 = vpush %v1996_v19 }
0x1434   :  { %v2016_v23 = vadd.f32 %v2015_v22, %v2014_v20  ;;  %v2035_v25 = vrot.slane %v2034_v24, 1 }
0x1436   :  { %2902 = vpush %v2016_v23  ;;  %v2036_v26 = vadd.f32 %v2035_v25, %v2034_v24 }
0x1438   :  { %2904 = vpush %v2036_v26 }
0x1462   :  { %s2899_s23 = spop %2898 }
0x1463   :  { %p1978_p3 = scmp.ge.f32.partialorder %s5343_s13, %s2899_s23  ;;  %s1981_s24 = ssub.f32 %s5343_s13, %s2899_s23 }
0x1464   :  { %s2901_s26 = spop %2900 }
0x1465   :  { %s5357_s25 = smov (!%p1978_p3, %s1979_s25), %s5341_s14  ;;  %p1998_p4 = scmp.ge.f32.partialorder %s5347_s17, %s2901_s26 }
0x1466   :  { %s2001_s28 = ssub.f32 %s5347_s17, %s2901_s26  ;;  %v2045_v29 = vstv %s5357_s25  ;;  %s5359_s24 = smov (!%p1978_p3, %s1981_s24), %s5343_s13 }
0x1467   :  { %vm2046_vm4 = vcmp.eq.s32.totalorder %v2043_v27, %v2045_v29  ;;  %vm2047_vm5 = vcmp.eq.s32.totalorder %v2044_v28, %v2045_v29  ;;  %s5361_s27 = smov (!%p1998_p4, %s1999_s27), %s5345_s16  ;;  %s2903_s29 = spop %2902 }
0x1468   :  { %v2048_v30 = vsel %vm2046_vm4, 1.0, %v3025_v10  ;;  %v2049_v31 = vsel %vm2047_vm5, 1.0, %v3025_v10  ;;  %p2018_p5 = scmp.ge.f32.partialorder %s5351_s19, %s2903_s29  ;;  %s2021_s4 = ssub.f32 %s5351_s19, %s2903_s29  ;;  %v2065_v33 = vstv %s5361_s27 }
0x1469   :  { %v2050_v32 = vadd.f32 %v2049_v31, %v2048_v30  ;;  %vm2066_vm6 = vcmp.eq.s32.totalorder %v2043_v27, %v2065_v33  ;;  %vm2067_vm7 = vcmp.eq.s32.totalorder %v2044_v28, %v2065_v33  ;;  %s5363_s28 = smov (!%p1998_p4, %s2001_s28), %s5347_s17  ;;  %s2905_s5 = spop %2904 }
0x146a   :  { %s5365_s30 = smov (!%p2018_p5, %s2019_s30), %s5349_s0  ;;  %v2068_v34 = vsel %vm2066_vm6, 1.0, %v3025_v10  ;;  %v2069_v35 = vsel %vm2067_vm7, 1.0, %v3025_v10  ;;  %p2038_p6 = scmp.ge.f32.partialorder %s5355_s22, %s2905_s5 }
0x146b   :  { %2051 = vadd.xlane.f32.xlu1 %v2050_v32  ;;  %v2070_v36 = vadd.f32 %v2069_v35, %v2068_v34  ;;  %s2041_s7 = ssub.f32 %s5355_s22, %s2905_s5  ;;  %v2085_v37 = vstv %s5365_s30  ;;  %s5367_s4 = smov (!%p2018_p5, %s2021_s4), %s5351_s19 }
0x146c   :  { %vm2086_vm8 = vcmp.eq.s32.totalorder %v2043_v27, %v2085_v37  ;;  %vm2087_vm9 = vcmp.eq.s32.totalorder %v2044_v28, %v2085_v37  ;;  %s5369_s6 = smov (!%p2038_p6, %s2039_s6), %s5353_s21  ;;  %s2061_s10 = sor.u32 64, %s5357_s25 }
0x146d   :  { %2071 = vadd.xlane.f32.xlu0 %v2070_v36  ;;  %v2088_v38 = vsel %vm2086_vm8, 1.0, %v3025_v10  ;;  %v2089_v39 = vsel %vm2087_vm9, 1.0, %v3025_v10  ;;  %v2105_v41 = vstv %s5369_s6  ;;  %s5371_s7 = smov (!%p2038_p6, %s2041_s7), %s5355_s22  ;;  %s2081_s12 = sor.u32 64, %s5361_s27 }
0x146e   :  { %v2090_v40 = vadd.f32 %v2089_v39, %v2088_v38  ;;  %vm2106_vm10 = vcmp.eq.s32.totalorder %v2043_v27, %v2105_v41  ;;  %vm2107_vm11 = vcmp.eq.s32.totalorder %v2044_v28, %v2105_v41  ;;  %s2101_s15 = sor.u32 64, %s5365_s30  ;;  %s2121_s18 = sor.u32 64, %s5369_s6 }
0x146f   :  { %v2108_v42 = vsel %vm2106_vm10, 1.0, %v3025_v10  ;;  %v2109_v43 = vsel %vm2107_vm11, 1.0, %v3025_v10 }
0x1470   :  { %2091 = vadd.xlane.f32.xlu1 %v2090_v40  ;;  %v2110_v44 = vadd.f32 %v2109_v43, %v2108_v42 }
0x1472   :  { %2111 = vadd.xlane.f32.xlu0 %v2110_v44 }
0x14f4   :  { %v2052_v45 = vpop.xlane.xlu1 %2051 }
0x14f5   :  { %v2053_v46 = vrot.slane %v2052_v45, 4 }
0x14f6   :  { %v2072_v48 = vpop.xlane.xlu0 %2071 }
0x14f7   :  { %v2054_v47 = vadd.f32 %v2053_v46, %v2052_v45  ;;  %v2073_v50 = vrot.slane %v2072_v48, 4 }
0x14f9   :  { %v2055_v49 = vrot.slane %v2054_v47, 2  ;;  %v2074_v51 = vadd.f32 %v2073_v50, %v2072_v48  ;;  %v2092_v53 = vpop.xlane.xlu1 %2091 }
0x14fa   :  { %v2093_v55 = vrot.slane %v2092_v53, 4 }
0x14fb   :  { %v2056_v52 = vadd.f32 %v2055_v49, %v2054_v47  ;;  %v2075_v54 = vrot.slane %v2074_v51, 2  ;;  %v2112_v60 = vpop.xlane.xlu0 %2111 }
0x14fc   :  { %v2094_v57 = vadd.f32 %v2093_v55, %v2092_v53  ;;  %v2113_v62 = vrot.slane %v2112_v60, 4 }
0x14fd   :  { %v2057_v56 = vrot.slane %v2056_v52, 1  ;;  %v2076_v59 = vadd.f32 %v2075_v54, %v2074_v51 }
0x14fe   :  { %v2095_v61 = vrot.slane %v2094_v57, 2  ;;  %v2114_v0 = vadd.f32 %v2113_v62, %v2112_v60 }
0x14ff   :  { %v2058_v58 = vadd.f32 %v2057_v56, %v2056_v52  ;;  %v2077_v63 = vrot.slane %v2076_v59, 1 }
0x1500   :  { %v2096_v2 = vadd.f32 %v2095_v61, %v2094_v57  ;;  %v2115_v3 = vrot.slane %v2114_v0, 2 }
0x1501   :  { %2906 = vpush %v2058_v58  ;;  %v2078_v1 = vadd.f32 %v2077_v63, %v2076_v59  ;;  %v2207_v58 = vand.u32 4294967280, %v3051_v6  ;;  %v2208_v59 = vand.u32 4294967280, %v3053_v7 }
0x1502   :  { %v2097_v4 = vrot.slane %v2096_v2, 1  ;;  %v2116_v8 = vadd.f32 %v2115_v3, %v2114_v0 }
0x1503   :  { %2908 = vpush %v2078_v1 }
0x1504   :  { %v2098_v5 = vadd.f32 %v2097_v4, %v2096_v2  ;;  %v2117_v9 = vrot.slane %v2116_v8, 1 }
0x1506   :  { %2910 = vpush %v2098_v5  ;;  %v2118_v11 = vadd.f32 %v2117_v9, %v2116_v8 }
0x1508   :  { %2912 = vpush %v2118_v11 }
0x1532   :  { %s2907_s8 = spop %2906 }
0x1533   :  { %p2060_p7 = scmp.ge.f32.partialorder %s5359_s24, %s2907_s8  ;;  %s2063_s9 = ssub.f32 %s5359_s24, %s2907_s8 }
0x1534   :  { %s2909_s11 = spop %2908 }
0x1535   :  { %s5373_s10 = smov (!%p2060_p7, %s2061_s10), %s5357_s25  ;;  %p2080_p8 = scmp.ge.f32.partialorder %s5363_s28, %s2909_s11 }
0x1536   :  { %s2083_s13 = ssub.f32 %s5363_s28, %s2909_s11  ;;  %v2127_v14 = vstv %s5373_s10  ;;  %s5375_s9 = smov (!%p2060_p7, %s2063_s9), %s5359_s24 }
0x1537   :  { %vm2128_vm12 = vcmp.eq.s32.totalorder %v2125_v12, %v2127_v14  ;;  %vm2129_vm13 = vcmp.eq.s32.totalorder %v2126_v13, %v2127_v14  ;;  %s5377_s12 = smov (!%p2080_p8, %s2081_s12), %s5361_s27  ;;  %s2911_s14 = spop %2910 }
0x1538   :  { %v2130_v15 = vsel %vm2128_vm12, 1.0, %v3025_v10  ;;  %v2131_v16 = vsel %vm2129_vm13, 1.0, %v3025_v10  ;;  %p2100_p9 = scmp.ge.f32.partialorder %s5367_s4, %s2911_s14  ;;  %s2103_s16 = ssub.f32 %s5367_s4, %s2911_s14  ;;  %v2147_v18 = vstv %s5377_s12 }
0x1539   :  { %v2132_v17 = vadd.f32 %v2131_v16, %v2130_v15  ;;  %vm2148_vm14 = vcmp.eq.s32.totalorder %v2125_v12, %v2147_v18  ;;  %vm2149_vm15 = vcmp.eq.s32.totalorder %v2126_v13, %v2147_v18  ;;  %s5379_s13 = smov (!%p2080_p8, %s2083_s13), %s5363_s28  ;;  %s2913_s17 = spop %2912 }
0x153a   :  { %s5381_s15 = smov (!%p2100_p9, %s2101_s15), %s5365_s30  ;;  %v2150_v19 = vsel %vm2148_vm14, 1.0, %v3025_v10  ;;  %v2151_v20 = vsel %vm2149_vm15, 1.0, %v3025_v10  ;;  %p2120_p10 = scmp.ge.f32.partialorder %s5371_s7, %s2913_s17 }
0x153b   :  { %2133 = vadd.xlane.f32.xlu1 %v2132_v17  ;;  %v2152_v21 = vadd.f32 %v2151_v20, %v2150_v19  ;;  %s2123_s0 = ssub.f32 %s5371_s7, %s2913_s17  ;;  %v2167_v22 = vstv %s5381_s15  ;;  %s5383_s16 = smov (!%p2100_p9, %s2103_s16), %s5367_s4 }
0x153c   :  { %vm2168_vm0 = vcmp.eq.s32.totalorder %v2125_v12, %v2167_v22  ;;  %vm2169_vm1 = vcmp.eq.s32.totalorder %v2126_v13, %v2167_v22  ;;  %s5385_s18 = smov (!%p2120_p10, %s2121_s18), %s5369_s6  ;;  %s2143_s21 = sor.u32 32, %s5373_s10 }
0x153d   :  { %2153 = vadd.xlane.f32.xlu0 %v2152_v21  ;;  %v2170_v23 = vsel %vm2168_vm0, 1.0, %v3025_v10  ;;  %v2171_v24 = vsel %vm2169_vm1, 1.0, %v3025_v10  ;;  %v2187_v26 = vstv %s5385_s18  ;;  %s5387_s0 = smov (!%p2120_p10, %s2123_s0), %s5371_s7  ;;  %s2163_s23 = sor.u32 32, %s5377_s12 }
0x153e   :  { %v2172_v25 = vadd.f32 %v2171_v24, %v2170_v23  ;;  %vm2188_vm2 = vcmp.eq.s32.totalorder %v2125_v12, %v2187_v26  ;;  %vm2189_vm3 = vcmp.eq.s32.totalorder %v2126_v13, %v2187_v26  ;;  %s2183_s26 = sor.u32 32, %s5381_s15  ;;  %s2203_s29 = sor.u32 32, %s5385_s18 }
0x153f   :  { %v2190_v27 = vsel %vm2188_vm2, 1.0, %v3025_v10  ;;  %v2191_v28 = vsel %vm2189_vm3, 1.0, %v3025_v10 }
0x1540   :  { %2173 = vadd.xlane.f32.xlu1 %v2172_v25  ;;  %v2192_v29 = vadd.f32 %v2191_v28, %v2190_v27 }
0x1542   :  { %2193 = vadd.xlane.f32.xlu0 %v2192_v29 }
0x15c4   :  { %v2134_v30 = vpop.xlane.xlu1 %2133 }
0x15c5   :  { %v2135_v31 = vrot.slane %v2134_v30, 4 }
0x15c6   :  { %v2154_v33 = vpop.xlane.xlu0 %2153 }
0x15c7   :  { %v2136_v32 = vadd.f32 %v2135_v31, %v2134_v30  ;;  %v2155_v35 = vrot.slane %v2154_v33, 4 }
0x15c9   :  { %v2137_v34 = vrot.slane %v2136_v32, 2  ;;  %v2156_v36 = vadd.f32 %v2155_v35, %v2154_v33  ;;  %v2174_v38 = vpop.xlane.xlu1 %2173 }
0x15ca   :  { %v2175_v40 = vrot.slane %v2174_v38, 4 }
0x15cb   :  { %v2138_v37 = vadd.f32 %v2137_v34, %v2136_v32  ;;  %v2157_v39 = vrot.slane %v2156_v36, 2  ;;  %v2194_v45 = vpop.xlane.xlu0 %2193 }
0x15cc   :  { %v2176_v42 = vadd.f32 %v2175_v40, %v2174_v38  ;;  %v2195_v47 = vrot.slane %v2194_v45, 4 }
0x15cd   :  { %v2139_v41 = vrot.slane %v2138_v37, 1  ;;  %v2158_v44 = vadd.f32 %v2157_v39, %v2156_v36 }
0x15ce   :  { %v2177_v46 = vrot.slane %v2176_v42, 2  ;;  %v2196_v49 = vadd.f32 %v2195_v47, %v2194_v45 }
0x15cf   :  { %v2140_v43 = vadd.f32 %v2139_v41, %v2138_v37  ;;  %v2159_v48 = vrot.slane %v2158_v44, 1 }
0x15d0   :  { %v2178_v51 = vadd.f32 %v2177_v46, %v2176_v42  ;;  %v2197_v52 = vrot.slane %v2196_v49, 2 }
0x15d1   :  { %2914 = vpush %v2140_v43  ;;  %v2160_v50 = vadd.f32 %v2159_v48, %v2158_v44  ;;  %v2289_v43 = vand.u32 4294967288, %v3051_v6  ;;  %v2290_v44 = vand.u32 4294967288, %v3053_v7 }
0x15d2   :  { %v2179_v53 = vrot.slane %v2178_v51, 1  ;;  %v2198_v55 = vadd.f32 %v2197_v52, %v2196_v49 }
0x15d3   :  { %2916 = vpush %v2160_v50 }
0x15d4   :  { %v2180_v54 = vadd.f32 %v2179_v53, %v2178_v51  ;;  %v2199_v56 = vrot.slane %v2198_v55, 1 }
0x15d6   :  { %2918 = vpush %v2180_v54  ;;  %v2200_v57 = vadd.f32 %v2199_v56, %v2198_v55 }
0x15d8   :  { %2920 = vpush %v2200_v57 }
0x1602   :  { %s2915_s19 = spop %2914 }
0x1603   :  { %p2142_p11 = scmp.ge.f32.partialorder %s5375_s9, %s2915_s19  ;;  %s2145_s20 = ssub.f32 %s5375_s9, %s2915_s19 }
0x1604   :  { %s2917_s22 = spop %2916 }
0x1605   :  { %s5389_s21 = smov (!%p2142_p11, %s2143_s21), %s5373_s10  ;;  %p2162_p12 = scmp.ge.f32.partialorder %s5379_s13, %s2917_s22 }
0x1606   :  { %s2165_s24 = ssub.f32 %s5379_s13, %s2917_s22  ;;  %v2209_v60 = vstv %s5389_s21  ;;  %s5391_s20 = smov (!%p2142_p11, %s2145_s20), %s5375_s9 }
0x1607   :  { %vm2210_vm4 = vcmp.eq.s32.totalorder %v2207_v58, %v2209_v60  ;;  %vm2211_vm5 = vcmp.eq.s32.totalorder %v2208_v59, %v2209_v60  ;;  %s5393_s23 = smov (!%p2162_p12, %s2163_s23), %s5377_s12  ;;  %s2919_s25 = spop %2918 }
0x1608   :  { %v2212_v61 = vsel %vm2210_vm4, 1.0, %v3025_v10  ;;  %v2213_v62 = vsel %vm2211_vm5, 1.0, %v3025_v10  ;;  %p2182_p13 = scmp.ge.f32.partialorder %s5383_s16, %s2919_s25  ;;  %s2185_s27 = ssub.f32 %s5383_s16, %s2919_s25  ;;  %v2229_v0 = vstv %s5393_s23 }
0x1609   :  { %v2214_v63 = vadd.f32 %v2213_v62, %v2212_v61  ;;  %vm2230_vm6 = vcmp.eq.s32.totalorder %v2207_v58, %v2229_v0  ;;  %vm2231_vm7 = vcmp.eq.s32.totalorder %v2208_v59, %v2229_v0  ;;  %s5395_s24 = smov (!%p2162_p12, %s2165_s24), %s5379_s13  ;;  %s2921_s28 = spop %2920 }
0x160a   :  { %s5397_s26 = smov (!%p2182_p13, %s2183_s26), %s5381_s15  ;;  %v2232_v1 = vsel %vm2230_vm6, 1.0, %v3025_v10  ;;  %v2233_v2 = vsel %vm2231_vm7, 1.0, %v3025_v10  ;;  %p2202_p0 = scmp.ge.f32.partialorder %s5387_s0, %s2921_s28 }
0x160b   :  { %2215 = vadd.xlane.f32.xlu1 %v2214_v63  ;;  %v2234_v3 = vadd.f32 %v2233_v2, %v2232_v1  ;;  %s2205_s30 = ssub.f32 %s5387_s0, %s2921_s28  ;;  %v2249_v4 = vstv %s5397_s26  ;;  %s5399_s27 = smov (!%p2182_p13, %s2185_s27), %s5383_s16 }
0x160c   :  { %vm2250_vm8 = vcmp.eq.s32.totalorder %v2207_v58, %v2249_v4  ;;  %vm2251_vm9 = vcmp.eq.s32.totalorder %v2208_v59, %v2249_v4  ;;  %s5401_s29 = smov (!%p2202_p0, %s2203_s29), %s5385_s18  ;;  %s2225_s6 = sor.u32 16, %s5389_s21 }
0x160d   :  { %2235 = vadd.xlane.f32.xlu0 %v2234_v3  ;;  %v2252_v5 = vsel %vm2250_vm8, 1.0, %v3025_v10  ;;  %v2253_v8 = vsel %vm2251_vm9, 1.0, %v3025_v10  ;;  %v2269_v11 = vstv %s5401_s29  ;;  %s5403_s30 = smov (!%p2202_p0, %s2205_s30), %s5387_s0  ;;  %s2245_s8 = sor.u32 16, %s5393_s23 }
0x160e   :  { %v2254_v9 = vadd.f32 %v2253_v8, %v2252_v5  ;;  %vm2270_vm10 = vcmp.eq.s32.totalorder %v2207_v58, %v2269_v11  ;;  %vm2271_vm11 = vcmp.eq.s32.totalorder %v2208_v59, %v2269_v11  ;;  %s2265_s11 = sor.u32 16, %s5397_s26  ;;  %s2285_s14 = sor.u32 16, %s5401_s29 }
0x160f   :  { %v2272_v12 = vsel %vm2270_vm10, 1.0, %v3025_v10  ;;  %v2273_v13 = vsel %vm2271_vm11, 1.0, %v3025_v10 }
0x1610   :  { %2255 = vadd.xlane.f32.xlu1 %v2254_v9  ;;  %v2274_v14 = vadd.f32 %v2273_v13, %v2272_v12 }
0x1612   :  { %2275 = vadd.xlane.f32.xlu0 %v2274_v14 }
0x1694   :  { %v2216_v15 = vpop.xlane.xlu1 %2215 }
0x1695   :  { %v2217_v16 = vrot.slane %v2216_v15, 4 }
0x1696   :  { %v2236_v18 = vpop.xlane.xlu0 %2235 }
0x1697   :  { %v2218_v17 = vadd.f32 %v2217_v16, %v2216_v15  ;;  %v2237_v20 = vrot.slane %v2236_v18, 4 }
0x1699   :  { %v2219_v19 = vrot.slane %v2218_v17, 2  ;;  %v2238_v21 = vadd.f32 %v2237_v20, %v2236_v18  ;;  %v2256_v23 = vpop.xlane.xlu1 %2255 }
0x169a   :  { %v2257_v25 = vrot.slane %v2256_v23, 4 }
0x169b   :  { %v2220_v22 = vadd.f32 %v2219_v19, %v2218_v17  ;;  %v2239_v24 = vrot.slane %v2238_v21, 2  ;;  %v2276_v30 = vpop.xlane.xlu0 %2275 }
0x169c   :  { %v2258_v27 = vadd.f32 %v2257_v25, %v2256_v23  ;;  %v2277_v32 = vrot.slane %v2276_v30, 4 }
0x169d   :  { %v2221_v26 = vrot.slane %v2220_v22, 1  ;;  %v2240_v29 = vadd.f32 %v2239_v24, %v2238_v21 }
0x169e   :  { %v2259_v31 = vrot.slane %v2258_v27, 2  ;;  %v2278_v34 = vadd.f32 %v2277_v32, %v2276_v30 }
0x169f   :  { %v2222_v28 = vadd.f32 %v2221_v26, %v2220_v22  ;;  %v2241_v33 = vrot.slane %v2240_v29, 1 }
0x16a0   :  { %v2260_v36 = vadd.f32 %v2259_v31, %v2258_v27  ;;  %v2279_v37 = vrot.slane %v2278_v34, 2 }
0x16a1   :  { %2922 = vpush %v2222_v28  ;;  %v2242_v35 = vadd.f32 %v2241_v33, %v2240_v29  ;;  %v2371_v28 = vand.u32 4294967292, %v3051_v6  ;;  %v2372_v29 = vand.u32 4294967292, %v3053_v7 }
0x16a2   :  { %v2261_v38 = vrot.slane %v2260_v36, 1  ;;  %v2280_v40 = vadd.f32 %v2279_v37, %v2278_v34 }
0x16a3   :  { %2924 = vpush %v2242_v35 }
0x16a4   :  { %v2262_v39 = vadd.f32 %v2261_v38, %v2260_v36  ;;  %v2281_v41 = vrot.slane %v2280_v40, 1 }
0x16a6   :  { %2926 = vpush %v2262_v39  ;;  %v2282_v42 = vadd.f32 %v2281_v41, %v2280_v40 }
0x16a8   :  { %2928 = vpush %v2282_v42 }
0x16d2   :  { %s2923_s4 = spop %2922 }
0x16d3   :  { %p2224_p1 = scmp.ge.f32.partialorder %s5391_s20, %s2923_s4  ;;  %s2227_s5 = ssub.f32 %s5391_s20, %s2923_s4 }
0x16d4   :  { %s2925_s7 = spop %2924 }
0x16d5   :  { %s5405_s6 = smov (!%p2224_p1, %s2225_s6), %s5389_s21  ;;  %p2244_p2 = scmp.ge.f32.partialorder %s5395_s24, %s2925_s7 }
0x16d6   :  { %s2247_s9 = ssub.f32 %s5395_s24, %s2925_s7  ;;  %v2291_v45 = vstv %s5405_s6  ;;  %s5407_s5 = smov (!%p2224_p1, %s2227_s5), %s5391_s20 }
0x16d7   :  { %vm2292_vm12 = vcmp.eq.s32.totalorder %v2289_v43, %v2291_v45  ;;  %vm2293_vm13 = vcmp.eq.s32.totalorder %v2290_v44, %v2291_v45  ;;  %s5409_s8 = smov (!%p2244_p2, %s2245_s8), %s5393_s23  ;;  %s2927_s10 = spop %2926 }
0x16d8   :  { %v2294_v46 = vsel %vm2292_vm12, 1.0, %v3025_v10  ;;  %v2295_v47 = vsel %vm2293_vm13, 1.0, %v3025_v10  ;;  %p2264_p3 = scmp.ge.f32.partialorder %s5399_s27, %s2927_s10  ;;  %s2267_s12 = ssub.f32 %s5399_s27, %s2927_s10  ;;  %v2311_v49 = vstv %s5409_s8 }
0x16d9   :  { %v2296_v48 = vadd.f32 %v2295_v47, %v2294_v46  ;;  %vm2312_vm14 = vcmp.eq.s32.totalorder %v2289_v43, %v2311_v49  ;;  %vm2313_vm15 = vcmp.eq.s32.totalorder %v2290_v44, %v2311_v49  ;;  %s5411_s9 = smov (!%p2244_p2, %s2247_s9), %s5395_s24  ;;  %s2929_s13 = spop %2928 }
0x16da   :  { %s5413_s11 = smov (!%p2264_p3, %s2265_s11), %s5397_s26  ;;  %v2314_v50 = vsel %vm2312_vm14, 1.0, %v3025_v10  ;;  %v2315_v51 = vsel %vm2313_vm15, 1.0, %v3025_v10  ;;  %p2284_p4 = scmp.ge.f32.partialorder %s5403_s30, %s2929_s13 }
0x16db   :  { %2297 = vadd.xlane.f32.xlu1 %v2296_v48  ;;  %v2316_v52 = vadd.f32 %v2315_v51, %v2314_v50  ;;  %s2287_s15 = ssub.f32 %s5403_s30, %s2929_s13  ;;  %v2331_v53 = vstv %s5413_s11  ;;  %s5415_s12 = smov (!%p2264_p3, %s2267_s12), %s5399_s27 }
0x16dc   :  { %vm2332_vm0 = vcmp.eq.s32.totalorder %v2289_v43, %v2331_v53  ;;  %vm2333_vm1 = vcmp.eq.s32.totalorder %v2290_v44, %v2331_v53  ;;  %s5417_s14 = smov (!%p2284_p4, %s2285_s14), %s5401_s29  ;;  %s2307_s18 = sor.u32 8, %s5405_s6 }
0x16dd   :  { %2317 = vadd.xlane.f32.xlu0 %v2316_v52  ;;  %v2334_v54 = vsel %vm2332_vm0, 1.0, %v3025_v10  ;;  %v2335_v55 = vsel %vm2333_vm1, 1.0, %v3025_v10  ;;  %v2351_v57 = vstv %s5417_s14  ;;  %s5419_s15 = smov (!%p2284_p4, %s2287_s15), %s5403_s30  ;;  %s2327_s19 = sor.u32 8, %s5409_s8 }
0x16de   :  { %v2336_v56 = vadd.f32 %v2335_v55, %v2334_v54  ;;  %vm2352_vm2 = vcmp.eq.s32.totalorder %v2289_v43, %v2351_v57  ;;  %vm2353_vm3 = vcmp.eq.s32.totalorder %v2290_v44, %v2351_v57  ;;  %s2347_s22 = sor.u32 8, %s5413_s11  ;;  %s2367_s25 = sor.u32 8, %s5417_s14 }
0x16df   :  { %v2354_v58 = vsel %vm2352_vm2, 1.0, %v3025_v10  ;;  %v2355_v59 = vsel %vm2353_vm3, 1.0, %v3025_v10 }
0x16e0   :  { %2337 = vadd.xlane.f32.xlu1 %v2336_v56  ;;  %v2356_v60 = vadd.f32 %v2355_v59, %v2354_v58 }
0x16e2   :  { %2357 = vadd.xlane.f32.xlu0 %v2356_v60 }
0x1764   :  { %v2298_v61 = vpop.xlane.xlu1 %2297 }
0x1765   :  { %v2299_v62 = vrot.slane %v2298_v61, 4 }
0x1766   :  { %v2318_v0 = vpop.xlane.xlu0 %2317 }
0x1767   :  { %v2300_v63 = vadd.f32 %v2299_v62, %v2298_v61  ;;  %v2319_v2 = vrot.slane %v2318_v0, 4 }
0x1769   :  { %v2301_v1 = vrot.slane %v2300_v63, 2  ;;  %v2320_v3 = vadd.f32 %v2319_v2, %v2318_v0  ;;  %v2338_v5 = vpop.xlane.xlu1 %2337 }
0x176a   :  { %v2339_v9 = vrot.slane %v2338_v5, 4 }
0x176b   :  { %v2302_v4 = vadd.f32 %v2301_v1, %v2300_v63  ;;  %v2321_v8 = vrot.slane %v2320_v3, 2  ;;  %v2358_v15 = vpop.xlane.xlu0 %2357 }
0x176c   :  { %v2340_v12 = vadd.f32 %v2339_v9, %v2338_v5  ;;  %v2359_v17 = vrot.slane %v2358_v15, 4 }
0x176d   :  { %v2303_v11 = vrot.slane %v2302_v4, 1  ;;  %v2322_v14 = vadd.f32 %v2321_v8, %v2320_v3 }
0x176e   :  { %v2341_v16 = vrot.slane %v2340_v12, 2  ;;  %v2360_v19 = vadd.f32 %v2359_v17, %v2358_v15 }
0x176f   :  { %v2304_v13 = vadd.f32 %v2303_v11, %v2302_v4  ;;  %v2323_v18 = vrot.slane %v2322_v14, 1 }
0x1770   :  { %v2342_v21 = vadd.f32 %v2341_v16, %v2340_v12  ;;  %v2361_v22 = vrot.slane %v2360_v19, 2 }
0x1771   :  { %2930 = vpush %v2304_v13  ;;  %v2324_v20 = vadd.f32 %v2323_v18, %v2322_v14  ;;  %v2453_v13 = vand.u32 4294967294, %v3051_v6  ;;  %v2454_v14 = vand.u32 4294967294, %v3053_v7 }
0x1772   :  { %v2343_v23 = vrot.slane %v2342_v21, 1  ;;  %v2362_v25 = vadd.f32 %v2361_v22, %v2360_v19 }
0x1773   :  { %2932 = vpush %v2324_v20 }
0x1774   :  { %v2344_v24 = vadd.f32 %v2343_v23, %v2342_v21  ;;  %v2363_v26 = vrot.slane %v2362_v25, 1 }
0x1776   :  { %2934 = vpush %v2344_v24  ;;  %v2364_v27 = vadd.f32 %v2363_v26, %v2362_v25 }
0x1778   :  { %2936 = vpush %v2364_v27 }
0x17a2   :  { %s2931_s16 = spop %2930 }
0x17a3   :  { %p2306_p5 = scmp.ge.f32.partialorder %s5407_s5, %s2931_s16  ;;  %s2309_s17 = ssub.f32 %s5407_s5, %s2931_s16 }
0x17a4   :  { %s2933_s0 = spop %2932 }
0x17a5   :  { %s5421_s18 = smov (!%p2306_p5, %s2307_s18), %s5405_s6  ;;  %p2326_p6 = scmp.ge.f32.partialorder %s5411_s9, %s2933_s0 }
0x17a6   :  { %s2329_s20 = ssub.f32 %s5411_s9, %s2933_s0  ;;  %v2373_v30 = vstv %s5421_s18  ;;  %s5423_s17 = smov (!%p2306_p5, %s2309_s17), %s5407_s5 }
0x17a7   :  { %vm2374_vm4 = vcmp.eq.s32.totalorder %v2371_v28, %v2373_v30  ;;  %vm2375_vm5 = vcmp.eq.s32.totalorder %v2372_v29, %v2373_v30  ;;  %s5425_s19 = smov (!%p2326_p6, %s2327_s19), %s5409_s8  ;;  %s2935_s21 = spop %2934 }
0x17a8   :  { %v2376_v31 = vsel %vm2374_vm4, 1.0, %v3025_v10  ;;  %v2377_v32 = vsel %vm2375_vm5, 1.0, %v3025_v10  ;;  %p2346_p7 = scmp.ge.f32.partialorder %s5415_s12, %s2935_s21  ;;  %s2349_s23 = ssub.f32 %s5415_s12, %s2935_s21  ;;  %v2393_v34 = vstv %s5425_s19 }
0x17a9   :  { %v2378_v33 = vadd.f32 %v2377_v32, %v2376_v31  ;;  %vm2394_vm6 = vcmp.eq.s32.totalorder %v2371_v28, %v2393_v34  ;;  %vm2395_vm7 = vcmp.eq.s32.totalorder %v2372_v29, %v2393_v34  ;;  %s5427_s20 = smov (!%p2326_p6, %s2329_s20), %s5411_s9  ;;  %s2937_s24 = spop %2936 }
0x17aa   :  { %s5429_s22 = smov (!%p2346_p7, %s2347_s22), %s5413_s11  ;;  %v2396_v35 = vsel %vm2394_vm6, 1.0, %v3025_v10  ;;  %v2397_v36 = vsel %vm2395_vm7, 1.0, %v3025_v10  ;;  %p2366_p8 = scmp.ge.f32.partialorder %s5419_s15, %s2937_s24 }
0x17ab   :  { %2379 = vadd.xlane.f32.xlu1 %v2378_v33  ;;  %v2398_v37 = vadd.f32 %v2397_v36, %v2396_v35  ;;  %s2369_s26 = ssub.f32 %s5419_s15, %s2937_s24  ;;  %v2413_v38 = vstv %s5429_s22  ;;  %s5431_s23 = smov (!%p2346_p7, %s2349_s23), %s5415_s12 }
0x17ac   :  { %vm2414_vm8 = vcmp.eq.s32.totalorder %v2371_v28, %v2413_v38  ;;  %vm2415_vm9 = vcmp.eq.s32.totalorder %v2372_v29, %v2413_v38  ;;  %s5433_s25 = smov (!%p2366_p8, %s2367_s25), %s5417_s14  ;;  %s2389_s29 = sor.u32 4, %s5421_s18 }
0x17ad   :  { %2399 = vadd.xlane.f32.xlu0 %v2398_v37  ;;  %v2416_v39 = vsel %vm2414_vm8, 1.0, %v3025_v10  ;;  %v2417_v40 = vsel %vm2415_vm9, 1.0, %v3025_v10  ;;  %v2433_v42 = vstv %s5433_s25  ;;  %s5435_s26 = smov (!%p2366_p8, %s2369_s26), %s5419_s15  ;;  %s2409_s4 = sor.u32 4, %s5425_s19 }
0x17ae   :  { %v2418_v41 = vadd.f32 %v2417_v40, %v2416_v39  ;;  %vm2434_vm10 = vcmp.eq.s32.totalorder %v2371_v28, %v2433_v42  ;;  %vm2435_vm11 = vcmp.eq.s32.totalorder %v2372_v29, %v2433_v42  ;;  %s2429_s7 = sor.u32 4, %s5429_s22  ;;  %s2449_s10 = sor.u32 4, %s5433_s25 }
0x17af   :  { %v2436_v43 = vsel %vm2434_vm10, 1.0, %v3025_v10  ;;  %v2437_v44 = vsel %vm2435_vm11, 1.0, %v3025_v10 }
0x17b0   :  { %2419 = vadd.xlane.f32.xlu1 %v2418_v41  ;;  %v2438_v45 = vadd.f32 %v2437_v44, %v2436_v43 }
0x17b2   :  { %2439 = vadd.xlane.f32.xlu0 %v2438_v45 }
0x1834   :  { %v2380_v46 = vpop.xlane.xlu1 %2379 }
0x1835   :  { %v2381_v47 = vrot.slane %v2380_v46, 4 }
0x1836   :  { %v2400_v49 = vpop.xlane.xlu0 %2399 }
0x1837   :  { %v2382_v48 = vadd.f32 %v2381_v47, %v2380_v46  ;;  %v2401_v51 = vrot.slane %v2400_v49, 4 }
0x1839   :  { %v2383_v50 = vrot.slane %v2382_v48, 2  ;;  %v2402_v52 = vadd.f32 %v2401_v51, %v2400_v49  ;;  %v2420_v54 = vpop.xlane.xlu1 %2419 }
0x183a   :  { %v2421_v56 = vrot.slane %v2420_v54, 4 }
0x183b   :  { %v2384_v53 = vadd.f32 %v2383_v50, %v2382_v48  ;;  %v2403_v55 = vrot.slane %v2402_v52, 2  ;;  %v2440_v61 = vpop.xlane.xlu0 %2439 }
0x183c   :  { %v2422_v58 = vadd.f32 %v2421_v56, %v2420_v54  ;;  %v2441_v63 = vrot.slane %v2440_v61, 4 }
0x183d   :  { %v2385_v57 = vrot.slane %v2384_v53, 1  ;;  %v2404_v60 = vadd.f32 %v2403_v55, %v2402_v52 }
0x183e   :  { %v2423_v62 = vrot.slane %v2422_v58, 2  ;;  %v2442_v1 = vadd.f32 %v2441_v63, %v2440_v61 }
0x183f   :  { %v2386_v59 = vadd.f32 %v2385_v57, %v2384_v53  ;;  %v2405_v0 = vrot.slane %v2404_v60, 1 }
0x1840   :  { %v2424_v3 = vadd.f32 %v2423_v62, %v2422_v58  ;;  %v2443_v4 = vrot.slane %v2442_v1, 2 }
0x1841   :  { %2938 = vpush %v2386_v59  ;;  %v2406_v2 = vadd.f32 %v2405_v0, %v2404_v60 }
0x1842   :  { %v2425_v5 = vrot.slane %v2424_v3, 1  ;;  %v2444_v9 = vadd.f32 %v2443_v4, %v2442_v1 }
0x1843   :  { %2940 = vpush %v2406_v2 }
0x1844   :  { %v2426_v8 = vadd.f32 %v2425_v5, %v2424_v3  ;;  %v2445_v11 = vrot.slane %v2444_v9, 1 }
0x1846   :  { %2942 = vpush %v2426_v8  ;;  %v2446_v12 = vadd.f32 %v2445_v11, %v2444_v9 }
0x1848   :  { %2944 = vpush %v2446_v12 }
0x1872   :  { %s2939_s27 = spop %2938 }
0x1873   :  { %p2388_p9 = scmp.ge.f32.partialorder %s5423_s17, %s2939_s27  ;;  %s2391_s28 = ssub.f32 %s5423_s17, %s2939_s27 }
0x1874   :  { %s2941_s30 = spop %2940 }
0x1875   :  { %s5437_s29 = smov (!%p2388_p9, %s2389_s29), %s5421_s18  ;;  %p2408_p10 = scmp.ge.f32.partialorder %s5427_s20, %s2941_s30 }
0x1876   :  { %s2411_s5 = ssub.f32 %s5427_s20, %s2941_s30  ;;  %v2455_v15 = vstv %s5437_s29  ;;  %s5439_s28 = smov (!%p2388_p9, %s2391_s28), %s5423_s17 }
0x1877   :  { %vm2456_vm12 = vcmp.eq.s32.totalorder %v2453_v13, %v2455_v15  ;;  %vm2457_vm13 = vcmp.eq.s32.totalorder %v2454_v14, %v2455_v15  ;;  %s5441_s4 = smov (!%p2408_p10, %s2409_s4), %s5425_s19  ;;  %s2943_s6 = spop %2942 }
0x1878   :  { %v2458_v16 = vsel %vm2456_vm12, 1.0, %v3025_v10  ;;  %v2459_v17 = vsel %vm2457_vm13, 1.0, %v3025_v10  ;;  %p2428_p11 = scmp.ge.f32.partialorder %s5431_s23, %s2943_s6  ;;  %s2431_s8 = ssub.f32 %s5431_s23, %s2943_s6  ;;  %v2475_v19 = vstv %s5441_s4 }
0x1879   :  { %v2460_v18 = vadd.f32 %v2459_v17, %v2458_v16  ;;  %vm2476_vm14 = vcmp.eq.s32.totalorder %v2453_v13, %v2475_v19  ;;  %vm2477_vm15 = vcmp.eq.s32.totalorder %v2454_v14, %v2475_v19  ;;  %s5443_s5 = smov (!%p2408_p10, %s2411_s5), %s5427_s20  ;;  %s2945_s9 = spop %2944 }
0x187a   :  { %s5445_s7 = smov (!%p2428_p11, %s2429_s7), %s5429_s22  ;;  %v2478_v20 = vsel %vm2476_vm14, 1.0, %v3025_v10  ;;  %v2479_v21 = vsel %vm2477_vm15, 1.0, %v3025_v10  ;;  %p2448_p12 = scmp.ge.f32.partialorder %s5435_s26, %s2945_s9 }
0x187b   :  { %2461 = vadd.xlane.f32.xlu1 %v2460_v18  ;;  %v2480_v22 = vadd.f32 %v2479_v21, %v2478_v20  ;;  %s2451_s11 = ssub.f32 %s5435_s26, %s2945_s9  ;;  %v2495_v23 = vstv %s5445_s7  ;;  %s5447_s8 = smov (!%p2428_p11, %s2431_s8), %s5431_s23 }
0x187c   :  { %vm2496_vm0 = vcmp.eq.s32.totalorder %v2453_v13, %v2495_v23  ;;  %vm2497_vm1 = vcmp.eq.s32.totalorder %v2454_v14, %v2495_v23  ;;  %s5449_s10 = smov (!%p2448_p12, %s2449_s10), %s5433_s25  ;;  %s2471_s14 = sor.u32 2, %s5437_s29 }
0x187d   :  { %2481 = vadd.xlane.f32.xlu0 %v2480_v22  ;;  %v2498_v24 = vsel %vm2496_vm0, 1.0, %v3025_v10  ;;  %v2499_v25 = vsel %vm2497_vm1, 1.0, %v3025_v10  ;;  %v2515_v27 = vstv %s5449_s10  ;;  %s5451_s11 = smov (!%p2448_p12, %s2451_s11), %s5435_s26  ;;  %s2491_s16 = sor.u32 2, %s5441_s4 }
0x187e   :  { %v2500_v26 = vadd.f32 %v2499_v25, %v2498_v24  ;;  %vm2516_vm2 = vcmp.eq.s32.totalorder %v2453_v13, %v2515_v27  ;;  %vm2517_vm3 = vcmp.eq.s32.totalorder %v2454_v14, %v2515_v27  ;;  %s2511_s0 = sor.u32 2, %s5445_s7  ;;  %s2531_s21 = sor.u32 2, %s5449_s10 }
0x187f   :  { %v2518_v28 = vsel %vm2516_vm2, 1.0, %v3025_v10  ;;  %v2519_v29 = vsel %vm2517_vm3, 1.0, %v3025_v10 }
0x1880   :  { %2501 = vadd.xlane.f32.xlu1 %v2500_v26  ;;  %v2520_v30 = vadd.f32 %v2519_v29, %v2518_v28 }
0x1882   :  { %2521 = vadd.xlane.f32.xlu0 %v2520_v30 }
0x1904   :  { %v2462_v31 = vpop.xlane.xlu1 %2461 }
0x1905   :  { %v2463_v32 = vrot.slane %v2462_v31, 4 }
0x1906   :  { %v2482_v34 = vpop.xlane.xlu0 %2481 }
0x1907   :  { %v2464_v33 = vadd.f32 %v2463_v32, %v2462_v31  ;;  %v2483_v36 = vrot.slane %v2482_v34, 4 }
0x1909   :  { %v2465_v35 = vrot.slane %v2464_v33, 2  ;;  %v2484_v37 = vadd.f32 %v2483_v36, %v2482_v34  ;;  %v2502_v39 = vpop.xlane.xlu1 %2501 }
0x190a   :  { %v2503_v41 = vrot.slane %v2502_v39, 4 }
0x190b   :  { %v2466_v38 = vadd.f32 %v2465_v35, %v2464_v33  ;;  %v2485_v40 = vrot.slane %v2484_v37, 2  ;;  %v2522_v46 = vpop.xlane.xlu0 %2521 }
0x190c   :  { %v2504_v43 = vadd.f32 %v2503_v41, %v2502_v39  ;;  %v2523_v48 = vrot.slane %v2522_v46, 4 }
0x190d   :  { %v2467_v42 = vrot.slane %v2466_v38, 1  ;;  %v2486_v45 = vadd.f32 %v2485_v40, %v2484_v37 }
0x190e   :  { %v2505_v47 = vrot.slane %v2504_v43, 2  ;;  %v2524_v50 = vadd.f32 %v2523_v48, %v2522_v46 }
0x190f   :  { %v2468_v44 = vadd.f32 %v2467_v42, %v2466_v38  ;;  %v2487_v49 = vrot.slane %v2486_v45, 1  ;;  %v2976_v42 = vld [vmem:[#allocation4] sm:$0xff] }
0x1910   :  { %v2506_v52 = vadd.f32 %v2505_v47, %v2504_v43  ;;  %v2525_v53 = vrot.slane %v2524_v50, 2 }
0x1911   :  { %2946 = vpush %v2468_v44  ;;  %v2488_v51 = vadd.f32 %v2487_v49, %v2486_v45  ;;  %v2977_v44 = vld [vmem:[#allocation4 + $0x8] sm:$0xff] }
0x1912   :  { %v2507_v54 = vrot.slane %v2506_v52, 1  ;;  %v2526_v56 = vadd.f32 %v2525_v53, %v2524_v50 }
0x1913   :  { %2948 = vpush %v2488_v51 }
0x1914   :  { %v2508_v55 = vadd.f32 %v2507_v54, %v2506_v52  ;;  %v2527_v57 = vrot.slane %v2526_v56, 1 }
0x1916   :  { %2950 = vpush %v2508_v55  ;;  %v2528_v58 = vadd.f32 %v2527_v57, %v2526_v56 }
0x1918   :  { %2952 = vpush %v2528_v58 }
0x1942   :  { %s2947_s12 = spop %2946 }
0x1943   :  { %p2470_p13 = scmp.ge.f32.partialorder %s5439_s28, %s2947_s12  ;;  %s2473_s13 = ssub.f32 %s5439_s28, %s2947_s12 }
0x1944   :  { %s2949_s15 = spop %2948 }
0x1945   :  { %s5453_s14 = smov (!%p2470_p13, %s2471_s14), %s5437_s29  ;;  %p2490_p0 = scmp.ge.f32.partialorder %s5443_s5, %s2949_s15 }
0x1946   :  { %s2493_s17 = ssub.f32 %s5443_s5, %s2949_s15  ;;  %v2535_v59 = vstv %s5453_s14  ;;  %s5455_s13 = smov (!%p2470_p13, %s2473_s13), %s5439_s28 }
0x1947   :  { %vm2536_vm4 = vcmp.eq.s32.totalorder %v3051_v6, %v2535_v59  ;;  %vm2537_vm5 = vcmp.eq.s32.totalorder %v3053_v7, %v2535_v59  ;;  %s5457_s16 = smov (!%p2490_p0, %s2491_s16), %s5441_s4  ;;  %s2951_s18 = spop %2950 }
0x1948   :  { %v2538_v60 = vsel %vm2536_vm4, 1.0, %v3025_v10  ;;  %v2539_v61 = vsel %vm2537_vm5, 1.0, %v3025_v10  ;;  %p2510_p1 = scmp.ge.f32.partialorder %s5447_s8, %s2951_s18  ;;  %s2513_s19 = ssub.f32 %s5447_s8, %s2951_s18  ;;  %v2553_v63 = vstv %s5457_s16 }
0x1949   :  { %v2540_v62 = vadd.f32 %v2539_v61, %v2538_v60  ;;  %vm2554_vm6 = vcmp.eq.s32.totalorder %v3051_v6, %v2553_v63  ;;  %vm2555_vm7 = vcmp.eq.s32.totalorder %v3053_v7, %v2553_v63  ;;  %s5459_s17 = smov (!%p2490_p0, %s2493_s17), %s5443_s5  ;;  %s2953_s20 = spop %2952 }
0x194a   :  { %s5461_s0 = smov (!%p2510_p1, %s2511_s0), %s5445_s7  ;;  %v2556_v0 = vsel %vm2554_vm6, 1.0, %v3025_v10  ;;  %v2557_v1 = vsel %vm2555_vm7, 1.0, %v3025_v10  ;;  %p2530_p2 = scmp.ge.f32.partialorder %s5451_s11, %s2953_s20 }
0x194b   :  { %2541 = vadd.xlane.f32.xlu1 %v2540_v62  ;;  %v2558_v2 = vadd.f32 %v2557_v1, %v2556_v0  ;;  %s2533_s22 = ssub.f32 %s5451_s11, %s2953_s20  ;;  %v2571_v3 = vstv %s5461_s0  ;;  %s5463_s19 = smov (!%p2510_p1, %s2513_s19), %s5447_s8 }
0x194c   :  { %vm2572_vm8 = vcmp.eq.s32.totalorder %v3051_v6, %v2571_v3  ;;  %vm2573_vm9 = vcmp.eq.s32.totalorder %v3053_v7, %v2571_v3  ;;  %s5465_s21 = smov (!%p2530_p2, %s2531_s21), %s5449_s10  ;;  %s2551_s24 = sor.u32 1, %s5453_s14 }
0x194d   :  { %2559 = vadd.xlane.f32.xlu0 %v2558_v2  ;;  %v2574_v4 = vsel %vm2572_vm8, 1.0, %v3025_v10  ;;  %v2575_v5 = vsel %vm2573_vm9, 1.0, %v3025_v10  ;;  %v2589_v9 = vstv %s5465_s21  ;;  %s5467_s22 = smov (!%p2530_p2, %s2533_s22), %s5451_s11  ;;  %s2569_s26 = sor.u32 1, %s5457_s16 }
0x194e   :  { %v2576_v8 = vadd.f32 %v2575_v5, %v2574_v4  ;;  %vm2590_vm10 = vcmp.eq.s32.totalorder %v3051_v6, %v2589_v9  ;;  %vm2591_vm11 = vcmp.eq.s32.totalorder %v3053_v7, %v2589_v9  ;;  %s2587_s28 = sor.u32 1, %s5461_s0  ;;  %s2605_s30 = sor.u32 1, %s5465_s21 }
0x194f   :  { %v2592_v11 = vsel %vm2590_vm10, 1.0, %v3025_v10  ;;  %v2593_v12 = vsel %vm2591_vm11, 1.0, %v3025_v10 }
0x1950   :  { %2577 = vadd.xlane.f32.xlu1 %v2576_v8  ;;  %v2594_v13 = vadd.f32 %v2593_v12, %v2592_v11 }
0x1952   :  { %2595 = vadd.xlane.f32.xlu0 %v2594_v13 }
0x19d4   :  { %v2542_v14 = vpop.xlane.xlu1 %2541 }
0x19d5   :  { %v2543_v15 = vrot.slane %v2542_v14, 4 }
0x19d6   :  { %v2560_v17 = vpop.xlane.xlu0 %2559 }
0x19d7   :  { %v2544_v16 = vadd.f32 %v2543_v15, %v2542_v14  ;;  %v2561_v19 = vrot.slane %v2560_v17, 4 }
0x19d9   :  { %v2545_v18 = vrot.slane %v2544_v16, 2  ;;  %v2562_v20 = vadd.f32 %v2561_v19, %v2560_v17  ;;  %v2578_v22 = vpop.xlane.xlu1 %2577 }
0x19da   :  { %v2579_v24 = vrot.slane %v2578_v22, 4 }
0x19db   :  { %v2546_v21 = vadd.f32 %v2545_v18, %v2544_v16  ;;  %v2563_v23 = vrot.slane %v2562_v20, 2  ;;  %v2596_v29 = vpop.xlane.xlu0 %2595 }
0x19dc   :  { %v2580_v26 = vadd.f32 %v2579_v24, %v2578_v22  ;;  %v2597_v10 = vrot.slane %v2596_v29, 4  ;;  %v2683_v24 = vlaneseq }
0x19dd   :  { %v2547_v25 = vrot.slane %v2546_v21, 1  ;;  %v2564_v28 = vadd.f32 %v2563_v23, %v2562_v20 }
0x19de   :  { %v2581_v30 = vrot.slane %v2580_v26, 2  ;;  %v2598_v32 = vadd.f32 %v2597_v10, %v2596_v29 }
0x19df   :  { %v2548_v27 = vadd.f32 %v2547_v25, %v2546_v21  ;;  %v2565_v31 = vrot.slane %v2564_v28, 1  ;;  %v2684_v25 = vand.u32 127, %v2683_v24 }
0x19e0   :  { %v2582_v34 = vadd.f32 %v2581_v30, %v2580_v26  ;;  %v2599_v35 = vrot.slane %v2598_v32, 2 }
0x19e1   :  { %2954 = vpush %v2548_v27  ;;  %v2566_v33 = vadd.f32 %v2565_v31, %v2564_v28  ;;  %vm2686_vm4 = vcmp.eq.s32.totalorder %v2684_v25, 1  ;;  %vm2685_vm5 = vcmp.eq.s32.totalorder %v2684_v25, 0 }
0x19e2   :  { %v2583_v36 = vrot.slane %v2582_v34, 1  ;;  %v2600_v38 = vadd.f32 %v2599_v35, %v2598_v32 }
0x19e3   :  { %2956 = vpush %v2566_v33 }
0x19e4   :  { %v2584_v37 = vadd.f32 %v2583_v36, %v2582_v34  ;;  %v2601_v39 = vrot.slane %v2600_v38, 1 }
0x19e6   :  { %2958 = vpush %v2584_v37  ;;  %v2602_v40 = vadd.f32 %v2601_v39, %v2600_v38 }
0x19e8   :  { %2960 = vpush %v2602_v40 }
0x1a12   :  { %s2955_s23 = spop %2954 }
0x1a13   :  { %p2550_p3 = scmp.ge.f32.partialorder %s5455_s13, %s2955_s23 }
0x1a14   :  { %s2957_s25 = spop %2956 }
0x1a15   :  { %s5469_s24 = smov (!%p2550_p3, %s2551_s24), %s5453_s14  ;;  %p2568_p4 = scmp.ge.f32.partialorder %s5459_s17, %s2957_s25 }
0x1a16   :  { %v2607_v41 = vstv %s5469_s24  ;;  %s2674_s14 = smul.f32 0.99, %s4977_s1  ;;  %s3026_s24 = smov [#allocation7]  }
0x1a17   :  { %vm2608_vm12 = vcmp.eq.s32.totalorder %v3051_v6, %v2607_v41  ;;  %vm2609_vm13 = vcmp.eq.s32.totalorder %v3053_v7, %v2607_v41  ;;  %s5471_s26 = smov (!%p2568_p4, %s2569_s26), %s5457_s16  ;;  %s2959_s27 = spop %2958 }
0x1a18   :  { %v2610_v43 = vsel %vm2608_vm12, %v2976_v42, -inf  ;;  %v2611_v45 = vsel %vm2609_vm13, %v2977_v44, -inf  ;;  %v2622_v47 = vstv %s5471_s26  ;;  %p2586_p5 = scmp.ge.f32.partialorder %s5463_s19, %s2959_s27  ;;  %s2678_s19 = smul.f32 0.99, %s4978_s2 }
0x1a19   :  { %v2612_v46 = vmax.f32 %v2610_v43, %v2611_v45  ;;  %vm2623_vm14 = vcmp.eq.s32.totalorder %v3051_v6, %v2622_v47  ;;  %vm2624_vm15 = vcmp.eq.s32.totalorder %v3053_v7, %v2622_v47  ;;  %s2961_s29 = spop %2960  ;;  %s2699_s25 = sshll.u32 %s3026_s24, 4  ;;  %s2700_s25 = int_to_ptr.vmem [resolvable:$true] %s2699_s25 }
0x1a1a   :  { %s5473_s28 = smov (!%p2586_p5, %s2587_s28), %s5461_s0  ;;  %v2625_v48 = vsel %vm2623_vm14, %v2976_v42, -inf  ;;  %v2626_v49 = vsel %vm2624_vm15, %v2977_v44, -inf  ;;  %p2604_p6 = scmp.ge.f32.partialorder %s5467_s22, %s2961_s29 }
0x1a1b   :  { %2613 = vmax.xlane.f32.xlu1 %v2612_v46  ;;  %v2627_v50 = vmax.f32 %v2625_v48, %v2626_v49  ;;  %v2637_v51 = vstv %s5473_s28  ;;  %s3027_s26 = smov 1e-08   ;;  %s2998_s1 = scalar_lea.vmem %s2700_s25, 16 }
0x1a1c   :  { %vm2638_vm0 = vcmp.eq.s32.totalorder %v3051_v6, %v2637_v51  ;;  %vm2639_vm1 = vcmp.eq.s32.totalorder %v3053_v7, %v2637_v51  ;;  %s5475_s30 = smov (!%p2604_p6, %s2605_s30), %s5465_s21  ;;  %p2999_p7 = scmp.ne.s32.totalorder %s2700_s25, %s2998_s1 }
0x1a1d   :  { %2628 = vmax.xlane.f32.xlu0 %v2627_v50  ;;  %v2640_v52 = vsel %vm2638_vm0, %v2976_v42, -inf  ;;  %v2641_v53 = vsel %vm2639_vm1, %v2977_v44, -inf  ;;  %v2652_v55 = vstv %s5475_s30  ;;  %s3002_s2 = scalar_lea.vmem %s2700_s25, 32  ;;  %p3003_p8 = scmp.lt.s32.totalorder %s2700_s25, %s2700_s25 }
0x1a1e   :  { %v2642_v54 = vmax.f32 %v2640_v52, %v2641_v53  ;;  %vm2653_vm2 = vcmp.eq.s32.totalorder %v3051_v6, %v2652_v55  ;;  %vm2654_vm3 = vcmp.eq.s32.totalorder %v3053_v7, %v2652_v55  ;;  %p3004_p9 = scmp.lt.s32.totalorder %s3002_s2, %s2998_s1 }
0x1a1f   :  { %v2655_v56 = vsel %vm2653_vm2, %v2976_v42, -inf  ;;  %v2656_v57 = vsel %vm2654_vm3, %v2977_v44, -inf }
0x1a20   :  { %2643 = vmax.xlane.f32.xlu1 %v2642_v54  ;;  %v2657_v58 = vmax.f32 %v2655_v56, %v2656_v57  ;;  %p3005_p10 = por %p3004_p9, %p3003_p8 }
0x1a22   :  { %2658 = vmax.xlane.f32.xlu0 %v2657_v58  ;;  %p3006_p11 = pnand %p3005_p10, %p2999_p7 }
0x1aa4   :  { %v2614_v59 = vpop.xlane.xlu1 %2613 }
0x1aa5   :  { %v2615_v60 = vrot.slane %v2614_v59, 4 }
0x1aa6   :  { %v2629_v62 = vpop.xlane.xlu0 %2628 }
0x1aa7   :  { %v2616_v61 = vmax.f32 %v2614_v59, %v2615_v60  ;;  %v2630_v0 = vrot.slane %v2629_v62, 4 }
0x1aa9   :  { %v2617_v63 = vrot.slane %v2616_v61, 2  ;;  %v2631_v1 = vmax.f32 %v2629_v62, %v2630_v0  ;;  %v2644_v3 = vpop.xlane.xlu1 %2643 }
0x1aaa   :  { %v2645_v5 = vrot.slane %v2644_v3, 4 }
0x1aab   :  { %v2618_v2 = vmax.f32 %v2616_v61, %v2617_v63  ;;  %v2632_v4 = vrot.slane %v2631_v1, 2  ;;  %v2659_v7 = vpop.xlane.xlu0 %2658 }
0x1aac   :  { %v2646_v9 = vmax.f32 %v2644_v3, %v2645_v5  ;;  %v2660_v13 = vrot.slane %v2659_v7, 4 }
0x1aad   :  { %v2619_v8 = vrot.slane %v2618_v2, 1  ;;  %v2633_v11 = vmax.f32 %v2631_v1, %v2632_v4 }
0x1aae   :  { %v2647_v12 = vrot.slane %v2646_v9, 2  ;;  %v2661_v16 = vmax.f32 %v2659_v7, %v2660_v13 }
0x1aaf   :  { %v2620_v6 = vmax.f32 %v2618_v2, %v2619_v8  ;;  %v2634_v14 = vrot.slane %v2633_v11, 1 }
0x1ab0   :  { %v2648_v15 = vmax.f32 %v2646_v9, %v2647_v12  ;;  %v2662_v18 = vrot.slane %v2661_v16, 2 }
0x1ab1   :  { %2962 = vpush %v2620_v6  ;;  %v2635_v17 = vmax.f32 %v2633_v11, %v2634_v14 }
0x1ab2   :  { %v2649_v19 = vrot.slane %v2648_v15, 1  ;;  %v2663_v20 = vmax.f32 %v2661_v16, %v2662_v18 }
0x1ab3   :  { %2964 = vpush %v2635_v17 }
0x1ab4   :  { %v2650_v21 = vmax.f32 %v2648_v15, %v2649_v19  ;;  %v2664_v22 = vrot.slane %v2663_v20, 1 }
0x1ab6   :  { %2966 = vpush %v2650_v21  ;;  %v2665_v23 = vmax.f32 %v2663_v20, %v2664_v22 }
0x1ab8   :  { %2968 = vpush %v2665_v23 }
0x1ae2   :  { %s2963_s4 = spop %2962 }
0x1ae4   :  { %s2965_s5 = spop %2964 }
0x1ae5   :  { %s2667_s6 = ssub.f32 %s2965_s5, %s2963_s4 }
0x1ae7   :  { %s2668_s7 = smul.f32 0.35, %s2667_s6  ;;  %s2967_s8 = spop %2966 }
0x1ae9   :  { %s2969_s9 = spop %2968  ;;  %s2669_s10 = sadd.f32 %s2963_s4, %s2668_s7 }
0x1aea   :  { %s2670_s11 = ssub.f32 %s2969_s9, %s2967_s8 }
0x1aeb   :  { %s2675_s16 = smul.f32 0.01, %s2669_s10 }
0x1aec   :  { %s2671_s15 = smul.f32 0.65, %s2670_s11 }
0x1aed   :  { %s2676_s21 = sadd.f32 %s2675_s16, %s2674_s14 }
0x1aee   :  { %s2672_s17 = sadd.f32 %s2967_s8, %s2671_s15 }
0x1aef   :  { %v2690_v29 = vstv %s2676_s21 }
0x1af0   :  { %s2679_s20 = smul.f32 0.01, %s2672_s17 }
0x1af2   :  { %s2680_s22 = sadd.f32 %s2679_s20, %s2678_s19 }
0x1af4   :  { %s2681_s23 = ssub.f32 %s2680_s22, %s2676_s21  ;;  %v2687_v26 = vstv %s2680_s22 }
0x1af6   :  { %s2682_s27 = smax.f32 %s3027_s26, %s2681_s23 }
0x1af7   :  { %v2688_v27 = vstv %s2682_s27 }
0x1af8   :  { %v2689_v28 = vsel %vm2686_vm4, %v2687_v26, %v2688_v27 }
0x1af9   :  { %v2691_v30 = vsel %vm2685_vm5, %v2690_v29, %v2689_v28 }
0x1afa   :  { %2692 = vst [vmem:[#allocation7] sm:$0x1] %v2691_v30 }
0x1afb   :  { %3009 = shalt.err (!%p3006_p11)
}
0x1afc   :  { %2702 = dma.vmem_to_hbm [thread:$0]  %s2700_s25, 16, %s4979_s3, [#allocation6]  }
0x1afd   :  { %3020 = dma.done.wait [#allocation6], 16  }
0x1afe   :  { %3021 = vsyncadd [#allocation6], 4294967280 }
0x1aff   :  { %2706 = vsyncpa [#allocation5], 1 }
0x1b00   :  { %2707 = vsyncpa [#allocation6], 1 }

</bundles_post_ra>
